<compile_context>
chip_gen: v7x
topology: tpu7x:2x2x1
jax: 0.10.0
libtpu: 0.0.40
codegen_flags: <defaults>
</compile_context>

<pallas_src>
import functools

import jax
import jax.numpy as jnp
from jax.experimental import pallas as pl
from jax.experimental.pallas import tpu as pltpu


def _round_up(v, m):
    return ((v + m - 1) // m) * m


def decoder_kernel(x_ref, h0_ref, c0_ref, w_ih_ref, w_hh_ref, b_ref,
                   w_aw2_ref, mask_ref, en_out_ref, w1_ref,
                   out_ref, hn_ref, cn_ref,
                   gx_ref,
                   *, n_layers, hidden_dim, attn_len, seq_len, unroll_time):
    H = hidden_dim          # padded hidden size (multiple of 128)
    Lp = attn_len           # padded MAX_LENGTH (multiple of 128)
    T = seq_len
    Bb = x_ref.shape[1]     # batch block (multiple of 8)
    TB = T * Bb

    # ---- multi-layer LSTM (PyTorch gate order: i, f, g, o) -----------------
    # out_ref doubles as the layer-IO sequence buffer (T, Bb, H): each layer
    # writes its h_t sequence into it, and the final projection overwrites it.
    for layer in range(n_layers):
        w_ih = w_ih_ref[layer]              # (H, 4H) f32, pre-transposed
        w_hh = w_hh_ref[layer]              # (H, 4H) f32, pre-transposed
        bias = b_ref[layer]                 # (1, 4H) f32  (b_ih + b_hh)

        # Hoisted input-to-hidden contribution: ONE (T*Bb, H)x(H, 4H) MXU
        # matmul per layer (bias folded in); the serial chain below only
        # pushes the small h @ W_hh per step.
        seq_in = x_ref[...] if layer == 0 else out_ref[...]
        seq_2d = seq_in.reshape(TB, H)                       # tile-aligned
        gx_ref[...] = (jnp.dot(seq_2d, w_ih,
                               preferred_element_type=jnp.float32)
                       + bias).reshape(T, Bb, 4 * H)         # (T, Bb, 4H)

        def step(t, carry, w_hh=w_hh):
            h, c = carry
            gates = gx_ref[t] + jnp.dot(h, w_hh,
                                        preferred_element_type=jnp.float32)
            i_g = jax.nn.sigmoid(gates[:, 0 * H:1 * H])
            f_g = jax.nn.sigmoid(gates[:, 1 * H:2 * H])
            g_g = jnp.tanh(gates[:, 2 * H:3 * H])
            o_g = jax.nn.sigmoid(gates[:, 3 * H:4 * H])
            c_new = f_g * c + i_g * g_g
            h_new = o_g * jnp.tanh(c_new)
            out_ref[t] = h_new              # becomes next layer's input
            return h_new, c_new

        carry0 = (h0_ref[layer], c0_ref[layer])
        if unroll_time:
            # fully unrolled: h/c stay in vregs, scheduler sees across steps
            h_f, c_f = carry0
            for t in range(T):
                h_f, c_f = step(t, (h_f, c_f))
        else:
            h_f, c_f = jax.lax.fori_loop(0, T, step, carry0)

        hn_ref[layer] = h_f
        cn_ref[layer] = c_f

    # ---- fused attention-scores + h@W2: single (T*Bb,H)x(H,Lp+H) matmul ----
    h_seq = out_ref[...]                                      # (T, Bb, H)
    h_2d = h_seq.reshape(TB, H)
    fused = jnp.dot(h_2d, w_aw2_ref[...],
                    preferred_element_type=jnp.float32)       # (TB, Lp+H)
    scores = fused[:, :Lp].reshape(T, Bb, Lp) + mask_ref[...][None]
    h_w2 = fused[:, Lp:]                                      # (TB, H)

    # masked softmax over (padded) MAX_LENGTH; mask is additive 0 / -1e30
    m = jnp.max(scores, axis=-1, keepdims=True)
    e = jnp.exp(scores - m)
    denom = jnp.sum(e, axis=-1, keepdims=True)
    attn = e * pl.reciprocal(denom, approx=True)              # (T, Bb, Lp)

    # ---- context = bmm(attn, en_out); out = tanh(ctx @ W1 + h @ W2) --------
    context = jnp.einsum('tbl,blh->tbh', attn, en_out_ref[...],
                         preferred_element_type=jnp.float32)  # (T, Bb, H)
    ctx_2d = context.reshape(TB, H)
    out_ref[...] = jnp.tanh(
        jnp.dot(ctx_2d, w1_ref[...], preferred_element_type=jnp.float32)
        + h_w2).reshape(T, Bb, H)


def _prep_weights(params, n_layers, H, L, Hp, Lp):
    """Wrapper-side layout plumbing: transpose + zero-pad weights (f32)."""
    f32 = jnp.float32
    w_ih_t = jnp.zeros((n_layers, Hp, 4 * Hp), f32)
    w_hh_t = jnp.zeros((n_layers, Hp, 4 * Hp), f32)
    bias_p = jnp.zeros((n_layers, 1, 4 * Hp), f32)
    for k in range(4):                      # gate order i, f, g, o
        w_ih_t = w_ih_t.at[:, :H, k * Hp:k * Hp + H].set(
            jnp.transpose(params['w_ih'][:, k * H:(k + 1) * H, :], (0, 2, 1)))
        w_hh_t = w_hh_t.at[:, :H, k * Hp:k * Hp + H].set(
            jnp.transpose(params['w_hh'][:, k * H:(k + 1) * H, :], (0, 2, 1)))
        bias_p = bias_p.at[:, :, k * Hp:k * Hp + H].set(
            params['bias'][:, :, k * H:(k + 1) * H])
    w_att_t = jnp.zeros((Hp, Lp), f32).at[:H, :L].set(params['w_att'].T)
    w1_t = jnp.zeros((Hp, Hp), f32).at[:H, :H].set(params['w_lin'][:, :H].T)
    w2_t = jnp.zeros((Hp, Hp), f32).at[:H, :H].set(params['w_lin'][:, H:].T)
    # fuse the two matmuls that share h_seq as LHS into one output dim
    w_aw2 = jnp.concatenate([w_att_t, w2_t], axis=1)          # (Hp, Lp+Hp)
    return w_ih_t, w_hh_t, bias_p, w_aw2, w1_t


def _vmem_limit_bytes():
    try:
        phys = pltpu.get_tpu_info().vmem_capacity_bytes
    except Exception:
        phys = 128 * 1024 * 1024
    # ~75% of physical, capped: 48 MiB on v7x (64 MiB), ~96-100 MiB on v5e/v6e
    return min(int(phys * 3 // 4), 100 * 1024 * 1024)


def decoder_forward(de_input, h0, c0, params, en_out, mask, *, b_block=None):
    """de_input: (B, T) int32; h0/c0: (n_layers, B, H); en_out: (B, L, H);
    mask: (B, L) bool (True = masked).  Returns ((B, T, H), (hn, cn))."""
    B, T = de_input.shape
    n_layers, _, H = h0.shape
    L = params['w_att'].shape[0]

    f32 = jnp.float32
    Hp = _round_up(max(H, 1), 128)          # lane-dense hidden
    Lp = _round_up(max(L, 1), 128)          # lane-dense MAX_LENGTH
    Bp = _round_up(max(B, 1), 8)            # full sublanes
    if b_block is None:
        # shard batch across the 2 v7x TensorCores when it divides cleanly
        b_block = Bp // 2 if (Bp >= 16 and Bp % 16 == 0) else Bp
    assert b_block % 8 == 0 and Bp % b_block == 0
    num_b_blocks = Bp // b_block

    # --- plain-JAX glue: embedding gather, zero-pad, time-major layout ------
    x = params['embedding'][de_input].astype(f32)                  # (B, T, H)
    x_tm = jnp.zeros((T, Bp, Hp), f32).at[:, :B, :H].set(
        jnp.transpose(x, (1, 0, 2)))
    h0_p = jnp.zeros((n_layers, Bp, Hp), f32).at[:, :B, :H].set(h0)
    c0_p = jnp.zeros((n_layers, Bp, Hp), f32).at[:, :B, :H].set(c0)
    en_out_p = jnp.zeros((Bp, Lp, Hp), f32).at[:B, :L, :H].set(
        en_out.astype(f32))
    # additive mask: 0 where attended, -1e30 where masked / padded
    mask_add = jnp.full((Bp, Lp), -1e30, f32).at[:B, :L].set(
        jnp.where(mask, -1e30, 0.0).astype(f32))

    w_ih_t, w_hh_t, bias_p, w_aw2, w1_t = _prep_weights(
        params, n_layers, H, L, Hp, Lp)

    # gate full time-unroll on vreg pressure (h, c, 4 gates, gx row live)
    live_vregs = (b_block // 8) * (Hp // 128) * 10
    unroll_time = (T <= 32) and (live_vregs <= 48)

    kernel = functools.partial(decoder_kernel, n_layers=n_layers,
                               hidden_dim=Hp, attn_len=Lp, seq_len=T,
                               unroll_time=unroll_time)

    def bcast(*shape):                      # same block for every grid step
        return pl.BlockSpec(shape, lambda b, _s=shape: (0,) * len(_s))

    def on_batch3(d0, d2):                  # (d0, b_block, d2), blocked on B
        return pl.BlockSpec((d0, b_block, d2), lambda b: (0, b, 0))

    in_specs = [
        on_batch3(T, Hp),                                   # x_tm
        on_batch3(n_layers, Hp),                            # h0
        on_batch3(n_layers, Hp),                            # c0
        bcast(n_layers, Hp, 4 * Hp),                        # w_ih_t
        bcast(n_layers, Hp, 4 * Hp),                        # w_hh_t
        bcast(n_layers, 1, 4 * Hp),                         # bias
        bcast(Hp, Lp + Hp),                                 # [w_att | W2]
        pl.BlockSpec((b_block, Lp), lambda b: (b, 0)),      # mask_add
        pl.BlockSpec((b_block, Lp, Hp), lambda b: (b, 0, 0)),  # en_out
        bcast(Hp, Hp),                                      # w1_t
    ]
    out_specs = (on_batch3(T, Hp), on_batch3(n_layers, Hp),
                 on_batch3(n_layers, Hp))

    out_tm, hn_p, cn_p = pl.pallas_call(
        kernel,
        grid=(num_b_blocks,),
        out_shape=(
            jax.ShapeDtypeStruct((T, Bp, Hp), f32),
            jax.ShapeDtypeStruct((n_layers, Bp, Hp), f32),
            jax.ShapeDtypeStruct((n_layers, Bp, Hp), f32),
        ),
        in_specs=in_specs,
        out_specs=out_specs,
        scratch_shapes=[
            pltpu.VMEM((T, b_block, 4 * Hp), f32),   # hoisted gates_x buffer
        ],
        compiler_params=pltpu.CompilerParams(
            dimension_semantics=("parallel",),
            vmem_limit_bytes=_vmem_limit_bytes()),
    )(x_tm, h0_p, c0_p, w_ih_t, w_hh_t, bias_p, w_aw2, mask_add,
      en_out_p, w1_t)

    output = jnp.transpose(out_tm[:, :B, :H], (1, 0, 2))   # (B, T, H)
    return output, (hn_p[:, :B, :H], cn_p[:, :B, :H])


def reference_forward(de_input, h0, c0, params, en_out, mask):
    """Pure-JAX f32 reference of the PyTorch forward (inference mode)."""
    x = params['embedding'][de_input]
    H = x.shape[-1]
    n_layers = h0.shape[0]
    layer_in = x
    hs, cs = [], []
    for l in range(n_layers):
        w_ih, w_hh = params['w_ih'][l], params['w_hh'][l]
        b = params['bias'][l][0]

        def step(carry, x_t, w_ih=w_ih, w_hh=w_hh, b=b):
            h, c = carry
            g = x_t @ w_ih.T + h @ w_hh.T + b
            i = jax.nn.sigmoid(g[:, :H])
            f = jax.nn.sigmoid(g[:, H:2 * H])
            gg = jnp.tanh(g[:, 2 * H:3 * H])
            o = jax.nn.sigmoid(g[:, 3 * H:])
            c = f * c + i * gg
            h = o * jnp.tanh(c)
            return (h, c), h

        (h_f, c_f), ys = jax.lax.scan(step, (h0[l], c0[l]),
                                      jnp.transpose(layer_in, (1, 0, 2)))
        layer_in = jnp.transpose(ys, (1, 0, 2))
        hs.append(h_f)
        cs.append(c_f)
    h_t = layer_in
    scores = jnp.einsum('bth,lh->btl', h_t, params['w_att'])
    scores = jnp.where(mask[:, None, :], -jnp.inf, scores)
    attn = jax.nn.softmax(scores, axis=-1)
    context = jnp.einsum('btl,blh->bth', attn, en_out)
    cat = jnp.concatenate([context, h_t], axis=-1)
    out = jnp.tanh(jnp.einsum('btk,hk->bth', cat, params['w_lin']))
    return out, (jnp.stack(hs), jnp.stack(cs))


if __name__ == "__main__":
    key = jax.random.PRNGKey(0)
    B, T, H, L, V, n_layers = 2, 8, 32, 16, 50, 2   # L = MAX_LENGTH
    keys = jax.random.split(key, 10)
    u = lambda k, s: jax.random.uniform(k, s, jnp.float32, -0.1, 0.1)

    params = {
        'embedding': u(keys[0], (V, H)),
        'w_ih': u(keys[1], (n_layers, 4 * H, H)),
        'w_hh': u(keys[2], (n_layers, 4 * H, H)),
        'bias': u(keys[3], (n_layers, 1, 4 * H)),   # b_ih + b_hh combined
        'w_att': u(keys[4], (L, H)),                # att_score.weight
        'w_lin': u(keys[5], (H, 2 * H)),            # linear.weight
    }

    de_input = jax.random.randint(keys[6], (B, T), 0, V)
    h0 = u(keys[7], (n_layers, B, H))
    c0 = u(keys[8], (n_layers, B, H))
    en_out = jax.random.normal(keys[9], (B, L, H), jnp.float32)
    # mask: True where encoder positions are padded
    lens = jnp.array([L, L - 4])
    mask = jnp.arange(L)[None, :] >= lens[:, None]   # (B, L) bool

    out, (hn, cn) = decoder_forward(de_input, h0, c0, params, en_out, mask)
    jax.block_until_ready((out, hn, cn))

    ref_out, (ref_hn, ref_cn) = reference_forward(de_input, h0, c0, params,
                                                  en_out, mask)
    # kernel is f32 throughout; only pl.reciprocal(approx=True) adds ~1e-3 rel
    assert jnp.allclose(out, ref_out, atol=5e-3, rtol=5e-3)
    assert jnp.allclose(hn, ref_hn, atol=5e-3, rtol=5e-3)
    assert jnp.allclose(cn, ref_cn, atol=5e-3, rtol=5e-3)
    print("KERNEL_OK")
</pallas_src>

<mosaic_0001>
module attributes {stable_mosaic.version = 11 : i64} {
  func.func @decoder_kernel(%arg0: i32, %arg1: memref<8x8x128xf32, #tpu.memory_space<vmem>>, %arg2: memref<2x8x128xf32, #tpu.memory_space<vmem>>, %arg3: memref<2x8x128xf32, #tpu.memory_space<vmem>>, %arg4: memref<2x128x512xf32, #tpu.memory_space<vmem>>, %arg5: memref<2x128x512xf32, #tpu.memory_space<vmem>>, %arg6: memref<2x1x512xf32, #tpu.memory_space<vmem>>, %arg7: memref<128x256xf32, #tpu.memory_space<vmem>>, %arg8: memref<8x128xf32, #tpu.memory_space<vmem>>, %arg9: memref<8x128x128xf32, #tpu.memory_space<vmem>>, %arg10: memref<128x128xf32, #tpu.memory_space<vmem>>, %arg11: memref<8x8x128xf32, #tpu.memory_space<vmem>>, %arg12: memref<2x8x128xf32, #tpu.memory_space<vmem>>, %arg13: memref<2x8x128xf32, #tpu.memory_space<vmem>>, %arg14: memref<8x8x512xf32, #tpu.memory_space<vmem>>) attributes {dimension_semantics = [#tpu.dimension_semantics<parallel>], iteration_bounds = array<i64: 1>, scalar_prefetch = 0 : i64, scratch_operands = 1 : i64, tpu.core_type = #tpu.core_type<tc>, window_params = [{transform_indices = @transform_0, window_bounds = array<i64: 8, 8, 128>}, {transform_indices = @transform_1, window_bounds = array<i64: 2, 8, 128>}, {transform_indices = @transform_2, window_bounds = array<i64: 2, 8, 128>}, {pipeline_mode = #tpu.pipeline_mode<synchronous>, transform_indices = @transform_3, window_bounds = array<i64: 2, 128, 512>}, {pipeline_mode = #tpu.pipeline_mode<synchronous>, transform_indices = @transform_4, window_bounds = array<i64: 2, 128, 512>}, {pipeline_mode = #tpu.pipeline_mode<synchronous>, transform_indices = @transform_5, window_bounds = array<i64: 2, 1, 512>}, {pipeline_mode = #tpu.pipeline_mode<synchronous>, transform_indices = @transform_6, window_bounds = array<i64: 128, 256>}, {transform_indices = @transform_7, window_bounds = array<i64: 8, 128>}, {transform_indices = @transform_8, window_bounds = array<i64: 8, 128, 128>}, {pipeline_mode = #tpu.pipeline_mode<synchronous>, transform_indices = @transform_9, window_bounds = array<i64: 128, 128>}, {transform_indices = @transform_10, window_bounds = array<i64: 8, 8, 128>}, {transform_indices = @transform_11, window_bounds = array<i64: 2, 8, 128>}, {transform_indices = @transform_12, window_bounds = array<i64: 2, 8, 128>}]} {
    %c0 = arith.constant 0 : index
    %c0_0 = arith.constant 0 : index
    %c0_1 = arith.constant 0 : index
    %0 = vector.load %arg4[%c0, %c0_0, %c0_1] : memref<2x128x512xf32, #tpu.memory_space<vmem>>, vector<1x128x512xf32>
    %1 = vector.shape_cast %0 : vector<1x128x512xf32> to vector<128x512xf32>
    %c0_2 = arith.constant 0 : index
    %c0_3 = arith.constant 0 : index
    %c0_4 = arith.constant 0 : index
    %2 = vector.load %arg5[%c0_2, %c0_3, %c0_4] : memref<2x128x512xf32, #tpu.memory_space<vmem>>, vector<1x128x512xf32>
    %3 = vector.shape_cast %2 : vector<1x128x512xf32> to vector<128x512xf32>
    %c0_5 = arith.constant 0 : index
    %c0_6 = arith.constant 0 : index
    %c0_7 = arith.constant 0 : index
    %4 = vector.load %arg6[%c0_5, %c0_6, %c0_7] : memref<2x1x512xf32, #tpu.memory_space<vmem>>, vector<1x1x512xf32>
    %5 = vector.shape_cast %4 : vector<1x1x512xf32> to vector<1x512xf32>
    %c0_8 = arith.constant 0 : index
    %c0_9 = arith.constant 0 : index
    %c0_10 = arith.constant 0 : index
    %6 = vector.load %arg1[%c0_8, %c0_9, %c0_10] : memref<8x8x128xf32, #tpu.memory_space<vmem>>, vector<8x8x128xf32>
    %7 = vector.shape_cast %6 : vector<8x8x128xf32> to vector<64x128xf32>
    %cst = arith.constant dense<0.000000e+00> : vector<64x512xf32>
    %8 = tpu.matmul %7, %1, %cst {dimension_numbers = #tpu.dot_dimension_numbers<[1], [0], [0], [1], [0, 0, 1, 1], [], []>} : vector<64x128xf32>, vector<128x512xf32>, vector<64x512xf32> -> vector<64x512xf32>
    %9 = vector.broadcast %5 : vector<1x512xf32> to vector<64x512xf32>
    %10 = arith.addf %8, %9 : vector<64x512xf32>
    %11 = vector.shape_cast %10 : vector<64x512xf32> to vector<8x8x512xf32>
    %c0_11 = arith.constant 0 : index
    %c0_12 = arith.constant 0 : index
    %c0_13 = arith.constant 0 : index
    %12 = vector.load %arg14[%c0_11, %c0_12, %c0_13] : memref<8x8x512xf32, #tpu.memory_space<vmem>>, vector<8x8x512xf32>
    tpu.vector_store %arg14[%c0_11, %c0_12, %c0_13], %11 {strides = array<i32>} : memref<8x8x512xf32, #tpu.memory_space<vmem>>, vector<8x8x512xf32>,
    %c0_14 = arith.constant 0 : index
    %c0_15 = arith.constant 0 : index
    %c0_16 = arith.constant 0 : index
    %13 = vector.load %arg2[%c0_14, %c0_15, %c0_16] : memref<2x8x128xf32, #tpu.memory_space<vmem>>, vector<1x8x128xf32>
    %14 = vector.shape_cast %13 : vector<1x8x128xf32> to vector<8x128xf32>
    %c0_17 = arith.constant 0 : index
    %c0_18 = arith.constant 0 : index
    %c0_19 = arith.constant 0 : index
    %15 = vector.load %arg3[%c0_17, %c0_18, %c0_19] : memref<2x8x128xf32, #tpu.memory_space<vmem>>, vector<1x8x128xf32>
    %16 = vector.shape_cast %15 : vector<1x8x128xf32> to vector<8x128xf32>
    %c0_20 = arith.constant 0 : index
    %c0_21 = arith.constant 0 : index
    %c0_22 = arith.constant 0 : index
    %17 = vector.load %arg14[%c0_20, %c0_21, %c0_22] : memref<8x8x512xf32, #tpu.memory_space<vmem>>, vector<1x8x512xf32>
    %18 = vector.shape_cast %17 : vector<1x8x512xf32> to vector<8x512xf32>
    %cst_23 = arith.constant dense<0.000000e+00> : vector<8x512xf32>
    %19 = tpu.matmul %14, %3, %cst_23 {dimension_numbers = #tpu.dot_dimension_numbers<[1], [0], [0], [1], [0, 0, 1, 1], [], []>} : vector<8x128xf32>, vector<128x512xf32>, vector<8x512xf32> -> vector<8x512xf32>
    %20 = arith.addf %18, %19 : vector<8x512xf32>
    %21 = vector.extract_strided_slice %20 {offsets = [0, 0], sizes = [8, 128], strides = [1, 1]} : vector<8x512xf32> to vector<8x128xf32>
    %22 = arith.negf %21 : vector<8x128xf32>
    %23 = math.exp %22 : vector<8x128xf32>
    %cst_24 = arith.constant 1.000000e+00 : f32
    %24 = vector.broadcast %cst_24 : f32 to vector<8x128xf32>
    %25 = arith.addf %24, %23 : vector<8x128xf32>
    %26 = arith.divf %24, %25 : vector<8x128xf32>
    %27 = vector.extract_strided_slice %20 {offsets = [0, 128], sizes = [8, 128], strides = [1, 1]} : vector<8x512xf32> to vector<8x128xf32>
    %28 = arith.negf %27 : vector<8x128xf32>
    %29 = math.exp %28 : vector<8x128xf32>
    %cst_25 = arith.constant 1.000000e+00 : f32
    %30 = vector.broadcast %cst_25 : f32 to vector<8x128xf32>
    %31 = arith.addf %30, %29 : vector<8x128xf32>
    %32 = arith.divf %30, %31 : vector<8x128xf32>
    %33 = vector.extract_strided_slice %20 {offsets = [0, 256], sizes = [8, 128], strides = [1, 1]} : vector<8x512xf32> to vector<8x128xf32>
    %34 = math.tanh %33 : vector<8x128xf32>
    %35 = vector.extract_strided_slice %20 {offsets = [0, 384], sizes = [8, 128], strides = [1, 1]} : vector<8x512xf32> to vector<8x128xf32>
    %36 = arith.negf %35 : vector<8x128xf32>
    %37 = math.exp %36 : vector<8x128xf32>
    %cst_26 = arith.constant 1.000000e+00 : f32
    %38 = vector.broadcast %cst_26 : f32 to vector<8x128xf32>
    %39 = arith.addf %38, %37 : vector<8x128xf32>
    %40 = arith.divf %38, %39 : vector<8x128xf32>
    %41 = arith.mulf %32, %16 : vector<8x128xf32>
    %42 = arith.mulf %26, %34 : vector<8x128xf32>
    %43 = arith.addf %41, %42 : vector<8x128xf32>
    %44 = math.tanh %43 : vector<8x128xf32>
    %45 = arith.mulf %40, %44 : vector<8x128xf32>
    %c0_27 = arith.constant 0 : index
    %c0_28 = arith.constant 0 : index
    %c0_29 = arith.constant 0 : index
    %46 = vector.load %arg11[%c0_27, %c0_28, %c0_29] : memref<8x8x128xf32, #tpu.memory_space<vmem>>, vector<1x8x128xf32>
    %47 = vector.shape_cast %46 : vector<1x8x128xf32> to vector<8x128xf32>
    %48 = vector.shape_cast %45 : vector<8x128xf32> to vector<1x8x128xf32>
    tpu.vector_store %arg11[%c0_27, %c0_28, %c0_29], %48 {strides = array<i32>} : memref<8x8x128xf32, #tpu.memory_space<vmem>>, vector<1x8x128xf32>,
    %c1 = arith.constant 1 : index
    %c0_30 = arith.constant 0 : index
    %c0_31 = arith.constant 0 : index
    %49 = vector.load %arg14[%c1, %c0_30, %c0_31] : memref<8x8x512xf32, #tpu.memory_space<vmem>>, vector<1x8x512xf32>
    %50 = vector.shape_cast %49 : vector<1x8x512xf32> to vector<8x512xf32>
    %cst_32 = arith.constant dense<0.000000e+00> : vector<8x512xf32>
    %51 = tpu.matmul %45, %3, %cst_32 {dimension_numbers = #tpu.dot_dimension_numbers<[1], [0], [0], [1], [0, 0, 1, 1], [], []>} : vector<8x128xf32>, vector<128x512xf32>, vector<8x512xf32> -> vector<8x512xf32>
    %52 = arith.addf %50, %51 : vector<8x512xf32>
    %53 = vector.extract_strided_slice %52 {offsets = [0, 0], sizes = [8, 128], strides = [1, 1]} : vector<8x512xf32> to vector<8x128xf32>
    %54 = arith.negf %53 : vector<8x128xf32>
    %55 = math.exp %54 : vector<8x128xf32>
    %cst_33 = arith.constant 1.000000e+00 : f32
    %56 = vector.broadcast %cst_33 : f32 to vector<8x128xf32>
    %57 = arith.addf %56, %55 : vector<8x128xf32>
    %58 = arith.divf %56, %57 : vector<8x128xf32>
    %59 = vector.extract_strided_slice %52 {offsets = [0, 128], sizes = [8, 128], strides = [1, 1]} : vector<8x512xf32> to vector<8x128xf32>
    %60 = arith.negf %59 : vector<8x128xf32>
    %61 = math.exp %60 : vector<8x128xf32>
    %cst_34 = arith.constant 1.000000e+00 : f32
    %62 = vector.broadcast %cst_34 : f32 to vector<8x128xf32>
    %63 = arith.addf %62, %61 : vector<8x128xf32>
    %64 = arith.divf %62, %63 : vector<8x128xf32>
    %65 = vector.extract_strided_slice %52 {offsets = [0, 256], sizes = [8, 128], strides = [1, 1]} : vector<8x512xf32> to vector<8x128xf32>
    %66 = math.tanh %65 : vector<8x128xf32>
    %67 = vector.extract_strided_slice %52 {offsets = [0, 384], sizes = [8, 128], strides = [1, 1]} : vector<8x512xf32> to vector<8x128xf32>
    %68 = arith.negf %67 : vector<8x128xf32>
    %69 = math.exp %68 : vector<8x128xf32>
    %cst_35 = arith.constant 1.000000e+00 : f32
    %70 = vector.broadcast %cst_35 : f32 to vector<8x128xf32>
    %71 = arith.addf %70, %69 : vector<8x128xf32>
    %72 = arith.divf %70, %71 : vector<8x128xf32>
    %73 = arith.mulf %64, %43 : vector<8x128xf32>
    %74 = arith.mulf %58, %66 : vector<8x128xf32>
    %75 = arith.addf %73, %74 : vector<8x128xf32>
    %76 = math.tanh %75 : vector<8x128xf32>
    %77 = arith.mulf %72, %76 : vector<8x128xf32>
    %c1_36 = arith.constant 1 : index
    %c0_37 = arith.constant 0 : index
    %c0_38 = arith.constant 0 : index
    %78 = vector.load %arg11[%c1_36, %c0_37, %c0_38] : memref<8x8x128xf32, #tpu.memory_space<vmem>>, vector<1x8x128xf32>
    %79 = vector.shape_cast %78 : vector<1x8x128xf32> to vector<8x128xf32>
    %80 = vector.shape_cast %77 : vector<8x128xf32> to vector<1x8x128xf32>
    tpu.vector_store %arg11[%c1_36, %c0_37, %c0_38], %80 {strides = array<i32>} : memref<8x8x128xf32, #tpu.memory_space<vmem>>, vector<1x8x128xf32>,
    %c2 = arith.constant 2 : index
    %c0_39 = arith.constant 0 : index
    %c0_40 = arith.constant 0 : index
    %81 = vector.load %arg14[%c2, %c0_39, %c0_40] : memref<8x8x512xf32, #tpu.memory_space<vmem>>, vector<1x8x512xf32>
    %82 = vector.shape_cast %81 : vector<1x8x512xf32> to vector<8x512xf32>
    %cst_41 = arith.constant dense<0.000000e+00> : vector<8x512xf32>
    %83 = tpu.matmul %77, %3, %cst_41 {dimension_numbers = #tpu.dot_dimension_numbers<[1], [0], [0], [1], [0, 0, 1, 1], [], []>} : vector<8x128xf32>, vector<128x512xf32>, vector<8x512xf32> -> vector<8x512xf32>
    %84 = arith.addf %82, %83 : vector<8x512xf32>
    %85 = vector.extract_strided_slice %84 {offsets = [0, 0], sizes = [8, 128], strides = [1, 1]} : vector<8x512xf32> to vector<8x128xf32>
    %86 = arith.negf %85 : vector<8x128xf32>
    %87 = math.exp %86 : vector<8x128xf32>
    %cst_42 = arith.constant 1.000000e+00 : f32
    %88 = vector.broadcast %cst_42 : f32 to vector<8x128xf32>
    %89 = arith.addf %88, %87 : vector<8x128xf32>
    %90 = arith.divf %88, %89 : vector<8x128xf32>
    %91 = vector.extract_strided_slice %84 {offsets = [0, 128], sizes = [8, 128], strides = [1, 1]} : vector<8x512xf32> to vector<8x128xf32>
    %92 = arith.negf %91 : vector<8x128xf32>
    %93 = math.exp %92 : vector<8x128xf32>
    %cst_43 = arith.constant 1.000000e+00 : f32
    %94 = vector.broadcast %cst_43 : f32 to vector<8x128xf32>
    %95 = arith.addf %94, %93 : vector<8x128xf32>
    %96 = arith.divf %94, %95 : vector<8x128xf32>
    %97 = vector.extract_strided_slice %84 {offsets = [0, 256], sizes = [8, 128], strides = [1, 1]} : vector<8x512xf32> to vector<8x128xf32>
    %98 = math.tanh %97 : vector<8x128xf32>
    %99 = vector.extract_strided_slice %84 {offsets = [0, 384], sizes = [8, 128], strides = [1, 1]} : vector<8x512xf32> to vector<8x128xf32>
    %100 = arith.negf %99 : vector<8x128xf32>
    %101 = math.exp %100 : vector<8x128xf32>
    %cst_44 = arith.constant 1.000000e+00 : f32
    %102 = vector.broadcast %cst_44 : f32 to vector<8x128xf32>
    %103 = arith.addf %102, %101 : vector<8x128xf32>
    %104 = arith.divf %102, %103 : vector<8x128xf32>
    %105 = arith.mulf %96, %75 : vector<8x128xf32>
    %106 = arith.mulf %90, %98 : vector<8x128xf32>
    %107 = arith.addf %105, %106 : vector<8x128xf32>
    %108 = math.tanh %107 : vector<8x128xf32>
    %109 = arith.mulf %104, %108 : vector<8x128xf32>
    %c2_45 = arith.constant 2 : index
    %c0_46 = arith.constant 0 : index
    %c0_47 = arith.constant 0 : index
    %110 = vector.load %arg11[%c2_45, %c0_46, %c0_47] : memref<8x8x128xf32, #tpu.memory_space<vmem>>, vector<1x8x128xf32>
    %111 = vector.shape_cast %110 : vector<1x8x128xf32> to vector<8x128xf32>
    %112 = vector.shape_cast %109 : vector<8x128xf32> to vector<1x8x128xf32>
    tpu.vector_store %arg11[%c2_45, %c0_46, %c0_47], %112 {strides = array<i32>} : memref<8x8x128xf32, #tpu.memory_space<vmem>>, vector<1x8x128xf32>,
    %c3 = arith.constant 3 : index
    %c0_48 = arith.constant 0 : index
    %c0_49 = arith.constant 0 : index
    %113 = vector.load %arg14[%c3, %c0_48, %c0_49] : memref<8x8x512xf32, #tpu.memory_space<vmem>>, vector<1x8x512xf32>
    %114 = vector.shape_cast %113 : vector<1x8x512xf32> to vector<8x512xf32>
    %cst_50 = arith.constant dense<0.000000e+00> : vector<8x512xf32>
    %115 = tpu.matmul %109, %3, %cst_50 {dimension_numbers = #tpu.dot_dimension_numbers<[1], [0], [0], [1], [0, 0, 1, 1], [], []>} : vector<8x128xf32>, vector<128x512xf32>, vector<8x512xf32> -> vector<8x512xf32>
    %116 = arith.addf %114, %115 : vector<8x512xf32>
    %117 = vector.extract_strided_slice %116 {offsets = [0, 0], sizes = [8, 128], strides = [1, 1]} : vector<8x512xf32> to vector<8x128xf32>
    %118 = arith.negf %117 : vector<8x128xf32>
    %119 = math.exp %118 : vector<8x128xf32>
    %cst_51 = arith.constant 1.000000e+00 : f32
    %120 = vector.broadcast %cst_51 : f32 to vector<8x128xf32>
    %121 = arith.addf %120, %119 : vector<8x128xf32>
    %122 = arith.divf %120, %121 : vector<8x128xf32>
    %123 = vector.extract_strided_slice %116 {offsets = [0, 128], sizes = [8, 128], strides = [1, 1]} : vector<8x512xf32> to vector<8x128xf32>
    %124 = arith.negf %123 : vector<8x128xf32>
    %125 = math.exp %124 : vector<8x128xf32>
    %cst_52 = arith.constant 1.000000e+00 : f32
    %126 = vector.broadcast %cst_52 : f32 to vector<8x128xf32>
    %127 = arith.addf %126, %125 : vector<8x128xf32>
    %128 = arith.divf %126, %127 : vector<8x128xf32>
    %129 = vector.extract_strided_slice %116 {offsets = [0, 256], sizes = [8, 128], strides = [1, 1]} : vector<8x512xf32> to vector<8x128xf32>
    %130 = math.tanh %129 : vector<8x128xf32>
    %131 = vector.extract_strided_slice %116 {offsets = [0, 384], sizes = [8, 128], strides = [1, 1]} : vector<8x512xf32> to vector<8x128xf32>
    %132 = arith.negf %131 : vector<8x128xf32>
    %133 = math.exp %132 : vector<8x128xf32>
    %cst_53 = arith.constant 1.000000e+00 : f32
    %134 = vector.broadcast %cst_53 : f32 to vector<8x128xf32>
    %135 = arith.addf %134, %133 : vector<8x128xf32>
    %136 = arith.divf %134, %135 : vector<8x128xf32>
    %137 = arith.mulf %128, %107 : vector<8x128xf32>
    %138 = arith.mulf %122, %130 : vector<8x128xf32>
    %139 = arith.addf %137, %138 : vector<8x128xf32>
    %140 = math.tanh %139 : vector<8x128xf32>
    %141 = arith.mulf %136, %140 : vector<8x128xf32>
    %c3_54 = arith.constant 3 : index
    %c0_55 = arith.constant 0 : index
    %c0_56 = arith.constant 0 : index
    %142 = vector.load %arg11[%c3_54, %c0_55, %c0_56] : memref<8x8x128xf32, #tpu.memory_space<vmem>>, vector<1x8x128xf32>
    %143 = vector.shape_cast %142 : vector<1x8x128xf32> to vector<8x128xf32>
    %144 = vector.shape_cast %141 : vector<8x128xf32> to vector<1x8x128xf32>
    tpu.vector_store %arg11[%c3_54, %c0_55, %c0_56], %144 {strides = array<i32>} : memref<8x8x128xf32, #tpu.memory_space<vmem>>, vector<1x8x128xf32>,
    %c4 = arith.constant 4 : index
    %c0_57 = arith.constant 0 : index
    %c0_58 = arith.constant 0 : index
    %145 = vector.load %arg14[%c4, %c0_57, %c0_58] : memref<8x8x512xf32, #tpu.memory_space<vmem>>, vector<1x8x512xf32>
    %146 = vector.shape_cast %145 : vector<1x8x512xf32> to vector<8x512xf32>
    %cst_59 = arith.constant dense<0.000000e+00> : vector<8x512xf32>
    %147 = tpu.matmul %141, %3, %cst_59 {dimension_numbers = #tpu.dot_dimension_numbers<[1], [0], [0], [1], [0, 0, 1, 1], [], []>} : vector<8x128xf32>, vector<128x512xf32>, vector<8x512xf32> -> vector<8x512xf32>
    %148 = arith.addf %146, %147 : vector<8x512xf32>
    %149 = vector.extract_strided_slice %148 {offsets = [0, 0], sizes = [8, 128], strides = [1, 1]} : vector<8x512xf32> to vector<8x128xf32>
    %150 = arith.negf %149 : vector<8x128xf32>
    %151 = math.exp %150 : vector<8x128xf32>
    %cst_60 = arith.constant 1.000000e+00 : f32
    %152 = vector.broadcast %cst_60 : f32 to vector<8x128xf32>
    %153 = arith.addf %152, %151 : vector<8x128xf32>
    %154 = arith.divf %152, %153 : vector<8x128xf32>
    %155 = vector.extract_strided_slice %148 {offsets = [0, 128], sizes = [8, 128], strides = [1, 1]} : vector<8x512xf32> to vector<8x128xf32>
    %156 = arith.negf %155 : vector<8x128xf32>
    %157 = math.exp %156 : vector<8x128xf32>
    %cst_61 = arith.constant 1.000000e+00 : f32
    %158 = vector.broadcast %cst_61 : f32 to vector<8x128xf32>
    %159 = arith.addf %158, %157 : vector<8x128xf32>
    %160 = arith.divf %158, %159 : vector<8x128xf32>
    %161 = vector.extract_strided_slice %148 {offsets = [0, 256], sizes = [8, 128], strides = [1, 1]} : vector<8x512xf32> to vector<8x128xf32>
    %162 = math.tanh %161 : vector<8x128xf32>
    %163 = vector.extract_strided_slice %148 {offsets = [0, 384], sizes = [8, 128], strides = [1, 1]} : vector<8x512xf32> to vector<8x128xf32>
    %164 = arith.negf %163 : vector<8x128xf32>
    %165 = math.exp %164 : vector<8x128xf32>
    %cst_62 = arith.constant 1.000000e+00 : f32
    %166 = vector.broadcast %cst_62 : f32 to vector<8x128xf32>
    %167 = arith.addf %166, %165 : vector<8x128xf32>
    %168 = arith.divf %166, %167 : vector<8x128xf32>
    %169 = arith.mulf %160, %139 : vector<8x128xf32>
    %170 = arith.mulf %154, %162 : vector<8x128xf32>
    %171 = arith.addf %169, %170 : vector<8x128xf32>
    %172 = math.tanh %171 : vector<8x128xf32>
    %173 = arith.mulf %168, %172 : vector<8x128xf32>
    %c4_63 = arith.constant 4 : index
    %c0_64 = arith.constant 0 : index
    %c0_65 = arith.constant 0 : index
    %174 = vector.load %arg11[%c4_63, %c0_64, %c0_65] : memref<8x8x128xf32, #tpu.memory_space<vmem>>, vector<1x8x128xf32>
    %175 = vector.shape_cast %174 : vector<1x8x128xf32> to vector<8x128xf32>
    %176 = vector.shape_cast %173 : vector<8x128xf32> to vector<1x8x128xf32>
    tpu.vector_store %arg11[%c4_63, %c0_64, %c0_65], %176 {strides = array<i32>} : memref<8x8x128xf32, #tpu.memory_space<vmem>>, vector<1x8x128xf32>,
    %c5 = arith.constant 5 : index
    %c0_66 = arith.constant 0 : index
    %c0_67 = arith.constant 0 : index
    %177 = vector.load %arg14[%c5, %c0_66, %c0_67] : memref<8x8x512xf32, #tpu.memory_space<vmem>>, vector<1x8x512xf32>
    %178 = vector.shape_cast %177 : vector<1x8x512xf32> to vector<8x512xf32>
    %cst_68 = arith.constant dense<0.000000e+00> : vector<8x512xf32>
    %179 = tpu.matmul %173, %3, %cst_68 {dimension_numbers = #tpu.dot_dimension_numbers<[1], [0], [0], [1], [0, 0, 1, 1], [], []>} : vector<8x128xf32>, vector<128x512xf32>, vector<8x512xf32> -> vector<8x512xf32>
    %180 = arith.addf %178, %179 : vector<8x512xf32>
    %181 = vector.extract_strided_slice %180 {offsets = [0, 0], sizes = [8, 128], strides = [1, 1]} : vector<8x512xf32> to vector<8x128xf32>
    %182 = arith.negf %181 : vector<8x128xf32>
    %183 = math.exp %182 : vector<8x128xf32>
    %cst_69 = arith.constant 1.000000e+00 : f32
    %184 = vector.broadcast %cst_69 : f32 to vector<8x128xf32>
    %185 = arith.addf %184, %183 : vector<8x128xf32>
    %186 = arith.divf %184, %185 : vector<8x128xf32>
    %187 = vector.extract_strided_slice %180 {offsets = [0, 128], sizes = [8, 128], strides = [1, 1]} : vector<8x512xf32> to vector<8x128xf32>
    %188 = arith.negf %187 : vector<8x128xf32>
    %189 = math.exp %188 : vector<8x128xf32>
    %cst_70 = arith.constant 1.000000e+00 : f32
    %190 = vector.broadcast %cst_70 : f32 to vector<8x128xf32>
    %191 = arith.addf %190, %189 : vector<8x128xf32>
    %192 = arith.divf %190, %191 : vector<8x128xf32>
    %193 = vector.extract_strided_slice %180 {offsets = [0, 256], sizes = [8, 128], strides = [1, 1]} : vector<8x512xf32> to vector<8x128xf32>
    %194 = math.tanh %193 : vector<8x128xf32>
    %195 = vector.extract_strided_slice %180 {offsets = [0, 384], sizes = [8, 128], strides = [1, 1]} : vector<8x512xf32> to vector<8x128xf32>
    %196 = arith.negf %195 : vector<8x128xf32>
    %197 = math.exp %196 : vector<8x128xf32>
    %cst_71 = arith.constant 1.000000e+00 : f32
    %198 = vector.broadcast %cst_71 : f32 to vector<8x128xf32>
    %199 = arith.addf %198, %197 : vector<8x128xf32>
    %200 = arith.divf %198, %199 : vector<8x128xf32>
    %201 = arith.mulf %192, %171 : vector<8x128xf32>
    %202 = arith.mulf %186, %194 : vector<8x128xf32>
    %203 = arith.addf %201, %202 : vector<8x128xf32>
    %204 = math.tanh %203 : vector<8x128xf32>
    %205 = arith.mulf %200, %204 : vector<8x128xf32>
    %c5_72 = arith.constant 5 : index
    %c0_73 = arith.constant 0 : index
    %c0_74 = arith.constant 0 : index
    %206 = vector.load %arg11[%c5_72, %c0_73, %c0_74] : memref<8x8x128xf32, #tpu.memory_space<vmem>>, vector<1x8x128xf32>
    %207 = vector.shape_cast %206 : vector<1x8x128xf32> to vector<8x128xf32>
    %208 = vector.shape_cast %205 : vector<8x128xf32> to vector<1x8x128xf32>
    tpu.vector_store %arg11[%c5_72, %c0_73, %c0_74], %208 {strides = array<i32>} : memref<8x8x128xf32, #tpu.memory_space<vmem>>, vector<1x8x128xf32>,
    %c6 = arith.constant 6 : index
    %c0_75 = arith.constant 0 : index
    %c0_76 = arith.constant 0 : index
    %209 = vector.load %arg14[%c6, %c0_75, %c0_76] : memref<8x8x512xf32, #tpu.memory_space<vmem>>, vector<1x8x512xf32>
    %210 = vector.shape_cast %209 : vector<1x8x512xf32> to vector<8x512xf32>
    %cst_77 = arith.constant dense<0.000000e+00> : vector<8x512xf32>
    %211 = tpu.matmul %205, %3, %cst_77 {dimension_numbers = #tpu.dot_dimension_numbers<[1], [0], [0], [1], [0, 0, 1, 1], [], []>} : vector<8x128xf32>, vector<128x512xf32>, vector<8x512xf32> -> vector<8x512xf32>
    %212 = arith.addf %210, %211 : vector<8x512xf32>
    %213 = vector.extract_strided_slice %212 {offsets = [0, 0], sizes = [8, 128], strides = [1, 1]} : vector<8x512xf32> to vector<8x128xf32>
    %214 = arith.negf %213 : vector<8x128xf32>
    %215 = math.exp %214 : vector<8x128xf32>
    %cst_78 = arith.constant 1.000000e+00 : f32
    %216 = vector.broadcast %cst_78 : f32 to vector<8x128xf32>
    %217 = arith.addf %216, %215 : vector<8x128xf32>
    %218 = arith.divf %216, %217 : vector<8x128xf32>
    %219 = vector.extract_strided_slice %212 {offsets = [0, 128], sizes = [8, 128], strides = [1, 1]} : vector<8x512xf32> to vector<8x128xf32>
    %220 = arith.negf %219 : vector<8x128xf32>
    %221 = math.exp %220 : vector<8x128xf32>
    %cst_79 = arith.constant 1.000000e+00 : f32
    %222 = vector.broadcast %cst_79 : f32 to vector<8x128xf32>
    %223 = arith.addf %222, %221 : vector<8x128xf32>
    %224 = arith.divf %222, %223 : vector<8x128xf32>
    %225 = vector.extract_strided_slice %212 {offsets = [0, 256], sizes = [8, 128], strides = [1, 1]} : vector<8x512xf32> to vector<8x128xf32>
    %226 = math.tanh %225 : vector<8x128xf32>
    %227 = vector.extract_strided_slice %212 {offsets = [0, 384], sizes = [8, 128], strides = [1, 1]} : vector<8x512xf32> to vector<8x128xf32>
    %228 = arith.negf %227 : vector<8x128xf32>
    %229 = math.exp %228 : vector<8x128xf32>
    %cst_80 = arith.constant 1.000000e+00 : f32
    %230 = vector.broadcast %cst_80 : f32 to vector<8x128xf32>
    %231 = arith.addf %230, %229 : vector<8x128xf32>
    %232 = arith.divf %230, %231 : vector<8x128xf32>
    %233 = arith.mulf %224, %203 : vector<8x128xf32>
    %234 = arith.mulf %218, %226 : vector<8x128xf32>
    %235 = arith.addf %233, %234 : vector<8x128xf32>
    %236 = math.tanh %235 : vector<8x128xf32>
    %237 = arith.mulf %232, %236 : vector<8x128xf32>
    %c6_81 = arith.constant 6 : index
    %c0_82 = arith.constant 0 : index
    %c0_83 = arith.constant 0 : index
    %238 = vector.load %arg11[%c6_81, %c0_82, %c0_83] : memref<8x8x128xf32, #tpu.memory_space<vmem>>, vector<1x8x128xf32>
    %239 = vector.shape_cast %238 : vector<1x8x128xf32> to vector<8x128xf32>
    %240 = vector.shape_cast %237 : vector<8x128xf32> to vector<1x8x128xf32>
    tpu.vector_store %arg11[%c6_81, %c0_82, %c0_83], %240 {strides = array<i32>} : memref<8x8x128xf32, #tpu.memory_space<vmem>>, vector<1x8x128xf32>,
    %c7 = arith.constant 7 : index
    %c0_84 = arith.constant 0 : index
    %c0_85 = arith.constant 0 : index
    %241 = vector.load %arg14[%c7, %c0_84, %c0_85] : memref<8x8x512xf32, #tpu.memory_space<vmem>>, vector<1x8x512xf32>
    %242 = vector.shape_cast %241 : vector<1x8x512xf32> to vector<8x512xf32>
    %cst_86 = arith.constant dense<0.000000e+00> : vector<8x512xf32>
    %243 = tpu.matmul %237, %3, %cst_86 {dimension_numbers = #tpu.dot_dimension_numbers<[1], [0], [0], [1], [0, 0, 1, 1], [], []>} : vector<8x128xf32>, vector<128x512xf32>, vector<8x512xf32> -> vector<8x512xf32>
    %244 = arith.addf %242, %243 : vector<8x512xf32>
    %245 = vector.extract_strided_slice %244 {offsets = [0, 0], sizes = [8, 128], strides = [1, 1]} : vector<8x512xf32> to vector<8x128xf32>
    %246 = arith.negf %245 : vector<8x128xf32>
    %247 = math.exp %246 : vector<8x128xf32>
    %cst_87 = arith.constant 1.000000e+00 : f32
    %248 = vector.broadcast %cst_87 : f32 to vector<8x128xf32>
    %249 = arith.addf %248, %247 : vector<8x128xf32>
    %250 = arith.divf %248, %249 : vector<8x128xf32>
    %251 = vector.extract_strided_slice %244 {offsets = [0, 128], sizes = [8, 128], strides = [1, 1]} : vector<8x512xf32> to vector<8x128xf32>
    %252 = arith.negf %251 : vector<8x128xf32>
    %253 = math.exp %252 : vector<8x128xf32>
    %cst_88 = arith.constant 1.000000e+00 : f32
    %254 = vector.broadcast %cst_88 : f32 to vector<8x128xf32>
    %255 = arith.addf %254, %253 : vector<8x128xf32>
    %256 = arith.divf %254, %255 : vector<8x128xf32>
    %257 = vector.extract_strided_slice %244 {offsets = [0, 256], sizes = [8, 128], strides = [1, 1]} : vector<8x512xf32> to vector<8x128xf32>
    %258 = math.tanh %257 : vector<8x128xf32>
    %259 = vector.extract_strided_slice %244 {offsets = [0, 384], sizes = [8, 128], strides = [1, 1]} : vector<8x512xf32> to vector<8x128xf32>
    %260 = arith.negf %259 : vector<8x128xf32>
    %261 = math.exp %260 : vector<8x128xf32>
    %cst_89 = arith.constant 1.000000e+00 : f32
    %262 = vector.broadcast %cst_89 : f32 to vector<8x128xf32>
    %263 = arith.addf %262, %261 : vector<8x128xf32>
    %264 = arith.divf %262, %263 : vector<8x128xf32>
    %265 = arith.mulf %256, %235 : vector<8x128xf32>
    %266 = arith.mulf %250, %258 : vector<8x128xf32>
    %267 = arith.addf %265, %266 : vector<8x128xf32>
    %268 = math.tanh %267 : vector<8x128xf32>
    %269 = arith.mulf %264, %268 : vector<8x128xf32>
    %c7_90 = arith.constant 7 : index
    %c0_91 = arith.constant 0 : index
    %c0_92 = arith.constant 0 : index
    %270 = vector.load %arg11[%c7_90, %c0_91, %c0_92] : memref<8x8x128xf32, #tpu.memory_space<vmem>>, vector<1x8x128xf32>
    %271 = vector.shape_cast %270 : vector<1x8x128xf32> to vector<8x128xf32>
    %272 = vector.shape_cast %269 : vector<8x128xf32> to vector<1x8x128xf32>
    tpu.vector_store %arg11[%c7_90, %c0_91, %c0_92], %272 {strides = array<i32>} : memref<8x8x128xf32, #tpu.memory_space<vmem>>, vector<1x8x128xf32>,
    %c0_93 = arith.constant 0 : index
    %c0_94 = arith.constant 0 : index
    %c0_95 = arith.constant 0 : index
    %273 = vector.load %arg12[%c0_93, %c0_94, %c0_95] : memref<2x8x128xf32, #tpu.memory_space<vmem>>, vector<1x8x128xf32>
    %274 = vector.shape_cast %273 : vector<1x8x128xf32> to vector<8x128xf32>
    %275 = vector.shape_cast %269 : vector<8x128xf32> to vector<1x8x128xf32>
    tpu.vector_store %arg12[%c0_93, %c0_94, %c0_95], %275 {strides = array<i32>} : memref<2x8x128xf32, #tpu.memory_space<vmem>>, vector<1x8x128xf32>,
    %c0_96 = arith.constant 0 : index
    %c0_97 = arith.constant 0 : index
    %c0_98 = arith.constant 0 : index
    %276 = vector.load %arg13[%c0_96, %c0_97, %c0_98] : memref<2x8x128xf32, #tpu.memory_space<vmem>>, vector<1x8x128xf32>
    %277 = vector.shape_cast %276 : vector<1x8x128xf32> to vector<8x128xf32>
    %278 = vector.shape_cast %267 : vector<8x128xf32> to vector<1x8x128xf32>
    tpu.vector_store %arg13[%c0_96, %c0_97, %c0_98], %278 {strides = array<i32>} : memref<2x8x128xf32, #tpu.memory_space<vmem>>, vector<1x8x128xf32>,
    %c1_99 = arith.constant 1 : index
    %c0_100 = arith.constant 0 : index
    %c0_101 = arith.constant 0 : index
    %279 = vector.load %arg4[%c1_99, %c0_100, %c0_101] : memref<2x128x512xf32, #tpu.memory_space<vmem>>, vector<1x128x512xf32>
    %280 = vector.shape_cast %279 : vector<1x128x512xf32> to vector<128x512xf32>
    %c1_102 = arith.constant 1 : index
    %c0_103 = arith.constant 0 : index
    %c0_104 = arith.constant 0 : index
    %281 = vector.load %arg5[%c1_102, %c0_103, %c0_104] : memref<2x128x512xf32, #tpu.memory_space<vmem>>, vector<1x128x512xf32>
    %282 = vector.shape_cast %281 : vector<1x128x512xf32> to vector<128x512xf32>
    %c1_105 = arith.constant 1 : index
    %c0_106 = arith.constant 0 : index
    %c0_107 = arith.constant 0 : index
    %283 = vector.load %arg6[%c1_105, %c0_106, %c0_107] : memref<2x1x512xf32, #tpu.memory_space<vmem>>, vector<1x1x512xf32>
    %284 = vector.shape_cast %283 : vector<1x1x512xf32> to vector<1x512xf32>
    %c0_108 = arith.constant 0 : index
    %c0_109 = arith.constant 0 : index
    %c0_110 = arith.constant 0 : index
    %285 = vector.load %arg11[%c0_108, %c0_109, %c0_110] : memref<8x8x128xf32, #tpu.memory_space<vmem>>, vector<8x8x128xf32>
    %286 = vector.shape_cast %285 : vector<8x8x128xf32> to vector<64x128xf32>
    %cst_111 = arith.constant dense<0.000000e+00> : vector<64x512xf32>
    %287 = tpu.matmul %286, %280, %cst_111 {dimension_numbers = #tpu.dot_dimension_numbers<[1], [0], [0], [1], [0, 0, 1, 1], [], []>} : vector<64x128xf32>, vector<128x512xf32>, vector<64x512xf32> -> vector<64x512xf32>
    %288 = vector.broadcast %284 : vector<1x512xf32> to vector<64x512xf32>
    %289 = arith.addf %287, %288 : vector<64x512xf32>
    %290 = vector.shape_cast %289 : vector<64x512xf32> to vector<8x8x512xf32>
    %c0_112 = arith.constant 0 : index
    %c0_113 = arith.constant 0 : index
    %c0_114 = arith.constant 0 : index
    %291 = vector.load %arg14[%c0_112, %c0_113, %c0_114] : memref<8x8x512xf32, #tpu.memory_space<vmem>>, vector<8x8x512xf32>
    tpu.vector_store %arg14[%c0_112, %c0_113, %c0_114], %290 {strides = array<i32>} : memref<8x8x512xf32, #tpu.memory_space<vmem>>, vector<8x8x512xf32>,
    %c1_115 = arith.constant 1 : index
    %c0_116 = arith.constant 0 : index
    %c0_117 = arith.constant 0 : index
    %292 = vector.load %arg2[%c1_115, %c0_116, %c0_117] : memref<2x8x128xf32, #tpu.memory_space<vmem>>, vector<1x8x128xf32>
    %293 = vector.shape_cast %292 : vector<1x8x128xf32> to vector<8x128xf32>
    %c1_118 = arith.constant 1 : index
    %c0_119 = arith.constant 0 : index
    %c0_120 = arith.constant 0 : index
    %294 = vector.load %arg3[%c1_118, %c0_119, %c0_120] : memref<2x8x128xf32, #tpu.memory_space<vmem>>, vector<1x8x128xf32>
    %295 = vector.shape_cast %294 : vector<1x8x128xf32> to vector<8x128xf32>
    %c0_121 = arith.constant 0 : index
    %c0_122 = arith.constant 0 : index
    %c0_123 = arith.constant 0 : index
    %296 = vector.load %arg14[%c0_121, %c0_122, %c0_123] : memref<8x8x512xf32, #tpu.memory_space<vmem>>, vector<1x8x512xf32>
    %297 = vector.shape_cast %296 : vector<1x8x512xf32> to vector<8x512xf32>
    %cst_124 = arith.constant dense<0.000000e+00> : vector<8x512xf32>
    %298 = tpu.matmul %293, %282, %cst_124 {dimension_numbers = #tpu.dot_dimension_numbers<[1], [0], [0], [1], [0, 0, 1, 1], [], []>} : vector<8x128xf32>, vector<128x512xf32>, vector<8x512xf32> -> vector<8x512xf32>
    %299 = arith.addf %297, %298 : vector<8x512xf32>
    %300 = vector.extract_strided_slice %299 {offsets = [0, 0], sizes = [8, 128], strides = [1, 1]} : vector<8x512xf32> to vector<8x128xf32>
    %301 = arith.negf %300 : vector<8x128xf32>
    %302 = math.exp %301 : vector<8x128xf32>
    %cst_125 = arith.constant 1.000000e+00 : f32
    %303 = vector.broadcast %cst_125 : f32 to vector<8x128xf32>
    %304 = arith.addf %303, %302 : vector<8x128xf32>
    %305 = arith.divf %303, %304 : vector<8x128xf32>
    %306 = vector.extract_strided_slice %299 {offsets = [0, 128], sizes = [8, 128], strides = [1, 1]} : vector<8x512xf32> to vector<8x128xf32>
    %307 = arith.negf %306 : vector<8x128xf32>
    %308 = math.exp %307 : vector<8x128xf32>
    %cst_126 = arith.constant 1.000000e+00 : f32
    %309 = vector.broadcast %cst_126 : f32 to vector<8x128xf32>
    %310 = arith.addf %309, %308 : vector<8x128xf32>
    %311 = arith.divf %309, %310 : vector<8x128xf32>
    %312 = vector.extract_strided_slice %299 {offsets = [0, 256], sizes = [8, 128], strides = [1, 1]} : vector<8x512xf32> to vector<8x128xf32>
    %313 = math.tanh %312 : vector<8x128xf32>
    %314 = vector.extract_strided_slice %299 {offsets = [0, 384], sizes = [8, 128], strides = [1, 1]} : vector<8x512xf32> to vector<8x128xf32>
    %315 = arith.negf %314 : vector<8x128xf32>
    %316 = math.exp %315 : vector<8x128xf32>
    %cst_127 = arith.constant 1.000000e+00 : f32
    %317 = vector.broadcast %cst_127 : f32 to vector<8x128xf32>
    %318 = arith.addf %317, %316 : vector<8x128xf32>
    %319 = arith.divf %317, %318 : vector<8x128xf32>
    %320 = arith.mulf %311, %295 : vector<8x128xf32>
    %321 = arith.mulf %305, %313 : vector<8x128xf32>
    %322 = arith.addf %320, %321 : vector<8x128xf32>
    %323 = math.tanh %322 : vector<8x128xf32>
    %324 = arith.mulf %319, %323 : vector<8x128xf32>
    %c0_128 = arith.constant 0 : index
    %c0_129 = arith.constant 0 : index
    %c0_130 = arith.constant 0 : index
    %325 = vector.load %arg11[%c0_128, %c0_129, %c0_130] : memref<8x8x128xf32, #tpu.memory_space<vmem>>, vector<1x8x128xf32>
    %326 = vector.shape_cast %325 : vector<1x8x128xf32> to vector<8x128xf32>
    %327 = vector.shape_cast %324 : vector<8x128xf32> to vector<1x8x128xf32>
    tpu.vector_store %arg11[%c0_128, %c0_129, %c0_130], %327 {strides = array<i32>} : memref<8x8x128xf32, #tpu.memory_space<vmem>>, vector<1x8x128xf32>,
    %c1_131 = arith.constant 1 : index
    %c0_132 = arith.constant 0 : index
    %c0_133 = arith.constant 0 : index
    %328 = vector.load %arg14[%c1_131, %c0_132, %c0_133] : memref<8x8x512xf32, #tpu.memory_space<vmem>>, vector<1x8x512xf32>
    %329 = vector.shape_cast %328 : vector<1x8x512xf32> to vector<8x512xf32>
    %cst_134 = arith.constant dense<0.000000e+00> : vector<8x512xf32>
    %330 = tpu.matmul %324, %282, %cst_134 {dimension_numbers = #tpu.dot_dimension_numbers<[1], [0], [0], [1], [0, 0, 1, 1], [], []>} : vector<8x128xf32>, vector<128x512xf32>, vector<8x512xf32> -> vector<8x512xf32>
    %331 = arith.addf %329, %330 : vector<8x512xf32>
    %332 = vector.extract_strided_slice %331 {offsets = [0, 0], sizes = [8, 128], strides = [1, 1]} : vector<8x512xf32> to vector<8x128xf32>
    %333 = arith.negf %332 : vector<8x128xf32>
    %334 = math.exp %333 : vector<8x128xf32>
    %cst_135 = arith.constant 1.000000e+00 : f32
    %335 = vector.broadcast %cst_135 : f32 to vector<8x128xf32>
    %336 = arith.addf %335, %334 : vector<8x128xf32>
    %337 = arith.divf %335, %336 : vector<8x128xf32>
    %338 = vector.extract_strided_slice %331 {offsets = [0, 128], sizes = [8, 128], strides = [1, 1]} : vector<8x512xf32> to vector<8x128xf32>
    %339 = arith.negf %338 : vector<8x128xf32>
    %340 = math.exp %339 : vector<8x128xf32>
    %cst_136 = arith.constant 1.000000e+00 : f32
    %341 = vector.broadcast %cst_136 : f32 to vector<8x128xf32>
    %342 = arith.addf %341, %340 : vector<8x128xf32>
    %343 = arith.divf %341, %342 : vector<8x128xf32>
    %344 = vector.extract_strided_slice %331 {offsets = [0, 256], sizes = [8, 128], strides = [1, 1]} : vector<8x512xf32> to vector<8x128xf32>
    %345 = math.tanh %344 : vector<8x128xf32>
    %346 = vector.extract_strided_slice %331 {offsets = [0, 384], sizes = [8, 128], strides = [1, 1]} : vector<8x512xf32> to vector<8x128xf32>
    %347 = arith.negf %346 : vector<8x128xf32>
    %348 = math.exp %347 : vector<8x128xf32>
    %cst_137 = arith.constant 1.000000e+00 : f32
    %349 = vector.broadcast %cst_137 : f32 to vector<8x128xf32>
    %350 = arith.addf %349, %348 : vector<8x128xf32>
    %351 = arith.divf %349, %350 : vector<8x128xf32>
    %352 = arith.mulf %343, %322 : vector<8x128xf32>
    %353 = arith.mulf %337, %345 : vector<8x128xf32>
    %354 = arith.addf %352, %353 : vector<8x128xf32>
    %355 = math.tanh %354 : vector<8x128xf32>
    %356 = arith.mulf %351, %355 : vector<8x128xf32>
    %c1_138 = arith.constant 1 : index
    %c0_139 = arith.constant 0 : index
    %c0_140 = arith.constant 0 : index
    %357 = vector.load %arg11[%c1_138, %c0_139, %c0_140] : memref<8x8x128xf32, #tpu.memory_space<vmem>>, vector<1x8x128xf32>
    %358 = vector.shape_cast %357 : vector<1x8x128xf32> to vector<8x128xf32>
    %359 = vector.shape_cast %356 : vector<8x128xf32> to vector<1x8x128xf32>
    tpu.vector_store %arg11[%c1_138, %c0_139, %c0_140], %359 {strides = array<i32>} : memref<8x8x128xf32, #tpu.memory_space<vmem>>, vector<1x8x128xf32>,
    %c2_141 = arith.constant 2 : index
    %c0_142 = arith.constant 0 : index
    %c0_143 = arith.constant 0 : index
    %360 = vector.load %arg14[%c2_141, %c0_142, %c0_143] : memref<8x8x512xf32, #tpu.memory_space<vmem>>, vector<1x8x512xf32>
    %361 = vector.shape_cast %360 : vector<1x8x512xf32> to vector<8x512xf32>
    %cst_144 = arith.constant dense<0.000000e+00> : vector<8x512xf32>
    %362 = tpu.matmul %356, %282, %cst_144 {dimension_numbers = #tpu.dot_dimension_numbers<[1], [0], [0], [1], [0, 0, 1, 1], [], []>} : vector<8x128xf32>, vector<128x512xf32>, vector<8x512xf32> -> vector<8x512xf32>
    %363 = arith.addf %361, %362 : vector<8x512xf32>
    %364 = vector.extract_strided_slice %363 {offsets = [0, 0], sizes = [8, 128], strides = [1, 1]} : vector<8x512xf32> to vector<8x128xf32>
    %365 = arith.negf %364 : vector<8x128xf32>
    %366 = math.exp %365 : vector<8x128xf32>
    %cst_145 = arith.constant 1.000000e+00 : f32
    %367 = vector.broadcast %cst_145 : f32 to vector<8x128xf32>
    %368 = arith.addf %367, %366 : vector<8x128xf32>
    %369 = arith.divf %367, %368 : vector<8x128xf32>
    %370 = vector.extract_strided_slice %363 {offsets = [0, 128], sizes = [8, 128], strides = [1, 1]} : vector<8x512xf32> to vector<8x128xf32>
    %371 = arith.negf %370 : vector<8x128xf32>
    %372 = math.exp %371 : vector<8x128xf32>
    %cst_146 = arith.constant 1.000000e+00 : f32
    %373 = vector.broadcast %cst_146 : f32 to vector<8x128xf32>
    %374 = arith.addf %373, %372 : vector<8x128xf32>
    %375 = arith.divf %373, %374 : vector<8x128xf32>
    %376 = vector.extract_strided_slice %363 {offsets = [0, 256], sizes = [8, 128], strides = [1, 1]} : vector<8x512xf32> to vector<8x128xf32>
    %377 = math.tanh %376 : vector<8x128xf32>
    %378 = vector.extract_strided_slice %363 {offsets = [0, 384], sizes = [8, 128], strides = [1, 1]} : vector<8x512xf32> to vector<8x128xf32>
    %379 = arith.negf %378 : vector<8x128xf32>
    %380 = math.exp %379 : vector<8x128xf32>
    %cst_147 = arith.constant 1.000000e+00 : f32
    %381 = vector.broadcast %cst_147 : f32 to vector<8x128xf32>
    %382 = arith.addf %381, %380 : vector<8x128xf32>
    %383 = arith.divf %381, %382 : vector<8x128xf32>
    %384 = arith.mulf %375, %354 : vector<8x128xf32>
    %385 = arith.mulf %369, %377 : vector<8x128xf32>
    %386 = arith.addf %384, %385 : vector<8x128xf32>
    %387 = math.tanh %386 : vector<8x128xf32>
    %388 = arith.mulf %383, %387 : vector<8x128xf32>
    %c2_148 = arith.constant 2 : index
    %c0_149 = arith.constant 0 : index
    %c0_150 = arith.constant 0 : index
    %389 = vector.load %arg11[%c2_148, %c0_149, %c0_150] : memref<8x8x128xf32, #tpu.memory_space<vmem>>, vector<1x8x128xf32>
    %390 = vector.shape_cast %389 : vector<1x8x128xf32> to vector<8x128xf32>
    %391 = vector.shape_cast %388 : vector<8x128xf32> to vector<1x8x128xf32>
    tpu.vector_store %arg11[%c2_148, %c0_149, %c0_150], %391 {strides = array<i32>} : memref<8x8x128xf32, #tpu.memory_space<vmem>>, vector<1x8x128xf32>,
    %c3_151 = arith.constant 3 : index
    %c0_152 = arith.constant 0 : index
    %c0_153 = arith.constant 0 : index
    %392 = vector.load %arg14[%c3_151, %c0_152, %c0_153] : memref<8x8x512xf32, #tpu.memory_space<vmem>>, vector<1x8x512xf32>
    %393 = vector.shape_cast %392 : vector<1x8x512xf32> to vector<8x512xf32>
    %cst_154 = arith.constant dense<0.000000e+00> : vector<8x512xf32>
    %394 = tpu.matmul %388, %282, %cst_154 {dimension_numbers = #tpu.dot_dimension_numbers<[1], [0], [0], [1], [0, 0, 1, 1], [], []>} : vector<8x128xf32>, vector<128x512xf32>, vector<8x512xf32> -> vector<8x512xf32>
    %395 = arith.addf %393, %394 : vector<8x512xf32>
    %396 = vector.extract_strided_slice %395 {offsets = [0, 0], sizes = [8, 128], strides = [1, 1]} : vector<8x512xf32> to vector<8x128xf32>
    %397 = arith.negf %396 : vector<8x128xf32>
    %398 = math.exp %397 : vector<8x128xf32>
    %cst_155 = arith.constant 1.000000e+00 : f32
    %399 = vector.broadcast %cst_155 : f32 to vector<8x128xf32>
    %400 = arith.addf %399, %398 : vector<8x128xf32>
    %401 = arith.divf %399, %400 : vector<8x128xf32>
    %402 = vector.extract_strided_slice %395 {offsets = [0, 128], sizes = [8, 128], strides = [1, 1]} : vector<8x512xf32> to vector<8x128xf32>
    %403 = arith.negf %402 : vector<8x128xf32>
    %404 = math.exp %403 : vector<8x128xf32>
    %cst_156 = arith.constant 1.000000e+00 : f32
    %405 = vector.broadcast %cst_156 : f32 to vector<8x128xf32>
    %406 = arith.addf %405, %404 : vector<8x128xf32>
    %407 = arith.divf %405, %406 : vector<8x128xf32>
    %408 = vector.extract_strided_slice %395 {offsets = [0, 256], sizes = [8, 128], strides = [1, 1]} : vector<8x512xf32> to vector<8x128xf32>
    %409 = math.tanh %408 : vector<8x128xf32>
    %410 = vector.extract_strided_slice %395 {offsets = [0, 384], sizes = [8, 128], strides = [1, 1]} : vector<8x512xf32> to vector<8x128xf32>
    %411 = arith.negf %410 : vector<8x128xf32>
    %412 = math.exp %411 : vector<8x128xf32>
    %cst_157 = arith.constant 1.000000e+00 : f32
    %413 = vector.broadcast %cst_157 : f32 to vector<8x128xf32>
    %414 = arith.addf %413, %412 : vector<8x128xf32>
    %415 = arith.divf %413, %414 : vector<8x128xf32>
    %416 = arith.mulf %407, %386 : vector<8x128xf32>
    %417 = arith.mulf %401, %409 : vector<8x128xf32>
    %418 = arith.addf %416, %417 : vector<8x128xf32>
    %419 = math.tanh %418 : vector<8x128xf32>
    %420 = arith.mulf %415, %419 : vector<8x128xf32>
    %c3_158 = arith.constant 3 : index
    %c0_159 = arith.constant 0 : index
    %c0_160 = arith.constant 0 : index
    %421 = vector.load %arg11[%c3_158, %c0_159, %c0_160] : memref<8x8x128xf32, #tpu.memory_space<vmem>>, vector<1x8x128xf32>
    %422 = vector.shape_cast %421 : vector<1x8x128xf32> to vector<8x128xf32>
    %423 = vector.shape_cast %420 : vector<8x128xf32> to vector<1x8x128xf32>
    tpu.vector_store %arg11[%c3_158, %c0_159, %c0_160], %423 {strides = array<i32>} : memref<8x8x128xf32, #tpu.memory_space<vmem>>, vector<1x8x128xf32>,
    %c4_161 = arith.constant 4 : index
    %c0_162 = arith.constant 0 : index
    %c0_163 = arith.constant 0 : index
    %424 = vector.load %arg14[%c4_161, %c0_162, %c0_163] : memref<8x8x512xf32, #tpu.memory_space<vmem>>, vector<1x8x512xf32>
    %425 = vector.shape_cast %424 : vector<1x8x512xf32> to vector<8x512xf32>
    %cst_164 = arith.constant dense<0.000000e+00> : vector<8x512xf32>
    %426 = tpu.matmul %420, %282, %cst_164 {dimension_numbers = #tpu.dot_dimension_numbers<[1], [0], [0], [1], [0, 0, 1, 1], [], []>} : vector<8x128xf32>, vector<128x512xf32>, vector<8x512xf32> -> vector<8x512xf32>
    %427 = arith.addf %425, %426 : vector<8x512xf32>
    %428 = vector.extract_strided_slice %427 {offsets = [0, 0], sizes = [8, 128], strides = [1, 1]} : vector<8x512xf32> to vector<8x128xf32>
    %429 = arith.negf %428 : vector<8x128xf32>
    %430 = math.exp %429 : vector<8x128xf32>
    %cst_165 = arith.constant 1.000000e+00 : f32
    %431 = vector.broadcast %cst_165 : f32 to vector<8x128xf32>
    %432 = arith.addf %431, %430 : vector<8x128xf32>
    %433 = arith.divf %431, %432 : vector<8x128xf32>
    %434 = vector.extract_strided_slice %427 {offsets = [0, 128], sizes = [8, 128], strides = [1, 1]} : vector<8x512xf32> to vector<8x128xf32>
    %435 = arith.negf %434 : vector<8x128xf32>
    %436 = math.exp %435 : vector<8x128xf32>
    %cst_166 = arith.constant 1.000000e+00 : f32
    %437 = vector.broadcast %cst_166 : f32 to vector<8x128xf32>
    %438 = arith.addf %437, %436 : vector<8x128xf32>
    %439 = arith.divf %437, %438 : vector<8x128xf32>
    %440 = vector.extract_strided_slice %427 {offsets = [0, 256], sizes = [8, 128], strides = [1, 1]} : vector<8x512xf32> to vector<8x128xf32>
    %441 = math.tanh %440 : vector<8x128xf32>
    %442 = vector.extract_strided_slice %427 {offsets = [0, 384], sizes = [8, 128], strides = [1, 1]} : vector<8x512xf32> to vector<8x128xf32>
    %443 = arith.negf %442 : vector<8x128xf32>
    %444 = math.exp %443 : vector<8x128xf32>
    %cst_167 = arith.constant 1.000000e+00 : f32
    %445 = vector.broadcast %cst_167 : f32 to vector<8x128xf32>
    %446 = arith.addf %445, %444 : vector<8x128xf32>
    %447 = arith.divf %445, %446 : vector<8x128xf32>
    %448 = arith.mulf %439, %418 : vector<8x128xf32>
    %449 = arith.mulf %433, %441 : vector<8x128xf32>
    %450 = arith.addf %448, %449 : vector<8x128xf32>
    %451 = math.tanh %450 : vector<8x128xf32>
    %452 = arith.mulf %447, %451 : vector<8x128xf32>
    %c4_168 = arith.constant 4 : index
    %c0_169 = arith.constant 0 : index
    %c0_170 = arith.constant 0 : index
    %453 = vector.load %arg11[%c4_168, %c0_169, %c0_170] : memref<8x8x128xf32, #tpu.memory_space<vmem>>, vector<1x8x128xf32>
    %454 = vector.shape_cast %453 : vector<1x8x128xf32> to vector<8x128xf32>
    %455 = vector.shape_cast %452 : vector<8x128xf32> to vector<1x8x128xf32>
    tpu.vector_store %arg11[%c4_168, %c0_169, %c0_170], %455 {strides = array<i32>} : memref<8x8x128xf32, #tpu.memory_space<vmem>>, vector<1x8x128xf32>,
    %c5_171 = arith.constant 5 : index
    %c0_172 = arith.constant 0 : index
    %c0_173 = arith.constant 0 : index
    %456 = vector.load %arg14[%c5_171, %c0_172, %c0_173] : memref<8x8x512xf32, #tpu.memory_space<vmem>>, vector<1x8x512xf32>
    %457 = vector.shape_cast %456 : vector<1x8x512xf32> to vector<8x512xf32>
    %cst_174 = arith.constant dense<0.000000e+00> : vector<8x512xf32>
    %458 = tpu.matmul %452, %282, %cst_174 {dimension_numbers = #tpu.dot_dimension_numbers<[1], [0], [0], [1], [0, 0, 1, 1], [], []>} : vector<8x128xf32>, vector<128x512xf32>, vector<8x512xf32> -> vector<8x512xf32>
    %459 = arith.addf %457, %458 : vector<8x512xf32>
    %460 = vector.extract_strided_slice %459 {offsets = [0, 0], sizes = [8, 128], strides = [1, 1]} : vector<8x512xf32> to vector<8x128xf32>
    %461 = arith.negf %460 : vector<8x128xf32>
    %462 = math.exp %461 : vector<8x128xf32>
    %cst_175 = arith.constant 1.000000e+00 : f32
    %463 = vector.broadcast %cst_175 : f32 to vector<8x128xf32>
    %464 = arith.addf %463, %462 : vector<8x128xf32>
    %465 = arith.divf %463, %464 : vector<8x128xf32>
    %466 = vector.extract_strided_slice %459 {offsets = [0, 128], sizes = [8, 128], strides = [1, 1]} : vector<8x512xf32> to vector<8x128xf32>
    %467 = arith.negf %466 : vector<8x128xf32>
    %468 = math.exp %467 : vector<8x128xf32>
    %cst_176 = arith.constant 1.000000e+00 : f32
    %469 = vector.broadcast %cst_176 : f32 to vector<8x128xf32>
    %470 = arith.addf %469, %468 : vector<8x128xf32>
    %471 = arith.divf %469, %470 : vector<8x128xf32>
    %472 = vector.extract_strided_slice %459 {offsets = [0, 256], sizes = [8, 128], strides = [1, 1]} : vector<8x512xf32> to vector<8x128xf32>
    %473 = math.tanh %472 : vector<8x128xf32>
    %474 = vector.extract_strided_slice %459 {offsets = [0, 384], sizes = [8, 128], strides = [1, 1]} : vector<8x512xf32> to vector<8x128xf32>
    %475 = arith.negf %474 : vector<8x128xf32>
    %476 = math.exp %475 : vector<8x128xf32>
    %cst_177 = arith.constant 1.000000e+00 : f32
    %477 = vector.broadcast %cst_177 : f32 to vector<8x128xf32>
    %478 = arith.addf %477, %476 : vector<8x128xf32>
    %479 = arith.divf %477, %478 : vector<8x128xf32>
    %480 = arith.mulf %471, %450 : vector<8x128xf32>
    %481 = arith.mulf %465, %473 : vector<8x128xf32>
    %482 = arith.addf %480, %481 : vector<8x128xf32>
    %483 = math.tanh %482 : vector<8x128xf32>
    %484 = arith.mulf %479, %483 : vector<8x128xf32>
    %c5_178 = arith.constant 5 : index
    %c0_179 = arith.constant 0 : index
    %c0_180 = arith.constant 0 : index
    %485 = vector.load %arg11[%c5_178, %c0_179, %c0_180] : memref<8x8x128xf32, #tpu.memory_space<vmem>>, vector<1x8x128xf32>
    %486 = vector.shape_cast %485 : vector<1x8x128xf32> to vector<8x128xf32>
    %487 = vector.shape_cast %484 : vector<8x128xf32> to vector<1x8x128xf32>
    tpu.vector_store %arg11[%c5_178, %c0_179, %c0_180], %487 {strides = array<i32>} : memref<8x8x128xf32, #tpu.memory_space<vmem>>, vector<1x8x128xf32>,
    %c6_181 = arith.constant 6 : index
    %c0_182 = arith.constant 0 : index
    %c0_183 = arith.constant 0 : index
    %488 = vector.load %arg14[%c6_181, %c0_182, %c0_183] : memref<8x8x512xf32, #tpu.memory_space<vmem>>, vector<1x8x512xf32>
    %489 = vector.shape_cast %488 : vector<1x8x512xf32> to vector<8x512xf32>
    %cst_184 = arith.constant dense<0.000000e+00> : vector<8x512xf32>
    %490 = tpu.matmul %484, %282, %cst_184 {dimension_numbers = #tpu.dot_dimension_numbers<[1], [0], [0], [1], [0, 0, 1, 1], [], []>} : vector<8x128xf32>, vector<128x512xf32>, vector<8x512xf32> -> vector<8x512xf32>
    %491 = arith.addf %489, %490 : vector<8x512xf32>
    %492 = vector.extract_strided_slice %491 {offsets = [0, 0], sizes = [8, 128], strides = [1, 1]} : vector<8x512xf32> to vector<8x128xf32>
    %493 = arith.negf %492 : vector<8x128xf32>
    %494 = math.exp %493 : vector<8x128xf32>
    %cst_185 = arith.constant 1.000000e+00 : f32
    %495 = vector.broadcast %cst_185 : f32 to vector<8x128xf32>
    %496 = arith.addf %495, %494 : vector<8x128xf32>
    %497 = arith.divf %495, %496 : vector<8x128xf32>
    %498 = vector.extract_strided_slice %491 {offsets = [0, 128], sizes = [8, 128], strides = [1, 1]} : vector<8x512xf32> to vector<8x128xf32>
    %499 = arith.negf %498 : vector<8x128xf32>
    %500 = math.exp %499 : vector<8x128xf32>
    %cst_186 = arith.constant 1.000000e+00 : f32
    %501 = vector.broadcast %cst_186 : f32 to vector<8x128xf32>
    %502 = arith.addf %501, %500 : vector<8x128xf32>
    %503 = arith.divf %501, %502 : vector<8x128xf32>
    %504 = vector.extract_strided_slice %491 {offsets = [0, 256], sizes = [8, 128], strides = [1, 1]} : vector<8x512xf32> to vector<8x128xf32>
    %505 = math.tanh %504 : vector<8x128xf32>
    %506 = vector.extract_strided_slice %491 {offsets = [0, 384], sizes = [8, 128], strides = [1, 1]} : vector<8x512xf32> to vector<8x128xf32>
    %507 = arith.negf %506 : vector<8x128xf32>
    %508 = math.exp %507 : vector<8x128xf32>
    %cst_187 = arith.constant 1.000000e+00 : f32
    %509 = vector.broadcast %cst_187 : f32 to vector<8x128xf32>
    %510 = arith.addf %509, %508 : vector<8x128xf32>
    %511 = arith.divf %509, %510 : vector<8x128xf32>
    %512 = arith.mulf %503, %482 : vector<8x128xf32>
    %513 = arith.mulf %497, %505 : vector<8x128xf32>
    %514 = arith.addf %512, %513 : vector<8x128xf32>
    %515 = math.tanh %514 : vector<8x128xf32>
    %516 = arith.mulf %511, %515 : vector<8x128xf32>
    %c6_188 = arith.constant 6 : index
    %c0_189 = arith.constant 0 : index
    %c0_190 = arith.constant 0 : index
    %517 = vector.load %arg11[%c6_188, %c0_189, %c0_190] : memref<8x8x128xf32, #tpu.memory_space<vmem>>, vector<1x8x128xf32>
    %518 = vector.shape_cast %517 : vector<1x8x128xf32> to vector<8x128xf32>
    %519 = vector.shape_cast %516 : vector<8x128xf32> to vector<1x8x128xf32>
    tpu.vector_store %arg11[%c6_188, %c0_189, %c0_190], %519 {strides = array<i32>} : memref<8x8x128xf32, #tpu.memory_space<vmem>>, vector<1x8x128xf32>,
    %c7_191 = arith.constant 7 : index
    %c0_192 = arith.constant 0 : index
    %c0_193 = arith.constant 0 : index
    %520 = vector.load %arg14[%c7_191, %c0_192, %c0_193] : memref<8x8x512xf32, #tpu.memory_space<vmem>>, vector<1x8x512xf32>
    %521 = vector.shape_cast %520 : vector<1x8x512xf32> to vector<8x512xf32>
    %cst_194 = arith.constant dense<0.000000e+00> : vector<8x512xf32>
    %522 = tpu.matmul %516, %282, %cst_194 {dimension_numbers = #tpu.dot_dimension_numbers<[1], [0], [0], [1], [0, 0, 1, 1], [], []>} : vector<8x128xf32>, vector<128x512xf32>, vector<8x512xf32> -> vector<8x512xf32>
    %523 = arith.addf %521, %522 : vector<8x512xf32>
    %524 = vector.extract_strided_slice %523 {offsets = [0, 0], sizes = [8, 128], strides = [1, 1]} : vector<8x512xf32> to vector<8x128xf32>
    %525 = arith.negf %524 : vector<8x128xf32>
    %526 = math.exp %525 : vector<8x128xf32>
    %cst_195 = arith.constant 1.000000e+00 : f32
    %527 = vector.broadcast %cst_195 : f32 to vector<8x128xf32>
    %528 = arith.addf %527, %526 : vector<8x128xf32>
    %529 = arith.divf %527, %528 : vector<8x128xf32>
    %530 = vector.extract_strided_slice %523 {offsets = [0, 128], sizes = [8, 128], strides = [1, 1]} : vector<8x512xf32> to vector<8x128xf32>
    %531 = arith.negf %530 : vector<8x128xf32>
    %532 = math.exp %531 : vector<8x128xf32>
    %cst_196 = arith.constant 1.000000e+00 : f32
    %533 = vector.broadcast %cst_196 : f32 to vector<8x128xf32>
    %534 = arith.addf %533, %532 : vector<8x128xf32>
    %535 = arith.divf %533, %534 : vector<8x128xf32>
    %536 = vector.extract_strided_slice %523 {offsets = [0, 256], sizes = [8, 128], strides = [1, 1]} : vector<8x512xf32> to vector<8x128xf32>
    %537 = math.tanh %536 : vector<8x128xf32>
    %538 = vector.extract_strided_slice %523 {offsets = [0, 384], sizes = [8, 128], strides = [1, 1]} : vector<8x512xf32> to vector<8x128xf32>
    %539 = arith.negf %538 : vector<8x128xf32>
    %540 = math.exp %539 : vector<8x128xf32>
    %cst_197 = arith.constant 1.000000e+00 : f32
    %541 = vector.broadcast %cst_197 : f32 to vector<8x128xf32>
    %542 = arith.addf %541, %540 : vector<8x128xf32>
    %543 = arith.divf %541, %542 : vector<8x128xf32>
    %544 = arith.mulf %535, %514 : vector<8x128xf32>
    %545 = arith.mulf %529, %537 : vector<8x128xf32>
    %546 = arith.addf %544, %545 : vector<8x128xf32>
    %547 = math.tanh %546 : vector<8x128xf32>
    %548 = arith.mulf %543, %547 : vector<8x128xf32>
    %c7_198 = arith.constant 7 : index
    %c0_199 = arith.constant 0 : index
    %c0_200 = arith.constant 0 : index
    %549 = vector.load %arg11[%c7_198, %c0_199, %c0_200] : memref<8x8x128xf32, #tpu.memory_space<vmem>>, vector<1x8x128xf32>
    %550 = vector.shape_cast %549 : vector<1x8x128xf32> to vector<8x128xf32>
    %551 = vector.shape_cast %548 : vector<8x128xf32> to vector<1x8x128xf32>
    tpu.vector_store %arg11[%c7_198, %c0_199, %c0_200], %551 {strides = array<i32>} : memref<8x8x128xf32, #tpu.memory_space<vmem>>, vector<1x8x128xf32>,
    %c1_201 = arith.constant 1 : index
    %c0_202 = arith.constant 0 : index
    %c0_203 = arith.constant 0 : index
    %552 = vector.load %arg12[%c1_201, %c0_202, %c0_203] : memref<2x8x128xf32, #tpu.memory_space<vmem>>, vector<1x8x128xf32>
    %553 = vector.shape_cast %552 : vector<1x8x128xf32> to vector<8x128xf32>
    %554 = vector.shape_cast %548 : vector<8x128xf32> to vector<1x8x128xf32>
    tpu.vector_store %arg12[%c1_201, %c0_202, %c0_203], %554 {strides = array<i32>} : memref<2x8x128xf32, #tpu.memory_space<vmem>>, vector<1x8x128xf32>,
    %c1_204 = arith.constant 1 : index
    %c0_205 = arith.constant 0 : index
    %c0_206 = arith.constant 0 : index
    %555 = vector.load %arg13[%c1_204, %c0_205, %c0_206] : memref<2x8x128xf32, #tpu.memory_space<vmem>>, vector<1x8x128xf32>
    %556 = vector.shape_cast %555 : vector<1x8x128xf32> to vector<8x128xf32>
    %557 = vector.shape_cast %546 : vector<8x128xf32> to vector<1x8x128xf32>
    tpu.vector_store %arg13[%c1_204, %c0_205, %c0_206], %557 {strides = array<i32>} : memref<2x8x128xf32, #tpu.memory_space<vmem>>, vector<1x8x128xf32>,
    %c0_207 = arith.constant 0 : index
    %c0_208 = arith.constant 0 : index
    %c0_209 = arith.constant 0 : index
    %558 = vector.load %arg11[%c0_207, %c0_208, %c0_209] : memref<8x8x128xf32, #tpu.memory_space<vmem>>, vector<8x8x128xf32>
    %559 = vector.shape_cast %558 : vector<8x8x128xf32> to vector<64x128xf32>
    %c0_210 = arith.constant 0 : index
    %c0_211 = arith.constant 0 : index
    %560 = vector.load %arg7[%c0_210, %c0_211] : memref<128x256xf32, #tpu.memory_space<vmem>>, vector<128x256xf32>
    %cst_212 = arith.constant dense<0.000000e+00> : vector<64x256xf32>
    %561 = tpu.matmul %559, %560, %cst_212 {dimension_numbers = #tpu.dot_dimension_numbers<[1], [0], [0], [1], [0, 0, 1, 1], [], []>} : vector<64x128xf32>, vector<128x256xf32>, vector<64x256xf32> -> vector<64x256xf32>
    %562 = vector.extract_strided_slice %561 {offsets = [0, 0], sizes = [64, 128], strides = [1, 1]} : vector<64x256xf32> to vector<64x128xf32>
    %563 = vector.shape_cast %562 : vector<64x128xf32> to vector<8x8x128xf32>
    %c0_213 = arith.constant 0 : index
    %c0_214 = arith.constant 0 : index
    %564 = vector.load %arg8[%c0_213, %c0_214] : memref<8x128xf32, #tpu.memory_space<vmem>>, vector<8x128xf32>
    %565 = vector.shape_cast %564 : vector<8x128xf32> to vector<1x8x128xf32>
    %566 = vector.broadcast %565 : vector<1x8x128xf32> to vector<8x8x128xf32>
    %567 = arith.addf %563, %566 : vector<8x8x128xf32>
    %568 = vector.extract_strided_slice %561 {offsets = [0, 128], sizes = [64, 128], strides = [1, 1]} : vector<64x256xf32> to vector<64x128xf32>
    %cst_215 = arith.constant dense<0xFF800000> : vector<8x8xf32>
    %569 = vector.multi_reduction <maximumf>, %567, %cst_215 [2] : vector<8x8x128xf32> to vector<8x8xf32>
    %570 = vector.shape_cast %569 : vector<8x8xf32> to vector<8x8x1xf32>
    %571 = vector.broadcast %570 : vector<8x8x1xf32> to vector<8x8x128xf32>
    %572 = arith.subf %567, %571 : vector<8x8x128xf32>
    %573 = math.exp %572 : vector<8x8x128xf32>
    %cst_216 = arith.constant dense<0.000000e+00> : vector<8x8xf32>
    %574 = vector.multi_reduction <add>, %573, %cst_216 [2] : vector<8x8x128xf32> to vector<8x8xf32>
    %575 = vector.shape_cast %574 : vector<8x8xf32> to vector<8x8x1xf32>
    %576 = tpu.reciprocal %575 {approx = true} : vector<8x8x1xf32> -> vector<8x8x1xf32>
    %577 = vector.broadcast %576 : vector<8x8x1xf32> to vector<8x8x128xf32>
    %578 = arith.mulf %573, %577 : vector<8x8x128xf32>
    %c0_217 = arith.constant 0 : index
    %c0_218 = arith.constant 0 : index
    %c0_219 = arith.constant 0 : index
    %579 = vector.load %arg9[%c0_217, %c0_218, %c0_219] : memref<8x128x128xf32, #tpu.memory_space<vmem>>, vector<8x128x128xf32>
    "tpu.trace_start"() <{level = 10 : i32, message = "tbl,blh->tbh"}> : () -> ()
    %cst_220 = arith.constant dense<0.000000e+00> : vector<8x128x8xf32>
    %580 = tpu.matmul %579, %578, %cst_220 {dimension_numbers = #tpu.dot_dimension_numbers<[1], [2], [2], [0], [0, 0, 0, 2, 1, 0], [0], [1]>} : vector<8x128x128xf32>, vector<8x8x128xf32>, vector<8x128x8xf32> -> vector<8x128x8xf32>
    %581 = tpu.transpose %580, [2, 0, 1] : vector<8x128x8xf32> -> vector<8x8x128xf32>
    "tpu.trace_stop"() : () -> ()
    %582 = vector.shape_cast %581 : vector<8x8x128xf32> to vector<64x128xf32>
    %c0_221 = arith.constant 0 : index
    %c0_222 = arith.constant 0 : index
    %583 = vector.load %arg10[%c0_221, %c0_222] : memref<128x128xf32, #tpu.memory_space<vmem>>, vector<128x128xf32>
    %cst_223 = arith.constant dense<0.000000e+00> : vector<64x128xf32>
    %584 = tpu.matmul %582, %583, %cst_223 {dimension_numbers = #tpu.dot_dimension_numbers<[1], [0], [0], [1], [0, 0, 1, 1], [], []>} : vector<64x128xf32>, vector<128x128xf32>, vector<64x128xf32> -> vector<64x128xf32>
    %585 = arith.addf %584, %568 : vector<64x128xf32>
    %586 = math.tanh %585 : vector<64x128xf32>
    %587 = vector.shape_cast %586 : vector<64x128xf32> to vector<8x8x128xf32>
    %c0_224 = arith.constant 0 : index
    %c0_225 = arith.constant 0 : index
    %c0_226 = arith.constant 0 : index
    %588 = vector.load %arg11[%c0_224, %c0_225, %c0_226] : memref<8x8x128xf32, #tpu.memory_space<vmem>>, vector<8x8x128xf32>
    tpu.vector_store %arg11[%c0_224, %c0_225, %c0_226], %587 {strides = array<i32>} : memref<8x8x128xf32, #tpu.memory_space<vmem>>, vector<8x8x128xf32>,
    return
  }
  func.func @transform_0(%arg0: i32) -> (i32, i32, i32) {
    %c0_i32 = arith.constant 0 : i32
    %c0_i32_0 = arith.constant 0 : i32
    %c0_i32_1 = arith.constant 0 : i32
    return %c0_i32, %arg0, %c0_i32_0 : i32, i32, i32
  }
  func.func @transform_1(%arg0: i32) -> (i32, i32, i32) {
    %c0_i32 = arith.constant 0 : i32
    %c0_i32_0 = arith.constant 0 : i32
    %c0_i32_1 = arith.constant 0 : i32
    return %c0_i32, %arg0, %c0_i32_0 : i32, i32, i32
  }
  func.func @transform_2(%arg0: i32) -> (i32, i32, i32) {
    %c0_i32 = arith.constant 0 : i32
    %c0_i32_0 = arith.constant 0 : i32
    %c0_i32_1 = arith.constant 0 : i32
    return %c0_i32, %arg0, %c0_i32_0 : i32, i32, i32
  }
  func.func @transform_3(%arg0: i32) -> (i32, i32, i32) {
    %c0_i32 = arith.constant 0 : i32
    %c0_i32_0 = arith.constant 0 : i32
    %c0_i32_1 = arith.constant 0 : i32
    %c0_i32_2 = arith.constant 0 : i32
    return %c0_i32, %c0_i32_0, %c0_i32_1 : i32, i32, i32
  }
  func.func @transform_4(%arg0: i32) -> (i32, i32, i32) {
    %c0_i32 = arith.constant 0 : i32
    %c0_i32_0 = arith.constant 0 : i32
    %c0_i32_1 = arith.constant 0 : i32
    %c0_i32_2 = arith.constant 0 : i32
    return %c0_i32, %c0_i32_0, %c0_i32_1 : i32, i32, i32
  }
  func.func @transform_5(%arg0: i32) -> (i32, i32, i32) {
    %c0_i32 = arith.constant 0 : i32
    %c0_i32_0 = arith.constant 0 : i32
    %c0_i32_1 = arith.constant 0 : i32
    %c0_i32_2 = arith.constant 0 : i32
    return %c0_i32, %c0_i32_0, %c0_i32_1 : i32, i32, i32
  }
  func.func @transform_6(%arg0: i32) -> (i32, i32) {
    %c0_i32 = arith.constant 0 : i32
    %c0_i32_0 = arith.constant 0 : i32
    %c0_i32_1 = arith.constant 0 : i32
    return %c0_i32, %c0_i32_0 : i32, i32
  }
  func.func @transform_7(%arg0: i32) -> (i32, i32) {
    %c0_i32 = arith.constant 0 : i32
    %c0_i32_0 = arith.constant 0 : i32
    return %arg0, %c0_i32 : i32, i32
  }
  func.func @transform_8(%arg0: i32) -> (i32, i32, i32) {
    %c0_i32 = arith.constant 0 : i32
    %c0_i32_0 = arith.constant 0 : i32
    %c0_i32_1 = arith.constant 0 : i32
    return %arg0, %c0_i32, %c0_i32_0 : i32, i32, i32
  }
  func.func @transform_9(%arg0: i32) -> (i32, i32) {
    %c0_i32 = arith.constant 0 : i32
    %c0_i32_0 = arith.constant 0 : i32
    %c0_i32_1 = arith.constant 0 : i32
    return %c0_i32, %c0_i32_0 : i32, i32
  }
  func.func @transform_10(%arg0: i32) -> (i32, i32, i32) {
    %c0_i32 = arith.constant 0 : i32
    %c0_i32_0 = arith.constant 0 : i32
    %c0_i32_1 = arith.constant 0 : i32
    return %c0_i32, %arg0, %c0_i32_0 : i32, i32, i32
  }
  func.func @transform_11(%arg0: i32) -> (i32, i32, i32) {
    %c0_i32 = arith.constant 0 : i32
    %c0_i32_0 = arith.constant 0 : i32
    %c0_i32_1 = arith.constant 0 : i32
    return %c0_i32, %arg0, %c0_i32_0 : i32, i32, i32
  }
  func.func @transform_12(%arg0: i32) -> (i32, i32, i32) {
    %c0_i32 = arith.constant 0 : i32
    %c0_i32_0 = arith.constant 0 : i32
    %c0_i32_1 = arith.constant 0 : i32
    return %c0_i32, %arg0, %c0_i32_0 : i32, i32, i32
  }
}

</mosaic_0001>

<bundles_post_ra>
// kernel: tpu_custom_call.1
= control target key start
LH: loop header
LB: loop body
LE: loop exit
PB: predicated region body
PF: predicated region fallthrough
CT: control target
= control target key end

     0   :  { %18 = vsyncpa [#allocation4], 0  ;;  %s22814_s0 = inlined_call_operand.hbm [shape: f32[8,8,128], index: 0, kind: input, shape index: {}]   ;;  %s22815_s1 = inlined_call_operand.hbm [shape: f32[2,8,128], index: 1, kind: input, shape index: {}]   ;;  %s22816_s2 = inlined_call_operand.hbm [shape: f32[2,8,128], index: 2, kind: input, shape index: {}]   ;;  %s22817_s3 = inlined_call_operand.hbm [shape: f32[2,128,512], index: 3, kind: input, shape index: {}]   ;;  %s22818_s4 = inlined_call_operand.hbm [shape: f32[2,128,512], index: 4, kind: input, shape index: {}]   ;;  %s22819_s5 = inlined_call_operand.hbm [shape: f32[2,1,512], index: 5, kind: input, shape index: {}]   ;;  %s22820_s6 = inlined_call_operand.hbm [shape: f32[128,256], index: 6, kind: input, shape index: {}]   ;;  %s22821_s7 = inlined_call_operand.hbm [shape: f32[8,128], index: 7, kind: input, shape index: {}]   ;;  %s22822_s8 = inlined_call_operand.hbm [shape: f32[8,128,128], index: 8, kind: input, shape index: {}]   ;;  %s22823_s9 = inlined_call_operand.hbm [shape: f32[128,128], index: 9, kind: input, shape index: {}]   ;;  %s22824_s10 = inlined_call_operand.hbm [shape: f32[8,8,128], index: 10, kind: output, shape index: {0}]   ;;  %s22825_s11 = inlined_call_operand.hbm [shape: f32[2,8,128], index: 11, kind: output, shape index: {1}]   ;;  %s22826_s12 = inlined_call_operand.hbm [shape: f32[2,8,128], index: 12, kind: output, shape index: {2}]  }
   0x1   :  { %19 = vsyncpa [#allocation7], 0 }
   0x2   :  { %20 = vsyncpa [#allocation10], 0 }
   0x3   :  { %21 = vsyncpa [#allocation13], 0 }
   0x4   :  { %22 = vsyncpa [#allocation16], 0 }
   0x5   :  { %23 = vsyncpa [#allocation19], 0 }
   0x6   :  { %24 = vsyncpa [#allocation5], 0 }
   0x7   :  { %25 = vsyncpa [#allocation22], 0  ;;  %s18397_s21 = smov [#allocation6]   ;;  %s18398_s23 = smov [#allocation9]  }
   0x8   :  { %s43_s22 = sshll.u32 %s18397_s21, 4  ;;  %s67_s24 = sshll.u32 %s18398_s23, 4  ;;  %s44_s22 = int_to_ptr.vmem [resolvable:$true] %s43_s22  ;;  %s18486_s24 = int_to_ptr.vmem [resolvable:$true] %s67_s24 }
   0x9   :  { %s18095_s27 = scalar_lea.hbm %s22815_s1, 256 }
   0xa   :  { %p18096_p0 = scmp.ne.s32.totalorder %s22815_s1, %s18095_s27  ;;  %p18099_p1 = scmp.lt.u32.totalorder %s18095_s27, %s22815_s1 }
   0xc   :  { %p18101_p2 = pnand %p18099_p1, %p18096_p0 }
   0xe   :  { %18104 = shalt.err (!%p18101_p2)
}
   0xf   :  { %s18105_s14 = scalar_lea.vmem %s44_s22, 256  ;;  %p18110_p4 = scmp.lt.s32.totalorder %s44_s22, %s44_s22 }
  0x10   :  { %p18106_p3 = scmp.ne.s32.totalorder %s44_s22, %s18105_s14  ;;  %p18111_p5 = scmp.lt.s32.totalorder %s18105_s14, %s18105_s14 }
  0x12   :  { %p18112_p6 = por %p18111_p5, %p18110_p4 }
  0x14   :  { %p18113_p7 = pnand %p18112_p6, %p18106_p3 }
  0x16   :  { %18116 = shalt.err (!%p18113_p7)
}
  0x17   :  { %s18399_s15 = smov 128   ;;  %s18400_s16 = smov 8  }
  0x18   :  { %49 = dma.hbm_to_vmem [thread:$0]  %s22815_s1, 256, %s44_s22, [#allocation7], %s18399_s15, %s18399_s15, %s18400_s16  }
  0x19   :  { %s18117_s21 = scalar_lea.hbm %s22817_s3, 16384 }
  0x1a   :  { %p18118_p8 = scmp.ne.s32.totalorder %s22817_s3, %s18117_s21  ;;  %p18121_p9 = scmp.lt.u32.totalorder %s18117_s21, %s22817_s3 }
  0x1c   :  { %p18123_p10 = pnand %p18121_p9, %p18118_p8 }
  0x1e   :  { %18126 = shalt.err (!%p18123_p10)
}
  0x1f   :  { %s18127_s28 = scalar_lea.vmem %s18486_s24, 16384  ;;  %p18132_p12 = scmp.lt.s32.totalorder %s18486_s24, %s18486_s24 }
  0x20   :  { %p18128_p11 = scmp.ne.s32.totalorder %s18486_s24, %s18127_s28  ;;  %p18133_p13 = scmp.lt.s32.totalorder %s18127_s28, %s18127_s28 }
  0x22   :  { %p18134_p0 = por %p18133_p13, %p18132_p12 }
  0x24   :  { %p18135_p1 = pnand %p18134_p0, %p18128_p11 }
  0x26   :  { %18138 = shalt.err (!%p18135_p1)
}
  0x27   :  { %s18401_s1 = smov 512   ;;  %s18402_s22 = smov 32  }
  0x28   :  { %73 = dma.hbm_to_vmem [thread:$0]  %s22817_s3, 16384, %s18486_s24, [#allocation10], %s18401_s1, %s18401_s1, %s18402_s22  }
  0x29   :  { %s18403_s13 = smov [#allocation12]   ;;  %s18139_s19 = scalar_lea.hbm %s22819_s5, 128 }
  0x2a   :  { %s91_s14 = sshll.u32 %s18403_s13, 4  ;;  %p18140_p2 = scmp.ne.s32.totalorder %s22819_s5, %s18139_s19  ;;  %s92_s14 = int_to_ptr.vmem [resolvable:$true] %s91_s14 }
  0x2b   :  { %p18143_p3 = scmp.lt.u32.totalorder %s18139_s19, %s22819_s5 }
  0x2d   :  { %p18145_p4 = pnand %p18143_p3, %p18140_p2 }
  0x2f   :  { %18148 = shalt.err (!%p18145_p4)
}
  0x30   :  { %s18149_s26 = scalar_lea.vmem %s92_s14, 128  ;;  %p18154_p6 = scmp.lt.s32.totalorder %s92_s14, %s92_s14 }
  0x31   :  { %p18150_p5 = scmp.ne.s32.totalorder %s92_s14, %s18149_s26  ;;  %p18155_p7 = scmp.lt.s32.totalorder %s18149_s26, %s18149_s26 }
  0x33   :  { %p18156_p8 = por %p18155_p7, %p18154_p6 }
  0x35   :  { %p18157_p9 = pnand %p18156_p8, %p18150_p5 }
  0x37   :  { %18160 = shalt.err (!%p18157_p9)
}
  0x38   :  { %s18404_s3 = smov 64   ;;  %s18405_s24 = smov 4  }
  0x39   :  { %97 = dma.hbm_to_vmem [thread:$0]  %s22819_s5, 128, %s92_s14, [#allocation13], %s18404_s3, %s18404_s3, %s18405_s24  }
  0x3a   :  { %s18406_s29 = smov [#allocation15]   ;;  %s18407_s13 = smov [#allocation3]  }
  0x3b   :  { %s116_s30 = sshll.u32 %s18406_s29, 4  ;;  %s31_s17 = sshll.u32 %s18407_s13, 4  ;;  %s117_s30 = int_to_ptr.vmem [resolvable:$true] %s116_s30  ;;  %s32_s17 = int_to_ptr.vmem [resolvable:$true] %s31_s17 }
  0x3c   :  { %s18161_s20 = scalar_lea.hbm %s22821_s7, 128 }
  0x3d   :  { %p18162_p10 = scmp.ne.s32.totalorder %s22821_s7, %s18161_s20  ;;  %p18165_p11 = scmp.lt.u32.totalorder %s18161_s20, %s22821_s7 }
  0x3f   :  { %p18167_p12 = pnand %p18165_p11, %p18162_p10 }
  0x41   :  { %18170 = shalt.err (!%p18167_p12)
}
  0x42   :  { %s18171_s5 = scalar_lea.vmem %s117_s30, 128  ;;  %p18176_p0 = scmp.lt.s32.totalorder %s117_s30, %s117_s30 }
  0x43   :  { %p18172_p13 = scmp.ne.s32.totalorder %s117_s30, %s18171_s5  ;;  %p18177_p1 = scmp.lt.s32.totalorder %s18171_s5, %s18171_s5 }
  0x45   :  { %p18178_p2 = por %p18177_p1, %p18176_p0 }
  0x47   :  { %p18179_p3 = pnand %p18178_p2, %p18172_p13 }
  0x49   :  { %18182 = shalt.err (!%p18179_p3)
}
  0x4a   :  { %119 = dma.hbm_to_vmem [thread:$0]  %s22821_s7, 128, %s117_s30, [#allocation16]  }
  0x4b   :  { %s18183_s28 = scalar_lea.hbm %s22814_s0, 1024 }
  0x4c   :  { %p18184_p4 = scmp.ne.s32.totalorder %s22814_s0, %s18183_s28  ;;  %p18187_p5 = scmp.lt.u32.totalorder %s18183_s28, %s22814_s0 }
  0x4e   :  { %p18189_p6 = pnand %p18187_p5, %p18184_p4 }
  0x50   :  { %18192 = shalt.err (!%p18189_p6)
}
  0x51   :  { %s18193_s20 = scalar_lea.vmem %s32_s17, 1024  ;;  %p18198_p8 = scmp.lt.s32.totalorder %s32_s17, %s32_s17 }
  0x52   :  { %p18194_p7 = scmp.ne.s32.totalorder %s32_s17, %s18193_s20  ;;  %p18199_p9 = scmp.lt.s32.totalorder %s18193_s20, %s18193_s20 }
  0x54   :  { %p18200_p10 = por %p18199_p9, %p18198_p8 }
  0x56   :  { %p18201_p11 = pnand %p18200_p10, %p18194_p7 }
  0x58   :  { %18204 = shalt.err (!%p18201_p11)
}
  0x59   :  { %37 = dma.hbm_to_vmem [thread:$0]  %s22814_s0, 1024, %s32_s17, [#allocation4], %s18399_s15, %s18399_s15, %s18400_s16  }
  0x5a   :  { %s18408_s21 = smov [#allocation8]   ;;  %s18409_s25 = smov [#allocation11]  }
  0x5b   :  { %s55_s23 = sshll.u32 %s18408_s21, 4  ;;  %s79_s26 = sshll.u32 %s18409_s25, 4  ;;  %s56_s23 = int_to_ptr.vmem [resolvable:$true] %s55_s23  ;;  %s80_s26 = int_to_ptr.vmem [resolvable:$true] %s79_s26 }
  0x5c   :  { %s18205_s3 = scalar_lea.hbm %s22816_s2, 256 }
  0x5d   :  { %p18206_p12 = scmp.ne.s32.totalorder %s22816_s2, %s18205_s3  ;;  %p18209_p13 = scmp.lt.u32.totalorder %s18205_s3, %s22816_s2 }
  0x5f   :  { %p18211_p0 = pnand %p18209_p13, %p18206_p12 }
  0x61   :  { %18214 = shalt.err (!%p18211_p0)
}
  0x62   :  { %s18215_s0 = scalar_lea.vmem %s56_s23, 256  ;;  %p18220_p2 = scmp.lt.s32.totalorder %s56_s23, %s56_s23 }
  0x63   :  { %p18216_p1 = scmp.ne.s32.totalorder %s56_s23, %s18215_s0  ;;  %p18221_p3 = scmp.lt.s32.totalorder %s18215_s0, %s18215_s0 }
  0x65   :  { %p18222_p4 = por %p18221_p3, %p18220_p2 }
  0x67   :  { %p18223_p5 = pnand %p18222_p4, %p18216_p1 }
  0x69   :  { %18226 = shalt.err (!%p18223_p5)
}
  0x6a   :  { %61 = dma.hbm_to_vmem [thread:$0]  %s22816_s2, 256, %s56_s23, [#allocation7], %s18399_s15, %s18399_s15, %s18400_s16  }
  0x6b   :  { %s18227_s20 = scalar_lea.hbm %s22818_s4, 16384 }
  0x6c   :  { %p18228_p6 = scmp.ne.s32.totalorder %s22818_s4, %s18227_s20  ;;  %p18231_p7 = scmp.lt.u32.totalorder %s18227_s20, %s22818_s4 }
  0x6e   :  { %p18233_p8 = pnand %p18231_p7, %p18228_p6 }
  0x70   :  { %18236 = shalt.err (!%p18233_p8)
}
  0x71   :  { %s18237_s5 = scalar_lea.vmem %s80_s26, 16384  ;;  %p18242_p10 = scmp.lt.s32.totalorder %s80_s26, %s80_s26 }
  0x72   :  { %p18238_p9 = scmp.ne.s32.totalorder %s80_s26, %s18237_s5  ;;  %p18243_p11 = scmp.lt.s32.totalorder %s18237_s5, %s18237_s5 }
  0x74   :  { %p18244_p12 = por %p18243_p11, %p18242_p10 }
  0x76   :  { %p18245_p13 = pnand %p18244_p12, %p18238_p9 }
  0x78   :  { %18248 = shalt.err (!%p18245_p13)
}
  0x79   :  { %85 = dma.hbm_to_vmem [thread:$0]  %s22818_s4, 16384, %s80_s26, [#allocation10], %s18401_s1, %s18401_s1, %s18402_s22  }
  0x7a   :  { %s18410_s14 = smov [#allocation14]   ;;  %s18249_s28 = scalar_lea.hbm %s22820_s6, 4096 }
  0x7b   :  { %s103_s3 = sshll.u32 %s18410_s14, 4  ;;  %p18250_p0 = scmp.ne.s32.totalorder %s22820_s6, %s18249_s28  ;;  %s104_s3 = int_to_ptr.vmem [resolvable:$true] %s103_s3 }
  0x7c   :  { %p18253_p1 = scmp.lt.u32.totalorder %s18249_s28, %s22820_s6 }
  0x7e   :  { %p18255_p2 = pnand %p18253_p1, %p18250_p0 }
  0x80   :  { %18258 = shalt.err (!%p18255_p2)
}
  0x81   :  { %s18259_s18 = scalar_lea.vmem %s104_s3, 4096  ;;  %p18264_p4 = scmp.lt.s32.totalorder %s104_s3, %s104_s3 }
  0x82   :  { %p18260_p3 = scmp.ne.s32.totalorder %s104_s3, %s18259_s18  ;;  %p18265_p5 = scmp.lt.s32.totalorder %s18259_s18, %s18259_s18 }
  0x84   :  { %p18266_p6 = por %p18265_p5, %p18264_p4 }
  0x86   :  { %p18267_p7 = pnand %p18266_p6, %p18260_p3 }
  0x88   :  { %18270 = shalt.err (!%p18267_p7)
}
  0x89   :  { %s18411_s4 = smov 256   ;;  %s18412_s1 = smov 16  }
  0x8a   :  { %109 = dma.hbm_to_vmem [thread:$0]  %s22820_s6, 4096, %s104_s3, [#allocation13], %s18411_s4, %s18411_s4, %s18412_s1  }
  0x8b   :  { %s18413_s19 = smov [#allocation17]   ;;  %s18414_s7 = smov [#allocation18]  }
  0x8c   :  { %s125_s20 = sshll.u32 %s18413_s19, 4  ;;  %s137_s30 = sshll.u32 %s18414_s7, 4  ;;  %s126_s20 = int_to_ptr.vmem [resolvable:$true] %s125_s20  ;;  %s18604_s30 = int_to_ptr.vmem [resolvable:$true] %s137_s30 }
  0x8d   :  { %s18271_s5 = scalar_lea.hbm %s22822_s8, 16384 }
  0x8e   :  { %p18272_p8 = scmp.ne.s32.totalorder %s22822_s8, %s18271_s5  ;;  %p18275_p9 = scmp.lt.u32.totalorder %s18271_s5, %s22822_s8 }
  0x90   :  { %p18277_p10 = pnand %p18275_p9, %p18272_p8 }
  0x92   :  { %18280 = shalt.err (!%p18277_p10)
}
  0x93   :  { %s18281_s6 = scalar_lea.vmem %s126_s20, 16384  ;;  %p18286_p12 = scmp.lt.s32.totalorder %s126_s20, %s126_s20 }
  0x94   :  { %p18282_p11 = scmp.ne.s32.totalorder %s126_s20, %s18281_s6  ;;  %p18287_p13 = scmp.lt.s32.totalorder %s18281_s6, %s18281_s6 }
  0x96   :  { %p18288_p0 = por %p18287_p13, %p18286_p12 }
  0x98   :  { %p18289_p1 = pnand %p18288_p0, %p18282_p11 }
  0x9a   :  { %18292 = shalt.err (!%p18289_p1)
}
  0x9b   :  { %131 = dma.hbm_to_vmem [thread:$0]  %s22822_s8, 16384, %s126_s20, [#allocation16], %s18399_s15, %s18399_s15, %s18400_s16  }
  0x9c   :  { %s18293_s0 = scalar_lea.hbm %s22823_s9, 2048 }
  0x9d   :  { %p18294_p2 = scmp.ne.s32.totalorder %s22823_s9, %s18293_s0  ;;  %p18297_p3 = scmp.lt.u32.totalorder %s18293_s0, %s22823_s9 }
  0x9f   :  { %p18299_p4 = pnand %p18297_p3, %p18294_p2 }
  0xa1   :  { %18302 = shalt.err (!%p18299_p4)
}
  0xa2   :  { %s18303_s1 = scalar_lea.vmem %s18604_s30, 2048  ;;  %p18308_p6 = scmp.lt.s32.totalorder %s18604_s30, %s18604_s30 }
  0xa3   :  { %p18304_p5 = scmp.ne.s32.totalorder %s18604_s30, %s18303_s1  ;;  %p18309_p7 = scmp.lt.s32.totalorder %s18303_s1, %s18303_s1 }
  0xa5   :  { %p18310_p8 = por %p18309_p7, %p18308_p6 }
  0xa7   :  { %p18311_p9 = pnand %p18310_p8, %p18304_p5 }
  0xa9   :  { %18314 = shalt.err (!%p18311_p9)
}
  0xaa   :  { %143 = dma.hbm_to_vmem [thread:$0]  %s22823_s9, 2048, %s18604_s30, [#allocation19], %s18399_s15, %s18399_s15, %s18400_s16  }
  0xab   :  { %18381 = dma.done.wait [#allocation4], 1024  }
  0xac   :  { %18382 = vsyncadd [#allocation4], 4294966272 }
  0xad   :  { %18383 = dma.done.wait [#allocation7], 512  }
  0xae   :  { %18384 = vsyncadd [#allocation7], 4294966784 }
  0xaf   :  { %18385 = dma.done.wait [#allocation10], 32768  }
  0xb0   :  { %18386 = vsyncadd [#allocation10], 4294934528 }
  0xb1   :  { %18387 = dma.done.wait [#allocation13], 4224  }
  0xb2   :  { %18388 = vsyncadd [#allocation13], 4294963072 }
  0xb3   :  { %18389 = dma.done.wait [#allocation16], 16512  }
  0xb4   :  { %18390 = vsyncadd [#allocation16], 4294950784 }
  0xb5   :  { %18391 = dma.done.wait [#allocation19], 2048  }
  0xb6   :  { %18392 = vsyncadd [#allocation19], 4294965248  ;;  %v18415_v0 = vmov 0.0   ;;  %v175_v1 = vld [vmem:[#allocation9 + $0x8] sm:$0xff]  ;;  %v177_v3 = vld [vmem:[#allocation9 + $0x18] sm:$0xff]  ;;  %s18418_s9 = smov [#allocation21]  }
  0xb7   :  { %396 = vmatprep.mubr.f32.mxu0 %v18415_v0  ;;  %509 = vmatprep.mubr.f32.mxu1 %v18415_v0  ;;  %v179_v2 = vld [vmem:[#allocation9 + $0x28] sm:$0xff]  ;;  %v181_v5 = vld [vmem:[#allocation9 + $0x38] sm:$0xff]  ;;  %v174_v6 = vld [vmem:[#allocation9] sm:$0xff]  ;;  %s14863_s26 = sshll.u32 %s18418_s9, 4  ;;  %s14864_s26 = int_to_ptr.vmem [resolvable:$true] %s14863_s26 }
  0xb8   :  { %v15719_v4 = vpack.c.bf16 %v179_v2, %v175_v1  ;;  %v178_v7 = vld [vmem:[#allocation9 + $0x20] sm:$0xff]  ;;  %v15751_v8 = vpack.c.bf16 %v181_v5, %v177_v3  ;;  %v176_v10 = vld [vmem:[#allocation9 + $0x10] sm:$0xff]  ;;  %v183_v12 = vld [vmem:[#allocation9 + $0x48] sm:$0xff]  ;;  %s18315_s19 = scalar_lea.vmem %s14864_s26, 256  ;;  %p18320_p11 = scmp.lt.s32.totalorder %s14864_s26, %s14864_s26 }
  0xb9   :  { %v15721_v9 = vpack.c.bf16 %v178_v7, %v174_v6  ;;  %v180_v11 = vld [vmem:[#allocation9 + $0x30] sm:$0xff]  ;;  %v187_v14 = vld [vmem:[#allocation9 + $0x68] sm:$0xff]  ;;  %v185_v15 = vld [vmem:[#allocation9 + $0x58] sm:$0xff]  ;;  %p18316_p10 = scmp.ne.s32.totalorder %s14864_s26, %s18315_s19  ;;  %p18321_p12 = scmp.lt.s32.totalorder %s18315_s19, %s18315_s19 }
  0xba   :  { %15720 = vmatprep.subr.bf16.mxu0 %v15719_v4  ;;  %v15753_v13 = vpack.c.bf16 %v180_v11, %v176_v10  ;;  %v189_v16 = vld [vmem:[#allocation9 + $0x78] sm:$0xff]  ;;  %15752 = vmatprep.subr.bf16.mxu1 %v15751_v8  ;;  %v15723_v17 = vpack.c.bf16 %v187_v14, %v183_v12  ;;  %v182_v19 = vld [vmem:[#allocation9 + $0x40] sm:$0xff]  ;;  %v184_v21 = vld [vmem:[#allocation9 + $0x50] sm:$0xff] }
  0xbb   :  { %15722 = vmatpush1.bf16.msra.mxu0 %v15721_v9  ;;  %v15755_v18 = vpack.c.bf16 %v189_v16, %v185_v15  ;;  %v186_v20 = vld [vmem:[#allocation9 + $0x60] sm:$0xff]  ;;  %v188_v23 = vld [vmem:[#allocation9 + $0x70] sm:$0xff]  ;;  %v191_v24 = vld [vmem:[#allocation9 + $0x88] sm:$0xff]  ;;  %p18322_p13 = por %p18321_p12, %p18320_p11 }
  0xbc   :  { %15754 = vmatpush1.bf16.msra.mxu1 %v15753_v13  ;;  %v15725_v22 = vpack.c.bf16 %v186_v20, %v182_v19  ;;  %v195_v25 = vld [vmem:[#allocation9 + $0xa8] sm:$0xff]  ;;  %15724 = vmatprep.subr.bf16.mxu0 %v15723_v17  ;;  %v15757_v26 = vpack.c.bf16 %v188_v23, %v184_v21  ;;  %v193_v28 = vld [vmem:[#allocation9 + $0x98] sm:$0xff]  ;;  %v190_v30 = vld [vmem:[#allocation9 + $0x80] sm:$0xff] }
  0xbd   :  { %15756 = vmatprep.subr.bf16.mxu1 %v15755_v18  ;;  %v15727_v27 = vpack.c.bf16 %v195_v25, %v191_v24  ;;  %v197_v29 = vld [vmem:[#allocation9 + $0xb8] sm:$0xff]  ;;  %v194_v32 = vld [vmem:[#allocation9 + $0xa0] sm:$0xff]  ;;  %v192_v33 = vld [vmem:[#allocation9 + $0x90] sm:$0xff]  ;;  %p18323_p0 = pnand %p18322_p13, %p18316_p10 }
  0xbe   :  { %v15759_v31 = vpack.c.bf16 %v197_v29, %v193_v28  ;;  %v196_v34 = vld [vmem:[#allocation9 + $0xb0] sm:$0xff]  ;;  %v15729_v35 = vpack.c.bf16 %v194_v32, %v190_v30  ;;  %v199_v36 = vld [vmem:[#allocation9 + $0xc8] sm:$0xff]  ;;  %v201_v38 = vld [vmem:[#allocation9 + $0xd8] sm:$0xff] }
  0xbf   :  { %15726 = vmatpush1.bf16.msra.mxu0 %v15725_v22  ;;  %v203_v37 = vld [vmem:[#allocation9 + $0xe8] sm:$0xff]  ;;  %v15761_v39 = vpack.c.bf16 %v196_v34, %v192_v33  ;;  %v205_v41 = vld [vmem:[#allocation9 + $0xf8] sm:$0xff]  ;;  %v198_v42 = vld [vmem:[#allocation9 + $0xc0] sm:$0xff] }
  0xc0   :  { %15758 = vmatpush1.bf16.msra.mxu1 %v15757_v26  ;;  %15728 = vmatprep.subr.bf16.mxu0 %v15727_v27  ;;  %v15731_v40 = vpack.c.bf16 %v203_v37, %v199_v36  ;;  %v202_v43 = vld [vmem:[#allocation9 + $0xe0] sm:$0xff]  ;;  %v15763_v44 = vpack.c.bf16 %v205_v41, %v201_v38  ;;  %v200_v45 = vld [vmem:[#allocation9 + $0xd0] sm:$0xff]  ;;  %v207_v47 = vld [vmem:[#allocation9 + $0x108] sm:$0xff] }
  0xc1   :  { %15760 = vmatprep.subr.bf16.mxu1 %v15759_v31  ;;  %v204_v46 = vld [vmem:[#allocation9 + $0xf0] sm:$0xff]  ;;  %v211_v48 = vld [vmem:[#allocation9 + $0x128] sm:$0xff]  ;;  %v209_v49 = vld [vmem:[#allocation9 + $0x118] sm:$0xff]  ;;  %v15733_v51 = vpack.c.bf16 %v202_v43, %v198_v42 }
  0xc2   :  { %v213_v50 = vld [vmem:[#allocation9 + $0x138] sm:$0xff]  ;;  %v15765_v52 = vpack.c.bf16 %v204_v46, %v200_v45  ;;  %v15735_v53 = vpack.c.bf16 %v211_v48, %v207_v47  ;;  %v206_v54 = vld [vmem:[#allocation9 + $0x100] sm:$0xff]  ;;  %v208_v56 = vld [vmem:[#allocation9 + $0x110] sm:$0xff] }
  0xc3   :  { %15730 = vmatpush1.bf16.msra.mxu0 %v15729_v35  ;;  %v210_v55 = vld [vmem:[#allocation9 + $0x120] sm:$0xff]  ;;  %v15767_v57 = vpack.c.bf16 %v213_v50, %v209_v49  ;;  %v212_v58 = vld [vmem:[#allocation9 + $0x130] sm:$0xff]  ;;  %v215_v59 = vld [vmem:[#allocation9 + $0x148] sm:$0xff] }
  0xc4   :  { %15762 = vmatpush1.bf16.msra.mxu1 %v15761_v39  ;;  %15732 = vmatprep.subr.bf16.mxu0 %v15731_v40  ;;  %v219_v60 = vld [vmem:[#allocation9 + $0x168] sm:$0xff]  ;;  %v217_v61 = vld [vmem:[#allocation9 + $0x158] sm:$0xff]  ;;  %v15737_v63 = vpack.c.bf16 %v210_v55, %v206_v54  ;;  %v15769_v1 = vpack.c.bf16 %v212_v58, %v208_v56  ;;  %v214_v3 = vld [vmem:[#allocation9 + $0x140] sm:$0xff] }
  0xc5   :  { %15764 = vmatprep.subr.bf16.mxu1 %v15763_v44  ;;  %v221_v62 = vld [vmem:[#allocation9 + $0x178] sm:$0xff]  ;;  %v15739_v2 = vpack.c.bf16 %v219_v60, %v215_v59  ;;  %v218_v4 = vld [vmem:[#allocation9 + $0x160] sm:$0xff]  ;;  %v216_v5 = vld [vmem:[#allocation9 + $0x150] sm:$0xff] }
  0xc6   :  { %v15771_v6 = vpack.c.bf16 %v221_v62, %v217_v61  ;;  %v220_v7 = vld [vmem:[#allocation9 + $0x170] sm:$0xff]  ;;  %v223_v8 = vld [vmem:[#allocation9 + $0x188] sm:$0xff]  ;;  %v225_v10 = vld [vmem:[#allocation9 + $0x198] sm:$0xff]  ;;  %v15741_v12 = vpack.c.bf16 %v218_v4, %v214_v3 }
  0xc7   :  { %15734 = vmatpush1.bf16.msra.mxu0 %v15733_v51  ;;  %v227_v9 = vld [vmem:[#allocation9 + $0x1a8] sm:$0xff]  ;;  %v229_v11 = vld [vmem:[#allocation9 + $0x1b8] sm:$0xff]  ;;  %v15773_v13 = vpack.c.bf16 %v220_v7, %v216_v5  ;;  %v222_v15 = vld [vmem:[#allocation9 + $0x180] sm:$0xff] }
  0xc8   :  { %15766 = vmatpush1.bf16.msra.mxu1 %v15765_v52  ;;  %15736 = vmatprep.subr.bf16.mxu0 %v15735_v53  ;;  %v15743_v14 = vpack.c.bf16 %v227_v9, %v223_v8  ;;  %v226_v16 = vld [vmem:[#allocation9 + $0x1a0] sm:$0xff]  ;;  %v224_v17 = vld [vmem:[#allocation9 + $0x190] sm:$0xff]  ;;  %v15775_v18 = vpack.c.bf16 %v229_v11, %v225_v10  ;;  %v231_v20 = vld [vmem:[#allocation9 + $0x1c8] sm:$0xff] }
  0xc9   :  { %15768 = vmatprep.subr.bf16.mxu1 %v15767_v57  ;;  %v228_v19 = vld [vmem:[#allocation9 + $0x1b0] sm:$0xff]  ;;  %v235_v21 = vld [vmem:[#allocation9 + $0x1e8] sm:$0xff]  ;;  %v233_v22 = vld [vmem:[#allocation9 + $0x1d8] sm:$0xff]  ;;  %v15745_v24 = vpack.c.bf16 %v226_v16, %v222_v15 }
  0xca   :  { %v237_v23 = vld [vmem:[#allocation9 + $0x1f8] sm:$0xff]  ;;  %v15777_v25 = vpack.c.bf16 %v228_v19, %v224_v17  ;;  %v15747_v26 = vpack.c.bf16 %v235_v21, %v231_v20  ;;  %v230_v27 = vld [vmem:[#allocation9 + $0x1c0] sm:$0xff]  ;;  %v232_v29 = vld [vmem:[#allocation9 + $0x1d0] sm:$0xff] }
  0xcb   :  { %15738 = vmatpush1.bf16.msra.mxu0 %v15737_v63  ;;  %v234_v28 = vld [vmem:[#allocation9 + $0x1e0] sm:$0xff]  ;;  %v15779_v30 = vpack.c.bf16 %v237_v23, %v233_v22  ;;  %v236_v31 = vld [vmem:[#allocation9 + $0x1f0] sm:$0xff]  ;;  %v239_v32 = vld [vmem:[#allocation11 + $0x8] sm:$0xff] }
  0xcc   :  { %15770 = vmatpush1.bf16.msra.mxu1 %v15769_v1  ;;  %15740 = vmatprep.subr.bf16.mxu0 %v15739_v2  ;;  %v243_v33 = vld [vmem:[#allocation11 + $0x28] sm:$0xff]  ;;  %v241_v34 = vld [vmem:[#allocation11 + $0x18] sm:$0xff]  ;;  %v15749_v36 = vpack.c.bf16 %v234_v28, %v230_v27  ;;  %v15781_v37 = vpack.c.bf16 %v236_v31, %v232_v29  ;;  %v238_v39 = vld [vmem:[#allocation11] sm:$0xff] }
  0xcd   :  { %15772 = vmatprep.subr.bf16.mxu1 %v15771_v6  ;;  %v245_v35 = vld [vmem:[#allocation11 + $0x38] sm:$0xff]  ;;  %v18643_v38 = vpack.c.bf16 %v243_v33, %v239_v32  ;;  %v242_v40 = vld [vmem:[#allocation11 + $0x20] sm:$0xff]  ;;  %v240_v42 = vld [vmem:[#allocation11 + $0x10] sm:$0xff] }
  0xce   :  { %v18645_v41 = vpack.c.bf16 %v245_v35, %v241_v34  ;;  %v244_v43 = vld [vmem:[#allocation11 + $0x30] sm:$0xff]  ;;  %v247_v44 = vld [vmem:[#allocation11 + $0x48] sm:$0xff]  ;;  %v303_v46 = vld [vmem:[#allocation3] sm:$0xff]  ;;  %v18647_v47 = vpack.c.bf16 %v242_v40, %v238_v39 }
  0xcf   :  { %15742 = vmatpush1.bf16.msra.mxu0 %v15741_v12  ;;  %v251_v45 = vld [vmem:[#allocation11 + $0x68] sm:$0xff]  ;;  %v249_v48 = vld [vmem:[#allocation11 + $0x58] sm:$0xff]  ;;  %v18650_v50 = vpack.c.bf16 %v244_v43, %v240_v42  ;;  %v246_v51 = vld [vmem:[#allocation11 + $0x40] sm:$0xff] }
  0xd0   :  { %15774 = vmatpush1.bf16.msra.mxu1 %v15773_v13  ;;  %15744 = vmatprep.subr.bf16.mxu0 %v15743_v14  ;;  %v253_v49 = vld [vmem:[#allocation11 + $0x78] sm:$0xff]  ;;  %v250_v52 = vld [vmem:[#allocation11 + $0x60] sm:$0xff]  ;;  %v18653_v53 = vpack.c.bf16 %v251_v45, %v247_v44  ;;  %v248_v54 = vld [vmem:[#allocation11 + $0x50] sm:$0xff] }
  0xd1   :  { %15776 = vmatprep.subr.bf16.mxu1 %v15775_v18  ;;  %v252_v55 = vld [vmem:[#allocation11 + $0x70] sm:$0xff]  ;;  %v18655_v56 = vpack.c.bf16 %v253_v49, %v249_v48  ;;  %v255_v57 = vld [vmem:[#allocation11 + $0x88] sm:$0xff]  ;;  %v18658_v60 = vpack.c.bf16 %v250_v52, %v246_v51  ;;  %v257_v61 = vld [vmem:[#allocation11 + $0x98] sm:$0xff] }
  0xd2   :  { %v259_v58 = vld [vmem:[#allocation11 + $0xa8] sm:$0xff]  ;;  %v261_v62 = vld [vmem:[#allocation11 + $0xb8] sm:$0xff]  ;;  %v18662_v63 = vpack.c.bf16 %v252_v55, %v248_v54  ;;  %v254_v1 = vld [vmem:[#allocation11 + $0x80] sm:$0xff] }
  0xd3   :  { %15746 = vmatpush1.bf16.msra.mxu0 %v15745_v24  ;;  %v304_v59 = vld [vmem:[#allocation3 + $0x8] sm:$0xff]  ;;  %v258_v2 = vld [vmem:[#allocation11 + $0xa0] sm:$0xff]  ;;  %v18666_v3 = vpack.c.bf16 %v259_v58, %v255_v57  ;;  %v256_v4 = vld [vmem:[#allocation11 + $0x90] sm:$0xff]  ;;  %v18669_v6 = vpack.c.bf16 %v261_v62, %v257_v61 }
  0xd4   :  { %15778 = vmatpush1.bf16.msra.mxu1 %v15777_v25  ;;  %15748 = vmatprep.subr.bf16.mxu0 %v15747_v26  ;;  %v260_v5 = vld [vmem:[#allocation11 + $0xb0] sm:$0xff]  ;;  %v263_v7 = vld [vmem:[#allocation11 + $0xc8] sm:$0xff]  ;;  %v18672_v10 = vpack.c.bf16 %v258_v2, %v254_v1  ;;  %v265_v11 = vld [vmem:[#allocation11 + $0xd8] sm:$0xff] }
  0xd5   :  { %15780 = vmatprep.subr.bf16.mxu1 %v15779_v30  ;;  %v267_v8 = vld [vmem:[#allocation11 + $0xe8] sm:$0xff]  ;;  %v305_v9 = vld [vmem:[#allocation3 + $0x10] sm:$0xff]  ;;  %v269_v12 = vld [vmem:[#allocation11 + $0xf8] sm:$0xff]  ;;  %v18676_v13 = vpack.c.bf16 %v260_v5, %v256_v4 }
  0xd6   :  { %v262_v14 = vld [vmem:[#allocation11 + $0xc0] sm:$0xff]  ;;  %v18680_v16 = vpack.c.bf16 %v267_v8, %v263_v7  ;;  %v264_v17 = vld [vmem:[#allocation11 + $0xd0] sm:$0xff]  ;;  %v18683_v19 = vpack.c.bf16 %v269_v12, %v265_v11  ;;  %v271_v20 = vld [vmem:[#allocation11 + $0x108] sm:$0xff] }
  0xd7   :  { %15750 = vmatpush1.bf16.msra.mxu0 %v15749_v36  ;;  %v266_v15 = vld [vmem:[#allocation11 + $0xe0] sm:$0xff]  ;;  %v268_v18 = vld [vmem:[#allocation11 + $0xf0] sm:$0xff]  ;;  %v275_v21 = vld [vmem:[#allocation11 + $0x128] sm:$0xff] }
  0xd8   :  { %15782 = vmatpush1.bf16.msra.mxu1 %v15781_v37  ;;  %15784 = vmatprep.subr.bf16.mxu0 %v18643_v38  ;;  %v306_v22 = vld [vmem:[#allocation3 + $0x18] sm:$0xff]  ;;  %v18686_v23 = vpack.c.bf16 %v266_v15, %v262_v14  ;;  %v18690_v26 = vpack.c.bf16 %v268_v18, %v264_v17  ;;  %v270_v27 = vld [vmem:[#allocation11 + $0x100] sm:$0xff]  ;;  %v18694_v29 = vpack.c.bf16 %v275_v21, %v271_v20  ;;  %v272_v30 = vld [vmem:[#allocation11 + $0x110] sm:$0xff] }
  0xd9   :  { %15816 = vmatprep.subr.bf16.mxu1 %v18645_v41  ;;  %v273_v24 = vld [vmem:[#allocation11 + $0x118] sm:$0xff]  ;;  %v274_v28 = vld [vmem:[#allocation11 + $0x120] sm:$0xff]  ;;  %v276_v31 = vld [vmem:[#allocation11 + $0x130] sm:$0xff] }
  0xda   :  { %397 = vmatmul.mubr.f32.vlgmr.msra.gmra.mrb[0].mxu0 %v303_v46  ;;  %v277_v25 = vld [vmem:[#allocation11 + $0x138] sm:$0xff]  ;;  %v279_v33 = vld [vmem:[#allocation11 + $0x148] sm:$0xff]  ;;  %v307_v35 = vld [vmem:[#allocation3 + $0x20] sm:$0xff]  ;;  %v18700_v36 = vpack.c.bf16 %v274_v28, %v270_v27  ;;  %v18704_v40 = vpack.c.bf16 %v276_v31, %v272_v30  ;;  %v312_v30 = vlaneseq }
  0xdb   :  { %510 = vmatmul.mubr.f32.vlgmr.msra.gmra.mrb[0].mxu1 %v303_v46  ;;  %15786 = vmatpush1.bf16.msra.mxu0 %v18647_v47  ;;  %v18697_v32 = vpack.c.bf16 %v277_v25, %v273_v24  ;;  %v283_v34 = vld [vmem:[#allocation11 + $0x168] sm:$0xff]  ;;  %v281_v37 = vld [vmem:[#allocation11 + $0x158] sm:$0xff]  ;;  %v278_v42 = vld [vmem:[#allocation11 + $0x140] sm:$0xff] }
  0xdc   :  { %15818 = vmatpush1.bf16.msra.mxu1 %v18650_v50  ;;  %402 = vmatprep.mubr.f32.mxu0 %v18415_v0  ;;  %v285_v39 = vld [vmem:[#allocation11 + $0x178] sm:$0xff]  ;;  %v282_v43 = vld [vmem:[#allocation11 + $0x160] sm:$0xff]  ;;  %v18708_v44 = vpack.c.bf16 %v283_v34, %v279_v33  ;;  %v280_v45 = vld [vmem:[#allocation11 + $0x150] sm:$0xff]  ;;  %v18791_v31 = vshrl.u32 %v312_v30, 7 }
  0xdd   :  { %515 = vmatprep.mubr.f32.mxu1 %v18415_v0  ;;  %15788 = vmatprep.subr.bf16.mxu0 %v18653_v53  ;;  %v284_v46 = vld [vmem:[#allocation11 + $0x170] sm:$0xff]  ;;  %v18711_v48 = vpack.c.bf16 %v285_v39, %v281_v37  ;;  %v287_v49 = vld [vmem:[#allocation11 + $0x188] sm:$0xff]  ;;  %v18714_v54 = vpack.c.bf16 %v282_v43, %v278_v42  ;;  %v289_v55 = vld [vmem:[#allocation11 + $0x198] sm:$0xff] }
  0xde   :  { %403 = vmatmul.mubr.f32.gmra.mrb[2].mxu0 %v304_v59  ;;  %15820 = vmatprep.subr.bf16.mxu1 %v18655_v56  ;;  %v291_v51 = vld [vmem:[#allocation11 + $0x1a8] sm:$0xff]  ;;  %v293_v57 = vld [vmem:[#allocation11 + $0x1b8] sm:$0xff]  ;;  %v18718_v58 = vpack.c.bf16 %v284_v46, %v280_v45  ;;  %v290_v61 = vld [vmem:[#allocation11 + $0x1a0] sm:$0xff]  ;;  %v314_v33 = vsub.s32 0, %v18791_v31  ;;  %v326_v43 = vsub.s32 3, %v18791_v31 }
  0xdf   :  { %516 = vmatmul.mubr.f32.gmra.mrb[2].mxu1 %v304_v59  ;;  %15790 = vmatpush1.bf16.msra.mxu0 %v18658_v60  ;;  %v308_v52 = vld [vmem:[#allocation3 + $0x28] sm:$0xff]  ;;  %v286_v59 = vld [vmem:[#allocation11 + $0x180] sm:$0xff]  ;;  %v18722_v62 = vpack.c.bf16 %v291_v51, %v287_v49  ;;  %v288_v1 = vld [vmem:[#allocation11 + $0x190] sm:$0xff]  ;;  %v18725_v4 = vpack.c.bf16 %v293_v57, %v289_v55 }
  0xe0   :  { %15822 = vmatpush1.bf16.msra.mxu1 %v18662_v63  ;;  %408 = vmatprep.mubr.f32.mxu0 %v18415_v0  ;;  %v292_v2 = vld [vmem:[#allocation11 + $0x1b0] sm:$0xff]  ;;  %v295_v5 = vld [vmem:[#allocation11 + $0x1c8] sm:$0xff]  ;;  %v297_v11 = vld [vmem:[#allocation11 + $0x1d8] sm:$0xff] }
  0xe1   :  { %521 = vmatprep.mubr.f32.mxu1 %v18415_v0  ;;  %15792 = vmatprep.subr.bf16.mxu0 %v18666_v3  ;;  %v299_v7 = vld [vmem:[#allocation11 + $0x1e8] sm:$0xff]  ;;  %v309_v8 = vld [vmem:[#allocation3 + $0x30] sm:$0xff]  ;;  %v301_v12 = vld [vmem:[#allocation11 + $0x1f8] sm:$0xff]  ;;  %v18732_v14 = vpack.c.bf16 %v292_v2, %v288_v1 }
  0xe2   :  { %409 = vmatmul.mubr.f32.gmra.mrb[4].mxu0 %v305_v9  ;;  %15824 = vmatprep.subr.bf16.mxu1 %v18669_v6  ;;  %v294_v15 = vld [vmem:[#allocation11 + $0x1c0] sm:$0xff]  ;;  %v18736_v18 = vpack.c.bf16 %v299_v7, %v295_v5  ;;  %v296_v20 = vld [vmem:[#allocation11 + $0x1d0] sm:$0xff]  ;;  %v310_v24 = vld [vmem:[#allocation3 + $0x38] sm:$0xff] }
  0xe3   :  { %522 = vmatmul.mubr.f32.gmra.mrb[4].mxu1 %v305_v9  ;;  %15794 = vmatpush1.bf16.msra.mxu0 %v18672_v10  ;;  %v18728_v9 = vpack.c.bf16 %v290_v61, %v286_v59  ;;  %v298_v17 = vld [vmem:[#allocation11 + $0x1e0] sm:$0xff]  ;;  %v300_v21 = vld [vmem:[#allocation11 + $0x1f0] sm:$0xff]  ;;  %v322_v61 = vsub.s32 2, %v18791_v31 }
  0xe4   :  { %15826 = vmatpush1.bf16.msra.mxu1 %v18676_v13  ;;  %414 = vmatprep.mubr.f32.mxu0 %v18415_v0  ;;  %v18742_v25 = vpack.c.bf16 %v298_v17, %v294_v15  ;;  %v18746_v27 = vpack.c.bf16 %v300_v21, %v296_v20  ;;  %v590_v28 = vld [vmem:[#allocation6] sm:$0xff]  ;;  %v591_v21 = vld [vmem:[#allocation8] sm:$0xff] }
  0xe5   :  { %527 = vmatprep.mubr.f32.mxu1 %v18415_v0  ;;  %15796 = vmatprep.subr.bf16.mxu0 %v18680_v16  ;;  %v302_v34 = vld [vmem:[#allocation12] sm:$0xf] }
  0xe6   :  { %415 = vmatmul.mubr.f32.gmra.mrb[6].mxu0 %v306_v22  ;;  %15828 = vmatprep.subr.bf16.mxu1 %v18683_v19  ;;  %v18797_v37 = vrot.slane %v302_v34, %v314_v33  ;;  %v18808_v59 = vrot.slane %v302_v34, %v326_v43  ;;  %v18814_v2 = vrot.slane %v302_v34, %v322_v61 }
  0xe7   :  { %528 = vmatmul.mubr.f32.gmra.mrb[6].mxu1 %v306_v22  ;;  %15798 = vmatpush1.bf16.msra.mxu0 %v18686_v23  ;;  %v18739_v22 = vpack.c.bf16 %v301_v12, %v297_v11 }
  0xe8   :  { %15830 = vmatpush1.bf16.msra.mxu1 %v18690_v26  ;;  %420 = vmatprep.mubr.f32.mxu0 %v18415_v0 }
  0xe9   :  { %533 = vmatprep.mubr.f32.mxu1 %v18415_v0  ;;  %15800 = vmatprep.subr.bf16.mxu0 %v18694_v29 }
  0xea   :  { %421 = vmatmul.mubr.f32.gmra.mrb[8].mxu0 %v307_v35  ;;  %15832 = vmatprep.subr.bf16.mxu1 %v18697_v32 }
  0xeb   :  { %534 = vmatmul.mubr.f32.gmra.mrb[8].mxu1 %v307_v35  ;;  %15802 = vmatpush1.bf16.msra.mxu0 %v18700_v36  ;;  %v318_v35 = vsub.s32 1, %v18791_v31 }
  0xec   :  { %15834 = vmatpush1.bf16.msra.mxu1 %v18704_v40  ;;  %426 = vmatprep.mubr.f32.mxu0 %v18415_v0 }
  0xed   :  { %539 = vmatprep.mubr.f32.mxu1 %v18415_v0  ;;  %15804 = vmatprep.subr.bf16.mxu0 %v18708_v44  ;;  %v18801_v39 = vrot.slane %v302_v34, %v318_v35 }
  0xee   :  { %427 = vmatmul.mubr.f32.gmra.mrb[10].mxu0 %v308_v52  ;;  %15836 = vmatprep.subr.bf16.mxu1 %v18711_v48 }
  0xef   :  { %540 = vmatmul.mubr.f32.gmra.mrb[10].mxu1 %v308_v52  ;;  %15806 = vmatpush1.bf16.msra.mxu0 %v18714_v54 }
  0xf0   :  { %15838 = vmatpush1.bf16.msra.mxu1 %v18718_v58  ;;  %432 = vmatprep.mubr.f32.mxu0 %v18415_v0 }
  0xf1   :  { %545 = vmatprep.mubr.f32.mxu1 %v18415_v0  ;;  %15808 = vmatprep.subr.bf16.mxu0 %v18722_v62 }
  0xf2   :  { %433 = vmatmul.mubr.f32.gmra.mrb[12].mxu0 %v309_v8  ;;  %15840 = vmatprep.subr.bf16.mxu1 %v18725_v4 }
  0xf3   :  { %546 = vmatmul.mubr.f32.gmra.mrb[12].mxu1 %v309_v8  ;;  %15810 = vmatpush1.bf16.msra.mxu0 %v18728_v9 }
  0xf4   :  { %15842 = vmatpush1.bf16.msra.mxu1 %v18732_v14  ;;  %438 = vmatprep.mubr.f32.mxu0 %v18415_v0 }
  0xf5   :  { %551 = vmatprep.mubr.f32.mxu1 %v18415_v0  ;;  %15812 = vmatprep.subr.bf16.mxu0 %v18736_v18 }
  0xf6   :  { %439 = vmatmul.mubr.f32.gmra.mrb[14].mxu0 %v310_v24  ;;  %15844 = vmatprep.subr.bf16.mxu1 %v18739_v22 }
  0xf7   :  { %552 = vmatmul.mubr.f32.gmra.mrb[14].mxu1 %v310_v24  ;;  %15814 = vmatpush1.bf16.msra.mxu0 %v18742_v25 }
  0xf8   :  { %15846 = vmatpush1.bf16.msra.mxu1 %v18746_v27  ;;  %660 = vmatprep.mubr.f32.mxu0 %v18415_v0 }
  0xf9   :  { %731 = vmatprep.mubr.f32.mxu1 %v18415_v0  ;;  %15848 = vmatprep.subr.bf16.mxu0 %v18643_v38 }
  0xfa   :  { %661 = vmatmul.mubr.f32.vlgmr.msra.gmra.mrb[0].mxu0 %v590_v28  ;;  %15880 = vmatprep.subr.bf16.mxu1 %v18645_v41 }
  0xfb   :  { %732 = vmatmul.mubr.f32.vlgmr.msra.gmra.mrb[0].mxu1 %v590_v28  ;;  %15850 = vmatpush1.bf16.msra.mxu0 %v18647_v47 }
  0xfc   :  { %15882 = vmatpush1.bf16.msra.mxu1 %v18650_v50  ;;  %15852 = vmatprep.subr.bf16.mxu0 %v18653_v53 }
  0xfd   :  { %15884 = vmatprep.subr.bf16.mxu1 %v18655_v56  ;;  %836 = vmatprep.mubr.f32.mxu0 %v18415_v0 }
  0xfe   :  { %907 = vmatprep.mubr.f32.mxu1 %v18415_v0 }
  0xff   :  { %15854 = vmatpush1.bf16.msra.mxu0 %v18658_v60 }
 0x100   :  { %15886 = vmatpush1.bf16.msra.mxu1 %v18662_v63  ;;  %15856 = vmatprep.subr.bf16.mxu0 %v18666_v3 }
 0x101   :  { %15888 = vmatprep.subr.bf16.mxu1 %v18669_v6 }
 0x103   :  { %15858 = vmatpush1.bf16.msra.mxu0 %v18672_v10 }
 0x104   :  { %15890 = vmatpush1.bf16.msra.mxu1 %v18676_v13  ;;  %15860 = vmatprep.subr.bf16.mxu0 %v18680_v16 }
 0x105   :  { %15892 = vmatprep.subr.bf16.mxu1 %v18683_v19 }
 0x107   :  { %15862 = vmatpush1.bf16.msra.mxu0 %v18686_v23 }
 0x108   :  { %15894 = vmatpush1.bf16.msra.mxu1 %v18690_v26  ;;  %15864 = vmatprep.subr.bf16.mxu0 %v18694_v29 }
 0x109   :  { %15896 = vmatprep.subr.bf16.mxu1 %v18697_v32 }
 0x10b   :  { %15866 = vmatpush1.bf16.msra.mxu0 %v18700_v36 }
 0x10c   :  { %15898 = vmatpush1.bf16.msra.mxu1 %v18704_v40  ;;  %15868 = vmatprep.subr.bf16.mxu0 %v18708_v44 }
 0x10d   :  { %15900 = vmatprep.subr.bf16.mxu1 %v18711_v48 }
 0x10f   :  { %15870 = vmatpush1.bf16.msra.mxu0 %v18714_v54 }
 0x110   :  { %15902 = vmatpush1.bf16.msra.mxu1 %v18718_v58  ;;  %15872 = vmatprep.subr.bf16.mxu0 %v18722_v62 }
 0x111   :  { %15904 = vmatprep.subr.bf16.mxu1 %v18725_v4 }
 0x113   :  { %15874 = vmatpush1.bf16.msra.mxu0 %v18728_v9 }
 0x114   :  { %15906 = vmatpush1.bf16.msra.mxu1 %v18732_v14  ;;  %15876 = vmatprep.subr.bf16.mxu0 %v18736_v18 }
 0x115   :  { %15908 = vmatprep.subr.bf16.mxu1 %v18739_v22 }
 0x117   :  { %15878 = vmatpush1.bf16.msra.mxu0 %v18742_v25 }
 0x118   :  { %15910 = vmatpush1.bf16.msra.mxu1 %v18746_v27  ;;  %15912 = vmatprep.subr.bf16.mxu0 %v18643_v38 }
 0x119   :  { %15944 = vmatprep.subr.bf16.mxu1 %v18645_v41 }
 0x1cd   :  { %v662_v42 = vpop.f32.mrb[0].mxu0 }
 0x1ce   :  { %v17191_v45 = vadd.f32 %v662_v42, %v18797_v37  ;;  %v733_v46 = vpop.f32.mrb[0].mxu1  ;;  %v664_v49 = vpop.f32.mrb[1].mxu0 }
 0x1cf   :  { %v17192_v51 = vadd.f32 %v664_v49, %v18801_v39  ;;  %v735_v52 = vpop.f32.mrb[1].mxu1  ;;  %v17207_v7 = vadd.f32 %v733_v46, %v18814_v2 }
 0x1d0   :  { %v14899_v55 = vmul.f32 -1.442695, %v17191_v45  ;;  %v17208_v1 = vadd.f32 %v735_v52, %v18808_v59 }
 0x1d1   :  { %v14900_v57 = vmul.f32 -1.442695, %v17192_v51 }
 0x1d2   :  { %17791 = vpow2.f32 %v14899_v55  ;;  %v14901_v5 = vmul.f32 -1.442695, %v17208_v1 }
 0x1d3   :  { %17793 = vpow2.f32 %v14900_v57 }
 0x1d4   :  { %17795 = vpow2.f32 %v14901_v5 }
 0x1d5   :  { %17797 = vtanh.f32 %v17207_v7 }
 0x1dc   :  { %v17792_v8 = vpop.eup %17791 }
 0x1dd   :  { %v17794_v11 = vpop.eup %17793  ;;  %v745_v12 = vadd.f32 1.0, %v17792_v8 }
 0x1de   :  { %v751_v15 = vadd.f32 1.0, %v17794_v11  ;;  %v17796_v17 = vpop.eup %17795 }
 0x1df   :  { %17799 = vrcp.f32 %v745_v12  ;;  %v17798_v20 = vpop.eup %17797  ;;  %v758_v42 = vadd.f32 1.0, %v17796_v17 }
 0x1e0   :  { %17801 = vrcp.f32 %v751_v15 }
 0x1e1   :  { %17803 = vrcp.f32 %v758_v42 }
 0x1e9   :  { %v17800_v24 = vpop.eup %17799 }
 0x1ea   :  { %v17802_v28 = vpop.eup %17801  ;;  %v762_v30 = vmul.f32 %v17800_v24, %v17798_v20 }
 0x1eb   :  { %v761_v34 = vmul.f32 %v17802_v28, %v591_v21  ;;  %v17804_v46 = vpop.eup %17803 }
 0x1ed   :  { %v18817_v45 = vadd.f32 %v762_v30, %v761_v34 }
 0x1ef   :  { %17805 = vtanh.f32 %v18817_v45 }
 0x1f9   :  { %v17806_v49 = vpop.eup %17805 }
 0x1fa   :  { %v18820_v51 = vmul.f32 %v17806_v49, %v17804_v46 }
 0x1fc   :  { %837 = vmatmul.mubr.f32.vlgmr.msra.gmra.mrb[2].mxu0 %v18820_v51  ;;  %908 = vmatmul.mubr.f32.vlgmr.msra.gmra.mrb[2].mxu1 %v18820_v51 }
 0x1fd   :  { %15914 = vmatpush1.bf16.msra.mxu0 %v18647_v47  ;;  %15946 = vmatpush1.bf16.msra.mxu1 %v18650_v50 }
 0x1fe   :  { %15916 = vmatprep.subr.bf16.mxu0 %v18653_v53  ;;  %15948 = vmatprep.subr.bf16.mxu1 %v18655_v56 }
 0x1ff   :  { %1013 = vmatprep.mubr.f32.mxu0 %v18415_v0  ;;  %1084 = vmatprep.mubr.f32.mxu1 %v18415_v0 }
 0x201   :  { %15918 = vmatpush1.bf16.msra.mxu0 %v18658_v60  ;;  %15950 = vmatpush1.bf16.msra.mxu1 %v18662_v63 }
 0x202   :  { %15920 = vmatprep.subr.bf16.mxu0 %v18666_v3  ;;  %15952 = vmatprep.subr.bf16.mxu1 %v18669_v6 }
 0x205   :  { %15922 = vmatpush1.bf16.msra.mxu0 %v18672_v10  ;;  %15954 = vmatpush1.bf16.msra.mxu1 %v18676_v13 }
 0x206   :  { %15924 = vmatprep.subr.bf16.mxu0 %v18680_v16  ;;  %15956 = vmatprep.subr.bf16.mxu1 %v18683_v19 }
 0x209   :  { %15926 = vmatpush1.bf16.msra.mxu0 %v18686_v23  ;;  %15958 = vmatpush1.bf16.msra.mxu1 %v18690_v26 }
 0x20a   :  { %15928 = vmatprep.subr.bf16.mxu0 %v18694_v29  ;;  %15960 = vmatprep.subr.bf16.mxu1 %v18697_v32 }
 0x20d   :  { %15930 = vmatpush1.bf16.msra.mxu0 %v18700_v36  ;;  %15962 = vmatpush1.bf16.msra.mxu1 %v18704_v40 }
 0x20e   :  { %15932 = vmatprep.subr.bf16.mxu0 %v18708_v44  ;;  %15964 = vmatprep.subr.bf16.mxu1 %v18711_v48 }
 0x211   :  { %15934 = vmatpush1.bf16.msra.mxu0 %v18714_v54  ;;  %15966 = vmatpush1.bf16.msra.mxu1 %v18718_v58 }
 0x212   :  { %15936 = vmatprep.subr.bf16.mxu0 %v18722_v62  ;;  %15968 = vmatprep.subr.bf16.mxu1 %v18725_v4 }
 0x215   :  { %15938 = vmatpush1.bf16.msra.mxu0 %v18728_v9  ;;  %15970 = vmatpush1.bf16.msra.mxu1 %v18732_v14 }
 0x216   :  { %15940 = vmatprep.subr.bf16.mxu0 %v18736_v18  ;;  %15972 = vmatprep.subr.bf16.mxu1 %v18739_v22 }
 0x219   :  { %15942 = vmatpush1.bf16.msra.mxu0 %v18742_v25  ;;  %15974 = vmatpush1.bf16.msra.mxu1 %v18746_v27 }
 0x21a   :  { %15976 = vmatprep.subr.bf16.mxu0 %v18643_v38  ;;  %16008 = vmatprep.subr.bf16.mxu1 %v18645_v41 }
 0x2cf   :  { %v838_v52 = vpop.f32.mrb[2].mxu0  ;;  %v909_v55 = vpop.f32.mrb[2].mxu1 }
 0x2d0   :  { %v17193_v57 = vadd.f32 %v838_v52, %v18797_v37  ;;  %v840_v1 = vpop.f32.mrb[3].mxu0  ;;  %v911_v5 = vpop.f32.mrb[3].mxu1  ;;  %v17209_v17 = vadd.f32 %v909_v55, %v18814_v2 }
 0x2d1   :  { %v17194_v7 = vadd.f32 %v840_v1, %v18801_v39  ;;  %v17210_v12 = vadd.f32 %v911_v5, %v18808_v59 }
 0x2d2   :  { %v14902_v8 = vmul.f32 -1.442695, %v17193_v57 }
 0x2d3   :  { %v14903_v11 = vmul.f32 -1.442695, %v17194_v7  ;;  %v14904_v15 = vmul.f32 -1.442695, %v17210_v12 }
 0x2d4   :  { %17807 = vpow2.f32 %v14902_v8 }
 0x2d5   :  { %17809 = vpow2.f32 %v14903_v11 }
 0x2d6   :  { %17811 = vpow2.f32 %v14904_v15 }
 0x2d7   :  { %17813 = vtanh.f32 %v17209_v17 }
 0x2de   :  { %v17808_v20 = vpop.eup %17807 }
 0x2df   :  { %v17810_v21 = vpop.eup %17809  ;;  %v921_v24 = vadd.f32 1.0, %v17808_v20 }
 0x2e0   :  { %v927_v28 = vadd.f32 1.0, %v17810_v21  ;;  %v17812_v30 = vpop.eup %17811 }
 0x2e1   :  { %17815 = vrcp.f32 %v921_v24  ;;  %v17814_v42 = vpop.eup %17813  ;;  %v934_v52 = vadd.f32 1.0, %v17812_v30 }
 0x2e2   :  { %17817 = vrcp.f32 %v927_v28 }
 0x2e3   :  { %17819 = vrcp.f32 %v934_v52 }
 0x2eb   :  { %v17816_v34 = vpop.eup %17815 }
 0x2ec   :  { %v17818_v46 = vpop.eup %17817  ;;  %v938_v49 = vmul.f32 %v17816_v34, %v17814_v42 }
 0x2ed   :  { %v937_v57 = vmul.f32 %v17818_v46, %v18817_v45  ;;  %v17820_v55 = vpop.eup %17819 }
 0x2ef   :  { %v18863_v1 = vadd.f32 %v938_v49, %v937_v57 }
 0x2f1   :  { %17821 = vtanh.f32 %v18863_v1 }
 0x2fb   :  { %v17822_v5 = vpop.eup %17821 }
 0x2fc   :  { %v18866_v7 = vmul.f32 %v17822_v5, %v17820_v55 }
 0x2fe   :  { %1014 = vmatmul.mubr.f32.vlgmr.msra.gmra.mrb[4].mxu0 %v18866_v7  ;;  %1085 = vmatmul.mubr.f32.vlgmr.msra.gmra.mrb[4].mxu1 %v18866_v7 }
 0x2ff   :  { %15978 = vmatpush1.bf16.msra.mxu0 %v18647_v47  ;;  %16010 = vmatpush1.bf16.msra.mxu1 %v18650_v50 }
 0x300   :  { %15980 = vmatprep.subr.bf16.mxu0 %v18653_v53  ;;  %16012 = vmatprep.subr.bf16.mxu1 %v18655_v56 }
 0x301   :  { %1190 = vmatprep.mubr.f32.mxu0 %v18415_v0  ;;  %1261 = vmatprep.mubr.f32.mxu1 %v18415_v0 }
 0x303   :  { %15982 = vmatpush1.bf16.msra.mxu0 %v18658_v60  ;;  %16014 = vmatpush1.bf16.msra.mxu1 %v18662_v63 }
 0x304   :  { %15984 = vmatprep.subr.bf16.mxu0 %v18666_v3  ;;  %16016 = vmatprep.subr.bf16.mxu1 %v18669_v6 }
 0x307   :  { %15986 = vmatpush1.bf16.msra.mxu0 %v18672_v10  ;;  %16018 = vmatpush1.bf16.msra.mxu1 %v18676_v13 }
 0x308   :  { %15988 = vmatprep.subr.bf16.mxu0 %v18680_v16  ;;  %16020 = vmatprep.subr.bf16.mxu1 %v18683_v19 }
 0x30b   :  { %15990 = vmatpush1.bf16.msra.mxu0 %v18686_v23  ;;  %16022 = vmatpush1.bf16.msra.mxu1 %v18690_v26 }
 0x30c   :  { %15992 = vmatprep.subr.bf16.mxu0 %v18694_v29  ;;  %16024 = vmatprep.subr.bf16.mxu1 %v18697_v32 }
 0x30f   :  { %15994 = vmatpush1.bf16.msra.mxu0 %v18700_v36  ;;  %16026 = vmatpush1.bf16.msra.mxu1 %v18704_v40 }
 0x310   :  { %15996 = vmatprep.subr.bf16.mxu0 %v18708_v44  ;;  %16028 = vmatprep.subr.bf16.mxu1 %v18711_v48 }
 0x313   :  { %15998 = vmatpush1.bf16.msra.mxu0 %v18714_v54  ;;  %16030 = vmatpush1.bf16.msra.mxu1 %v18718_v58 }
 0x314   :  { %16000 = vmatprep.subr.bf16.mxu0 %v18722_v62  ;;  %16032 = vmatprep.subr.bf16.mxu1 %v18725_v4 }
 0x317   :  { %16002 = vmatpush1.bf16.msra.mxu0 %v18728_v9  ;;  %16034 = vmatpush1.bf16.msra.mxu1 %v18732_v14 }
 0x318   :  { %16004 = vmatprep.subr.bf16.mxu0 %v18736_v18  ;;  %16036 = vmatprep.subr.bf16.mxu1 %v18739_v22 }
 0x31b   :  { %16006 = vmatpush1.bf16.msra.mxu0 %v18742_v25  ;;  %16038 = vmatpush1.bf16.msra.mxu1 %v18746_v27 }
 0x31c   :  { %16040 = vmatprep.subr.bf16.mxu0 %v18643_v38  ;;  %16072 = vmatprep.subr.bf16.mxu1 %v18645_v41 }
 0x3d1   :  { %v1015_v45 = vpop.f32.mrb[4].mxu0  ;;  %v1086_v8 = vpop.f32.mrb[4].mxu1 }
 0x3d2   :  { %v17195_v11 = vadd.f32 %v1015_v45, %v18797_v37  ;;  %v1017_v12 = vpop.f32.mrb[5].mxu0  ;;  %v1088_v15 = vpop.f32.mrb[5].mxu1  ;;  %v17211_v30 = vadd.f32 %v1086_v8, %v18814_v2 }
 0x3d3   :  { %v17196_v17 = vadd.f32 %v1017_v12, %v18801_v39  ;;  %v17212_v24 = vadd.f32 %v1088_v15, %v18808_v59 }
 0x3d4   :  { %v14905_v20 = vmul.f32 -1.442695, %v17195_v11 }
 0x3d5   :  { %v14906_v21 = vmul.f32 -1.442695, %v17196_v17  ;;  %v14907_v28 = vmul.f32 -1.442695, %v17212_v24 }
 0x3d6   :  { %17823 = vpow2.f32 %v14905_v20 }
 0x3d7   :  { %17825 = vpow2.f32 %v14906_v21 }
 0x3d8   :  { %17827 = vpow2.f32 %v14907_v28 }
 0x3d9   :  { %17829 = vtanh.f32 %v17211_v30 }
 0x3e0   :  { %v17824_v42 = vpop.eup %17823 }
 0x3e1   :  { %v17826_v34 = vpop.eup %17825  ;;  %v1098_v46 = vadd.f32 1.0, %v17824_v42 }
 0x3e2   :  { %v1104_v49 = vadd.f32 1.0, %v17826_v34  ;;  %v17828_v52 = vpop.eup %17827 }
 0x3e3   :  { %17831 = vrcp.f32 %v1098_v46  ;;  %v17830_v57 = vpop.eup %17829  ;;  %v1111_v11 = vadd.f32 1.0, %v17828_v52 }
 0x3e4   :  { %17833 = vrcp.f32 %v1104_v49 }
 0x3e5   :  { %17835 = vrcp.f32 %v1111_v11 }
 0x3ed   :  { %v17832_v55 = vpop.eup %17831 }
 0x3ee   :  { %v17834_v5 = vpop.eup %17833  ;;  %v1115_v45 = vmul.f32 %v17832_v55, %v17830_v57 }
 0x3ef   :  { %v1114_v12 = vmul.f32 %v17834_v5, %v18863_v1  ;;  %v17836_v8 = vpop.eup %17835 }
 0x3f1   :  { %v18909_v15 = vadd.f32 %v1115_v45, %v1114_v12 }
 0x3f3   :  { %17837 = vtanh.f32 %v18909_v15 }
 0x3fd   :  { %v17838_v17 = vpop.eup %17837 }
 0x3fe   :  { %v18912_v20 = vmul.f32 %v17838_v17, %v17836_v8 }
 0x400   :  { %1191 = vmatmul.mubr.f32.vlgmr.msra.gmra.mrb[6].mxu0 %v18912_v20  ;;  %1262 = vmatmul.mubr.f32.vlgmr.msra.gmra.mrb[6].mxu1 %v18912_v20 }
 0x401   :  { %16042 = vmatpush1.bf16.msra.mxu0 %v18647_v47  ;;  %16074 = vmatpush1.bf16.msra.mxu1 %v18650_v50 }
 0x402   :  { %16044 = vmatprep.subr.bf16.mxu0 %v18653_v53  ;;  %16076 = vmatprep.subr.bf16.mxu1 %v18655_v56 }
 0x403   :  { %1367 = vmatprep.mubr.f32.mxu0 %v18415_v0  ;;  %1438 = vmatprep.mubr.f32.mxu1 %v18415_v0 }
 0x405   :  { %16046 = vmatpush1.bf16.msra.mxu0 %v18658_v60  ;;  %16078 = vmatpush1.bf16.msra.mxu1 %v18662_v63 }
 0x406   :  { %16048 = vmatprep.subr.bf16.mxu0 %v18666_v3  ;;  %16080 = vmatprep.subr.bf16.mxu1 %v18669_v6 }
 0x409   :  { %16050 = vmatpush1.bf16.msra.mxu0 %v18672_v10  ;;  %16082 = vmatpush1.bf16.msra.mxu1 %v18676_v13 }
 0x40a   :  { %16052 = vmatprep.subr.bf16.mxu0 %v18680_v16  ;;  %16084 = vmatprep.subr.bf16.mxu1 %v18683_v19 }
 0x40d   :  { %16054 = vmatpush1.bf16.msra.mxu0 %v18686_v23  ;;  %16086 = vmatpush1.bf16.msra.mxu1 %v18690_v26 }
 0x40e   :  { %16056 = vmatprep.subr.bf16.mxu0 %v18694_v29  ;;  %16088 = vmatprep.subr.bf16.mxu1 %v18697_v32 }
 0x411   :  { %16058 = vmatpush1.bf16.msra.mxu0 %v18700_v36  ;;  %16090 = vmatpush1.bf16.msra.mxu1 %v18704_v40 }
 0x412   :  { %16060 = vmatprep.subr.bf16.mxu0 %v18708_v44  ;;  %16092 = vmatprep.subr.bf16.mxu1 %v18711_v48 }
 0x415   :  { %16062 = vmatpush1.bf16.msra.mxu0 %v18714_v54  ;;  %16094 = vmatpush1.bf16.msra.mxu1 %v18718_v58 }
 0x416   :  { %16064 = vmatprep.subr.bf16.mxu0 %v18722_v62  ;;  %16096 = vmatprep.subr.bf16.mxu1 %v18725_v4 }
 0x419   :  { %16066 = vmatpush1.bf16.msra.mxu0 %v18728_v9  ;;  %16098 = vmatpush1.bf16.msra.mxu1 %v18732_v14 }
 0x41a   :  { %16068 = vmatprep.subr.bf16.mxu0 %v18736_v18  ;;  %16100 = vmatprep.subr.bf16.mxu1 %v18739_v22 }
 0x41d   :  { %16070 = vmatpush1.bf16.msra.mxu0 %v18742_v25  ;;  %16102 = vmatpush1.bf16.msra.mxu1 %v18746_v27 }
 0x41e   :  { %16104 = vmatprep.subr.bf16.mxu0 %v18643_v38  ;;  %16136 = vmatprep.subr.bf16.mxu1 %v18645_v41 }
 0x4d3   :  { %v1192_v1 = vpop.f32.mrb[6].mxu0  ;;  %v1263_v21 = vpop.f32.mrb[6].mxu1 }
 0x4d4   :  { %v17197_v24 = vadd.f32 %v1192_v1, %v18797_v37  ;;  %v1194_v28 = vpop.f32.mrb[7].mxu0  ;;  %v1265_v30 = vpop.f32.mrb[7].mxu1  ;;  %v17213_v57 = vadd.f32 %v1263_v21, %v18814_v2 }
 0x4d5   :  { %v17198_v42 = vadd.f32 %v1194_v28, %v18801_v39  ;;  %v17214_v49 = vadd.f32 %v1265_v30, %v18808_v59 }
 0x4d6   :  { %v14908_v34 = vmul.f32 -1.442695, %v17197_v24 }
 0x4d7   :  { %v14909_v46 = vmul.f32 -1.442695, %v17198_v42  ;;  %v14910_v52 = vmul.f32 -1.442695, %v17214_v49 }
 0x4d8   :  { %17839 = vpow2.f32 %v14908_v34 }
 0x4d9   :  { %17841 = vpow2.f32 %v14909_v46 }
 0x4da   :  { %17843 = vpow2.f32 %v14910_v52 }
 0x4db   :  { %17845 = vtanh.f32 %v17213_v57 }
 0x4e2   :  { %v17840_v55 = vpop.eup %17839 }
 0x4e3   :  { %v17842_v5 = vpop.eup %17841  ;;  %v1275_v45 = vadd.f32 1.0, %v17840_v55 }
 0x4e4   :  { %v1281_v11 = vadd.f32 1.0, %v17842_v5  ;;  %v17844_v12 = vpop.eup %17843 }
 0x4e5   :  { %17847 = vrcp.f32 %v1275_v45  ;;  %v17846_v8 = vpop.eup %17845  ;;  %v1288_v28 = vadd.f32 1.0, %v17844_v12 }
 0x4e6   :  { %17849 = vrcp.f32 %v1281_v11 }
 0x4e7   :  { %17851 = vrcp.f32 %v1288_v28 }
 0x4ef   :  { %v17848_v17 = vpop.eup %17847 }
 0x4f0   :  { %v17850_v1 = vpop.eup %17849  ;;  %v1292_v24 = vmul.f32 %v17848_v17, %v17846_v8 }
 0x4f1   :  { %v1291_v42 = vmul.f32 %v17850_v1, %v18909_v15  ;;  %v17852_v21 = vpop.eup %17851 }
 0x4f3   :  { %v18955_v30 = vadd.f32 %v1292_v24, %v1291_v42 }
 0x4f5   :  { %17853 = vtanh.f32 %v18955_v30 }
 0x4ff   :  { %v17854_v34 = vpop.eup %17853 }
 0x500   :  { %v18958_v46 = vmul.f32 %v17854_v34, %v17852_v21 }
 0x502   :  { %1368 = vmatmul.mubr.f32.vlgmr.msra.gmra.mrb[8].mxu0 %v18958_v46  ;;  %1439 = vmatmul.mubr.f32.vlgmr.msra.gmra.mrb[8].mxu1 %v18958_v46 }
 0x503   :  { %16106 = vmatpush1.bf16.msra.mxu0 %v18647_v47  ;;  %16138 = vmatpush1.bf16.msra.mxu1 %v18650_v50 }
 0x504   :  { %16108 = vmatprep.subr.bf16.mxu0 %v18653_v53  ;;  %16140 = vmatprep.subr.bf16.mxu1 %v18655_v56 }
 0x505   :  { %1544 = vmatprep.mubr.f32.mxu0 %v18415_v0  ;;  %1615 = vmatprep.mubr.f32.mxu1 %v18415_v0 }
 0x507   :  { %16110 = vmatpush1.bf16.msra.mxu0 %v18658_v60  ;;  %16142 = vmatpush1.bf16.msra.mxu1 %v18662_v63 }
 0x508   :  { %16112 = vmatprep.subr.bf16.mxu0 %v18666_v3  ;;  %16144 = vmatprep.subr.bf16.mxu1 %v18669_v6 }
 0x50b   :  { %16114 = vmatpush1.bf16.msra.mxu0 %v18672_v10  ;;  %16146 = vmatpush1.bf16.msra.mxu1 %v18676_v13 }
 0x50c   :  { %16116 = vmatprep.subr.bf16.mxu0 %v18680_v16  ;;  %16148 = vmatprep.subr.bf16.mxu1 %v18683_v19 }
 0x50f   :  { %16118 = vmatpush1.bf16.msra.mxu0 %v18686_v23  ;;  %16150 = vmatpush1.bf16.msra.mxu1 %v18690_v26 }
 0x510   :  { %16120 = vmatprep.subr.bf16.mxu0 %v18694_v29  ;;  %16152 = vmatprep.subr.bf16.mxu1 %v18697_v32 }
 0x513   :  { %16122 = vmatpush1.bf16.msra.mxu0 %v18700_v36  ;;  %16154 = vmatpush1.bf16.msra.mxu1 %v18704_v40 }
 0x514   :  { %16124 = vmatprep.subr.bf16.mxu0 %v18708_v44  ;;  %16156 = vmatprep.subr.bf16.mxu1 %v18711_v48 }
 0x517   :  { %16126 = vmatpush1.bf16.msra.mxu0 %v18714_v54  ;;  %16158 = vmatpush1.bf16.msra.mxu1 %v18718_v58 }
 0x518   :  { %16128 = vmatprep.subr.bf16.mxu0 %v18722_v62  ;;  %16160 = vmatprep.subr.bf16.mxu1 %v18725_v4 }
 0x51b   :  { %16130 = vmatpush1.bf16.msra.mxu0 %v18728_v9  ;;  %16162 = vmatpush1.bf16.msra.mxu1 %v18732_v14 }
 0x51c   :  { %16132 = vmatprep.subr.bf16.mxu0 %v18736_v18  ;;  %16164 = vmatprep.subr.bf16.mxu1 %v18739_v22 }
 0x51f   :  { %16134 = vmatpush1.bf16.msra.mxu0 %v18742_v25  ;;  %16166 = vmatpush1.bf16.msra.mxu1 %v18746_v27 }
 0x520   :  { %16168 = vmatprep.subr.bf16.mxu0 %v18643_v38  ;;  %16200 = vmatprep.subr.bf16.mxu1 %v18645_v41 }
 0x5d5   :  { %v1369_v15 = vpop.f32.mrb[8].mxu0  ;;  %v1440_v49 = vpop.f32.mrb[8].mxu1 }
 0x5d6   :  { %v17199_v52 = vadd.f32 %v1369_v15, %v18797_v37  ;;  %v1371_v57 = vpop.f32.mrb[9].mxu0  ;;  %v1442_v55 = vpop.f32.mrb[9].mxu1  ;;  %v17215_v17 = vadd.f32 %v1440_v49, %v18814_v2 }
 0x5d7   :  { %v17200_v5 = vadd.f32 %v1371_v57, %v18801_v39  ;;  %v17216_v12 = vadd.f32 %v1442_v55, %v18808_v59 }
 0x5d8   :  { %v14911_v45 = vmul.f32 -1.442695, %v17199_v52 }
 0x5d9   :  { %v14912_v11 = vmul.f32 -1.442695, %v17200_v5  ;;  %v14913_v8 = vmul.f32 -1.442695, %v17216_v12 }
 0x5da   :  { %17855 = vpow2.f32 %v14911_v45 }
 0x5db   :  { %17857 = vpow2.f32 %v14912_v11 }
 0x5dc   :  { %17859 = vpow2.f32 %v14913_v8 }
 0x5dd   :  { %17861 = vtanh.f32 %v17215_v17 }
 0x5e4   :  { %v17856_v1 = vpop.eup %17855 }
 0x5e5   :  { %v17858_v24 = vpop.eup %17857  ;;  %v1452_v28 = vadd.f32 1.0, %v17856_v1 }
 0x5e6   :  { %v1458_v42 = vadd.f32 1.0, %v17858_v24  ;;  %v17860_v21 = vpop.eup %17859 }
 0x5e7   :  { %17863 = vrcp.f32 %v1452_v28  ;;  %v17862_v34 = vpop.eup %17861  ;;  %v1465_v5 = vadd.f32 1.0, %v17860_v21 }
 0x5e8   :  { %17865 = vrcp.f32 %v1458_v42 }
 0x5e9   :  { %17867 = vrcp.f32 %v1465_v5 }
 0x5f1   :  { %v17864_v15 = vpop.eup %17863 }
 0x5f2   :  { %v17866_v52 = vpop.eup %17865  ;;  %v1469_v57 = vmul.f32 %v17864_v15, %v17862_v34 }
 0x5f3   :  { %v1468_v45 = vmul.f32 %v17866_v52, %v18955_v30  ;;  %v17868_v49 = vpop.eup %17867 }
 0x5f5   :  { %v19001_v55 = vadd.f32 %v1469_v57, %v1468_v45 }
 0x5f7   :  { %17869 = vtanh.f32 %v19001_v55 }
 0x601   :  { %v17870_v11 = vpop.eup %17869 }
 0x602   :  { %v19004_v12 = vmul.f32 %v17870_v11, %v17868_v49 }
 0x604   :  { %1545 = vmatmul.mubr.f32.vlgmr.msra.gmra.mrb[10].mxu0 %v19004_v12  ;;  %1616 = vmatmul.mubr.f32.vlgmr.msra.gmra.mrb[10].mxu1 %v19004_v12 }
 0x605   :  { %16170 = vmatpush1.bf16.msra.mxu0 %v18647_v47  ;;  %16202 = vmatpush1.bf16.msra.mxu1 %v18650_v50 }
 0x606   :  { %16172 = vmatprep.subr.bf16.mxu0 %v18653_v53  ;;  %16204 = vmatprep.subr.bf16.mxu1 %v18655_v56 }
 0x607   :  { %1721 = vmatprep.mubr.f32.mxu0 %v18415_v0  ;;  %1792 = vmatprep.mubr.f32.mxu1 %v18415_v0 }
 0x609   :  { %16174 = vmatpush1.bf16.msra.mxu0 %v18658_v60  ;;  %16206 = vmatpush1.bf16.msra.mxu1 %v18662_v63 }
 0x60a   :  { %16176 = vmatprep.subr.bf16.mxu0 %v18666_v3  ;;  %16208 = vmatprep.subr.bf16.mxu1 %v18669_v6 }
 0x60d   :  { %16178 = vmatpush1.bf16.msra.mxu0 %v18672_v10  ;;  %16210 = vmatpush1.bf16.msra.mxu1 %v18676_v13 }
 0x60e   :  { %16180 = vmatprep.subr.bf16.mxu0 %v18680_v16  ;;  %16212 = vmatprep.subr.bf16.mxu1 %v18683_v19 }
 0x611   :  { %16182 = vmatpush1.bf16.msra.mxu0 %v18686_v23  ;;  %16214 = vmatpush1.bf16.msra.mxu1 %v18690_v26 }
 0x612   :  { %16184 = vmatprep.subr.bf16.mxu0 %v18694_v29  ;;  %16216 = vmatprep.subr.bf16.mxu1 %v18697_v32 }
 0x615   :  { %16186 = vmatpush1.bf16.msra.mxu0 %v18700_v36  ;;  %16218 = vmatpush1.bf16.msra.mxu1 %v18704_v40 }
 0x616   :  { %16188 = vmatprep.subr.bf16.mxu0 %v18708_v44  ;;  %16220 = vmatprep.subr.bf16.mxu1 %v18711_v48 }
 0x619   :  { %16190 = vmatpush1.bf16.msra.mxu0 %v18714_v54  ;;  %16222 = vmatpush1.bf16.msra.mxu1 %v18718_v58 }
 0x61a   :  { %16192 = vmatprep.subr.bf16.mxu0 %v18722_v62  ;;  %16224 = vmatprep.subr.bf16.mxu1 %v18725_v4 }
 0x61d   :  { %16194 = vmatpush1.bf16.msra.mxu0 %v18728_v9  ;;  %16226 = vmatpush1.bf16.msra.mxu1 %v18732_v14 }
 0x61e   :  { %16196 = vmatprep.subr.bf16.mxu0 %v18736_v18  ;;  %16228 = vmatprep.subr.bf16.mxu1 %v18739_v22 }
 0x621   :  { %16198 = vmatpush1.bf16.msra.mxu0 %v18742_v25  ;;  %16230 = vmatpush1.bf16.msra.mxu1 %v18746_v27 }
 0x622   :  { %16232 = vmatprep.subr.bf16.mxu0 %v18643_v38  ;;  %16264 = vmatprep.subr.bf16.mxu1 %v18645_v41 }
 0x6d7   :  { %v1546_v30 = vpop.f32.mrb[10].mxu0  ;;  %v1617_v8 = vpop.f32.mrb[10].mxu1 }
 0x6d8   :  { %v17201_v17 = vadd.f32 %v1546_v30, %v18797_v37  ;;  %v1548_v1 = vpop.f32.mrb[11].mxu0  ;;  %v1619_v24 = vpop.f32.mrb[11].mxu1  ;;  %v17217_v52 = vadd.f32 %v1617_v8, %v18814_v2 }
 0x6d9   :  { %v17202_v28 = vadd.f32 %v1548_v1, %v18801_v39  ;;  %v17218_v34 = vadd.f32 %v1619_v24, %v18808_v59 }
 0x6da   :  { %v14914_v42 = vmul.f32 -1.442695, %v17201_v17 }
 0x6db   :  { %v14915_v21 = vmul.f32 -1.442695, %v17202_v28  ;;  %v14916_v15 = vmul.f32 -1.442695, %v17218_v34  ;;  %v2011_v34 = vld [vmem:[#allocation9 + $0x210] sm:$0xff] }
 0x6dc   :  { %17871 = vpow2.f32 %v14914_v42 }
 0x6dd   :  { %17873 = vpow2.f32 %v14915_v21 }
 0x6de   :  { %17875 = vpow2.f32 %v14916_v15  ;;  %v2015_v15 = vld [vmem:[#allocation9 + $0x230] sm:$0xff] }
 0x6df   :  { %17877 = vtanh.f32 %v17217_v52  ;;  %v2018_v52 = vld [vmem:[#allocation9 + $0x248] sm:$0xff] }
 0x6e6   :  { %v17872_v38 = vpop.eup %17871 }
 0x6e7   :  { %v17874_v57 = vpop.eup %17873  ;;  %v1629_v41 = vadd.f32 1.0, %v17872_v38  ;;  %v2022_v38 = vld [vmem:[#allocation9 + $0x268] sm:$0xff] }
 0x6e8   :  { %v1635_v5 = vadd.f32 1.0, %v17874_v57  ;;  %v17876_v45 = vpop.eup %17875  ;;  %v2020_v57 = vld [vmem:[#allocation9 + $0x258] sm:$0xff] }
 0x6e9   :  { %17879 = vrcp.f32 %v1629_v41  ;;  %v17878_v49 = vpop.eup %17877  ;;  %v1642_v1 = vadd.f32 1.0, %v17876_v45  ;;  %v2024_v41 = vld [vmem:[#allocation9 + $0x278] sm:$0xff] }
 0x6ea   :  { %17881 = vrcp.f32 %v1635_v5 }
 0x6eb   :  { %17883 = vrcp.f32 %v1642_v1 }
 0x6f3   :  { %v17880_v11 = vpop.eup %17879 }
 0x6f4   :  { %v17882_v30 = vpop.eup %17881  ;;  %v1646_v17 = vmul.f32 %v17880_v11, %v17878_v49  ;;  %v16329_v11 = vpack.c.bf16 %v2015_v15, %v2011_v34  ;;  %v2041_v34 = vld [vmem:[#allocation9 + $0x300] sm:$0xff] }
 0x6f5   :  { %v1645_v28 = vmul.f32 %v17882_v30, %v19001_v55  ;;  %v17884_v8 = vpop.eup %17883  ;;  %v2013_v55 = vld [vmem:[#allocation9 + $0x220] sm:$0xff] }
 0x6f6   :  { %v2017_v30 = vld [vmem:[#allocation9 + $0x240] sm:$0xff] }
 0x6f7   :  { %v19047_v24 = vadd.f32 %v1646_v17, %v1645_v28  ;;  %v2021_v17 = vld [vmem:[#allocation9 + $0x260] sm:$0xff]  ;;  %v16299_v28 = vpack.c.bf16 %v2022_v38, %v2018_v52 }
 0x6f8   :  { %v2045_v15 = vld [vmem:[#allocation9 + $0x320] sm:$0xff] }
 0x6f9   :  { %17885 = vtanh.f32 %v19047_v24 }
 0x703   :  { %v17886_v42 = vpop.eup %17885 }
 0x704   :  { %v19050_v21 = vmul.f32 %v17886_v42, %v17884_v8  ;;  %v2019_v8 = vld [vmem:[#allocation9 + $0x250] sm:$0xff] }
 0x705   :  { %v2023_v42 = vld [vmem:[#allocation9 + $0x270] sm:$0xff] }
 0x706   :  { %1722 = vmatmul.mubr.f32.vlgmr.msra.gmra.mrb[12].mxu0 %v19050_v21  ;;  %1793 = vmatmul.mubr.f32.vlgmr.msra.gmra.mrb[12].mxu1 %v19050_v21 }
 0x707   :  { %16234 = vmatpush1.bf16.msra.mxu0 %v18647_v47  ;;  %16266 = vmatpush1.bf16.msra.mxu1 %v18650_v50  ;;  %v2010_v47 = vld [vmem:[#allocation9 + $0x208] sm:$0xff] }
 0x708   :  { %16236 = vmatprep.subr.bf16.mxu0 %v18653_v53  ;;  %16268 = vmatprep.subr.bf16.mxu1 %v18655_v56  ;;  %v2014_v50 = vld [vmem:[#allocation9 + $0x228] sm:$0xff]  ;;  %v2012_v53 = vld [vmem:[#allocation9 + $0x218] sm:$0xff] }
 0x709   :  { %1898 = vmatprep.mubr.f32.mxu0 %v18415_v0  ;;  %1969 = vmatprep.mubr.f32.mxu1 %v18415_v0  ;;  %v16295_v56 = vpack.c.bf16 %v2014_v50, %v2010_v47  ;;  %v2026_v47 = vld [vmem:[#allocation9 + $0x288] sm:$0xff] }
 0x70a   :  { %v2030_v50 = vld [vmem:[#allocation9 + $0x2a8] sm:$0xff] }
 0x70b   :  { %16238 = vmatpush1.bf16.msra.mxu0 %v18658_v60  ;;  %16270 = vmatpush1.bf16.msra.mxu1 %v18662_v63  ;;  %v2016_v60 = vld [vmem:[#allocation9 + $0x238] sm:$0xff] }
 0x70c   :  { %16240 = vmatprep.subr.bf16.mxu0 %v18666_v3  ;;  %16272 = vmatprep.subr.bf16.mxu1 %v18669_v6  ;;  %v16327_v63 = vpack.c.bf16 %v2016_v60, %v2012_v53  ;;  %v2028_v53 = vld [vmem:[#allocation9 + $0x298] sm:$0xff]  ;;  %v16301_v60 = vpack.c.bf16 %v2021_v17, %v2017_v30  ;;  %v16313_v30 = vpack.c.bf16 %v2045_v15, %v2041_v34  ;;  %v2076_v15 = vld [vmem:[#allocation11 + $0x210] sm:$0xff] }
 0x70f   :  { %16242 = vmatpush1.bf16.msra.mxu0 %v18672_v10  ;;  %16274 = vmatpush1.bf16.msra.mxu1 %v18676_v13 }
 0x710   :  { %16244 = vmatprep.subr.bf16.mxu0 %v18680_v16  ;;  %16276 = vmatprep.subr.bf16.mxu1 %v18683_v19 }
 0x713   :  { %16246 = vmatpush1.bf16.msra.mxu0 %v18686_v23  ;;  %16278 = vmatpush1.bf16.msra.mxu1 %v18690_v26 }
 0x714   :  { %16248 = vmatprep.subr.bf16.mxu0 %v18694_v29  ;;  %16280 = vmatprep.subr.bf16.mxu1 %v18697_v32 }
 0x717   :  { %16250 = vmatpush1.bf16.msra.mxu0 %v18700_v36  ;;  %16282 = vmatpush1.bf16.msra.mxu1 %v18704_v40 }
 0x718   :  { %16252 = vmatprep.subr.bf16.mxu0 %v18708_v44  ;;  %16284 = vmatprep.subr.bf16.mxu1 %v18711_v48 }
 0x71b   :  { %16254 = vmatpush1.bf16.msra.mxu0 %v18714_v54  ;;  %16286 = vmatpush1.bf16.msra.mxu1 %v18718_v58 }
 0x71c   :  { %16256 = vmatprep.subr.bf16.mxu0 %v18722_v62  ;;  %16288 = vmatprep.subr.bf16.mxu1 %v18725_v4 }
 0x71f   :  { %16258 = vmatpush1.bf16.msra.mxu0 %v18728_v9  ;;  %16290 = vmatpush1.bf16.msra.mxu1 %v18732_v14 }
 0x720   :  { %16260 = vmatprep.subr.bf16.mxu0 %v18736_v18  ;;  %16292 = vmatprep.subr.bf16.mxu1 %v18739_v22 }
 0x723   :  { %16262 = vmatpush1.bf16.msra.mxu0 %v18742_v25  ;;  %16294 = vmatpush1.bf16.msra.mxu1 %v18746_v27  ;;  %v2009_v27 = vld [vmem:[#allocation9 + $0x200] sm:$0xff] }
 0x724   :  { %16296 = vmatprep.subr.bf16.mxu0 %v16295_v56  ;;  %16328 = vmatprep.subr.bf16.mxu1 %v16327_v63  ;;  %v16297_v49 = vpack.c.bf16 %v2013_v55, %v2009_v27  ;;  %v2032_v56 = vld [vmem:[#allocation9 + $0x2b8] sm:$0xff]  ;;  %v16333_v63 = vpack.c.bf16 %v2023_v42, %v2019_v8 }
 0x7d9   :  { %v1723_v3 = vpop.f32.mrb[12].mxu0  ;;  %v1794_v6 = vpop.f32.mrb[12].mxu1 }
 0x7da   :  { %v17203_v10 = vadd.f32 %v1723_v3, %v18797_v37  ;;  %v1725_v13 = vpop.f32.mrb[13].mxu0  ;;  %v1796_v16 = vpop.f32.mrb[13].mxu1  ;;  %v17219_v36 = vadd.f32 %v1794_v6, %v18814_v2  ;;  %v2025_v3 = vld [vmem:[#allocation9 + $0x280] sm:$0xff] }
 0x7db   :  { %v17204_v19 = vadd.f32 %v1725_v13, %v18801_v39  ;;  %v17220_v29 = vadd.f32 %v1796_v16, %v18808_v59  ;;  %v2029_v6 = vld [vmem:[#allocation9 + $0x2a0] sm:$0xff]  ;;  %v16335_v13 = vpack.c.bf16 %v2032_v56, %v2028_v53  ;;  %v2027_v16 = vld [vmem:[#allocation9 + $0x290] sm:$0xff]  ;;  %v2058_v53 = vld [vmem:[#allocation9 + $0x388] sm:$0xff] }
 0x7dc   :  { %v14917_v23 = vmul.f32 -1.442695, %v17203_v10  ;;  %v16303_v10 = vpack.c.bf16 %v2030_v50, %v2026_v47  ;;  %v2051_v47 = vld [vmem:[#allocation9 + $0x350] sm:$0xff]  ;;  %v2062_v56 = vld [vmem:[#allocation9 + $0x3a8] sm:$0xff] }
 0x7dd   :  { %v14918_v26 = vmul.f32 -1.442695, %v17204_v19  ;;  %v14919_v32 = vmul.f32 -1.442695, %v17220_v29  ;;  %v2031_v19 = vld [vmem:[#allocation9 + $0x2b0] sm:$0xff]  ;;  %v2036_v29 = vld [vmem:[#allocation9 + $0x2d8] sm:$0xff] }
 0x7de   :  { %17887 = vpow2.f32 %v14917_v23  ;;  %v2034_v23 = vld [vmem:[#allocation9 + $0x2c8] sm:$0xff]  ;;  %v2055_v50 = vld [vmem:[#allocation9 + $0x370] sm:$0xff] }
 0x7df   :  { %17889 = vpow2.f32 %v14918_v26  ;;  %v2038_v26 = vld [vmem:[#allocation9 + $0x2e8] sm:$0xff] }
 0x7e0   :  { %17891 = vpow2.f32 %v14919_v32  ;;  %v2040_v32 = vld [vmem:[#allocation9 + $0x2f8] sm:$0xff] }
 0x7e1   :  { %17893 = vtanh.f32 %v17219_v36  ;;  %v16305_v36 = vpack.c.bf16 %v2029_v6, %v2025_v3  ;;  %v16349_v6 = vpack.c.bf16 %v2055_v50, %v2051_v47  ;;  %v2095_v47 = vld [vmem:[#allocation11 + $0x2a8] sm:$0xff]  ;;  %v2093_v50 = vld [vmem:[#allocation11 + $0x298] sm:$0xff] }
 0x7e8   :  { %v17888_v40 = vpop.eup %17887 }
 0x7e9   :  { %v17890_v44 = vpop.eup %17889  ;;  %v1806_v48 = vadd.f32 1.0, %v17888_v40  ;;  %v16337_v40 = vpack.c.bf16 %v2031_v19, %v2027_v16  ;;  %v16319_v16 = vpack.c.bf16 %v2062_v56, %v2058_v53  ;;  %v2097_v56 = vld [vmem:[#allocation11 + $0x2b8] sm:$0xff] }
 0x7ea   :  { %v1812_v54 = vadd.f32 1.0, %v17890_v44  ;;  %v17892_v58 = vpop.eup %17891  ;;  %v2033_v44 = vld [vmem:[#allocation9 + $0x2c0] sm:$0xff] }
 0x7eb   :  { %17895 = vrcp.f32 %v1806_v48  ;;  %v17894_v62 = vpop.eup %17893  ;;  %v1819_v18 = vadd.f32 1.0, %v17892_v58  ;;  %v2037_v48 = vld [vmem:[#allocation9 + $0x2e0] sm:$0xff]  ;;  %v16339_v58 = vpack.c.bf16 %v2040_v32, %v2036_v29  ;;  %v2066_v29 = vld [vmem:[#allocation9 + $0x3c8] sm:$0xff] }
 0x7ec   :  { %17897 = vrcp.f32 %v1812_v54  ;;  %v16307_v54 = vpack.c.bf16 %v2038_v26, %v2034_v23  ;;  %v16309_v27 = vpack.c.bf16 %v2037_v48, %v2033_v44  ;;  %v2059_v23 = vld [vmem:[#allocation9 + $0x390] sm:$0xff]  ;;  %v2070_v32 = vld [vmem:[#allocation9 + $0x3e8] sm:$0xff] }
 0x7ed   :  { %17899 = vrcp.f32 %v1819_v18  ;;  %v2044_v18 = vld [vmem:[#allocation9 + $0x318] sm:$0xff]  ;;  %v2063_v26 = vld [vmem:[#allocation9 + $0x3b0] sm:$0xff] }
 0x7ee   :  { %v16353_v48 = vpack.c.bf16 %v2063_v26, %v2059_v23  ;;  %v2103_v23 = vld [vmem:[#allocation11 + $0x2e8] sm:$0xff]  ;;  %v2101_v26 = vld [vmem:[#allocation11 + $0x2d8] sm:$0xff] }
 0x7f5   :  { %v17896_v4 = vpop.eup %17895 }
 0x7f6   :  { %v17898_v9 = vpop.eup %17897  ;;  %v1823_v14 = vmul.f32 %v17896_v4, %v17894_v62  ;;  %v2035_v62 = vld [vmem:[#allocation9 + $0x2d0] sm:$0xff] }
 0x7f7   :  { %v1822_v22 = vmul.f32 %v17898_v9, %v19047_v24  ;;  %v17900_v5 = vpop.eup %17899  ;;  %v16331_v24 = vpack.c.bf16 %v2024_v41, %v2020_v57  ;;  %v2039_v4 = vld [vmem:[#allocation9 + $0x2f0] sm:$0xff]  ;;  %v2042_v9 = vld [vmem:[#allocation9 + $0x308] sm:$0xff] }
 0x7f8   :  { %v16341_v55 = vpack.c.bf16 %v2039_v4, %v2035_v62  ;;  %v2043_v57 = vld [vmem:[#allocation9 + $0x310] sm:$0xff]  ;;  %v2069_v4 = vld [vmem:[#allocation9 + $0x3e0] sm:$0xff] }
 0x7f9   :  { %v19091_v25 = vadd.f32 %v1823_v14, %v1822_v22  ;;  %v2046_v14 = vld [vmem:[#allocation9 + $0x328] sm:$0xff]  ;;  %v2048_v22 = vld [vmem:[#allocation9 + $0x338] sm:$0xff]  ;;  %v2047_v41 = vld [vmem:[#allocation9 + $0x330] sm:$0xff] }
 0x7fa   :  { %v16311_v52 = vpack.c.bf16 %v2046_v14, %v2042_v9  ;;  %v16343_v38 = vpack.c.bf16 %v2048_v22, %v2044_v18  ;;  %v16345_v17 = vpack.c.bf16 %v2047_v41, %v2043_v57  ;;  %v2067_v9 = vld [vmem:[#allocation9 + $0x3d0] sm:$0xff]  ;;  %v2087_v57 = vld [vmem:[#allocation11 + $0x268] sm:$0xff]  ;;  %v2085_v41 = vld [vmem:[#allocation11 + $0x258] sm:$0xff] }
 0x7fb   :  { %17901 = vtanh.f32 %v19091_v25  ;;  %v2071_v14 = vld [vmem:[#allocation9 + $0x3f0] sm:$0xff] }
 0x7fc   :  { %v16357_v22 = vpack.c.bf16 %v2071_v14, %v2067_v9  ;;  %v2111_v9 = vld [vmem:[#allocation11 + $0x328] sm:$0xff]  ;;  %v2109_v14 = vld [vmem:[#allocation11 + $0x318] sm:$0xff] }
 0x805   :  { %v17902_v45 = vpop.eup %17901 }
 0x806   :  { %v19094_v1 = vmul.f32 %v17902_v45, %v17900_v5  ;;  %v2050_v5 = vld [vmem:[#allocation9 + $0x348] sm:$0xff] }
 0x807   :  { %v2054_v45 = vld [vmem:[#allocation9 + $0x368] sm:$0xff] }
 0x808   :  { %1899 = vmatmul.mubr.f32.vlgmr.msra.gmra.mrb[14].mxu0 %v19094_v1  ;;  %1970 = vmatmul.mubr.f32.vlgmr.msra.gmra.mrb[14].mxu1 %v19094_v1  ;;  %v16315_v8 = vpack.c.bf16 %v2054_v45, %v2050_v5  ;;  %v2089_v45 = vld [vmem:[#allocation11 + $0x278] sm:$0xff] }
 0x809   :  { %16298 = vmatpush1.bf16.msra.mxu0 %v16297_v49  ;;  %16330 = vmatpush1.bf16.msra.mxu1 %v16329_v11  ;;  %v2052_v49 = vld [vmem:[#allocation9 + $0x358] sm:$0xff] }
 0x80a   :  { %16300 = vmatprep.subr.bf16.mxu0 %v16299_v28  ;;  %16332 = vmatprep.subr.bf16.mxu1 %v16331_v24  ;;  %v2056_v11 = vld [vmem:[#allocation9 + $0x378] sm:$0xff]  ;;  %v2049_v28 = vld [vmem:[#allocation9 + $0x340] sm:$0xff] }
 0x80b   :  { %2233 = vmatprep.mubr.f32.mxu0 %v18415_v0  ;;  %2346 = vmatprep.mubr.f32.mxu1 %v18415_v0  ;;  %v2053_v24 = vld [vmem:[#allocation9 + $0x360] sm:$0xff]  ;;  %v16347_v42 = vpack.c.bf16 %v2056_v11, %v2052_v49 }
 0x80c   :  { %v16317_v3 = vpack.c.bf16 %v2053_v24, %v2049_v28  ;;  %v2082_v49 = vld [vmem:[#allocation11 + $0x240] sm:$0xff]  ;;  %v2084_v28 = vld [vmem:[#allocation11 + $0x250] sm:$0xff] }
 0x80d   :  { %16302 = vmatpush1.bf16.msra.mxu0 %v16301_v60  ;;  %16334 = vmatpush1.bf16.msra.mxu1 %v16333_v63  ;;  %v2060_v60 = vld [vmem:[#allocation9 + $0x398] sm:$0xff]  ;;  %v2086_v11 = vld [vmem:[#allocation11 + $0x260] sm:$0xff]  ;;  %v2088_v24 = vld [vmem:[#allocation11 + $0x270] sm:$0xff] }
 0x80e   :  { %16304 = vmatprep.subr.bf16.mxu0 %v16303_v10  ;;  %16336 = vmatprep.subr.bf16.mxu1 %v16335_v13  ;;  %v2064_v63 = vld [vmem:[#allocation9 + $0x3b8] sm:$0xff]  ;;  %v2057_v10 = vld [vmem:[#allocation9 + $0x380] sm:$0xff] }
 0x80f   :  { %v2061_v13 = vld [vmem:[#allocation9 + $0x3a0] sm:$0xff]  ;;  %v16351_v19 = vpack.c.bf16 %v2064_v63, %v2060_v60 }
 0x810   :  { %v16321_v44 = vpack.c.bf16 %v2061_v13, %v2057_v10  ;;  %v2090_v60 = vld [vmem:[#allocation11 + $0x280] sm:$0xff]  ;;  %v2092_v10 = vld [vmem:[#allocation11 + $0x290] sm:$0xff] }
 0x811   :  { %16306 = vmatpush1.bf16.msra.mxu0 %v16305_v36  ;;  %16338 = vmatpush1.bf16.msra.mxu1 %v16337_v40  ;;  %v2068_v36 = vld [vmem:[#allocation9 + $0x3d8] sm:$0xff]  ;;  %v2094_v63 = vld [vmem:[#allocation11 + $0x2a0] sm:$0xff]  ;;  %v2096_v13 = vld [vmem:[#allocation11 + $0x2b0] sm:$0xff] }
 0x812   :  { %16308 = vmatprep.subr.bf16.mxu0 %v16307_v54  ;;  %16340 = vmatprep.subr.bf16.mxu1 %v16339_v58  ;;  %v2072_v40 = vld [vmem:[#allocation9 + $0x3f8] sm:$0xff]  ;;  %v2065_v54 = vld [vmem:[#allocation9 + $0x3c0] sm:$0xff]  ;;  %v16323_v58 = vpack.c.bf16 %v2070_v32, %v2066_v29 }
 0x813   :  { %v16355_v62 = vpack.c.bf16 %v2072_v40, %v2068_v36  ;;  %v16325_v18 = vpack.c.bf16 %v2069_v4, %v2065_v54  ;;  %v2105_v32 = vld [vmem:[#allocation11 + $0x2f8] sm:$0xff]  ;;  %v2098_v36 = vld [vmem:[#allocation11 + $0x2c0] sm:$0xff]  ;;  %v2100_v54 = vld [vmem:[#allocation11 + $0x2d0] sm:$0xff] }
 0x814   :  { %v2102_v40 = vld [vmem:[#allocation11 + $0x2e0] sm:$0xff]  ;;  %v2107_v4 = vld [vmem:[#allocation11 + $0x308] sm:$0xff] }
 0x815   :  { %16310 = vmatpush1.bf16.msra.mxu0 %v16309_v27  ;;  %16342 = vmatpush1.bf16.msra.mxu1 %v16341_v55  ;;  %v2074_v27 = vld [vmem:[#allocation11 + $0x200] sm:$0xff] }
 0x816   :  { %16312 = vmatprep.subr.bf16.mxu0 %v16311_v52  ;;  %16344 = vmatprep.subr.bf16.mxu1 %v16343_v38  ;;  %v2080_v52 = vld [vmem:[#allocation11 + $0x230] sm:$0xff]  ;;  %v2083_v38 = vld [vmem:[#allocation11 + $0x248] sm:$0xff] }
 0x817   :  { %v19140_v5 = vpack.c.bf16 %v2087_v57, %v2083_v38  ;;  %v2119_v38 = vld [vmem:[#allocation11 + $0x368] sm:$0xff]  ;;  %v2117_v57 = vld [vmem:[#allocation11 + $0x358] sm:$0xff] }
 0x819   :  { %16314 = vmatpush1.bf16.msra.mxu0 %v16313_v30  ;;  %16346 = vmatpush1.bf16.msra.mxu1 %v16345_v17  ;;  %v19142_v30 = vpack.c.bf16 %v2089_v45, %v2085_v41  ;;  %v19144_v17 = vpack.c.bf16 %v2086_v11, %v2082_v49  ;;  %v2121_v45 = vld [vmem:[#allocation11 + $0x378] sm:$0xff]  ;;  %v2114_v49 = vld [vmem:[#allocation11 + $0x340] sm:$0xff] }
 0x81a   :  { %16316 = vmatprep.subr.bf16.mxu0 %v16315_v8  ;;  %16348 = vmatprep.subr.bf16.mxu1 %v16347_v42  ;;  %v19147_v8 = vpack.c.bf16 %v2088_v24, %v2084_v28  ;;  %v2091_v42 = vld [vmem:[#allocation11 + $0x288] sm:$0xff]  ;;  %v2118_v11 = vld [vmem:[#allocation11 + $0x360] sm:$0xff]  ;;  %v19190_v28 = vpack.c.bf16 %v2121_v45, %v2117_v57 }
 0x81b   :  { %v19152_v53 = vpack.c.bf16 %v2095_v47, %v2091_v42  ;;  %v19192_v24 = vpack.c.bf16 %v2118_v11, %v2114_v49  ;;  %v2116_v42 = vld [vmem:[#allocation11 + $0x350] sm:$0xff] }
 0x81c   :  { %v2120_v47 = vld [vmem:[#allocation11 + $0x370] sm:$0xff] }
 0x81d   :  { %16318 = vmatpush1.bf16.msra.mxu0 %v16317_v3  ;;  %16350 = vmatpush1.bf16.msra.mxu1 %v16349_v6  ;;  %v19154_v3 = vpack.c.bf16 %v2097_v56, %v2093_v50  ;;  %v19156_v6 = vpack.c.bf16 %v2094_v63, %v2090_v60  ;;  %v19195_v50 = vpack.c.bf16 %v2120_v47, %v2116_v42  ;;  %v2123_v56 = vld [vmem:[#allocation11 + $0x388] sm:$0xff]  ;;  %v2125_v63 = vld [vmem:[#allocation11 + $0x398] sm:$0xff] }
 0x81e   :  { %16320 = vmatprep.subr.bf16.mxu0 %v16319_v16  ;;  %16352 = vmatprep.subr.bf16.mxu1 %v16351_v19  ;;  %v19159_v16 = vpack.c.bf16 %v2096_v13, %v2092_v10  ;;  %v2099_v19 = vld [vmem:[#allocation11 + $0x2c8] sm:$0xff]  ;;  %v2129_v13 = vld [vmem:[#allocation11 + $0x3b8] sm:$0xff] }
 0x81f   :  { %v19164_v29 = vpack.c.bf16 %v2103_v23, %v2099_v19  ;;  %v2127_v60 = vld [vmem:[#allocation11 + $0x3a8] sm:$0xff]  ;;  %v2122_v19 = vld [vmem:[#allocation11 + $0x380] sm:$0xff] }
 0x820   :  { %v19200_v10 = vpack.c.bf16 %v2127_v60, %v2123_v56  ;;  %v2126_v23 = vld [vmem:[#allocation11 + $0x3a0] sm:$0xff] }
 0x821   :  { %16322 = vmatpush1.bf16.msra.mxu0 %v16321_v44  ;;  %16354 = vmatpush1.bf16.msra.mxu1 %v16353_v48  ;;  %v19166_v44 = vpack.c.bf16 %v2105_v32, %v2101_v26  ;;  %v19168_v48 = vpack.c.bf16 %v2102_v40, %v2098_v36  ;;  %v19202_v26 = vpack.c.bf16 %v2129_v13, %v2125_v63  ;;  %v2124_v36 = vld [vmem:[#allocation11 + $0x390] sm:$0xff] }
 0x822   :  { %16324 = vmatprep.subr.bf16.mxu0 %v16323_v58  ;;  %16356 = vmatprep.subr.bf16.mxu1 %v16355_v62  ;;  %v2104_v58 = vld [vmem:[#allocation11 + $0x2f0] sm:$0xff]  ;;  %v19204_v32 = vpack.c.bf16 %v2126_v23, %v2122_v19 }
 0x823   :  { %v19171_v62 = vpack.c.bf16 %v2104_v58, %v2100_v54  ;;  %v2128_v40 = vld [vmem:[#allocation11 + $0x3b0] sm:$0xff]  ;;  %v2131_v58 = vld [vmem:[#allocation11 + $0x3c8] sm:$0xff] }
 0x824   :  { %v19207_v54 = vpack.c.bf16 %v2128_v40, %v2124_v36 }
 0x825   :  { %16326 = vmatpush1.bf16.msra.mxu0 %v16325_v18  ;;  %16358 = vmatpush1.bf16.msra.mxu1 %v16357_v22  ;;  %v19176_v18 = vpack.c.bf16 %v2111_v9, %v2107_v4  ;;  %v2113_v22 = vld [vmem:[#allocation11 + $0x338] sm:$0xff]  ;;  %v2135_v4 = vld [vmem:[#allocation11 + $0x3e8] sm:$0xff] }
 0x826   :  { %v2133_v9 = vld [vmem:[#allocation11 + $0x3d8] sm:$0xff] }
 0x828   :  { %2234 = vmatmul.mubr.f32.vlgmr.msra.gmra.mrb[16].mxu0 %v18820_v51  ;;  %2347 = vmatmul.mubr.f32.vlgmr.msra.gmra.mrb[16].mxu1 %v18820_v51  ;;  %v2075_v51 = vld [vmem:[#allocation11 + $0x208] sm:$0xff] }
 0x829   :  { %2239 = vmatprep.mubr.f32.mxu0 %v18415_v0  ;;  %2352 = vmatprep.mubr.f32.mxu1 %v18415_v0 }
 0x82c   :  { %2240 = vmatmul.mubr.f32.gmra.mrb[18].mxu0 %v18866_v7  ;;  %2353 = vmatmul.mubr.f32.gmra.mrb[18].mxu1 %v18866_v7  ;;  %v2079_v7 = vld [vmem:[#allocation11 + $0x228] sm:$0xff] }
 0x82d   :  { %2245 = vmatprep.mubr.f32.mxu0 %v18415_v0  ;;  %2358 = vmatprep.mubr.f32.mxu1 %v18415_v0 }
 0x830   :  { %2246 = vmatmul.mubr.f32.gmra.mrb[20].mxu0 %v18912_v20  ;;  %2359 = vmatmul.mubr.f32.gmra.mrb[20].mxu1 %v18912_v20  ;;  %v2077_v20 = vld [vmem:[#allocation11 + $0x218] sm:$0xff] }
 0x831   :  { %2251 = vmatprep.mubr.f32.mxu0 %v18415_v0  ;;  %2364 = vmatprep.mubr.f32.mxu1 %v18415_v0 }
 0x834   :  { %2252 = vmatmul.mubr.f32.gmra.mrb[22].mxu0 %v18958_v46  ;;  %2365 = vmatmul.mubr.f32.gmra.mrb[22].mxu1 %v18958_v46  ;;  %v19128_v46 = vpack.c.bf16 %v2079_v7, %v2075_v51  ;;  %v2106_v51 = vld [vmem:[#allocation11 + $0x300] sm:$0xff] }
 0x835   :  { %2257 = vmatprep.mubr.f32.mxu0 %v18415_v0  ;;  %2370 = vmatprep.mubr.f32.mxu1 %v18415_v0  ;;  %v2110_v7 = vld [vmem:[#allocation11 + $0x320] sm:$0xff] }
 0x836   :  { %16360 = vmatprep.subr.bf16.mxu0 %v19128_v46 }
 0x838   :  { %2258 = vmatmul.mubr.f32.gmra.mrb[24].mxu0 %v19004_v12  ;;  %2371 = vmatmul.mubr.f32.gmra.mrb[24].mxu1 %v19004_v12  ;;  %v2081_v12 = vld [vmem:[#allocation11 + $0x238] sm:$0xff] }
 0x839   :  { %2263 = vmatprep.mubr.f32.mxu0 %v18415_v0  ;;  %2376 = vmatprep.mubr.f32.mxu1 %v18415_v0  ;;  %v19130_v55 = vpack.c.bf16 %v2081_v12, %v2077_v20  ;;  %v19178_v20 = vpack.c.bf16 %v2113_v22, %v2109_v14  ;;  %v19180_v12 = vpack.c.bf16 %v2110_v7, %v2106_v51  ;;  %v2137_v22 = vld [vmem:[#allocation11 + $0x3f8] sm:$0xff]  ;;  %v2130_v51 = vld [vmem:[#allocation11 + $0x3c0] sm:$0xff] }
 0x83a   :  { %v19212_v14 = vpack.c.bf16 %v2135_v4, %v2131_v58  ;;  %v2134_v7 = vld [vmem:[#allocation11 + $0x3e0] sm:$0xff] }
 0x83b   :  { %16392 = vmatprep.subr.bf16.mxu1 %v19130_v55 }
 0x83c   :  { %2264 = vmatmul.mubr.f32.gmra.mrb[26].mxu0 %v19050_v21  ;;  %2377 = vmatmul.mubr.f32.gmra.mrb[26].mxu1 %v19050_v21  ;;  %v2078_v21 = vld [vmem:[#allocation11 + $0x220] sm:$0xff] }
 0x83d   :  { %2269 = vmatprep.mubr.f32.mxu0 %v18415_v0  ;;  %2382 = vmatprep.mubr.f32.mxu1 %v18415_v0  ;;  %v19132_v34 = vpack.c.bf16 %v2078_v21, %v2074_v27  ;;  %v2108_v27 = vld [vmem:[#allocation11 + $0x310] sm:$0xff] }
 0x83e   :  { %v2112_v21 = vld [vmem:[#allocation11 + $0x330] sm:$0xff] }
 0x83f   :  { %16362 = vmatpush1.bf16.msra.mxu0 %v19132_v34 }
 0x840   :  { %2270 = vmatmul.mubr.f32.gmra.mrb[28].mxu0 %v19094_v1  ;;  %2383 = vmatmul.mubr.f32.gmra.mrb[28].mxu1 %v19094_v1  ;;  %v19135_v1 = vpack.c.bf16 %v2080_v52, %v2076_v15  ;;  %v19183_v15 = vpack.c.bf16 %v2112_v21, %v2108_v27  ;;  %v2115_v52 = vld [vmem:[#allocation11 + $0x348] sm:$0xff]  ;;  %v19214_v27 = vpack.c.bf16 %v2137_v22, %v2133_v9 }
 0x841   :  { %2275 = vmatprep.mubr.f32.mxu0 %v18415_v0  ;;  %2388 = vmatprep.mubr.f32.mxu1 %v18415_v0  ;;  %v19188_v41 = vpack.c.bf16 %v2119_v38, %v2115_v52  ;;  %v19216_v21 = vpack.c.bf16 %v2134_v7, %v2130_v51  ;;  %v2132_v52 = vld [vmem:[#allocation11 + $0x3d0] sm:$0xff] }
 0x842   :  { %16394 = vmatpush1.bf16.msra.mxu1 %v19135_v1  ;;  %16364 = vmatprep.subr.bf16.mxu0 %v19140_v5  ;;  %v2136_v38 = vld [vmem:[#allocation11 + $0x3f0] sm:$0xff] }
 0x843   :  { %16396 = vmatprep.subr.bf16.mxu1 %v19142_v30  ;;  %16366 = vmatpush1.bf16.msra.mxu0 %v19144_v17  ;;  %v19219_v57 = vpack.c.bf16 %v2136_v38, %v2132_v52 }
 0x844   :  { %16368 = vmatprep.subr.bf16.mxu0 %v19152_v53 }
 0x846   :  { %16398 = vmatpush1.bf16.msra.mxu1 %v19147_v8 }
 0x847   :  { %16400 = vmatprep.subr.bf16.mxu1 %v19154_v3  ;;  %16370 = vmatpush1.bf16.msra.mxu0 %v19156_v6 }
 0x848   :  { %16372 = vmatprep.subr.bf16.mxu0 %v19164_v29 }
 0x84a   :  { %16402 = vmatpush1.bf16.msra.mxu1 %v19159_v16 }
 0x84b   :  { %16404 = vmatprep.subr.bf16.mxu1 %v19166_v44  ;;  %16374 = vmatpush1.bf16.msra.mxu0 %v19168_v48 }
 0x84c   :  { %16376 = vmatprep.subr.bf16.mxu0 %v19176_v18 }
 0x84e   :  { %16406 = vmatpush1.bf16.msra.mxu1 %v19171_v62 }
 0x84f   :  { %16408 = vmatprep.subr.bf16.mxu1 %v19178_v20  ;;  %16378 = vmatpush1.bf16.msra.mxu0 %v19180_v12 }
 0x850   :  { %16380 = vmatprep.subr.bf16.mxu0 %v19188_v41 }
 0x852   :  { %16410 = vmatpush1.bf16.msra.mxu1 %v19183_v15 }
 0x853   :  { %16412 = vmatprep.subr.bf16.mxu1 %v19190_v28  ;;  %16382 = vmatpush1.bf16.msra.mxu0 %v19192_v24 }
 0x854   :  { %16384 = vmatprep.subr.bf16.mxu0 %v19200_v10 }
 0x856   :  { %16414 = vmatpush1.bf16.msra.mxu1 %v19195_v50 }
 0x857   :  { %16416 = vmatprep.subr.bf16.mxu1 %v19202_v26  ;;  %16386 = vmatpush1.bf16.msra.mxu0 %v19204_v32 }
 0x858   :  { %16388 = vmatprep.subr.bf16.mxu0 %v19212_v14 }
 0x85a   :  { %16418 = vmatpush1.bf16.msra.mxu1 %v19207_v54 }
 0x85b   :  { %16420 = vmatprep.subr.bf16.mxu1 %v19214_v27  ;;  %16390 = vmatpush1.bf16.msra.mxu0 %v19216_v21 }
 0x85c   :  { %16424 = vmatprep.subr.bf16.mxu0 %v19128_v46 }
 0x85e   :  { %16422 = vmatpush1.bf16.msra.mxu1 %v19219_v57 }
 0x85f   :  { %16456 = vmatprep.subr.bf16.mxu1 %v19130_v55 }
 0x8db   :  { %v1900_v45 = vpop.f32.mrb[14].mxu0  ;;  %v1971_v49 = vpop.f32.mrb[14].mxu1 }
 0x8dc   :  { %v17205_v11 = vadd.f32 %v1900_v45, %v18797_v37  ;;  %v1902_v42 = vpop.f32.mrb[15].mxu0  ;;  %v1973_v47 = vpop.f32.mrb[15].mxu1  ;;  %v17221_v23 = vadd.f32 %v1971_v49, %v18814_v2  ;;  %v2428_v49 = vld [vmem:[#allocation6 + $0x8] sm:$0xff] }
 0x8dd   :  { %v17206_v56 = vadd.f32 %v1902_v42, %v18801_v39  ;;  %v17222_v13 = vadd.f32 %v1973_v47, %v18808_v59 }
 0x8de   :  { %v14920_v60 = vmul.f32 -1.442695, %v17205_v11 }
 0x8df   :  { %v14921_v63 = vmul.f32 -1.442695, %v17206_v56  ;;  %v14922_v19 = vmul.f32 -1.442695, %v17222_v13 }
 0x8e0   :  { %17903 = vpow2.f32 %v14920_v60 }
 0x8e1   :  { %17905 = vpow2.f32 %v14921_v63 }
 0x8e2   :  { %17907 = vpow2.f32 %v14922_v19 }
 0x8e3   :  { %17909 = vtanh.f32 %v17221_v23 }
 0x8ea   :  { %v17904_v36 = vpop.eup %17903 }
 0x8eb   :  { %v17906_v40 = vpop.eup %17905  ;;  %v1983_v58 = vadd.f32 1.0, %v17904_v36 }
 0x8ec   :  { %v1989_v4 = vadd.f32 1.0, %v17906_v40  ;;  %v17908_v37 = vpop.eup %17907 }
 0x8ed   :  { %17911 = vrcp.f32 %v1983_v58  ;;  %v17910_v9 = vpop.eup %17909  ;;  %v1996_v7 = vadd.f32 1.0, %v17908_v37 }
 0x8ee   :  { %17913 = vrcp.f32 %v1989_v4 }
 0x8ef   :  { %17915 = vrcp.f32 %v1996_v7  ;;  %v2430_v7 = vld [vmem:[#allocation8 + $0x8] sm:$0xff] }
 0x8f7   :  { %v17912_v39 = vpop.eup %17911 }
 0x8f8   :  { %v17914_v22 = vpop.eup %17913  ;;  %v2000_v51 = vmul.f32 %v17912_v39, %v17910_v9 }
 0x8f9   :  { %v1999_v52 = vmul.f32 %v17914_v22, %v19091_v25  ;;  %v17916_v2 = vpop.eup %17915  ;;  %v2139_v25 = vld [vmem:[#allocation12 + $0x4] sm:$0xf] }
 0x8fa   :  { %v19269_v11 = vrot.slane %v2139_v25, %v314_v33  ;;  %v19273_v42 = vrot.slane %v2139_v25, %v318_v35  ;;  %v19279_v40 = vrot.slane %v2139_v25, %v326_v43  ;;  %v19284_v35 = vrot.slane %v2139_v25, %v322_v61 }
 0x8fb   :  { %v2001_v59 = vadd.f32 %v2000_v51, %v1999_v52 }
 0x8fd   :  { %17917 = vtanh.f32 %v2001_v59  ;;  %2007 = vst [vmem:[#allocation23] sm:$0xff] %v2001_v59 }
 0x907   :  { %v17918_v38 = vpop.eup %17917 }
 0x908   :  { %v2003_v45 = vmul.f32 %v17918_v38, %v17916_v2 }
 0x90a   :  { %2006 = vst [vmem:[#allocation21] sm:$0xff] %v2003_v45  ;;  %2276 = vmatmul.mubr.f32.gmra.mrb[30].mxu0 %v2003_v45  ;;  %2389 = vmatmul.mubr.f32.gmra.mrb[30].mxu1 %v2003_v45 }
 0x90b   :  { %2499 = vmatprep.mubr.f32.mxu0 %v18415_v0  ;;  %2570 = vmatprep.mubr.f32.mxu1 %v18415_v0 }
 0x90e   :  { %2500 = vmatmul.mubr.f32.vlgmr.msra.gmra.mrb[16].mxu0 %v2428_v49  ;;  %2571 = vmatmul.mubr.f32.vlgmr.msra.gmra.mrb[16].mxu1 %v2428_v49 }
 0x90f   :  { %16426 = vmatpush1.bf16.msra.mxu0 %v19132_v34  ;;  %16458 = vmatpush1.bf16.msra.mxu1 %v19135_v1 }
 0x910   :  { %16428 = vmatprep.subr.bf16.mxu0 %v19140_v5  ;;  %16460 = vmatprep.subr.bf16.mxu1 %v19142_v30 }
 0x911   :  { %2674 = vmatprep.mubr.f32.mxu0 %v18415_v0  ;;  %2745 = vmatprep.mubr.f32.mxu1 %v18415_v0 }
 0x913   :  { %16430 = vmatpush1.bf16.msra.mxu0 %v19144_v17  ;;  %16462 = vmatpush1.bf16.msra.mxu1 %v19147_v8 }
 0x914   :  { %16432 = vmatprep.subr.bf16.mxu0 %v19152_v53  ;;  %16464 = vmatprep.subr.bf16.mxu1 %v19154_v3 }
 0x917   :  { %16434 = vmatpush1.bf16.msra.mxu0 %v19156_v6  ;;  %16466 = vmatpush1.bf16.msra.mxu1 %v19159_v16 }
 0x918   :  { %16436 = vmatprep.subr.bf16.mxu0 %v19164_v29  ;;  %16468 = vmatprep.subr.bf16.mxu1 %v19166_v44 }
 0x91b   :  { %16438 = vmatpush1.bf16.msra.mxu0 %v19168_v48  ;;  %16470 = vmatpush1.bf16.msra.mxu1 %v19171_v62 }
 0x91c   :  { %16440 = vmatprep.subr.bf16.mxu0 %v19176_v18  ;;  %16472 = vmatprep.subr.bf16.mxu1 %v19178_v20 }
 0x91f   :  { %16442 = vmatpush1.bf16.msra.mxu0 %v19180_v12  ;;  %16474 = vmatpush1.bf16.msra.mxu1 %v19183_v15 }
 0x920   :  { %16444 = vmatprep.subr.bf16.mxu0 %v19188_v41  ;;  %16476 = vmatprep.subr.bf16.mxu1 %v19190_v28 }
 0x923   :  { %16446 = vmatpush1.bf16.msra.mxu0 %v19192_v24  ;;  %16478 = vmatpush1.bf16.msra.mxu1 %v19195_v50 }
 0x924   :  { %16448 = vmatprep.subr.bf16.mxu0 %v19200_v10  ;;  %16480 = vmatprep.subr.bf16.mxu1 %v19202_v26 }
 0x927   :  { %16450 = vmatpush1.bf16.msra.mxu0 %v19204_v32  ;;  %16482 = vmatpush1.bf16.msra.mxu1 %v19207_v54 }
 0x928   :  { %16452 = vmatprep.subr.bf16.mxu0 %v19212_v14  ;;  %16484 = vmatprep.subr.bf16.mxu1 %v19214_v27 }
 0x92b   :  { %16454 = vmatpush1.bf16.msra.mxu0 %v19216_v21  ;;  %16486 = vmatpush1.bf16.msra.mxu1 %v19219_v57 }
 0x92c   :  { %16488 = vmatprep.subr.bf16.mxu0 %v19128_v46  ;;  %16520 = vmatprep.subr.bf16.mxu1 %v19130_v55 }
 0x9e1   :  { %v2501_v47 = vpop.f32.mrb[16].mxu0  ;;  %v2572_v56 = vpop.f32.mrb[16].mxu1 }
 0x9e2   :  { %v17223_v60 = vadd.f32 %v2501_v47, %v19269_v11  ;;  %v2503_v63 = vpop.f32.mrb[17].mxu0  ;;  %v2574_v13 = vpop.f32.mrb[17].mxu1  ;;  %v17239_v4 = vadd.f32 %v2572_v56, %v19284_v35 }
 0x9e3   :  { %v17224_v19 = vadd.f32 %v2503_v63, %v19273_v42  ;;  %v17240_v33 = vadd.f32 %v2574_v13, %v19279_v40 }
 0x9e4   :  { %v14923_v23 = vmul.f32 -1.442695, %v17223_v60 }
 0x9e5   :  { %v14924_v36 = vmul.f32 -1.442695, %v17224_v19  ;;  %v14925_v58 = vmul.f32 -1.442695, %v17240_v33 }
 0x9e6   :  { %17919 = vpow2.f32 %v14923_v23 }
 0x9e7   :  { %17921 = vpow2.f32 %v14924_v36 }
 0x9e8   :  { %17923 = vpow2.f32 %v14925_v58 }
 0x9e9   :  { %17925 = vtanh.f32 %v17239_v4 }
 0x9f0   :  { %v17920_v37 = vpop.eup %17919 }
 0x9f1   :  { %v17922_v9 = vpop.eup %17921  ;;  %v2584_v39 = vadd.f32 1.0, %v17920_v37 }
 0x9f2   :  { %v2590_v22 = vadd.f32 1.0, %v17922_v9  ;;  %v17924_v43 = vpop.eup %17923 }
 0x9f3   :  { %17927 = vrcp.f32 %v2584_v39  ;;  %v17926_v51 = vpop.eup %17925  ;;  %v2597_v38 = vadd.f32 1.0, %v17924_v43 }
 0x9f4   :  { %17929 = vrcp.f32 %v2590_v22 }
 0x9f5   :  { %17931 = vrcp.f32 %v2597_v38 }
 0x9fd   :  { %v17928_v52 = vpop.eup %17927 }
 0x9fe   :  { %v17930_v59 = vpop.eup %17929  ;;  %v2601_v2 = vmul.f32 %v17928_v52, %v17926_v51 }
 0x9ff   :  { %v2600_v61 = vmul.f32 %v17930_v59, %v2430_v7  ;;  %v17932_v49 = vpop.eup %17931 }
 0xa01   :  { %v19287_v45 = vadd.f32 %v2601_v2, %v2600_v61 }
 0xa03   :  { %17933 = vtanh.f32 %v19287_v45 }
 0xa0d   :  { %v17934_v25 = vpop.eup %17933 }
 0xa0e   :  { %v19290_v47 = vmul.f32 %v17934_v25, %v17932_v49 }
 0xa10   :  { %2675 = vmatmul.mubr.f32.vlgmr.msra.gmra.mrb[18].mxu0 %v19290_v47  ;;  %2746 = vmatmul.mubr.f32.vlgmr.msra.gmra.mrb[18].mxu1 %v19290_v47 }
 0xa11   :  { %16490 = vmatpush1.bf16.msra.mxu0 %v19132_v34  ;;  %16522 = vmatpush1.bf16.msra.mxu1 %v19135_v1 }
 0xa12   :  { %16492 = vmatprep.subr.bf16.mxu0 %v19140_v5  ;;  %16524 = vmatprep.subr.bf16.mxu1 %v19142_v30 }
 0xa13   :  { %2849 = vmatprep.mubr.f32.mxu0 %v18415_v0  ;;  %2920 = vmatprep.mubr.f32.mxu1 %v18415_v0 }
 0xa15   :  { %16494 = vmatpush1.bf16.msra.mxu0 %v19144_v17  ;;  %16526 = vmatpush1.bf16.msra.mxu1 %v19147_v8 }
 0xa16   :  { %16496 = vmatprep.subr.bf16.mxu0 %v19152_v53  ;;  %16528 = vmatprep.subr.bf16.mxu1 %v19154_v3 }
 0xa19   :  { %16498 = vmatpush1.bf16.msra.mxu0 %v19156_v6  ;;  %16530 = vmatpush1.bf16.msra.mxu1 %v19159_v16 }
 0xa1a   :  { %16500 = vmatprep.subr.bf16.mxu0 %v19164_v29  ;;  %16532 = vmatprep.subr.bf16.mxu1 %v19166_v44 }
 0xa1d   :  { %16502 = vmatpush1.bf16.msra.mxu0 %v19168_v48  ;;  %16534 = vmatpush1.bf16.msra.mxu1 %v19171_v62 }
 0xa1e   :  { %16504 = vmatprep.subr.bf16.mxu0 %v19176_v18  ;;  %16536 = vmatprep.subr.bf16.mxu1 %v19178_v20 }
 0xa21   :  { %16506 = vmatpush1.bf16.msra.mxu0 %v19180_v12  ;;  %16538 = vmatpush1.bf16.msra.mxu1 %v19183_v15 }
 0xa22   :  { %16508 = vmatprep.subr.bf16.mxu0 %v19188_v41  ;;  %16540 = vmatprep.subr.bf16.mxu1 %v19190_v28 }
 0xa25   :  { %16510 = vmatpush1.bf16.msra.mxu0 %v19192_v24  ;;  %16542 = vmatpush1.bf16.msra.mxu1 %v19195_v50 }
 0xa26   :  { %16512 = vmatprep.subr.bf16.mxu0 %v19200_v10  ;;  %16544 = vmatprep.subr.bf16.mxu1 %v19202_v26 }
 0xa29   :  { %16514 = vmatpush1.bf16.msra.mxu0 %v19204_v32  ;;  %16546 = vmatpush1.bf16.msra.mxu1 %v19207_v54 }
 0xa2a   :  { %16516 = vmatprep.subr.bf16.mxu0 %v19212_v14  ;;  %16548 = vmatprep.subr.bf16.mxu1 %v19214_v27 }
 0xa2d   :  { %16518 = vmatpush1.bf16.msra.mxu0 %v19216_v21  ;;  %16550 = vmatpush1.bf16.msra.mxu1 %v19219_v57 }
 0xa2e   :  { %16552 = vmatprep.subr.bf16.mxu0 %v19128_v46  ;;  %16584 = vmatprep.subr.bf16.mxu1 %v19130_v55 }
 0xae3   :  { %v2676_v56 = vpop.f32.mrb[18].mxu0  ;;  %v2747_v60 = vpop.f32.mrb[18].mxu1 }
 0xae4   :  { %v17225_v63 = vadd.f32 %v2676_v56, %v19269_v11  ;;  %v2678_v13 = vpop.f32.mrb[19].mxu0  ;;  %v2749_v19 = vpop.f32.mrb[19].mxu1  ;;  %v17241_v37 = vadd.f32 %v2747_v60, %v19284_v35 }
 0xae5   :  { %v17226_v23 = vadd.f32 %v2678_v13, %v19273_v42  ;;  %v17242_v58 = vadd.f32 %v2749_v19, %v19279_v40 }
 0xae6   :  { %v14926_v36 = vmul.f32 -1.442695, %v17225_v63 }
 0xae7   :  { %v14927_v33 = vmul.f32 -1.442695, %v17226_v23  ;;  %v14928_v4 = vmul.f32 -1.442695, %v17242_v58 }
 0xae8   :  { %17935 = vpow2.f32 %v14926_v36 }
 0xae9   :  { %17937 = vpow2.f32 %v14927_v33 }
 0xaea   :  { %17939 = vpow2.f32 %v14928_v4 }
 0xaeb   :  { %17941 = vtanh.f32 %v17241_v37 }
 0xaf2   :  { %v17936_v9 = vpop.eup %17935 }
 0xaf3   :  { %v17938_v39 = vpop.eup %17937  ;;  %v2759_v22 = vadd.f32 1.0, %v17936_v9 }
 0xaf4   :  { %v2765_v43 = vadd.f32 1.0, %v17938_v39  ;;  %v17940_v51 = vpop.eup %17939 }
 0xaf5   :  { %17943 = vrcp.f32 %v2759_v22  ;;  %v17942_v7 = vpop.eup %17941  ;;  %v2772_v38 = vadd.f32 1.0, %v17940_v51 }
 0xaf6   :  { %17945 = vrcp.f32 %v2765_v43 }
 0xaf7   :  { %17947 = vrcp.f32 %v2772_v38 }
 0xaff   :  { %v17944_v52 = vpop.eup %17943 }
 0xb00   :  { %v17946_v59 = vpop.eup %17945  ;;  %v2776_v2 = vmul.f32 %v17944_v52, %v17942_v7 }
 0xb01   :  { %v2775_v61 = vmul.f32 %v17946_v59, %v19287_v45  ;;  %v17948_v25 = vpop.eup %17947 }
 0xb03   :  { %v19333_v49 = vadd.f32 %v2776_v2, %v2775_v61 }
 0xb05   :  { %17949 = vtanh.f32 %v19333_v49 }
 0xb0f   :  { %v17950_v56 = vpop.eup %17949 }
 0xb10   :  { %v19336_v60 = vmul.f32 %v17950_v56, %v17948_v25 }
 0xb12   :  { %2850 = vmatmul.mubr.f32.vlgmr.msra.gmra.mrb[20].mxu0 %v19336_v60  ;;  %2921 = vmatmul.mubr.f32.vlgmr.msra.gmra.mrb[20].mxu1 %v19336_v60 }
 0xb13   :  { %16554 = vmatpush1.bf16.msra.mxu0 %v19132_v34  ;;  %16586 = vmatpush1.bf16.msra.mxu1 %v19135_v1 }
 0xb14   :  { %16556 = vmatprep.subr.bf16.mxu0 %v19140_v5  ;;  %16588 = vmatprep.subr.bf16.mxu1 %v19142_v30 }
 0xb15   :  { %3024 = vmatprep.mubr.f32.mxu0 %v18415_v0  ;;  %3095 = vmatprep.mubr.f32.mxu1 %v18415_v0 }
 0xb17   :  { %16558 = vmatpush1.bf16.msra.mxu0 %v19144_v17  ;;  %16590 = vmatpush1.bf16.msra.mxu1 %v19147_v8 }
 0xb18   :  { %16560 = vmatprep.subr.bf16.mxu0 %v19152_v53  ;;  %16592 = vmatprep.subr.bf16.mxu1 %v19154_v3 }
 0xb1b   :  { %16562 = vmatpush1.bf16.msra.mxu0 %v19156_v6  ;;  %16594 = vmatpush1.bf16.msra.mxu1 %v19159_v16 }
 0xb1c   :  { %16564 = vmatprep.subr.bf16.mxu0 %v19164_v29  ;;  %16596 = vmatprep.subr.bf16.mxu1 %v19166_v44 }
 0xb1f   :  { %16566 = vmatpush1.bf16.msra.mxu0 %v19168_v48  ;;  %16598 = vmatpush1.bf16.msra.mxu1 %v19171_v62 }
 0xb20   :  { %16568 = vmatprep.subr.bf16.mxu0 %v19176_v18  ;;  %16600 = vmatprep.subr.bf16.mxu1 %v19178_v20 }
 0xb23   :  { %16570 = vmatpush1.bf16.msra.mxu0 %v19180_v12  ;;  %16602 = vmatpush1.bf16.msra.mxu1 %v19183_v15 }
 0xb24   :  { %16572 = vmatprep.subr.bf16.mxu0 %v19188_v41  ;;  %16604 = vmatprep.subr.bf16.mxu1 %v19190_v28 }
 0xb27   :  { %16574 = vmatpush1.bf16.msra.mxu0 %v19192_v24  ;;  %16606 = vmatpush1.bf16.msra.mxu1 %v19195_v50 }
 0xb28   :  { %16576 = vmatprep.subr.bf16.mxu0 %v19200_v10  ;;  %16608 = vmatprep.subr.bf16.mxu1 %v19202_v26 }
 0xb2b   :  { %16578 = vmatpush1.bf16.msra.mxu0 %v19204_v32  ;;  %16610 = vmatpush1.bf16.msra.mxu1 %v19207_v54 }
 0xb2c   :  { %16580 = vmatprep.subr.bf16.mxu0 %v19212_v14  ;;  %16612 = vmatprep.subr.bf16.mxu1 %v19214_v27 }
 0xb2f   :  { %16582 = vmatpush1.bf16.msra.mxu0 %v19216_v21  ;;  %16614 = vmatpush1.bf16.msra.mxu1 %v19219_v57 }
 0xb30   :  { %16616 = vmatprep.subr.bf16.mxu0 %v19128_v46  ;;  %16648 = vmatprep.subr.bf16.mxu1 %v19130_v55 }
 0xbe5   :  { %v2851_v45 = vpop.f32.mrb[20].mxu0  ;;  %v2922_v63 = vpop.f32.mrb[20].mxu1 }
 0xbe6   :  { %v17227_v13 = vadd.f32 %v2851_v45, %v19269_v11  ;;  %v2853_v19 = vpop.f32.mrb[21].mxu0  ;;  %v2924_v23 = vpop.f32.mrb[21].mxu1  ;;  %v17243_v9 = vadd.f32 %v2922_v63, %v19284_v35 }
 0xbe7   :  { %v17228_v36 = vadd.f32 %v2853_v19, %v19273_v42  ;;  %v17244_v4 = vadd.f32 %v2924_v23, %v19279_v40 }
 0xbe8   :  { %v14929_v33 = vmul.f32 -1.442695, %v17227_v13 }
 0xbe9   :  { %v14930_v58 = vmul.f32 -1.442695, %v17228_v36  ;;  %v14931_v37 = vmul.f32 -1.442695, %v17244_v4 }
 0xbea   :  { %17951 = vpow2.f32 %v14929_v33 }
 0xbeb   :  { %17953 = vpow2.f32 %v14930_v58 }
 0xbec   :  { %17955 = vpow2.f32 %v14931_v37 }
 0xbed   :  { %17957 = vtanh.f32 %v17243_v9 }
 0xbf4   :  { %v17952_v39 = vpop.eup %17951 }
 0xbf5   :  { %v17954_v22 = vpop.eup %17953  ;;  %v2934_v43 = vadd.f32 1.0, %v17952_v39 }
 0xbf6   :  { %v2940_v51 = vadd.f32 1.0, %v17954_v22  ;;  %v17956_v7 = vpop.eup %17955 }
 0xbf7   :  { %17959 = vrcp.f32 %v2934_v43  ;;  %v17958_v52 = vpop.eup %17957  ;;  %v2947_v61 = vadd.f32 1.0, %v17956_v7 }
 0xbf8   :  { %17961 = vrcp.f32 %v2940_v51 }
 0xbf9   :  { %17963 = vrcp.f32 %v2947_v61 }
 0xc01   :  { %v17960_v59 = vpop.eup %17959 }
 0xc02   :  { %v17962_v2 = vpop.eup %17961  ;;  %v2951_v38 = vmul.f32 %v17960_v59, %v17958_v52 }
 0xc03   :  { %v2950_v25 = vmul.f32 %v17962_v2, %v19333_v49  ;;  %v17964_v45 = vpop.eup %17963 }
 0xc05   :  { %v19379_v56 = vadd.f32 %v2951_v38, %v2950_v25 }
 0xc07   :  { %17965 = vtanh.f32 %v19379_v56 }
 0xc11   :  { %v17966_v63 = vpop.eup %17965 }
 0xc12   :  { %v19382_v13 = vmul.f32 %v17966_v63, %v17964_v45 }
 0xc14   :  { %3025 = vmatmul.mubr.f32.vlgmr.msra.gmra.mrb[22].mxu0 %v19382_v13  ;;  %3096 = vmatmul.mubr.f32.vlgmr.msra.gmra.mrb[22].mxu1 %v19382_v13 }
 0xc15   :  { %16618 = vmatpush1.bf16.msra.mxu0 %v19132_v34  ;;  %16650 = vmatpush1.bf16.msra.mxu1 %v19135_v1 }
 0xc16   :  { %16620 = vmatprep.subr.bf16.mxu0 %v19140_v5  ;;  %16652 = vmatprep.subr.bf16.mxu1 %v19142_v30 }
 0xc17   :  { %3199 = vmatprep.mubr.f32.mxu0 %v18415_v0  ;;  %3270 = vmatprep.mubr.f32.mxu1 %v18415_v0 }
 0xc19   :  { %16622 = vmatpush1.bf16.msra.mxu0 %v19144_v17  ;;  %16654 = vmatpush1.bf16.msra.mxu1 %v19147_v8 }
 0xc1a   :  { %16624 = vmatprep.subr.bf16.mxu0 %v19152_v53  ;;  %16656 = vmatprep.subr.bf16.mxu1 %v19154_v3 }
 0xc1d   :  { %16626 = vmatpush1.bf16.msra.mxu0 %v19156_v6  ;;  %16658 = vmatpush1.bf16.msra.mxu1 %v19159_v16 }
 0xc1e   :  { %16628 = vmatprep.subr.bf16.mxu0 %v19164_v29  ;;  %16660 = vmatprep.subr.bf16.mxu1 %v19166_v44 }
 0xc21   :  { %16630 = vmatpush1.bf16.msra.mxu0 %v19168_v48  ;;  %16662 = vmatpush1.bf16.msra.mxu1 %v19171_v62 }
 0xc22   :  { %16632 = vmatprep.subr.bf16.mxu0 %v19176_v18  ;;  %16664 = vmatprep.subr.bf16.mxu1 %v19178_v20 }
 0xc25   :  { %16634 = vmatpush1.bf16.msra.mxu0 %v19180_v12  ;;  %16666 = vmatpush1.bf16.msra.mxu1 %v19183_v15 }
 0xc26   :  { %16636 = vmatprep.subr.bf16.mxu0 %v19188_v41  ;;  %16668 = vmatprep.subr.bf16.mxu1 %v19190_v28 }
 0xc29   :  { %16638 = vmatpush1.bf16.msra.mxu0 %v19192_v24  ;;  %16670 = vmatpush1.bf16.msra.mxu1 %v19195_v50 }
 0xc2a   :  { %16640 = vmatprep.subr.bf16.mxu0 %v19200_v10  ;;  %16672 = vmatprep.subr.bf16.mxu1 %v19202_v26 }
 0xc2d   :  { %16642 = vmatpush1.bf16.msra.mxu0 %v19204_v32  ;;  %16674 = vmatpush1.bf16.msra.mxu1 %v19207_v54 }
 0xc2e   :  { %16644 = vmatprep.subr.bf16.mxu0 %v19212_v14  ;;  %16676 = vmatprep.subr.bf16.mxu1 %v19214_v27 }
 0xc31   :  { %16646 = vmatpush1.bf16.msra.mxu0 %v19216_v21  ;;  %16678 = vmatpush1.bf16.msra.mxu1 %v19219_v57 }
 0xc32   :  { %16680 = vmatprep.subr.bf16.mxu0 %v19128_v46  ;;  %16712 = vmatprep.subr.bf16.mxu1 %v19130_v55 }
 0xce7   :  { %v3026_v49 = vpop.f32.mrb[22].mxu0  ;;  %v3097_v19 = vpop.f32.mrb[22].mxu1 }
 0xce8   :  { %v17229_v23 = vadd.f32 %v3026_v49, %v19269_v11  ;;  %v3028_v36 = vpop.f32.mrb[23].mxu0  ;;  %v3099_v33 = vpop.f32.mrb[23].mxu1  ;;  %v17245_v22 = vadd.f32 %v3097_v19, %v19284_v35 }
 0xce9   :  { %v17230_v58 = vadd.f32 %v3028_v36, %v19273_v42  ;;  %v17246_v9 = vadd.f32 %v3099_v33, %v19279_v40 }
 0xcea   :  { %v14932_v4 = vmul.f32 -1.442695, %v17229_v23 }
 0xceb   :  { %v14933_v37 = vmul.f32 -1.442695, %v17230_v58  ;;  %v14934_v39 = vmul.f32 -1.442695, %v17246_v9 }
 0xcec   :  { %17967 = vpow2.f32 %v14932_v4 }
 0xced   :  { %17969 = vpow2.f32 %v14933_v37 }
 0xcee   :  { %17971 = vpow2.f32 %v14934_v39 }
 0xcef   :  { %17973 = vtanh.f32 %v17245_v22 }
 0xcf6   :  { %v17968_v43 = vpop.eup %17967 }
 0xcf7   :  { %v17970_v51 = vpop.eup %17969  ;;  %v3109_v7 = vadd.f32 1.0, %v17968_v43 }
 0xcf8   :  { %v3115_v52 = vadd.f32 1.0, %v17970_v51  ;;  %v17972_v59 = vpop.eup %17971 }
 0xcf9   :  { %17975 = vrcp.f32 %v3109_v7  ;;  %v17974_v2 = vpop.eup %17973  ;;  %v3122_v45 = vadd.f32 1.0, %v17972_v59 }
 0xcfa   :  { %17977 = vrcp.f32 %v3115_v52 }
 0xcfb   :  { %17979 = vrcp.f32 %v3122_v45 }
 0xd03   :  { %v17976_v38 = vpop.eup %17975 }
 0xd04   :  { %v17978_v61 = vpop.eup %17977  ;;  %v3126_v25 = vmul.f32 %v17976_v38, %v17974_v2 }
 0xd05   :  { %v3125_v63 = vmul.f32 %v17978_v61, %v19379_v56  ;;  %v17980_v19 = vpop.eup %17979 }
 0xd07   :  { %v19425_v49 = vadd.f32 %v3126_v25, %v3125_v63 }
 0xd09   :  { %17981 = vtanh.f32 %v19425_v49 }
 0xd13   :  { %v17982_v23 = vpop.eup %17981 }
 0xd14   :  { %v19428_v36 = vmul.f32 %v17982_v23, %v17980_v19 }
 0xd16   :  { %3200 = vmatmul.mubr.f32.vlgmr.msra.gmra.mrb[24].mxu0 %v19428_v36  ;;  %3271 = vmatmul.mubr.f32.vlgmr.msra.gmra.mrb[24].mxu1 %v19428_v36 }
 0xd17   :  { %16682 = vmatpush1.bf16.msra.mxu0 %v19132_v34  ;;  %16714 = vmatpush1.bf16.msra.mxu1 %v19135_v1 }
 0xd18   :  { %16684 = vmatprep.subr.bf16.mxu0 %v19140_v5  ;;  %16716 = vmatprep.subr.bf16.mxu1 %v19142_v30 }
 0xd19   :  { %3374 = vmatprep.mubr.f32.mxu0 %v18415_v0  ;;  %3445 = vmatprep.mubr.f32.mxu1 %v18415_v0 }
 0xd1b   :  { %16686 = vmatpush1.bf16.msra.mxu0 %v19144_v17  ;;  %16718 = vmatpush1.bf16.msra.mxu1 %v19147_v8 }
 0xd1c   :  { %16688 = vmatprep.subr.bf16.mxu0 %v19152_v53  ;;  %16720 = vmatprep.subr.bf16.mxu1 %v19154_v3 }
 0xd1f   :  { %16690 = vmatpush1.bf16.msra.mxu0 %v19156_v6  ;;  %16722 = vmatpush1.bf16.msra.mxu1 %v19159_v16 }
 0xd20   :  { %16692 = vmatprep.subr.bf16.mxu0 %v19164_v29  ;;  %16724 = vmatprep.subr.bf16.mxu1 %v19166_v44 }
 0xd23   :  { %16694 = vmatpush1.bf16.msra.mxu0 %v19168_v48  ;;  %16726 = vmatpush1.bf16.msra.mxu1 %v19171_v62 }
 0xd24   :  { %16696 = vmatprep.subr.bf16.mxu0 %v19176_v18  ;;  %16728 = vmatprep.subr.bf16.mxu1 %v19178_v20 }
 0xd27   :  { %16698 = vmatpush1.bf16.msra.mxu0 %v19180_v12  ;;  %16730 = vmatpush1.bf16.msra.mxu1 %v19183_v15 }
 0xd28   :  { %16700 = vmatprep.subr.bf16.mxu0 %v19188_v41  ;;  %16732 = vmatprep.subr.bf16.mxu1 %v19190_v28 }
 0xd2b   :  { %16702 = vmatpush1.bf16.msra.mxu0 %v19192_v24  ;;  %16734 = vmatpush1.bf16.msra.mxu1 %v19195_v50 }
 0xd2c   :  { %16704 = vmatprep.subr.bf16.mxu0 %v19200_v10  ;;  %16736 = vmatprep.subr.bf16.mxu1 %v19202_v26 }
 0xd2f   :  { %16706 = vmatpush1.bf16.msra.mxu0 %v19204_v32  ;;  %16738 = vmatpush1.bf16.msra.mxu1 %v19207_v54 }
 0xd30   :  { %16708 = vmatprep.subr.bf16.mxu0 %v19212_v14  ;;  %16740 = vmatprep.subr.bf16.mxu1 %v19214_v27 }
 0xd33   :  { %16710 = vmatpush1.bf16.msra.mxu0 %v19216_v21  ;;  %16742 = vmatpush1.bf16.msra.mxu1 %v19219_v57 }
 0xd34   :  { %16744 = vmatprep.subr.bf16.mxu0 %v19128_v46  ;;  %16776 = vmatprep.subr.bf16.mxu1 %v19130_v55 }
 0xde9   :  { %v3201_v56 = vpop.f32.mrb[24].mxu0  ;;  %v3272_v33 = vpop.f32.mrb[24].mxu1 }
 0xdea   :  { %v17231_v58 = vadd.f32 %v3201_v56, %v19269_v11  ;;  %v3203_v4 = vpop.f32.mrb[25].mxu0  ;;  %v3274_v37 = vpop.f32.mrb[25].mxu1  ;;  %v17247_v7 = vadd.f32 %v3272_v33, %v19284_v35 }
 0xdeb   :  { %v17232_v9 = vadd.f32 %v3203_v4, %v19273_v42  ;;  %v17248_v43 = vadd.f32 %v3274_v37, %v19279_v40 }
 0xdec   :  { %v14935_v39 = vmul.f32 -1.442695, %v17231_v58 }
 0xded   :  { %v14936_v22 = vmul.f32 -1.442695, %v17232_v9  ;;  %v14937_v51 = vmul.f32 -1.442695, %v17248_v43 }
 0xdee   :  { %17983 = vpow2.f32 %v14935_v39 }
 0xdef   :  { %17985 = vpow2.f32 %v14936_v22 }
 0xdf0   :  { %17987 = vpow2.f32 %v14937_v51 }
 0xdf1   :  { %17989 = vtanh.f32 %v17247_v7 }
 0xdf8   :  { %v17984_v52 = vpop.eup %17983 }
 0xdf9   :  { %v17986_v59 = vpop.eup %17985  ;;  %v3284_v2 = vadd.f32 1.0, %v17984_v52 }
 0xdfa   :  { %v3290_v38 = vadd.f32 1.0, %v17986_v59  ;;  %v17988_v61 = vpop.eup %17987 }
 0xdfb   :  { %17991 = vrcp.f32 %v3284_v2  ;;  %v17990_v25 = vpop.eup %17989  ;;  %v3297_v23 = vadd.f32 1.0, %v17988_v61 }
 0xdfc   :  { %17993 = vrcp.f32 %v3290_v38 }
 0xdfd   :  { %17995 = vrcp.f32 %v3297_v23 }
 0xe05   :  { %v17992_v45 = vpop.eup %17991 }
 0xe06   :  { %v17994_v63 = vpop.eup %17993  ;;  %v3301_v19 = vmul.f32 %v17992_v45, %v17990_v25 }
 0xe07   :  { %v3300_v56 = vmul.f32 %v17994_v63, %v19425_v49  ;;  %v17996_v33 = vpop.eup %17995 }
 0xe09   :  { %v19471_v58 = vadd.f32 %v3301_v19, %v3300_v56 }
 0xe0b   :  { %17997 = vtanh.f32 %v19471_v58 }
 0xe15   :  { %v17998_v4 = vpop.eup %17997 }
 0xe16   :  { %v19474_v37 = vmul.f32 %v17998_v4, %v17996_v33 }
 0xe18   :  { %3375 = vmatmul.mubr.f32.vlgmr.msra.gmra.mrb[26].mxu0 %v19474_v37  ;;  %3446 = vmatmul.mubr.f32.vlgmr.msra.gmra.mrb[26].mxu1 %v19474_v37 }
 0xe19   :  { %16746 = vmatpush1.bf16.msra.mxu0 %v19132_v34  ;;  %16778 = vmatpush1.bf16.msra.mxu1 %v19135_v1 }
 0xe1a   :  { %16748 = vmatprep.subr.bf16.mxu0 %v19140_v5  ;;  %16780 = vmatprep.subr.bf16.mxu1 %v19142_v30 }
 0xe1b   :  { %3549 = vmatprep.mubr.f32.mxu0 %v18415_v0  ;;  %3620 = vmatprep.mubr.f32.mxu1 %v18415_v0 }
 0xe1d   :  { %16750 = vmatpush1.bf16.msra.mxu0 %v19144_v17  ;;  %16782 = vmatpush1.bf16.msra.mxu1 %v19147_v8 }
 0xe1e   :  { %16752 = vmatprep.subr.bf16.mxu0 %v19152_v53  ;;  %16784 = vmatprep.subr.bf16.mxu1 %v19154_v3 }
 0xe21   :  { %16754 = vmatpush1.bf16.msra.mxu0 %v19156_v6  ;;  %16786 = vmatpush1.bf16.msra.mxu1 %v19159_v16 }
 0xe22   :  { %16756 = vmatprep.subr.bf16.mxu0 %v19164_v29  ;;  %16788 = vmatprep.subr.bf16.mxu1 %v19166_v44 }
 0xe25   :  { %16758 = vmatpush1.bf16.msra.mxu0 %v19168_v48  ;;  %16790 = vmatpush1.bf16.msra.mxu1 %v19171_v62 }
 0xe26   :  { %16760 = vmatprep.subr.bf16.mxu0 %v19176_v18  ;;  %16792 = vmatprep.subr.bf16.mxu1 %v19178_v20 }
 0xe29   :  { %16762 = vmatpush1.bf16.msra.mxu0 %v19180_v12  ;;  %16794 = vmatpush1.bf16.msra.mxu1 %v19183_v15 }
 0xe2a   :  { %16764 = vmatprep.subr.bf16.mxu0 %v19188_v41  ;;  %16796 = vmatprep.subr.bf16.mxu1 %v19190_v28 }
 0xe2d   :  { %16766 = vmatpush1.bf16.msra.mxu0 %v19192_v24  ;;  %16798 = vmatpush1.bf16.msra.mxu1 %v19195_v50 }
 0xe2e   :  { %16768 = vmatprep.subr.bf16.mxu0 %v19200_v10  ;;  %16800 = vmatprep.subr.bf16.mxu1 %v19202_v26 }
 0xe31   :  { %16770 = vmatpush1.bf16.msra.mxu0 %v19204_v32  ;;  %16802 = vmatpush1.bf16.msra.mxu1 %v19207_v54 }
 0xe32   :  { %16772 = vmatprep.subr.bf16.mxu0 %v19212_v14  ;;  %16804 = vmatprep.subr.bf16.mxu1 %v19214_v27 }
 0xe35   :  { %16774 = vmatpush1.bf16.msra.mxu0 %v19216_v21  ;;  %16806 = vmatpush1.bf16.msra.mxu1 %v19219_v57 }
 0xe36   :  { %16808 = vmatprep.subr.bf16.mxu0 %v19128_v46  ;;  %16840 = vmatprep.subr.bf16.mxu1 %v19130_v55 }
 0xeeb   :  { %v3376_v49 = vpop.f32.mrb[26].mxu0  ;;  %v3447_v9 = vpop.f32.mrb[26].mxu1 }
 0xeec   :  { %v17233_v39 = vadd.f32 %v3376_v49, %v19269_v11  ;;  %v3378_v22 = vpop.f32.mrb[27].mxu0  ;;  %v3449_v43 = vpop.f32.mrb[27].mxu1  ;;  %v17249_v38 = vadd.f32 %v3447_v9, %v19284_v35 }
 0xeed   :  { %v17234_v51 = vadd.f32 %v3378_v22, %v19273_v42  ;;  %v17250_v59 = vadd.f32 %v3449_v43, %v19279_v40 }
 0xeee   :  { %v14938_v7 = vmul.f32 -1.442695, %v17233_v39 }
 0xeef   :  { %v14939_v52 = vmul.f32 -1.442695, %v17234_v51  ;;  %v14940_v2 = vmul.f32 -1.442695, %v17250_v59  ;;  %v3847_v59 = vld [vmem:[#allocation14 + $0x20] sm:$0xff] }
 0xef0   :  { %17999 = vpow2.f32 %v14938_v7 }
 0xef1   :  { %18001 = vpow2.f32 %v14939_v52 }
 0xef2   :  { %18003 = vpow2.f32 %v14940_v2  ;;  %v3849_v2 = vld [vmem:[#allocation14 + $0x30] sm:$0xff] }
 0xef3   :  { %18005 = vtanh.f32 %v17249_v38  ;;  %v3852_v38 = vld [vmem:[#allocation14 + $0x48] sm:$0xff] }
 0xefa   :  { %v18000_v46 = vpop.eup %17999 }
 0xefb   :  { %v18002_v61 = vpop.eup %18001  ;;  %v3459_v55 = vadd.f32 1.0, %v18000_v46  ;;  %v3854_v46 = vld [vmem:[#allocation14 + $0x58] sm:$0xff] }
 0xefc   :  { %v3465_v25 = vadd.f32 1.0, %v18002_v61  ;;  %v18004_v45 = vpop.eup %18003  ;;  %v16877_v61 = vpack.c.bf16 %v3849_v2, %v3847_v59 }
 0xefd   :  { %18007 = vrcp.f32 %v3459_v55  ;;  %v18006_v63 = vpop.eup %18005  ;;  %v3472_v33 = vadd.f32 1.0, %v18004_v45  ;;  %v16879_v55 = vpack.c.bf16 %v3854_v46, %v3852_v38  ;;  %v3853_v45 = vld [vmem:[#allocation14 + $0x50] sm:$0xff] }
 0xefe   :  { %18009 = vrcp.f32 %v3465_v25  ;;  %v3851_v25 = vld [vmem:[#allocation14 + $0x40] sm:$0xff] }
 0xeff   :  { %18011 = vrcp.f32 %v3472_v33  ;;  %v3855_v33 = vld [vmem:[#allocation14 + $0x60] sm:$0xff] }
 0xf07   :  { %v18008_v19 = vpop.eup %18007 }
 0xf08   :  { %v18010_v23 = vpop.eup %18009  ;;  %v3476_v56 = vmul.f32 %v18008_v19, %v18006_v63  ;;  %v3856_v63 = vld [vmem:[#allocation14 + $0x68] sm:$0xff]  ;;  %v3858_v19 = vld [vmem:[#allocation14 + $0x78] sm:$0xff] }
 0xf09   :  { %v3475_v4 = vmul.f32 %v18010_v23, %v19471_v58  ;;  %v18012_v9 = vpop.eup %18011  ;;  %v16881_v23 = vpack.c.bf16 %v3853_v45, %v3851_v25 }
 0xf0b   :  { %v19517_v49 = vadd.f32 %v3476_v56, %v3475_v4  ;;  %v16883_v56 = vpack.c.bf16 %v3858_v19, %v3856_v63  ;;  %v3857_v4 = vld [vmem:[#allocation14 + $0x70] sm:$0xff] }
 0xf0d   :  { %18013 = vtanh.f32 %v19517_v49 }
 0xf17   :  { %v18014_v39 = vpop.eup %18013 }
 0xf18   :  { %v19520_v22 = vmul.f32 %v18014_v39, %v18012_v9  ;;  %v3862_v9 = vld [vmem:[#allocation14 + $0x98] sm:$0xff]  ;;  %v16885_v39 = vpack.c.bf16 %v3857_v4, %v3855_v33 }
 0xf1a   :  { %3550 = vmatmul.mubr.f32.vlgmr.msra.gmra.mrb[28].mxu0 %v19520_v22  ;;  %3621 = vmatmul.mubr.f32.vlgmr.msra.gmra.mrb[28].mxu1 %v19520_v22 }
 0xf1b   :  { %16810 = vmatpush1.bf16.msra.mxu0 %v19132_v34  ;;  %16842 = vmatpush1.bf16.msra.mxu1 %v19135_v1  ;;  %v3844_v34 = vld [vmem:[#allocation14 + $0x8] sm:$0xff]  ;;  %v3846_v1 = vld [vmem:[#allocation14 + $0x18] sm:$0xff] }
 0xf1c   :  { %16812 = vmatprep.subr.bf16.mxu0 %v19140_v5  ;;  %16844 = vmatprep.subr.bf16.mxu1 %v19142_v30  ;;  %v16871_v5 = vpack.c.bf16 %v3846_v1, %v3844_v34  ;;  %v3859_v1 = vld [vmem:[#allocation14 + $0x80] sm:$0xff] }
 0xf1d   :  { %3724 = vmatprep.mubr.f32.mxu0 %v18415_v0  ;;  %3795 = vmatprep.mubr.f32.mxu1 %v18415_v0 }
 0xf1f   :  { %16814 = vmatpush1.bf16.msra.mxu0 %v19144_v17  ;;  %16846 = vmatpush1.bf16.msra.mxu1 %v19147_v8 }
 0xf20   :  { %16816 = vmatprep.subr.bf16.mxu0 %v19152_v53  ;;  %16848 = vmatprep.subr.bf16.mxu1 %v19154_v3 }
 0xf23   :  { %16818 = vmatpush1.bf16.msra.mxu0 %v19156_v6  ;;  %16850 = vmatpush1.bf16.msra.mxu1 %v19159_v16 }
 0xf24   :  { %16820 = vmatprep.subr.bf16.mxu0 %v19164_v29  ;;  %16852 = vmatprep.subr.bf16.mxu1 %v19166_v44 }
 0xf27   :  { %16822 = vmatpush1.bf16.msra.mxu0 %v19168_v48  ;;  %16854 = vmatpush1.bf16.msra.mxu1 %v19171_v62 }
 0xf28   :  { %16824 = vmatprep.subr.bf16.mxu0 %v19176_v18  ;;  %16856 = vmatprep.subr.bf16.mxu1 %v19178_v20 }
 0xf2b   :  { %16826 = vmatpush1.bf16.msra.mxu0 %v19180_v12  ;;  %16858 = vmatpush1.bf16.msra.mxu1 %v19183_v15 }
 0xf2c   :  { %16828 = vmatprep.subr.bf16.mxu0 %v19188_v41  ;;  %16860 = vmatprep.subr.bf16.mxu1 %v19190_v28 }
 0xf2f   :  { %16830 = vmatpush1.bf16.msra.mxu0 %v19192_v24  ;;  %16862 = vmatpush1.bf16.msra.mxu1 %v19195_v50 }
 0xf30   :  { %16832 = vmatprep.subr.bf16.mxu0 %v19200_v10  ;;  %16864 = vmatprep.subr.bf16.mxu1 %v19202_v26 }
 0xf33   :  { %16834 = vmatpush1.bf16.msra.mxu0 %v19204_v32  ;;  %16866 = vmatpush1.bf16.msra.mxu1 %v19207_v54 }
 0xf34   :  { %16836 = vmatprep.subr.bf16.mxu0 %v19212_v14  ;;  %16868 = vmatprep.subr.bf16.mxu1 %v19214_v27  ;;  %v3843_v14 = vld [vmem:[#allocation14] sm:$0xff]  ;;  %v3845_v27 = vld [vmem:[#allocation14 + $0x10] sm:$0xff] }
 0xf35   :  { %v16873_v51 = vpack.c.bf16 %v3845_v27, %v3843_v14 }
 0xf37   :  { %16838 = vmatpush1.bf16.msra.mxu0 %v19216_v21  ;;  %16870 = vmatpush1.bf16.msra.mxu1 %v19219_v57  ;;  %v3848_v21 = vld [vmem:[#allocation14 + $0x28] sm:$0xff]  ;;  %v3850_v57 = vld [vmem:[#allocation14 + $0x38] sm:$0xff] }
 0xf38   :  { %16872 = vmatprep.subr.bf16.mxu0 %v16871_v5  ;;  %v16875_v52 = vpack.c.bf16 %v3850_v57, %v3848_v21  ;;  %v3861_v5 = vld [vmem:[#allocation14 + $0x90] sm:$0xff] }
 0xfed   :  { %v3551_v30 = vpop.f32.mrb[28].mxu0  ;;  %v3622_v17 = vpop.f32.mrb[28].mxu1 }
 0xfee   :  { %v17235_v8 = vadd.f32 %v3551_v30, %v19269_v11  ;;  %v3553_v53 = vpop.f32.mrb[29].mxu0  ;;  %v3624_v3 = vpop.f32.mrb[29].mxu1  ;;  %v17251_v62 = vadd.f32 %v3622_v17, %v19284_v35  ;;  %v3864_v30 = vld [vmem:[#allocation14 + $0xa8] sm:$0xff]  ;;  %v3866_v17 = vld [vmem:[#allocation14 + $0xb8] sm:$0xff] }
 0xfef   :  { %v17236_v6 = vadd.f32 %v3553_v53, %v19273_v42  ;;  %v17252_v44 = vadd.f32 %v3624_v3, %v19279_v40  ;;  %v16891_v53 = vpack.c.bf16 %v3866_v17, %v3864_v30  ;;  %v3863_v3 = vld [vmem:[#allocation14 + $0xa0] sm:$0xff] }
 0xff0   :  { %v14941_v16 = vmul.f32 -1.442695, %v17235_v8  ;;  %v16889_v8 = vpack.c.bf16 %v3861_v5, %v3859_v1 }
 0xff1   :  { %v14942_v29 = vmul.f32 -1.442695, %v17236_v6  ;;  %v14943_v48 = vmul.f32 -1.442695, %v17252_v44  ;;  %v3865_v6 = vld [vmem:[#allocation14 + $0xb0] sm:$0xff] }
 0xff2   :  { %18015 = vpow2.f32 %v14941_v16  ;;  %v3868_v16 = vld [vmem:[#allocation14 + $0xc8] sm:$0xff]  ;;  %v16893_v44 = vpack.c.bf16 %v3865_v6, %v3863_v3 }
 0xff3   :  { %18017 = vpow2.f32 %v14942_v29  ;;  %v3870_v29 = vld [vmem:[#allocation14 + $0xd8] sm:$0xff] }
 0xff4   :  { %18019 = vpow2.f32 %v14943_v48  ;;  %v16895_v48 = vpack.c.bf16 %v3870_v29, %v3868_v16 }
 0xff5   :  { %18021 = vtanh.f32 %v17251_v62  ;;  %v3867_v62 = vld [vmem:[#allocation14 + $0xc0] sm:$0xff] }
 0xffc   :  { %v18016_v18 = vpop.eup %18015 }
 0xffd   :  { %v18018_v20 = vpop.eup %18017  ;;  %v3634_v12 = vadd.f32 1.0, %v18016_v18  ;;  %v3869_v18 = vld [vmem:[#allocation14 + $0xd0] sm:$0xff] }
 0xffe   :  { %v3640_v15 = vadd.f32 1.0, %v18018_v20  ;;  %v18020_v41 = vpop.eup %18019  ;;  %v3872_v20 = vld [vmem:[#allocation14 + $0xe8] sm:$0xff] }
 0xfff   :  { %18023 = vrcp.f32 %v3634_v12  ;;  %v18022_v28 = vpop.eup %18021  ;;  %v3647_v26 = vadd.f32 1.0, %v18020_v41  ;;  %v3874_v12 = vld [vmem:[#allocation14 + $0xf8] sm:$0xff] }
0x1000   :  { %18025 = vrcp.f32 %v3640_v15  ;;  %v16897_v15 = vpack.c.bf16 %v3869_v18, %v3867_v62  ;;  %v16899_v41 = vpack.c.bf16 %v3874_v12, %v3872_v20 }
0x1001   :  { %18027 = vrcp.f32 %v3647_v26 }
0x1009   :  { %v18024_v24 = vpop.eup %18023 }
0x100a   :  { %v18026_v50 = vpop.eup %18025  ;;  %v3651_v10 = vmul.f32 %v18024_v24, %v18022_v28  ;;  %v3871_v28 = vld [vmem:[#allocation14 + $0xe0] sm:$0xff]  ;;  %v3873_v24 = vld [vmem:[#allocation14 + $0xf0] sm:$0xff] }
0x100b   :  { %v3650_v32 = vmul.f32 %v18026_v50, %v19517_v49  ;;  %v18028_v58 = vpop.eup %18027  ;;  %v3860_v49 = vld [vmem:[#allocation14 + $0x88] sm:$0xff]  ;;  %v16901_v50 = vpack.c.bf16 %v3873_v24, %v3871_v28 }
0x100c   :  { %v16887_v34 = vpack.c.bf16 %v3862_v9, %v3860_v49 }
0x100d   :  { %v19561_v54 = vadd.f32 %v3651_v10, %v3650_v32 }
0x100f   :  { %18029 = vtanh.f32 %v19561_v54 }
0x1019   :  { %v18030_v43 = vpop.eup %18029 }
0x101a   :  { %v19564_v7 = vmul.f32 %v18030_v43, %v18028_v58 }
0x101c   :  { %3725 = vmatmul.mubr.f32.vlgmr.msra.gmra.mrb[30].mxu0 %v19564_v7  ;;  %3796 = vmatmul.mubr.f32.vlgmr.msra.gmra.mrb[30].mxu1 %v19564_v7 }
0x101d   :  { %16874 = vmatpush1.bf16.msra.mxu0 %v16873_v51  ;;  %3939 = vmatprep.mubr.f32.mxu0 %v18415_v0 }
0x101e   :  { %16876 = vmatprep.subr.bf16.mxu0 %v16875_v52 }
0x1021   :  { %16878 = vmatpush1.bf16.msra.mxu0 %v16877_v61 }
0x1022   :  { %16880 = vmatprep.subr.bf16.mxu0 %v16879_v55 }
0x1025   :  { %16882 = vmatpush1.bf16.msra.mxu0 %v16881_v23 }
0x1026   :  { %16884 = vmatprep.subr.bf16.mxu0 %v16883_v56 }
0x1029   :  { %16886 = vmatpush1.bf16.msra.mxu0 %v16885_v39 }
0x102a   :  { %16888 = vmatprep.subr.bf16.mxu0 %v16887_v34 }
0x102d   :  { %16890 = vmatpush1.bf16.msra.mxu0 %v16889_v8 }
0x102e   :  { %16892 = vmatprep.subr.bf16.mxu0 %v16891_v53 }
0x1031   :  { %16894 = vmatpush1.bf16.msra.mxu0 %v16893_v44 }
0x1032   :  { %16896 = vmatprep.subr.bf16.mxu0 %v16895_v48 }
0x1035   :  { %16898 = vmatpush1.bf16.msra.mxu0 %v16897_v15 }
0x1036   :  { %16900 = vmatprep.subr.bf16.mxu0 %v16899_v41 }
0x1039   :  { %16902 = vmatpush1.bf16.msra.mxu0 %v16901_v50 }
0x103c   :  { %3940 = vmatmul.mubr.f32.vlgmr.msra.gmra.mrb[32].mxu0 %v19290_v47 }
0x103d   :  { %3945 = vmatprep.mubr.f32.mxu0 %v18415_v0 }
0x1040   :  { %3946 = vmatmul.mubr.f32.gmra.mrb[34].mxu0 %v19336_v60 }
0x1041   :  { %3951 = vmatprep.mubr.f32.mxu0 %v18415_v0 }
0x1044   :  { %3952 = vmatmul.mubr.f32.gmra.mrb[36].mxu0 %v19382_v13 }
0x1045   :  { %3957 = vmatprep.mubr.f32.mxu0 %v18415_v0 }
0x1048   :  { %3958 = vmatmul.mubr.f32.gmra.mrb[38].mxu0 %v19428_v36 }
0x1049   :  { %3963 = vmatprep.mubr.f32.mxu0 %v18415_v0 }
0x104c   :  { %3964 = vmatmul.mubr.f32.gmra.mrb[40].mxu0 %v19474_v37 }
0x104d   :  { %3969 = vmatprep.mubr.f32.mxu0 %v18415_v0 }
0x1050   :  { %3970 = vmatmul.mubr.f32.gmra.mrb[42].mxu0 %v19520_v22 }
0x1051   :  { %3975 = vmatprep.mubr.f32.mxu0 %v18415_v0 }
0x1054   :  { %3976 = vmatmul.mubr.f32.gmra.mrb[44].mxu0 %v19564_v7 }
0x1055   :  { %3981 = vmatprep.mubr.f32.mxu0 %v18415_v0 }
0x10ef   :  { %v3726_v47 = vpop.f32.mrb[30].mxu0  ;;  %v3797_v60 = vpop.f32.mrb[30].mxu1 }
0x10f0   :  { %v17237_v13 = vadd.f32 %v3726_v47, %v19269_v11  ;;  %v3728_v10 = vpop.f32.mrb[31].mxu0  ;;  %v3799_v36 = vpop.f32.mrb[31].mxu1  ;;  %v17253_v27 = vadd.f32 %v3797_v60, %v19284_v35 }
0x10f1   :  { %v17238_v26 = vadd.f32 %v3728_v10, %v19273_v42  ;;  %v17254_v22 = vadd.f32 %v3799_v36, %v19279_v40  ;;  %v19588_v40 = vld [vmem:[#allocation15] sm:$0xff] }
0x10f2   :  { %v14944_v32 = vmul.f32 -1.442695, %v17237_v13 }
0x10f3   :  { %v14945_v37 = vmul.f32 -1.442695, %v17238_v26  ;;  %v14946_v14 = vmul.f32 -1.442695, %v17254_v22 }
0x10f4   :  { %18031 = vpow2.f32 %v14944_v32 }
0x10f5   :  { %18033 = vpow2.f32 %v14945_v37 }
0x10f6   :  { %18035 = vpow2.f32 %v14946_v14 }
0x10f7   :  { %18037 = vtanh.f32 %v17253_v27 }
0x10fe   :  { %v18032_v21 = vpop.eup %18031 }
0x10ff   :  { %v18034_v57 = vpop.eup %18033  ;;  %v3809_v0 = vadd.f32 1.0, %v18032_v21 }
0x1100   :  { %v3815_v58 = vadd.f32 1.0, %v18034_v57  ;;  %v18036_v11 = vpop.eup %18035 }
0x1101   :  { %18039 = vrcp.f32 %v3809_v0  ;;  %v18038_v43 = vpop.eup %18037  ;;  %v3822_v52 = vadd.f32 1.0, %v18036_v11 }
0x1102   :  { %18041 = vrcp.f32 %v3815_v58 }
0x1103   :  { %18043 = vrcp.f32 %v3822_v52 }
0x110b   :  { %v18040_v42 = vpop.eup %18039 }
0x110c   :  { %v18042_v51 = vpop.eup %18041  ;;  %v3826_v7 = vmul.f32 %v18040_v42, %v18038_v43 }
0x110d   :  { %v3825_v59 = vmul.f32 %v18042_v51, %v19561_v54  ;;  %v18044_v19 = vpop.eup %18043 }
0x110f   :  { %v3827_v2 = vadd.f32 %v3826_v7, %v3825_v59  ;;  %v3941_v35 = vpop.f32.mrb[32].mxu0 }
0x1110   :  { %v3989_v38 = vadd.f32 %v19588_v40, %v3941_v35  ;;  %v19591_v46 = vpop.f32.mrb[33].mxu0 }
0x1111   :  { %22967 = vst [vmem:[#allocation32_spill] sm:$0xff] %v19591_v46  ;;  %18045 = vtanh.f32 %v3827_v2  ;;  %3834 = vst [vmem:[#allocation23 + $0x8] sm:$0xff] %v3827_v2 }
0x1112   :  { %3997 = vmax.xlane.f32.xlu0 %v3989_v38 }
0x1113   :  { %v3947_v61 = vpop.f32.mrb[34].mxu0 }
0x1114   :  { %v3990_v55 = vadd.f32 %v19588_v40, %v3947_v61  ;;  %v19594_v25 = vpop.f32.mrb[35].mxu0 }
0x1115   :  { %22968 = vst [vmem:[#allocation33_spill] sm:$0xff] %v19594_v25 }
0x1116   :  { %3999 = vmax.xlane.f32.xlu0 %v3990_v55 }
0x1117   :  { %v3953_v45 = vpop.f32.mrb[36].mxu0 }
0x1118   :  { %v3991_v54 = vadd.f32 %v19588_v40, %v3953_v45  ;;  %v19597_v63 = vpop.f32.mrb[37].mxu0 }
0x1119   :  { %22969 = vst [vmem:[#allocation34_spill] sm:$0xff] %v19597_v63 }
0x111a   :  { %4001 = vmax.xlane.f32.xlu1 %v3991_v54 }
0x111b   :  { %v18046_v23 = vpop.eup %18045  ;;  %v3959_v56 = vpop.f32.mrb[38].mxu0 }
0x111c   :  { %v3829_v33 = vmul.f32 %v18046_v23, %v18044_v19  ;;  %v3992_v4 = vadd.f32 %v19588_v40, %v3959_v56  ;;  %v19600_v49 = vpop.f32.mrb[39].mxu0 }
0x111d   :  { %22970 = vst [vmem:[#allocation35_spill] sm:$0xff] %v19600_v49 }
0x111e   :  { %3832 = vst [vmem:[#allocation21 + $0x8] sm:$0xff] %v3829_v33  ;;  %4003 = vmax.xlane.f32.xlu1 %v3992_v4  ;;  %3982 = vmatmul.mubr.f32.gmra.mrb[46].mxu0 %v3829_v33 }
0x111f   :  { %v3965_v9 = vpop.f32.mrb[40].mxu0 }
0x1120   :  { %v3993_v39 = vadd.f32 %v19588_v40, %v3965_v9  ;;  %v19603_v34 = vpop.f32.mrb[41].mxu0 }
0x1121   :  { %22971 = vst [vmem:[#allocation36_spill] sm:$0xff] %v19603_v34 }
0x1122   :  { %4005 = vmax.xlane.f32.xlu0 %v3993_v39 }
0x1123   :  { %v3971_v1 = vpop.f32.mrb[42].mxu0 }
0x1124   :  { %v3994_v5 = vadd.f32 %v19588_v40, %v3971_v1  ;;  %v19606_v30 = vpop.f32.mrb[43].mxu0 }
0x1125   :  { %22972 = vst [vmem:[#allocation37_spill] sm:$0xff] %v19606_v30 }
0x1126   :  { %4007 = vmax.xlane.f32.xlu1 %v3994_v5 }
0x1127   :  { %v3977_v17 = vpop.f32.mrb[44].mxu0 }
0x1128   :  { %v3995_v8 = vadd.f32 %v19588_v40, %v3977_v17  ;;  %v19609_v53 = vpop.f32.mrb[45].mxu0 }
0x1129   :  { %22973 = vst [vmem:[#allocation38_spill] sm:$0xff] %v19609_v53 }
0x112a   :  { %4009 = vmax.xlane.f32.xlu0 %v3995_v8 }
0x119f   :  { %v3998_v3 = vpop.xlane.xlu0 %3997 }
0x11a0   :  { %v4013_v6 = vsub.f32 %v3989_v38, %v3998_v3 }
0x11a2   :  { %v4021_v16 = vmul.f32 1.442695, %v4013_v6 }
0x11a3   :  { %v4000_v29 = vpop.xlane.xlu0 %3999 }
0x11a4   :  { %18047 = vpow2.f32 %v4021_v16  ;;  %v4014_v44 = vsub.f32 %v3990_v55, %v4000_v29 }
0x11a6   :  { %v4023_v48 = vmul.f32 1.442695, %v4014_v44 }
0x11a7   :  { %v4002_v62 = vpop.xlane.xlu1 %4001 }
0x11a8   :  { %18049 = vpow2.f32 %v4023_v48  ;;  %v4015_v18 = vsub.f32 %v3991_v54, %v4002_v62 }
0x11aa   :  { %v4025_v20 = vmul.f32 1.442695, %v4015_v18 }
0x11ab   :  { %v4004_v12 = vpop.xlane.xlu1 %4003 }
0x11ac   :  { %18051 = vpow2.f32 %v4025_v20  ;;  %v4016_v15 = vsub.f32 %v3992_v4, %v4004_v12 }
0x11ae   :  { %v18048_v41 = vpop.eup %18047  ;;  %v4027_v28 = vmul.f32 1.442695, %v4016_v15 }
0x11af   :  { %v4006_v24 = vpop.xlane.xlu0 %4005  ;;  %4037 = vadd.xlane.f32.xlu0 %v18048_v41 }
0x11b0   :  { %18053 = vpow2.f32 %v4027_v28  ;;  %v4017_v50 = vsub.f32 %v3993_v39, %v4006_v24 }
0x11b2   :  { %v18050_v47 = vpop.eup %18049  ;;  %v4029_v60 = vmul.f32 1.442695, %v4017_v50 }
0x11b3   :  { %4039 = vadd.xlane.f32.xlu1 %v18050_v47  ;;  %v4008_v13 = vpop.xlane.xlu1 %4007 }
0x11b4   :  { %18055 = vpow2.f32 %v4029_v60  ;;  %v4018_v10 = vsub.f32 %v3994_v5, %v4008_v13 }
0x11b6   :  { %v18052_v36 = vpop.eup %18051  ;;  %v4031_v26 = vmul.f32 1.442695, %v4018_v10 }
0x11b7   :  { %4041 = vadd.xlane.f32.xlu0 %v18052_v36  ;;  %v4010_v32 = vpop.xlane.xlu0 %4009 }
0x11b8   :  { %18057 = vpow2.f32 %v4031_v26  ;;  %v4019_v37 = vsub.f32 %v3995_v8, %v4010_v32 }
0x11ba   :  { %v18054_v22 = vpop.eup %18053  ;;  %v4033_v14 = vmul.f32 1.442695, %v4019_v37 }
0x11bb   :  { %4043 = vadd.xlane.f32.xlu1 %v18054_v22 }
0x11bc   :  { %18059 = vpow2.f32 %v4033_v14  ;;  %v18416_v14 = vmov 1983009808  }
0x11be   :  { %v18056_v27 = vpop.eup %18055 }
0x11bf   :  { %4045 = vadd.xlane.f32.xlu0 %v18056_v27 }
0x11c2   :  { %v18058_v21 = vpop.eup %18057 }
0x11c3   :  { %4047 = vadd.xlane.f32.xlu1 %v18058_v21 }
0x11c6   :  { %v19611_v57 = vpop.eup %18059 }
0x11c7   :  { %4049 = vadd.xlane.f32.xlu0 %v19611_v57 }
0x11f1   :  { %v3983_v0 = vpop.f32.mrb[46].mxu0 }
0x11f2   :  { %v19615_v58 = vadd.f32 %v19588_v40, %v3983_v0  ;;  %v19617_v11 = vpop.f32.mrb[47].mxu0 }
0x11f3   :  { %22974 = vst [vmem:[#allocation39_spill] sm:$0xff] %v19617_v11 }
0x11f4   :  { %4011 = vmax.xlane.f32.xlu1 %v19615_v58 }
0x123c   :  { %v4038_v43 = vpop.xlane.xlu0 %4037 }
0x123d   :  { %18061 = vrcp.f32 %v4038_v43 }
0x1240   :  { %v4040_v42 = vpop.xlane.xlu1 %4039 }
0x1241   :  { %18063 = vrcp.f32 %v4040_v42 }
0x1244   :  { %v4042_v2 = vpop.xlane.xlu0 %4041 }
0x1245   :  { %18065 = vrcp.f32 %v4042_v2 }
0x1247   :  { %v18062_v51 = vpop.eup %18061 }
0x1248   :  { %v4061_v7 = vmul.f32 %v18062_v51, %v18048_v41  ;;  %v4044_v35 = vpop.xlane.xlu1 %4043 }
0x1249   :  { %18067 = vrcp.f32 %v4044_v35 }
0x124a   :  { %4197 = vxpose.xlu0.b32.start.end [1/1] (short) %v4061_v7, 128 }
0x124b   :  { %v18064_v52 = vpop.eup %18063 }
0x124c   :  { %v4062_v59 = vmul.f32 %v18064_v52, %v18050_v47  ;;  %v4046_v45 = vpop.xlane.xlu0 %4045 }
0x124d   :  { %18069 = vrcp.f32 %v4046_v45 }
0x124e   :  { %4229 = vxpose.xlu1.b32.start.end [1/1] (short) %v4062_v59, 128 }
0x124f   :  { %v18066_v40 = vpop.eup %18065 }
0x1250   :  { %v4063_v38 = vmul.f32 %v18066_v40, %v18052_v36  ;;  %v4048_v54 = vpop.xlane.xlu1 %4047 }
0x1251   :  { %18071 = vrcp.f32 %v4048_v54 }
0x1253   :  { %v18068_v61 = vpop.eup %18067 }
0x1254   :  { %v4064_v55 = vmul.f32 %v18068_v61, %v18054_v22  ;;  %v4050_v33 = vpop.xlane.xlu0 %4049 }
0x1255   :  { %18073 = vrcp.f32 %v4050_v33 }
0x1257   :  { %v18070_v19 = vpop.eup %18069 }
0x1258   :  { %v4065_v23 = vmul.f32 %v18070_v19, %v18056_v27  ;;  %v4456_v27 = vunpack.c.l.s4 %v18416_v14 }
0x125a   :  { %v4457_v43 = vunpack.c.0.s8 %v4456_v27 }
0x125b   :  { %v18072_v56 = vpop.eup %18071 }
0x125c   :  { %v4066_v4 = vmul.f32 %v18072_v56, %v18058_v21  ;;  %v19680_v7 = vsub.s32 %v4457_v43, %v18791_v31 }
0x125e   :  { %22978 = vst [vmem:[#allocation43_spill] sm:$0xff] %v19680_v7 }
0x125f   :  { %v18074_v26 = vpop.eup %18073 }
0x1260   :  { %v4067_v22 = vmul.f32 %v18074_v26, %v19611_v57 }
0x1281   :  { %v19620_v9 = vpop.xlane.xlu1 %4011 }
0x1287   :  { %4261 = vxpose.xlu0.b32.start.end [1/1] (short) %v4063_v38, 128 }
0x128b   :  { %4293 = vxpose.xlu1.b32.start.end [1/1] (short) %v4064_v55, 128 }
0x12c4   :  { %4325 = vxpose.xlu0.b32.start.end [1/1] (short) %v4065_v23, 128 }
0x12c8   :  { %4357 = vxpose.xlu1.b32.start.end [1/1] (short) %v4066_v4, 128 }
0x12ca   :  { %v4213_v39 = vpop.trf.xlu0 }
0x12ce   :  { %v4214_v1 = vpop.trf.xlu0  ;;  %v4245_v5 = vpop.trf.xlu1 }
0x12d2   :  { %v19622_v17 = vpop.trf.xlu0  ;;  %v19624_v8 = vpop.trf.xlu1 }
0x12d6   :  { %v19626_v3 = vpop.trf.xlu0  ;;  %v19628_v6 = vpop.trf.xlu1 }
0x12da   :  { %v19630_v16 = vpop.trf.xlu0  ;;  %v19632_v29 = vpop.trf.xlu1 }
0x12de   :  { %v19634_v44 = vpop.trf.xlu0  ;;  %v19636_v48 = vpop.trf.xlu1 }
0x12e2   :  { %v19638_v62 = vpop.trf.xlu0  ;;  %v19640_v18 = vpop.trf.xlu1 }
0x12e6   :  { %v19642_v20 = vpop.trf.xlu0  ;;  %v19644_v12 = vpop.trf.xlu1 }
0x12ea   :  { %v19646_v15 = vpop.trf.xlu0  ;;  %v19648_v41 = vpop.trf.xlu1 }
0x12ee   :  { %v19650_v28 = vpop.trf.xlu0  ;;  %v19652_v24 = vpop.trf.xlu1 }
0x12f2   :  { %v19654_v50 = vpop.trf.xlu0  ;;  %v19656_v47 = vpop.trf.xlu1 }
0x12f6   :  { %v19658_v60 = vpop.trf.xlu0  ;;  %v19660_v13 = vpop.trf.xlu1 }
0x12fa   :  { %v19662_v10 = vpop.trf.xlu0  ;;  %v19664_v36 = vpop.trf.xlu1 }
0x12fe   :  { %v19666_v32 = vpop.trf.xlu0  ;;  %v19668_v37 = vpop.trf.xlu1 }
0x1302   :  { %v19671_v21 = vpop.trf.xlu0  ;;  %4389 = vxpose.xlu0.b32.start.end [1/1] (short) %v4067_v22, 128  ;;  %v19673_v0 = vpop.trf.xlu1 }
0x1303   :  { %22975 = vst [vmem:[#allocation40_spill] sm:$0xff] %v19671_v21 }
0x1306   :  { %v19675_v42 = vpop.trf.xlu1  ;;  %v19677_v51 = vpop.trf.xlu0 }
0x1307   :  { %22976 = vst [vmem:[#allocation41_spill] sm:$0xff] %v19675_v42  ;;  %22977 = vst [vmem:[#allocation42_spill] sm:$0xff] %v19677_v51 }
0x130a   :  { %v19682_v52 = vpop.trf.xlu1  ;;  %v4277_v59 = vpop.trf.xlu0 }
0x130b   :  { %22979 = vst [vmem:[#allocation44_spill] sm:$0xff] %v19682_v52  ;;  %v4453_v2 = vcombine.low %v4213_v39, %v4277_v59  ;;  %v4454_v57 = vcombine.high %v4213_v39, %v4277_v59 }
0x130d   :  { %v19685_v35 = vrot.slane %v4453_v2, %v19680_v7  ;;  %v19688_v40 = vrot.slane %v4454_v57, %v19680_v7  ;;  %v4020_v57 = vsub.f32 %v19615_v58, %v19620_v9 }
0x130e   :  { %v4309_v38 = vpop.trf.xlu1  ;;  %v4278_v61 = vpop.trf.xlu0 }
0x130f   :  { %v4469_v55 = vcombine.low %v4245_v5, %v4309_v38  ;;  %v4470_v45 = vcombine.high %v4245_v5, %v4309_v38  ;;  %v4589_v54 = vcombine.low %v4214_v1, %v4278_v61  ;;  %v4590_v19 = vcombine.high %v4214_v1, %v4278_v61 }
0x1311   :  { %v19691_v23 = vrot.slane %v4469_v55, %v19680_v7  ;;  %v19694_v56 = vrot.slane %v4470_v45, %v19680_v7  ;;  %v19697_v33 = vrot.slane %v4589_v54, %v19680_v7  ;;  %v19700_v4 = vrot.slane %v4590_v19, %v19680_v7 }
0x1312   :  { %v4310_v39 = vpop.trf.xlu1  ;;  %v4279_v26 = vpop.trf.xlu0 }
0x1313   :  { %v4605_v27 = vcombine.low %v19624_v8, %v4310_v39  ;;  %v4606_v43 = vcombine.high %v19624_v8, %v4310_v39  ;;  %v4725_v59 = vcombine.low %v19622_v17, %v4279_v26  ;;  %v4726_v2 = vcombine.high %v19622_v17, %v4279_v26 }
0x1315   :  { %v19717_v38 = vrot.slane %v4605_v27, %v19680_v7  ;;  %v19720_v61 = vrot.slane %v4606_v43, %v19680_v7  ;;  %v19723_v55 = vrot.slane %v4725_v59, %v19680_v7  ;;  %v19726_v45 = vrot.slane %v4726_v2, %v19680_v7 }
0x1316   :  { %v4311_v8 = vpop.trf.xlu1  ;;  %v4280_v54 = vpop.trf.xlu0  ;;  %v4035_v59 = vmul.f32 1.442695, %v4020_v57 }
0x1317   :  { %v4741_v19 = vcombine.low %v19628_v6, %v4311_v8  ;;  %v4742_v17 = vcombine.high %v19628_v6, %v4311_v8  ;;  %v4861_v58 = vcombine.low %v19626_v3, %v4280_v54  ;;  %v4862_v9 = vcombine.high %v19626_v3, %v4280_v54 }
0x1318   :  { %18075 = vpow2.f32 %v4035_v59 }
0x1319   :  { %v19741_v2 = vrot.slane %v4741_v19, %v19680_v7  ;;  %v19744_v6 = vrot.slane %v4742_v17, %v19680_v7  ;;  %v19747_v3 = vrot.slane %v4861_v58, %v19680_v7  ;;  %v19750_v8 = vrot.slane %v4862_v9, %v19680_v7 }
0x131a   :  { %v4312_v54 = vpop.trf.xlu1  ;;  %v4281_v26 = vpop.trf.xlu0 }
0x131b   :  { %v4877_v58 = vcombine.low %v19632_v29, %v4312_v54  ;;  %v4878_v43 = vcombine.high %v19632_v29, %v4312_v54  ;;  %v4997_v9 = vcombine.low %v19630_v16, %v4281_v26  ;;  %v4998_v39 = vcombine.high %v19630_v16, %v4281_v26 }
0x131d   :  { %v19765_v27 = vrot.slane %v4877_v58, %v19680_v7  ;;  %v19768_v57 = vrot.slane %v4878_v43, %v19680_v7  ;;  %v19771_v19 = vrot.slane %v4997_v9, %v19680_v7  ;;  %v19774_v17 = vrot.slane %v4998_v39, %v19680_v7 }
0x131e   :  { %v4313_v14 = vpop.trf.xlu1  ;;  %v4282_v1 = vpop.trf.xlu0 }
0x131f   :  { %v5013_v29 = vcombine.low %v19636_v48, %v4313_v14  ;;  %v5014_v54 = vcombine.high %v19636_v48, %v4313_v14  ;;  %v5133_v16 = vcombine.low %v19634_v44, %v4282_v1  ;;  %v5134_v26 = vcombine.high %v19634_v44, %v4282_v1 }
0x1321   :  { %v19789_v9 = vrot.slane %v5013_v29, %v19680_v7  ;;  %v19792_v48 = vrot.slane %v5014_v54, %v19680_v7  ;;  %v19795_v44 = vrot.slane %v5133_v16, %v19680_v7  ;;  %v19798_v1 = vrot.slane %v5134_v26, %v19680_v7 }
0x1322   :  { %v4314_v14 = vpop.trf.xlu1  ;;  %v4283_v59 = vpop.trf.xlu0 }
0x1323   :  { %v5149_v16 = vcombine.low %v19640_v18, %v4314_v14  ;;  %v5150_v43 = vcombine.high %v19640_v18, %v4314_v14  ;;  %v5269_v26 = vcombine.low %v19638_v62, %v4283_v59  ;;  %v5270_v5 = vcombine.high %v19638_v62, %v4283_v59  ;;  %v19824_v11 = vpop.eup %18075 }
0x1325   :  { %v19813_v22 = vrot.slane %v5149_v16, %v19680_v7  ;;  %v19816_v39 = vrot.slane %v5150_v43, %v19680_v7  ;;  %v19819_v58 = vrot.slane %v5269_v26, %v19680_v7  ;;  %v19822_v29 = vrot.slane %v5270_v5, %v19680_v7 }
0x1326   :  { %v4315_v54 = vpop.trf.xlu1  ;;  %v4284_v53 = vpop.trf.xlu0 }
0x1327   :  { %v5285_v18 = vcombine.low %v19644_v12, %v4315_v54  ;;  %v5286_v62 = vcombine.high %v19644_v12, %v4315_v54  ;;  %v5405_v59 = vcombine.low %v19642_v20, %v4284_v53  ;;  %v5406_v14 = vcombine.high %v19642_v20, %v4284_v53 }
0x1329   :  { %v19839_v34 = vrot.slane %v5285_v18, %v19680_v7  ;;  %v19842_v12 = vrot.slane %v5286_v62, %v19680_v7  ;;  %v19845_v53 = vrot.slane %v5405_v59, %v19680_v7  ;;  %v19848_v20 = vrot.slane %v5406_v14, %v19680_v7 }
0x132a   :  { %v4316_v54 = vpop.trf.xlu1  ;;  %v4285_v16 = vpop.trf.xlu0 }
0x132b   :  { %22980 = vst [vmem:[#allocation45_spill] sm:$0xff] %v19845_v53  ;;  %22981 = vst [vmem:[#allocation46_spill] sm:$0xff] %v19848_v20  ;;  %4051 = vadd.xlane.f32.xlu1 %v19824_v11  ;;  %v5421_v59 = vcombine.low %v19648_v41, %v4316_v54  ;;  %v5422_v14 = vcombine.high %v19648_v41, %v4316_v54  ;;  %v5541_v43 = vcombine.low %v19646_v15, %v4285_v16 }
0x132c   :  { %v5542_v30 = vcombine.high %v19646_v15, %v4285_v16  ;;  %v23030_v53 = vcombine.low %v19688_v40, %v19694_v56 }
0x132d   :  { %v19864_v5 = vrot.slane %v5421_v59, %v19680_v7  ;;  %v19867_v26 = vrot.slane %v5422_v14, %v19680_v7  ;;  %v19870_v18 = vrot.slane %v5541_v43, %v19680_v7 }
0x132e   :  { %v19873_v62 = vrot.slane %v5542_v30, %v19680_v7  ;;  %v4317_v63 = vpop.trf.xlu1  ;;  %v4286_v49 = vpop.trf.xlu0 }
0x132f   :  { %22982 = vst [vmem:[#allocation47_spill] sm:$0xff] %v19864_v5  ;;  %22983 = vst [vmem:[#allocation48_spill] sm:$0xff] %v19867_v26  ;;  %v5557_v41 = vcombine.low %v19652_v24, %v4317_v63  ;;  %v5558_v54 = vcombine.high %v19652_v24, %v4317_v63  ;;  %v5677_v15 = vcombine.low %v19650_v28, %v4286_v49 }
0x1330   :  { %22984 = vst [vmem:[#allocation49_spill] sm:$0xff] %v19870_v18  ;;  %22985 = vst [vmem:[#allocation50_spill] sm:$0xff] %v19873_v62  ;;  %v5678_v16 = vcombine.high %v19650_v28, %v4286_v49 }
0x1331   :  { %v19888_v46 = vrot.slane %v5557_v41, %v19680_v7  ;;  %v19891_v63 = vrot.slane %v5558_v54, %v19680_v7  ;;  %v19894_v49 = vrot.slane %v5677_v15, %v19680_v7 }
0x1332   :  { %v19897_v28 = vrot.slane %v5678_v16, %v19680_v7  ;;  %v4318_v24 = vpop.trf.xlu1  ;;  %v4287_v43 = vpop.trf.xlu0 }
0x1333   :  { %22986 = vst [vmem:[#allocation51_spill] sm:$0xff] %v19888_v46  ;;  %22987 = vst [vmem:[#allocation52_spill] sm:$0xff] %v19891_v63  ;;  %v5693_v15 = vcombine.low %v19656_v47, %v4318_v24  ;;  %v5694_v59 = vcombine.high %v19656_v47, %v4318_v24  ;;  %v5813_v16 = vcombine.low %v19654_v50, %v4287_v43 }
0x1334   :  { %22988 = vst [vmem:[#allocation53_spill] sm:$0xff] %v19894_v49  ;;  %22989 = vst [vmem:[#allocation54_spill] sm:$0xff] %v19897_v28  ;;  %v5814_v25 = vcombine.high %v19654_v50, %v4287_v43 }
0x1335   :  { %v19912_v52 = vrot.slane %v5693_v15, %v19680_v7  ;;  %v19915_v30 = vrot.slane %v5694_v59, %v19680_v7  ;;  %v19918_v14 = vrot.slane %v5813_v16, %v19680_v7 }
0x1336   :  { %v19921_v41 = vrot.slane %v5814_v25, %v19680_v7  ;;  %v4319_v54 = vpop.trf.xlu1  ;;  %v4288_v51 = vpop.trf.xlu0 }
0x1337   :  { %22990 = vst [vmem:[#allocation55_spill] sm:$0xff] %v19912_v52  ;;  %22991 = vst [vmem:[#allocation56_spill] sm:$0xff] %v19915_v30  ;;  %v5829_v47 = vcombine.low %v19660_v13, %v4319_v54  ;;  %v5830_v24 = vcombine.high %v19660_v13, %v4319_v54  ;;  %v5949_v50 = vcombine.low %v19658_v60, %v4288_v51  ;;  %v18417_v52 = vmov 1934713408  }
0x1338   :  { %22992 = vst [vmem:[#allocation57_spill] sm:$0xff] %v19918_v14  ;;  %22993 = vst [vmem:[#allocation58_spill] sm:$0xff] %v19921_v41  ;;  %v5950_v43 = vcombine.high %v19658_v60, %v4288_v51  ;;  %v4520_v49 = vunpack.c.l.s4 %v18417_v52 }
0x1339   :  { %v19936_v42 = vrot.slane %v5829_v47, %v19680_v7  ;;  %v19939_v13 = vrot.slane %v5830_v24, %v19680_v7  ;;  %v19942_v60 = vrot.slane %v5949_v50, %v19680_v7 }
0x133a   :  { %v19945_v51 = vrot.slane %v5950_v43, %v19680_v7  ;;  %v4320_v54 = vpop.trf.xlu1  ;;  %v4289_v15 = vpop.trf.xlu0  ;;  %v4521_v62 = vunpack.c.0.s8 %v4520_v49 }
0x133b   :  { %22994 = vst [vmem:[#allocation59_spill] sm:$0xff] %v19936_v42  ;;  %22995 = vst [vmem:[#allocation60_spill] sm:$0xff] %v19939_v13  ;;  %v5965_v50 = vcombine.low %v19664_v36, %v4320_v54  ;;  %v5966_v59 = vcombine.high %v19664_v36, %v4320_v54  ;;  %v6085_v43 = vcombine.low %v19662_v10, %v4289_v15 }
0x133c   :  { %22996 = vst [vmem:[#allocation61_spill] sm:$0xff] %v19942_v60  ;;  %22997 = vst [vmem:[#allocation62_spill] sm:$0xff] %v19945_v51  ;;  %v6086_v21 = vcombine.high %v19662_v10, %v4289_v15 }
0x133d   :  { %v19960_v30 = vrot.slane %v5965_v50, %v19680_v7  ;;  %v19963_v25 = vrot.slane %v5966_v59, %v19680_v7  ;;  %v19966_v16 = vrot.slane %v6085_v43, %v19680_v7 }
0x133e   :  { %v19969_v47 = vrot.slane %v6086_v21, %v19680_v7  ;;  %v4321_v24 = vpop.trf.xlu1  ;;  %v4290_v13 = vpop.trf.xlu0 }
0x133f   :  { %22998 = vst [vmem:[#allocation63_spill] sm:$0xff] %v19960_v30  ;;  %22999 = vst [vmem:[#allocation64_spill] sm:$0xff] %v19963_v25  ;;  %v6101_v36 = vcombine.low %v19668_v37, %v4321_v24  ;;  %v6102_v54 = vcombine.high %v19668_v37, %v4321_v24  ;;  %v6221_v10 = vcombine.low %v19666_v32, %v4290_v13 }
0x1340   :  { %23000 = vst [vmem:[#allocation65_spill] sm:$0xff] %v19966_v16  ;;  %23001 = vst [vmem:[#allocation66_spill] sm:$0xff] %v19969_v47  ;;  %v6222_v15 = vcombine.high %v19666_v32, %v4290_v13 }
0x1341   :  { %v19984_v41 = vrot.slane %v6101_v36, %v19680_v7  ;;  %v19987_v37 = vrot.slane %v6102_v54, %v19680_v7  ;;  %v19998_v43 = vrot.slane %v6221_v10, %v19680_v7 }
0x1342   :  { %v4322_v24 = vpop.trf.xlu1  ;;  %v20001_v36 = vrot.slane %v6222_v15, %v19680_v7 }
0x1343   :  { %23002 = vst [vmem:[#allocation67_spill] sm:$0xff] %v19984_v41  ;;  %23003 = vst [vmem:[#allocation68_spill] sm:$0xff] %v19987_v37  ;;  %v6237_v54 = vcombine.low %v19673_v0, %v4322_v24  ;;  %v6238_v59 = vcombine.high %v19673_v0, %v4322_v24 }
0x1344   :  { %23004 = vst [vmem:[#allocation69_spill] sm:$0xff] %v19998_v43  ;;  %23005 = vst [vmem:[#allocation70_spill] sm:$0xff] %v20001_v36 }
0x1345   :  { %v20006_v32 = vrot.slane %v6237_v54, %v19680_v7  ;;  %v20009_v13 = vrot.slane %v6238_v59, %v19680_v7 }
0x1346   :  { %v20019_v37 = vpop.trf.xlu1 }
0x1347   :  { %23006 = vst [vmem:[#allocation71_spill] sm:$0xff] %v20006_v32  ;;  %23007 = vst [vmem:[#allocation72_spill] sm:$0xff] %v20009_v13 }
0x1348   :  { %23008 = vst [vmem:[#allocation73_spill] sm:$0xff] %v20019_v37 }
0x134a   :  { %v20021_v0 = vpop.trf.xlu1 }
0x134b   :  { %23009 = vst [vmem:[#allocation74_spill] sm:$0xff] %v20021_v0 }
0x134e   :  { %v4373_v24 = vpop.trf.xlu1 }
0x1352   :  { %v20023_v54 = vpop.trf.xlu1 }
0x1356   :  { %v20025_v59 = vpop.trf.xlu1 }
0x135a   :  { %v20027_v47 = vpop.trf.xlu1 }
0x135e   :  { %v20029_v50 = vpop.trf.xlu1 }
0x1362   :  { %v20031_v10 = vpop.trf.xlu1 }
0x1366   :  { %v20033_v32 = vpop.trf.xlu1 }
0x136a   :  { %v20035_v15 = vpop.trf.xlu1 }
0x136e   :  { %v20037_v21 = vpop.trf.xlu1 }
0x136f   :  { %23010 = vst [vmem:[#allocation75_spill] sm:$0xff] %v20037_v21  ;;  %v20054_v21 = vpop.trf.xlu0 }
0x1370   :  { %23018 = vst [vmem:[#allocation83_spill] sm:$0xff] %v20054_v21 }
0x1372   :  { %v20039_v13 = vpop.trf.xlu1 }
0x1373   :  { %23011 = vst [vmem:[#allocation76_spill] sm:$0xff] %v20039_v13  ;;  %v20056_v13 = vpop.trf.xlu0 }
0x1374   :  { %23019 = vst [vmem:[#allocation84_spill] sm:$0xff] %v20056_v13 }
0x1376   :  { %v20041_v36 = vpop.trf.xlu1 }
0x1377   :  { %23012 = vst [vmem:[#allocation77_spill] sm:$0xff] %v20041_v36  ;;  %v4341_v36 = vpop.trf.xlu0 }
0x137a   :  { %v20043_v0 = vpop.trf.xlu1 }
0x137b   :  { %23013 = vst [vmem:[#allocation78_spill] sm:$0xff] %v20043_v0  ;;  %v20058_v0 = vpop.trf.xlu0 }
0x137e   :  { %v20045_v43 = vpop.trf.xlu1 }
0x137f   :  { %23014 = vst [vmem:[#allocation79_spill] sm:$0xff] %v20045_v43  ;;  %v20060_v43 = vpop.trf.xlu0 }
0x1382   :  { %v20047_v41 = vpop.trf.xlu1 }
0x1383   :  { %23015 = vst [vmem:[#allocation80_spill] sm:$0xff] %v20047_v41  ;;  %v20062_v41 = vpop.trf.xlu0 }
0x1386   :  { %v20049_v16 = vpop.trf.xlu1 }
0x1387   :  { %23016 = vst [vmem:[#allocation81_spill] sm:$0xff] %v20049_v16  ;;  %v20064_v16 = vpop.trf.xlu0 }
0x138a   :  { %v20051_v37 = vpop.trf.xlu1 }
0x138b   :  { %23017 = vst [vmem:[#allocation82_spill] sm:$0xff] %v20051_v37  ;;  %v20066_v37 = vpop.trf.xlu0 }
0x13b8   :  { %v4052_v25 = vpop.xlane.xlu1 %4051 }
0x13b9   :  { %18077 = vrcp.f32 %v4052_v25  ;;  %v20068_v25 = vpop.trf.xlu0 }
0x13bd   :  { %v20070_v60 = vpop.trf.xlu0 }
0x13c3   :  { %v18078_v51 = vpop.eup %18077 }
0x13c4   :  { %v4068_v30 = vmul.f32 %v18078_v51, %v19824_v11  ;;  %v20072_v11 = vpop.trf.xlu0 }
0x13c5   :  { %23020 = vst [vmem:[#allocation85_spill] sm:$0xff] %v20072_v11 }
0x13c6   :  { %4421 = vxpose.xlu1.b32.start.end [1/1] (short) %v4068_v30, 128 }
0x13c8   :  { %v20074_v30 = vpop.trf.xlu0 }
0x13c9   :  { %23021 = vst [vmem:[#allocation86_spill] sm:$0xff] %v20074_v30 }
0x13cc   :  { %v20076_v51 = vpop.trf.xlu0 }
0x13cd   :  { %23022 = vst [vmem:[#allocation87_spill] sm:$0xff] %v20076_v51  ;;  %v20089_v51 = vsub.s32 %v4521_v62, %v18791_v31  ;;  %v23029_v31 = vcombine.low %v19685_v35, %v19691_v23 }
0x13cf   :  { %23028 = vst [vmem:[#allocation93_spill] sm:$0xff] %v20089_v51 }
0x13d0   :  { %v20078_v13 = vpop.trf.xlu0 }
0x13d1   :  { %23023 = vst [vmem:[#allocation88_spill] sm:$0xff] %v20078_v13 }
0x13d4   :  { %v20080_v21 = vpop.trf.xlu0 }
0x13d5   :  { %23024 = vst [vmem:[#allocation89_spill] sm:$0xff] %v20080_v21 }
0x13d8   :  { %v20082_v42 = vpop.trf.xlu0 }
0x13d9   :  { %23025 = vst [vmem:[#allocation90_spill] sm:$0xff] %v20082_v42 }
0x13dc   :  { %v20084_v14 = vpop.trf.xlu0 }
0x13dd   :  { %23026 = vst [vmem:[#allocation91_spill] sm:$0xff] %v20084_v14 }
0x13e0   :  { %v20086_v28 = vpop.trf.xlu0 }
0x13e1   :  { %23027 = vst [vmem:[#allocation92_spill] sm:$0xff] %v20086_v28 }
0x13e4   :  { %v4405_v63 = vpop.trf.xlu0 }
0x13e5   :  { %v4485_v46 = vcombine.low %v4341_v36, %v4405_v63  ;;  %v4486_v11 = vcombine.high %v4341_v36, %v4405_v63 }
0x13e7   :  { %v4493_v21 = vrot.slane %v4485_v46, %v19680_v7  ;;  %v4500_v42 = vrot.slane %v4486_v11, %v19680_v7  ;;  %v4525_v46 = vrot.slane %v23029_v31, %v20089_v51  ;;  %v4541_v31 = vrot.slane %v23030_v53, %v20089_v51 }
0x13e8   :  { %v4406_v13 = vpop.trf.xlu0  ;;  %v23032_v53 = vcombine.high %v19688_v40, %v19694_v56 }
0x1446   :  { %v4437_v18 = vpop.trf.xlu1 }
0x1447   :  { %v4501_v30 = vcombine.low %v4373_v24, %v4437_v18  ;;  %v4502_v26 = vcombine.high %v4373_v24, %v4437_v18  ;;  %v4621_v18 = vcombine.low %v20058_v0, %v4406_v13 }
0x1449   :  { %v4509_v14 = vrot.slane %v4501_v30, %v19680_v7  ;;  %v4516_v28 = vrot.slane %v4502_v26, %v19680_v7 }
0x144a   :  { %v4438_v52 = vpop.trf.xlu1 }
0x144b   :  { %v4549_v20 = vcombine.low %v4493_v21, %v4509_v14  ;;  %v4550_v49 = vcombine.high %v4493_v21, %v4509_v14  ;;  %v4565_v5 = vcombine.low %v4500_v42, %v4516_v28  ;;  %v4637_v63 = vcombine.low %v20023_v54, %v4438_v52 }
0x144c   :  { %v4566_v36 = vcombine.high %v4500_v42, %v4516_v28  ;;  %v4629_v21 = vrot.slane %v4621_v18, %v19680_v7  ;;  %v23031_v42 = vcombine.high %v19685_v35, %v19691_v23  ;;  %v4622_v18 = vcombine.high %v20058_v0, %v4406_v13 }
0x144d   :  { %v4557_v62 = vrot.slane %v4549_v20, %v20089_v51  ;;  %v4573_v24 = vrot.slane %v4565_v5, %v20089_v51  ;;  %v4645_v26 = vrot.slane %v4637_v63, %v19680_v7  ;;  %v4564_v14 = vrot.slane %v4550_v49, %v20089_v51 }
0x144e   :  { %v4532_v5 = vrot.slane %v23031_v42, %v20089_v51  ;;  %v4638_v20 = vcombine.high %v20023_v54, %v4438_v52  ;;  %v4580_v49 = vrot.slane %v4566_v36, %v20089_v51  ;;  %v4439_v23 = vpop.trf.xlu1  ;;  %v4636_v42 = vrot.slane %v4622_v18, %v19680_v7  ;;  %v4407_v36 = vpop.trf.xlu0 }
0x144f   :  { %v4582_v11 = vcombine.high %v4525_v46, %v4557_v62  ;;  %v4581_v30 = vcombine.low %v4525_v46, %v4557_v62  ;;  %v4685_v28 = vcombine.low %v4629_v21, %v4645_v26  ;;  %v4585_v63 = vcombine.low %v4541_v31, %v4573_v24 }
0x1450   :  { %v4583_v46 = vcombine.low %v4532_v5, %v4564_v14  ;;  %v4548_v62 = vrot.slane %v23032_v53, %v20089_v51  ;;  %v4686_v35 = vcombine.high %v4629_v21, %v4645_v26  ;;  %v4584_v54 = vcombine.high %v4532_v5, %v4564_v14 }
0x1451   :  { %6661 = vxpose.xlu1.b32.start.end [1/1] (short) (narrow) %v4582_v11, 8  ;;  %6629 = vxpose.xlu0.b32.start.end [1/1] (short) (narrow) %v4581_v30, 8  ;;  %v4652_v11 = vrot.slane %v4638_v20, %v19680_v7  ;;  %v4693_v52 = vrot.slane %v4685_v28, %v20089_v51  ;;  %v23033_v13 = vcombine.low %v19697_v33, %v19717_v38 }
0x1452   :  { %v4587_v30 = vcombine.low %v4548_v62, %v4580_v49  ;;  %v4773_v40 = vcombine.low %v20025_v59, %v4439_v23  ;;  %v4586_v20 = vcombine.high %v4541_v31, %v4573_v24  ;;  %v4700_v21 = vrot.slane %v4686_v35, %v20089_v51 }
0x1453   :  { %v4661_v0 = vrot.slane %v23033_v13, %v20089_v51  ;;  %v4701_v56 = vcombine.low %v4636_v42, %v4652_v11  ;;  %v4757_v14 = vcombine.low %v20060_v43, %v4407_v36  ;;  %v23034_v5 = vcombine.high %v19697_v33, %v19717_v38 }
0x1454   :  { %v4588_v18 = vcombine.high %v4548_v62, %v4580_v49  ;;  %v23035_v31 = vcombine.low %v19700_v4, %v19720_v61  ;;  %v4758_v49 = vcombine.high %v20060_v43, %v4407_v36  ;;  %v23036_v62 = vcombine.high %v19700_v4, %v19720_v61  ;;  %v4408_v36 = vpop.trf.xlu0 }
0x1455   :  { %6757 = vxpose.xlu1.b32.start.end [1/1] (short) (narrow) %v4585_v63, 8  ;;  %6693 = vxpose.xlu0.b32.start.end [1/1] (short) (narrow) %v4583_v46, 8  ;;  %v4717_v26 = vcombine.low %v4661_v0, %v4693_v52  ;;  %v4668_v28 = vrot.slane %v23034_v5, %v20089_v51  ;;  %v4702_v63 = vcombine.high %v4636_v42, %v4652_v11 }
0x1456   :  { %v4781_v46 = vrot.slane %v4773_v40, %v19680_v7  ;;  %v4765_v24 = vrot.slane %v4757_v14, %v19680_v7  ;;  %v4677_v35 = vrot.slane %v23035_v31, %v20089_v51  ;;  %v4718_v38 = vcombine.high %v4661_v0, %v4693_v52  ;;  %v4440_v52 = vpop.trf.xlu1 }
0x1457   :  { %v4719_v53 = vcombine.low %v4668_v28, %v4700_v21  ;;  %v4716_v42 = vrot.slane %v4702_v63, %v20089_v51  ;;  %v4684_v13 = vrot.slane %v23036_v62, %v20089_v51  ;;  %v23037_v43 = vcombine.low %v19723_v55, %v19741_v2 }
0x1458   :  { %v4821_v33 = vcombine.low %v4765_v24, %v4781_v46  ;;  %v4909_v61 = vcombine.low %v20027_v47, %v4440_v52  ;;  %v23038_v63 = vcombine.high %v19723_v55, %v19741_v2  ;;  %v23040_v62 = vcombine.high %v19726_v45, %v19744_v6 }
0x1459   :  { %6821 = vxpose.xlu1.b32.start.end [1/1] (short) (narrow) %v4587_v30, 8  ;;  %6725 = vxpose.xlu0.b32.start.end [1/1] (short) (narrow) %v4584_v54, 8  ;;  %v4709_v30 = vrot.slane %v4701_v56, %v20089_v51  ;;  %v4774_v54 = vcombine.high %v20025_v59, %v4439_v23  ;;  %v4822_v56 = vcombine.high %v4765_v24, %v4781_v46 }
0x145a   :  { %v4829_v59 = vrot.slane %v4821_v33, %v20089_v51  ;;  %v4772_v23 = vrot.slane %v4758_v49, %v19680_v7  ;;  %v4797_v0 = vrot.slane %v23037_v43, %v20089_v51  ;;  %v4804_v46 = vrot.slane %v23038_v63, %v20089_v51  ;;  %v4409_v43 = vpop.trf.xlu0 }
0x145b   :  { %v4721_v11 = vcombine.low %v4677_v35, %v4709_v30  ;;  %v4788_v40 = vrot.slane %v4774_v54, %v19680_v7  ;;  %v4722_v14 = vcombine.high %v4677_v35, %v4709_v30  ;;  %v4724_v24 = vcombine.high %v4684_v13, %v4716_v42 }
0x145c   :  { %v4853_v5 = vcombine.low %v4797_v0, %v4829_v59  ;;  %v23039_v35 = vcombine.low %v19726_v45, %v19744_v6  ;;  %v4854_v2 = vcombine.high %v4797_v0, %v4829_v59 }
0x145d   :  { %6789 = vxpose.xlu0.b32.start.end [1/1] (short) (narrow) %v4586_v20, 8  ;;  %6885 = vxpose.xlu1.b32.start.end [1/1] (short) (narrow) %v4717_v26, 8  ;;  %v4720_v20 = vcombine.high %v4668_v28, %v4700_v21  ;;  %v4723_v26 = vcombine.low %v4684_v13, %v4716_v42  ;;  %v4837_v4 = vcombine.low %v4772_v23, %v4788_v40 }
0x145e   :  { %v4836_v21 = vrot.slane %v4822_v56, %v20089_v51  ;;  %v4893_v28 = vcombine.low %v20062_v41, %v4408_v36  ;;  %v4813_v33 = vrot.slane %v23039_v35, %v20089_v51  ;;  %v4894_v42 = vcombine.high %v20062_v41, %v4408_v36 }
0x145f   :  { %v4845_v54 = vrot.slane %v4837_v4, %v20089_v51  ;;  %v4820_v13 = vrot.slane %v23040_v62, %v20089_v51  ;;  %v23041_v41 = vcombine.low %v19747_v3, %v19765_v27 }
0x1460   :  { %v4855_v31 = vcombine.low %v4804_v46, %v4836_v21  ;;  %v4901_v30 = vrot.slane %v4893_v28, %v19680_v7 }
0x1461   :  { %6853 = vxpose.xlu0.b32.start.end [1/1] (short) (narrow) %v4588_v18, 8  ;;  %6949 = vxpose.xlu1.b32.start.end [1/1] (short) (narrow) %v4719_v53, 8  ;;  %v4838_v18 = vcombine.high %v4772_v23, %v4788_v40  ;;  %v4917_v53 = vrot.slane %v4909_v61, %v19680_v7  ;;  %v4908_v23 = vrot.slane %v4894_v42, %v19680_v7 }
0x1462   :  { %v4858_v0 = vcombine.high %v4813_v33, %v4845_v54  ;;  %v5029_v61 = vcombine.low %v20064_v16, %v4409_v43 }
0x1463   :  { %v4957_v55 = vcombine.low %v4901_v30, %v4917_v53  ;;  %v4852_v49 = vrot.slane %v4838_v18, %v20089_v51  ;;  %v4958_v56 = vcombine.high %v4901_v30, %v4917_v53 }
0x1464   :  { %v5037_v53 = vrot.slane %v5029_v61, %v19680_v7 }
0x1465   :  { %6917 = vxpose.xlu0.b32.start.end [1/1] (short) (narrow) %v4718_v38, 8  ;;  %7013 = vxpose.xlu1.b32.start.end [1/1] (short) (narrow) %v4721_v11, 8  ;;  %v4910_v38 = vcombine.high %v20027_v47, %v4440_v52  ;;  %v4857_v11 = vcombine.low %v4813_v33, %v4845_v54  ;;  %v4859_v47 = vcombine.low %v4820_v13, %v4852_v49 }
0x1466   :  { %v4965_v59 = vrot.slane %v4957_v55, %v20089_v51  ;;  %v4933_v52 = vrot.slane %v23041_v41, %v20089_v51  ;;  %v4972_v4 = vrot.slane %v4958_v56, %v20089_v51  ;;  %v4860_v63 = vcombine.high %v4820_v13, %v4852_v49  ;;  %v4410_v56 = vpop.trf.xlu0 }
0x1467   :  { %v4924_v40 = vrot.slane %v4910_v38, %v19680_v7  ;;  %v5030_v33 = vcombine.high %v20064_v16, %v4409_v43  ;;  %v23044_v38 = vcombine.high %v19750_v8, %v19768_v57  ;;  %v23045_v16 = vcombine.low %v19771_v19, %v19789_v9 }
0x1468   :  { %v4989_v36 = vcombine.low %v4933_v52, %v4965_v59 }
0x1469   :  { %6981 = vxpose.xlu0.b32.start.end [1/1] (short) (narrow) %v4720_v20, 8  ;;  %7077 = vxpose.xlu1.b32.start.end [1/1] (short) (narrow) %v4723_v26, 8  ;;  %v4441_v20 = vpop.trf.xlu1  ;;  %v4856_v26 = vcombine.high %v4804_v46, %v4836_v21  ;;  %v4973_v6 = vcombine.low %v4908_v23, %v4924_v40  ;;  %v4974_v21 = vcombine.high %v4908_v23, %v4924_v40 }
0x146a   :  { %v5045_v45 = vcombine.low %v20029_v50, %v4441_v20  ;;  %v5046_v54 = vcombine.high %v20029_v50, %v4441_v20  ;;  %v4956_v55 = vrot.slane %v23044_v38, %v20089_v51  ;;  %v5044_v62 = vrot.slane %v5030_v33, %v19680_v7 }
0x146b   :  { %v4981_v18 = vrot.slane %v4973_v6, %v20089_v51  ;;  %v4988_v35 = vrot.slane %v4974_v21, %v20089_v51  ;;  %v5069_v40 = vrot.slane %v23045_v16, %v20089_v51  ;;  %v23046_v23 = vcombine.high %v19771_v19, %v19789_v9 }
0x146c   :  { %v5053_v28 = vrot.slane %v5045_v45, %v19680_v7 }
0x146d   :  { %7045 = vxpose.xlu0.b32.start.end [1/1] (short) (narrow) %v4722_v14, 8  ;;  %7141 = vxpose.xlu1.b32.start.end [1/1] (short) (narrow) %v4853_v5, 8  ;;  %v23042_v14 = vcombine.high %v19747_v3, %v19765_v27  ;;  %v4990_v3 = vcombine.high %v4933_v52, %v4965_v59  ;;  %v4995_v42 = vcombine.low %v4956_v55, %v4988_v35  ;;  %v4442_v13 = vpop.trf.xlu1 }
0x146e   :  { %v5093_v27 = vcombine.low %v5037_v53, %v5053_v28  ;;  %v5165_v59 = vcombine.low %v20066_v37, %v4410_v56  ;;  %v5076_v41 = vrot.slane %v23046_v23, %v20089_v51  ;;  %v4996_v45 = vcombine.high %v4956_v55, %v4988_v35 }
0x146f   :  { %v4940_v5 = vrot.slane %v23042_v14, %v20089_v51  ;;  %v5182_v14 = vcombine.high %v20031_v10, %v4442_v13 }
0x1470   :  { %v5101_v50 = vrot.slane %v5093_v27, %v20089_v51 }
0x1471   :  { %7109 = vxpose.xlu0.b32.start.end [1/1] (short) (narrow) %v4724_v24, 8  ;;  %7205 = vxpose.xlu1.b32.start.end [1/1] (short) (narrow) %v4855_v31, 8  ;;  %v4991_v46 = vcombine.low %v4940_v5, %v4972_v4  ;;  %v23043_v24 = vcombine.low %v19750_v8, %v19768_v57  ;;  %v4992_v49 = vcombine.high %v4940_v5, %v4972_v4 }
0x1472   :  { %v5181_v57 = vcombine.low %v20031_v10, %v4442_v13  ;;  %v23047_v4 = vcombine.low %v19774_v17, %v19792_v48  ;;  %v5126_v9 = vcombine.high %v5069_v40, %v5101_v50 }
0x1473   :  { %v4949_v31 = vrot.slane %v23043_v24, %v20089_v51 }
0x1474   :  { %v5189_v43 = vrot.slane %v5181_v57, %v19680_v7  ;;  %v5085_v61 = vrot.slane %v23047_v4, %v20089_v51 }
0x1475   :  { %7173 = vxpose.xlu0.b32.start.end [1/1] (short) (narrow) %v4854_v2, 8  ;;  %7269 = vxpose.xlu1.b32.start.end [1/1] (short) (narrow) %v4857_v11, 8  ;;  %v4993_v30 = vcombine.low %v4949_v31, %v4981_v18  ;;  %v5060_v2 = vrot.slane %v5046_v54, %v19680_v7  ;;  %v5094_v11 = vcombine.high %v5037_v53, %v5053_v28  ;;  %v4411_v53 = vpop.trf.xlu0 }
0x1476   :  { %v4994_v20 = vcombine.high %v4949_v31, %v4981_v18  ;;  %v5166_v28 = vcombine.high %v20066_v37, %v4410_v56  ;;  %v5196_v18 = vrot.slane %v5182_v14, %v19680_v7  ;;  %v4443_v31 = vpop.trf.xlu1  ;;  %v23049_v37 = vcombine.low %v19795_v44, %v19813_v22 }
0x1477   :  { %v5109_v8 = vcombine.low %v5044_v62, %v5060_v2  ;;  %v5110_v52 = vcombine.high %v5044_v62, %v5060_v2  ;;  %v5301_v55 = vcombine.low %v20068_v25, %v4411_v53 }
0x1479   :  { %7237 = vxpose.xlu0.b32.start.end [1/1] (short) (narrow) %v4856_v26, 8  ;;  %7333 = vxpose.xlu1.b32.start.end [1/1] (short) (narrow) %v4859_v47, 8  ;;  %v5125_v26 = vcombine.low %v5069_v40, %v5101_v50  ;;  %v5108_v47 = vrot.slane %v5094_v11, %v20089_v51  ;;  %v5124_v21 = vrot.slane %v5110_v52, %v20089_v51  ;;  %v20243_v2 = vpop.trf.xlu0 }
0x147a   :  { %v20245_v11 = vpop.trf.xlu1  ;;  %v5309_v56 = vrot.slane %v5301_v55, %v19680_v7  ;;  %v23052_v52 = vcombine.high %v19798_v1, %v19816_v39 }
0x147b   :  { %v5127_v6 = vcombine.low %v5076_v41, %v5108_v47  ;;  %v5128_v10 = vcombine.high %v5076_v41, %v5108_v47  ;;  %v5302_v41 = vcombine.high %v20068_v25, %v4411_v53 }
0x147d   :  { %7301 = vxpose.xlu0.b32.start.end [1/1] (short) (narrow) %v4858_v0, 8  ;;  %7397 = vxpose.xlu1.b32.start.end [1/1] (short) (narrow) %v4989_v36, 8  ;;  %v5117_v0 = vrot.slane %v5109_v8, %v20089_v51  ;;  %v5173_v36 = vrot.slane %v5165_v59, %v19680_v7  ;;  %v23051_v8 = vcombine.low %v19798_v1, %v19816_v39 }
0x147e   :  { %v5316_v4 = vrot.slane %v5302_v41, %v19680_v7  ;;  %v23053_v39 = vcombine.low %v19819_v58, %v19839_v34 }
0x147f   :  { %v5229_v19 = vcombine.low %v5173_v36, %v5189_v43  ;;  %v5129_v5 = vcombine.low %v5085_v61, %v5117_v0  ;;  %v5230_v24 = vcombine.high %v5173_v36, %v5189_v43  ;;  %v5130_v35 = vcombine.high %v5085_v61, %v5117_v0 }
0x1480   :  { %v5221_v57 = vrot.slane %v23051_v8, %v20089_v51  ;;  %v5228_v43 = vrot.slane %v23052_v52, %v20089_v51  ;;  %v5341_v1 = vrot.slane %v23053_v39, %v20089_v51  ;;  %v23066_v8 = vld [vmem:[#allocation51_spill] sm:$0xff] }
0x1481   :  { %7365 = vxpose.xlu0.b32.start.end [1/1] (short) (narrow) %v4860_v63, 8  ;;  %7461 = vxpose.xlu1.b32.start.end [1/1] (short) (narrow) %v4991_v46, 8  ;;  %v23048_v63 = vcombine.high %v19774_v17, %v19792_v48  ;;  %v5237_v27 = vrot.slane %v5229_v19, %v20089_v51  ;;  %v5317_v17 = vcombine.low %v20033_v32, %v4443_v31 }
0x1482   :  { %v5244_v38 = vrot.slane %v5230_v24, %v20089_v51  ;;  %v5453_v19 = vcombine.low %v20035_v15, %v20245_v11 }
0x1483   :  { %v5092_v46 = vrot.slane %v23048_v63, %v20089_v51  ;;  %v5325_v62 = vrot.slane %v5317_v17, %v19680_v7  ;;  %v23054_v63 = vcombine.high %v19819_v58, %v19839_v34  ;;  %v23056_v34 = vcombine.high %v19822_v29, %v19842_v12  ;;  %v23057_v17 = vld [vmem:[#allocation45_spill] sm:$0xff] }
0x1484   :  { %v5461_v24 = vrot.slane %v5453_v19, %v19680_v7 }
0x1485   :  { %7429 = vxpose.xlu0.b32.start.end [1/1] (short) (narrow) %v4990_v3, 8  ;;  %7525 = vxpose.xlu1.b32.start.end [1/1] (short) (narrow) %v4993_v30, 8  ;;  %v5131_v54 = vcombine.low %v5092_v46, %v5124_v21  ;;  %v5180_v3 = vrot.slane %v5166_v28, %v19680_v7  ;;  %v5205_v30 = vrot.slane %v23049_v37, %v20089_v51 }
0x1486   :  { %v5132_v13 = vcombine.high %v5092_v46, %v5124_v21  ;;  %v5437_v28 = vcombine.low %v20070_v60, %v20243_v2  ;;  %v5348_v46 = vrot.slane %v23054_v63, %v20089_v51  ;;  %v20304_v58 = vrot.slane %v23056_v34, %v20089_v51 }
0x1487   :  { %v5245_v48 = vcombine.low %v5180_v3, %v5196_v18  ;;  %v5261_v33 = vcombine.low %v5205_v30, %v5237_v27  ;;  %v5246_v50 = vcombine.high %v5180_v3, %v5196_v18  ;;  %v5262_v47 = vcombine.high %v5205_v30, %v5237_v27 }
0x1488   :  { %v23055_v3 = vcombine.low %v19822_v29, %v19842_v12  ;;  %v5445_v30 = vrot.slane %v5437_v28, %v19680_v7  ;;  %v23062_v29 = vld [vmem:[#allocation48_spill] sm:$0xff] }
0x1489   :  { %7493 = vxpose.xlu0.b32.start.end [1/1] (short) (narrow) %v4992_v49, 8  ;;  %7589 = vxpose.xlu1.b32.start.end [1/1] (short) (narrow) %v4995_v42, 8  ;;  %v23050_v49 = vcombine.high %v19795_v44, %v19813_v22  ;;  %v5253_v40 = vrot.slane %v5245_v48, %v20089_v51  ;;  %v20259_v22 = vpop.trf.xlu0  ;;  %v5365_v44 = vcombine.low %v5309_v56, %v5325_v62  ;;  %v23058_v48 = vld [vmem:[#allocation47_spill] sm:$0xff] }
0x148a   :  { %v5260_v23 = vrot.slane %v5246_v50, %v20089_v51  ;;  %v5357_v37 = vrot.slane %v23055_v3, %v20089_v51  ;;  %v23060_v55 = vcombine.high %v23057_v17, %v23058_v48 }
0x148b   :  { %v5212_v42 = vrot.slane %v23050_v49, %v20089_v51  ;;  %v5265_v59 = vcombine.low %v5221_v57, %v5253_v40  ;;  %v5373_v36 = vrot.slane %v5365_v44, %v20089_v51 }
0x148c   :  { %v5267_v0 = vcombine.low %v5228_v43, %v5260_v23  ;;  %v20318_v49 = vrot.slane %v23060_v55, %v20089_v51 }
0x148d   :  { %7557 = vxpose.xlu0.b32.start.end [1/1] (short) (narrow) %v4994_v20, 8  ;;  %7653 = vxpose.xlu1.b32.start.end [1/1] (short) (narrow) %v5125_v26, 8  ;;  %v5263_v16 = vcombine.low %v5212_v42, %v5244_v38  ;;  %v5318_v20 = vcombine.high %v20033_v32, %v4443_v31  ;;  %v20261_v26 = vpop.trf.xlu1  ;;  %v20272_v61 = vpop.trf.xlu0 }
0x148f   :  { %v5332_v32 = vrot.slane %v5318_v20, %v19680_v7 }
0x1491   :  { %7621 = vxpose.xlu0.b32.start.end [1/1] (short) (narrow) %v4996_v45, 8  ;;  %7717 = vxpose.xlu1.b32.start.end [1/1] (short) (narrow) %v5127_v6, 8  ;;  %v5366_v45 = vcombine.high %v5309_v56, %v5325_v62  ;;  %v5264_v6 = vcombine.high %v5212_v42, %v5244_v38  ;;  %v20274_v14 = vpop.trf.xlu1  ;;  %v5381_v25 = vcombine.low %v5316_v4, %v5332_v32  ;;  %v20289_v53 = vpop.trf.xlu0  ;;  %v23061_v42 = vld [vmem:[#allocation46_spill] sm:$0xff]  ;;  %v23065_v56 = vld [vmem:[#allocation49_spill] sm:$0xff] }
0x1492   :  { %v5382_v18 = vcombine.high %v5316_v4, %v5332_v32  ;;  %v5454_v38 = vcombine.high %v20035_v15, %v20245_v11  ;;  %v23063_v12 = vcombine.low %v23061_v42, %v23062_v29  ;;  %v23064_v62 = vcombine.high %v23061_v42, %v23062_v29  ;;  %v23074_v4 = vld [vmem:[#allocation55_spill] sm:$0xff]  ;;  %v23085_v29 = vld [vmem:[#allocation58_spill] sm:$0xff] }
0x1493   :  { %v5380_v21 = vrot.slane %v5366_v45, %v20089_v51  ;;  %v5389_v27 = vrot.slane %v5381_v25, %v20089_v51  ;;  %v5398_v15 = vcombine.high %v5341_v1, %v5373_v36  ;;  %v23068_v44 = vcombine.high %v23065_v56, %v23066_v8 }
0x1494   :  { %v20324_v50 = vrot.slane %v23063_v12, %v20089_v51  ;;  %v5438_v45 = vcombine.high %v20070_v60, %v20243_v2  ;;  %v20378_v60 = vrot.slane %v5454_v38, %v19680_v7  ;;  %v23077_v2 = vld [vmem:[#allocation54_spill] sm:$0xff]  ;;  %v23086_v12 = vld [vmem:[#allocation60_spill] sm:$0xff] }
0x1495   :  { %7685 = vxpose.xlu0.b32.start.end [1/1] (short) (narrow) %v5126_v9, 8  ;;  %7781 = vxpose.xlu1.b32.start.end [1/1] (short) (narrow) %v5129_v5, 8  ;;  %v5266_v9 = vcombine.high %v5221_v57, %v5253_v40  ;;  %v5397_v5 = vcombine.low %v5341_v1, %v5373_v36  ;;  %v20292_v31 = vpop.trf.xlu1  ;;  %v5401_v11 = vcombine.low %v5357_v37, %v5389_v27  ;;  %v23073_v36 = vld [vmem:[#allocation53_spill] sm:$0xff] }
0x1496   :  { %v20333_v40 = vrot.slane %v5382_v18, %v20089_v51  ;;  %v23067_v57 = vcombine.low %v23065_v56, %v23066_v8  ;;  %v23075_v39 = vcombine.low %v23073_v36, %v23074_v4  ;;  %v23076_v25 = vcombine.high %v23073_v36, %v23074_v4  ;;  %v23097_v36 = vld [vmem:[#allocation40_spill] sm:$0xff] }
0x1497   :  { %v5452_v56 = vrot.slane %v5438_v45, %v19680_v7 }
0x1498   :  { %v20339_v20 = vrot.slane %v23067_v57, %v20089_v51  ;;  %v20369_v1 = vrot.slane %v23075_v39, %v20089_v51  ;;  %v20375_v19 = vrot.slane %v23076_v25, %v20089_v51  ;;  %v23098_v39 = vld [vmem:[#allocation73_spill] sm:$0xff] }
0x1499   :  { %7749 = vxpose.xlu0.b32.start.end [1/1] (short) (narrow) %v5128_v10, 8  ;;  %7845 = vxpose.xlu1.b32.start.end [1/1] (short) (narrow) %v5131_v54, 8  ;;  %v5268_v10 = vcombine.high %v5228_v43, %v5260_v23  ;;  %v5399_v54 = vcombine.low %v5348_v46, %v5380_v21  ;;  %v23070_v23 = vld [vmem:[#allocation52_spill] sm:$0xff]  ;;  %v23099_v25 = vld [vmem:[#allocation41_spill] sm:$0xff] }
0x149a   :  { %v6373_v45 = vcombine.low %v23099_v25, %v23098_v39 }
0x149d   :  { %7813 = vxpose.xlu0.b32.start.end [1/1] (short) (narrow) %v5130_v35, 8  ;;  %7909 = vxpose.xlu1.b32.start.end [1/1] (short) (narrow) %v5261_v33, 8  ;;  %v23059_v35 = vcombine.low %v23057_v17, %v23058_v48  ;;  %v5502_v17 = vcombine.high %v5445_v30, %v5461_v24  ;;  %v5400_v48 = vcombine.high %v5348_v46, %v5380_v21 }
0x149e   :  { %v23088_v21 = vcombine.high %v23085_v29, %v23086_v12 }
0x149f   :  { %v20310_v33 = vrot.slane %v23059_v35, %v20089_v51  ;;  %v5403_v35 = vcombine.low %v20304_v58, %v20333_v40 }
0x14a0   :  { %v20417_v46 = vrot.slane %v23088_v21, %v20089_v51  ;;  %v23103_v21 = vld [vmem:[#allocation42_spill] sm:$0xff] }
0x14a1   :  { %7877 = vxpose.xlu0.b32.start.end [1/1] (short) (narrow) %v5132_v13, 8  ;;  %7973 = vxpose.xlu1.b32.start.end [1/1] (short) (narrow) %v5263_v16, 8  ;;  %v20330_v13 = vrot.slane %v23064_v62, %v20089_v51  ;;  %v5501_v16 = vcombine.low %v5445_v30, %v5461_v24  ;;  %v23087_v62 = vcombine.low %v23085_v29, %v23086_v12  ;;  %v23089_v24 = vld [vmem:[#allocation61_spill] sm:$0xff]  ;;  %v23090_v30 = vld [vmem:[#allocation63_spill] sm:$0xff] }
0x14a2   :  { %v23092_v8 = vcombine.high %v23089_v24, %v23090_v30  ;;  %v6374_v12 = vcombine.high %v23099_v25, %v23098_v39  ;;  %v5518_v39 = vcombine.high %v5452_v56, %v20378_v60  ;;  %v23110_v25 = vld [vmem:[#allocation66_spill] sm:$0xff] }
0x14a3   :  { %v5509_v38 = vrot.slane %v5501_v16, %v20089_v51  ;;  %v23091_v16 = vcombine.low %v23089_v24, %v23090_v30  ;;  %v23104_v30 = vld [vmem:[#allocation65_spill] sm:$0xff] }
0x14a4   :  { %v20430_v57 = vrot.slane %v23092_v8, %v20089_v51 }
0x14a5   :  { %7941 = vxpose.xlu0.b32.start.end [1/1] (short) (narrow) %v5262_v47, 8  ;;  %8037 = vxpose.xlu1.b32.start.end [1/1] (short) (narrow) %v5265_v59, 8  ;;  %v20345_v47 = vrot.slane %v23068_v44, %v20089_v51  ;;  %v23069_v59 = vld [vmem:[#allocation50_spill] sm:$0xff] }
0x14a6   :  { %v23071_v41 = vcombine.low %v23069_v59, %v23070_v23  ;;  %v23072_v43 = vcombine.high %v23069_v59, %v23070_v23  ;;  %v23093_v44 = vld [vmem:[#allocation62_spill] sm:$0xff]  ;;  %v23094_v59 = vld [vmem:[#allocation64_spill] sm:$0xff] }
0x14a7   :  { %v23095_v23 = vcombine.low %v23093_v44, %v23094_v59 }
0x14a8   :  { %v20351_v52 = vrot.slane %v23071_v41, %v20089_v51  ;;  %v20357_v32 = vrot.slane %v23072_v43, %v20089_v51  ;;  %v23096_v43 = vld [vmem:[#allocation83_spill] sm:$0xff] }
0x14a9   :  { %8005 = vxpose.xlu0.b32.start.end [1/1] (short) (narrow) %v5264_v6, 8  ;;  %8101 = vxpose.xlu1.b32.start.end [1/1] (short) (narrow) %v5267_v0, 8  ;;  %v20361_v6 = vpop.trf.xlu0  ;;  %v20363_v0 = vpop.trf.xlu1  ;;  %v20436_v41 = vrot.slane %v23095_v23, %v20089_v51  ;;  %v6357_v4 = vcombine.low %v23097_v36, %v23096_v43  ;;  %v6358_v29 = vcombine.high %v23097_v36, %v23096_v43 }
0x14aa   :  { %v6381_v36 = vrot.slane %v6373_v45, %v19680_v7 }
0x14ab   :  { %v6365_v43 = vrot.slane %v6357_v4, %v19680_v7  ;;  %v6372_v4 = vrot.slane %v6358_v29, %v19680_v7  ;;  %v23118_v29 = vld [vmem:[#allocation69_spill] sm:$0xff] }
0x14ad   :  { %8069 = vxpose.xlu0.b32.start.end [1/1] (short) (narrow) %v5266_v9, 8  ;;  %8165 = vxpose.xlu1.b32.start.end [1/1] (short) (narrow) %v5397_v5, 8  ;;  %v23078_v9 = vld [vmem:[#allocation56_spill] sm:$0xff] }
0x14ae   :  { %v23079_v5 = vcombine.low %v23077_v2, %v23078_v9  ;;  %v23080_v63 = vcombine.high %v23077_v2, %v23078_v9  ;;  %v23100_v2 = vld [vmem:[#allocation75_spill] sm:$0xff] }
0x14af   :  { %v5589_v9 = vcombine.low %v23100_v2, %v20261_v26 }
0x14b0   :  { %v20384_v28 = vrot.slane %v23079_v5, %v20089_v51  ;;  %v20390_v18 = vrot.slane %v23080_v63, %v20089_v51  ;;  %v23101_v5 = vcombine.high %v23093_v44, %v23094_v59 }
0x14b1   :  { %8133 = vxpose.xlu0.b32.start.end [1/1] (short) (narrow) %v5268_v10, 8  ;;  %8229 = vxpose.xlu1.b32.start.end [1/1] (short) (narrow) %v5399_v54, 8  ;;  %v23081_v10 = vld [vmem:[#allocation57_spill] sm:$0xff]  ;;  %v23082_v54 = vld [vmem:[#allocation59_spill] sm:$0xff] }
0x14b2   :  { %v23083_v3 = vcombine.low %v23081_v10, %v23082_v54  ;;  %v23084_v55 = vcombine.high %v23081_v10, %v23082_v54  ;;  %v20448_v63 = vrot.slane %v23101_v5, %v20089_v51  ;;  %v20450_v10 = vpop.trf.xlu0  ;;  %v5517_v54 = vcombine.low %v5452_v56, %v20378_v60  ;;  %v23111_v5 = vld [vmem:[#allocation68_spill] sm:$0xff] }
0x14b3   :  { %v6388_v60 = vrot.slane %v6374_v12, %v19680_v7  ;;  %v23115_v45 = vcombine.high %v23110_v25, %v23111_v5  ;;  %v23119_v12 = vld [vmem:[#allocation71_spill] sm:$0xff] }
0x14b4   :  { %v20396_v34 = vrot.slane %v23083_v3, %v20089_v51  ;;  %v20405_v42 = vrot.slane %v23084_v55, %v20089_v51  ;;  %v20453_v3 = vpop.trf.xlu1  ;;  %v5516_v55 = vrot.slane %v5502_v17, %v20089_v51 }
0x14b5   :  { %8197 = vxpose.xlu0.b32.start.end [1/1] (short) (narrow) %v5398_v15, 8  ;;  %8293 = vxpose.xlu1.b32.start.end [1/1] (short) (narrow) %v5401_v11, 8  ;;  %v20411_v15 = vrot.slane %v23087_v62, %v20089_v51  ;;  %v20423_v11 = vrot.slane %v23091_v16, %v20089_v51  ;;  %v23102_v62 = vld [vmem:[#allocation84_spill] sm:$0xff]  ;;  %v23105_v16 = vld [vmem:[#allocation67_spill] sm:$0xff] }
0x14b6   :  { %v6493_v24 = vcombine.low %v23103_v21, %v23102_v62  ;;  %v23106_v8 = vcombine.low %v23104_v30, %v23105_v16  ;;  %v23108_v59 = vcombine.high %v23104_v30, %v23105_v16  ;;  %v5535_v30 = vcombine.low %v20318_v49, %v5516_v55 }
0x14b7   :  { %v20493_v16 = vrot.slane %v5517_v54, %v20089_v51  ;;  %v20510_v54 = vpop.trf.xlu0 }
0x14b8   :  { %v20467_v44 = vrot.slane %v23106_v8, %v20089_v51  ;;  %v20477_v23 = vrot.slane %v23108_v59, %v20089_v51  ;;  %v20498_v56 = vrot.slane %v6493_v24, %v19680_v7  ;;  %v20512_v8 = vpop.trf.xlu1  ;;  %v23120_v24 = vcombine.low %v23118_v29, %v23119_v12 }
0x14b9   :  { %8261 = vxpose.xlu0.b32.start.end [1/1] (short) (narrow) %v5400_v48, 8  ;;  %8357 = vxpose.xlu1.b32.start.end [1/1] (short) (narrow) %v5403_v35, 8  ;;  %v5402_v48 = vcombine.high %v5357_v37, %v5389_v27  ;;  %v5533_v35 = vcombine.low %v20310_v33, %v5509_v38  ;;  %v6494_v27 = vcombine.high %v23103_v21, %v23102_v62  ;;  %v23107_v37 = vld [vmem:[#allocation85_spill] sm:$0xff] }
0x14ba   :  { %v5573_v17 = vcombine.low %v23107_v37, %v20259_v22  ;;  %23109 = vst [vmem:[#allocation45_spill] sm:$0xff] %v20477_v23  ;;  %v23112_v62 = vcombine.low %v23110_v25, %v23111_v5  ;;  %23114 = vst [vmem:[#allocation46_spill] sm:$0xff] %v20498_v56  ;;  %v20518_v59 = vrot.slane %v23120_v24, %v20089_v51 }
0x14bb   :  { %v6421_v25 = vcombine.low %v6365_v43, %v6381_v36  ;;  %v6422_v5 = vcombine.high %v6365_v43, %v6381_v36  ;;  %v5574_v43 = vcombine.high %v23107_v37, %v20259_v22  ;;  %v23124_v36 = vcombine.high %v23118_v29, %v23119_v12 }
0x14bc   :  { %v20486_v21 = vrot.slane %v23112_v62, %v20089_v51  ;;  %23121 = vst [vmem:[#allocation51_spill] sm:$0xff] %v20518_v59  ;;  %v23122_v62 = vld [vmem:[#allocation74_spill] sm:$0xff]  ;;  %v6438_v23 = vcombine.high %v6372_v4, %v6388_v60 }
0x14bd   :  { %8325 = vxpose.xlu0.b32.start.end [1/1] (short) (narrow) %v5402_v48, 8  ;;  %8421 = vxpose.xlu1.b32.start.end [1/1] (short) (narrow) %v5533_v35, 8  ;;  %v5597_v48 = vrot.slane %v5589_v9, %v19680_v7  ;;  %v5404_v35 = vcombine.high %v20304_v58, %v20333_v40  ;;  %v20504_v9 = vrot.slane %v23115_v45, %v20089_v51  ;;  %v23123_v45 = vld [vmem:[#allocation44_spill] sm:$0xff] }
0x14be   :  { %23113 = vst [vmem:[#allocation47_spill] sm:$0xff] %v20486_v21  ;;  %v20507_v58 = vrot.slane %v6494_v27, %v19680_v7  ;;  %v5581_v40 = vrot.slane %v5573_v17, %v19680_v7  ;;  %v6509_v27 = vcombine.low %v23123_v45, %v23122_v62  ;;  %v5590_v17 = vcombine.high %v23100_v2, %v20261_v26 }
0x14bf   :  { %23116 = vst [vmem:[#allocation48_spill] sm:$0xff] %v20504_v9  ;;  %v5534_v21 = vcombine.high %v20310_v33, %v5509_v38  ;;  %v6510_v24 = vcombine.high %v23123_v45, %v23122_v62  ;;  %v20538_v26 = vrot.slane %v23124_v36, %v20089_v51  ;;  %v23125_v33 = vld [vmem:[#allocation70_spill] sm:$0xff]  ;;  %v23126_v38 = vld [vmem:[#allocation72_spill] sm:$0xff]  ;;  %v20559_v62 = vrot.slane %v6421_v25, %v20089_v51 }
0x14c0   :  { %23117 = vst [vmem:[#allocation49_spill] sm:$0xff] %v20507_v58  ;;  %v5637_v9 = vcombine.low %v5581_v40, %v5597_v48  ;;  %v23127_v2 = vcombine.low %v23125_v33, %v23126_v38  ;;  %v23129_v22 = vcombine.high %v23125_v33, %v23126_v38  ;;  %v20553_v29 = vrot.slane %v6509_v27, %v19680_v7 }
0x14c1   :  { %8389 = vxpose.xlu0.b32.start.end [1/1] (short) (narrow) %v5404_v35, 8  ;;  %8485 = vxpose.xlu1.b32.start.end [1/1] (short) (narrow) %v5535_v30, 8  ;;  %v5537_v35 = vcombine.low %v20324_v50, %v20493_v16  ;;  %v20528_v30 = vrot.slane %v5518_v39, %v20089_v51  ;;  %v6437_v39 = vcombine.low %v6372_v4, %v6388_v60  ;;  %v20566_v60 = vpop.trf.xlu1 }
0x14c2   :  { %v20544_v59 = vrot.slane %v23127_v2, %v20089_v51  ;;  %v20550_v37 = vrot.slane %v23129_v22, %v20089_v51  ;;  %23131 = vst [vmem:[#allocation53_spill] sm:$0xff] %v20553_v29  ;;  %v20556_v12 = vrot.slane %v5590_v17, %v19680_v7  ;;  %23132 = vst [vmem:[#allocation55_spill] sm:$0xff] %v20559_v62  ;;  %v23140_v22 = vld [vmem:[#allocation76_spill] sm:$0xff] }
0x14c3   :  { %v20562_v45 = vrot.slane %v6422_v5, %v20089_v51  ;;  %v5638_v4 = vcombine.high %v5581_v40, %v5597_v48  ;;  %v5539_v27 = vcombine.low %v20330_v13, %v20528_v30  ;;  %v20572_v36 = vrot.slane %v5637_v9, %v20089_v51  ;;  %v23135_v5 = vld [vmem:[#allocation86_spill] sm:$0xff]  ;;  %v23136_v40 = vld [vmem:[#allocation87_spill] sm:$0xff] }
0x14c4   :  { %23128 = vst [vmem:[#allocation50_spill] sm:$0xff] %v20544_v59  ;;  %23130 = vst [vmem:[#allocation52_spill] sm:$0xff] %v20550_v37  ;;  %v20575_v17 = vrot.slane %v6510_v24, %v19680_v7  ;;  %v5588_v25 = vrot.slane %v5574_v43, %v19680_v7  ;;  %v5709_v33 = vcombine.low %v23135_v5, %v20272_v61  ;;  %v23138_v43 = vld [vmem:[#allocation88_spill] sm:$0xff] }
0x14c5   :  { %8453 = vxpose.xlu0.b32.start.end [1/1] (short) (narrow) %v5534_v21, 8  ;;  %8549 = vxpose.xlu1.b32.start.end [1/1] (short) (narrow) %v5537_v35, 8  ;;  %23133 = vst [vmem:[#allocation54_spill] sm:$0xff] %v20562_v45  ;;  %v20564_v21 = vpop.trf.xlu0  ;;  %v5536_v35 = vcombine.high %v20318_v49, %v5516_v55  ;;  %v5710_v48 = vcombine.high %v23135_v5, %v20272_v61 }
0x14c6   :  { %23134 = vst [vmem:[#allocation56_spill] sm:$0xff] %v20575_v17  ;;  %v5845_v49 = vcombine.low %v23136_v40, %v20289_v53  ;;  %v5846_v55 = vcombine.high %v23136_v40, %v20289_v53  ;;  %v20587_v9 = vrot.slane %v6437_v39, %v20089_v51  ;;  %v5981_v38 = vcombine.low %v23138_v43, %v20361_v6 }
0x14c7   :  { %v5653_v2 = vcombine.low %v5588_v25, %v20556_v12  ;;  %v20595_v61 = vrot.slane %v6438_v23, %v20089_v51  ;;  %v5725_v5 = vcombine.low %v23140_v22, %v20274_v14  ;;  %v5538_v53 = vcombine.high %v20324_v50, %v20493_v16 }
0x14c8   :  { %23137 = vst [vmem:[#allocation57_spill] sm:$0xff] %v20587_v9  ;;  %v5669_v39 = vcombine.low %v20339_v20, %v20572_v36  ;;  %v20611_v23 = vrot.slane %v5709_v33, %v19680_v7  ;;  %v20614_v24 = vrot.slane %v5710_v48, %v19680_v7  ;;  %v20617_v50 = vrot.slane %v5845_v49, %v19680_v7  ;;  %v23142_v48 = vld [vmem:[#allocation89_spill] sm:$0xff] }
0x14c9   :  { %8517 = vxpose.xlu0.b32.start.end [1/1] (short) (narrow) %v5536_v35, 8  ;;  %8613 = vxpose.xlu1.b32.start.end [1/1] (short) (narrow) %v5539_v27, 8  ;;  %23139 = vst [vmem:[#allocation59_spill] sm:$0xff] %v20595_v61  ;;  %v20604_v35 = vrot.slane %v5638_v4, %v20089_v51  ;;  %v20620_v16 = vrot.slane %v5846_v55, %v19680_v7  ;;  %v20624_v61 = vpop.trf.xlu0  ;;  %v20626_v27 = vpop.trf.xlu1 }
0x14ca   :  { %v5982_v4 = vcombine.high %v23138_v43, %v20361_v6  ;;  %23141 = vst [vmem:[#allocation58_spill] sm:$0xff] %v20624_v61  ;;  %v20629_v33 = vrot.slane %v5981_v38, %v19680_v7  ;;  %v6117_v40 = vcombine.low %v23142_v48, %v20450_v10  ;;  %v6118_v49 = vcombine.high %v23142_v48, %v20450_v10  ;;  %v23143_v38 = vld [vmem:[#allocation90_spill] sm:$0xff]  ;;  %v23144_v10 = vld [vmem:[#allocation91_spill] sm:$0xff] }
0x14cb   :  { %v5654_v55 = vcombine.high %v5588_v25, %v20556_v12  ;;  %v5733_v58 = vrot.slane %v5725_v5, %v19680_v7  ;;  %v5540_v6 = vcombine.high %v20330_v13, %v20528_v30  ;;  %v5671_v43 = vcombine.low %v20345_v47, %v20604_v35 }
0x14cc   :  { %v6254_v17 = vcombine.high %v23143_v38, %v20510_v54  ;;  %v6389_v12 = vcombine.low %v23144_v10, %v20564_v21  ;;  %v5726_v25 = vcombine.high %v23140_v22, %v20274_v14  ;;  %v20653_v13 = vrot.slane %v5982_v4, %v19680_v7  ;;  %v23146_v14 = vld [vmem:[#allocation92_spill] sm:$0xff] }
0x14cd   :  { %8581 = vxpose.xlu0.b32.start.end [1/1] (short) (narrow) %v5538_v53, 8  ;;  %8677 = vxpose.xlu1.b32.start.end [1/1] (short) (narrow) %v5669_v39, 8  ;;  %v20642_v53 = vrot.slane %v5653_v2, %v20089_v51  ;;  %v6253_v39 = vcombine.low %v23143_v38, %v20510_v54  ;;  %v6390_v30 = vcombine.high %v23144_v10, %v20564_v21  ;;  %v23145_v2 = vld [vmem:[#allocation77_spill] sm:$0xff] }
0x14ce   :  { %v5861_v5 = vcombine.low %v23145_v2, %v20292_v31  ;;  %v20660_v54 = vrot.slane %v6117_v40, %v19680_v7  ;;  %v20663_v38 = vrot.slane %v6118_v49, %v19680_v7  ;;  %v6525_v22 = vcombine.low %v23146_v14, %v20624_v61 }
0x14cf   :  { %v5862_v4 = vcombine.high %v23145_v2, %v20292_v31  ;;  %v5773_v21 = vcombine.low %v20611_v23, %v5733_v58  ;;  %v5670_v10 = vcombine.high %v20339_v20, %v20572_v36  ;;  %v20675_v40 = vrot.slane %v5654_v55, %v20089_v51  ;;  %v23149_v55 = vld [vmem:[#allocation78_spill] sm:$0xff] }
0x14d0   :  { %v20678_v49 = vrot.slane %v6253_v39, %v19680_v7  ;;  %v20684_v29 = vrot.slane %v6389_v12, %v19680_v7  ;;  %v20687_v31 = vrot.slane %v5726_v25, %v19680_v7  ;;  %v20690_v20 = vrot.slane %v6390_v30, %v19680_v7 }
0x14d1   :  { %v6645_v48 = vpop.trf.xlu0  ;;  %8645 = vxpose.xlu0.b32.start.end [1/1] (short) (narrow) %v5540_v6, 8  ;;  %8741 = vxpose.xlu1.b32.start.end [1/1] (short) (narrow) %v5671_v43, 8  ;;  %v6677_v9 = vpop.trf.xlu1  ;;  %v5673_v6 = vcombine.low %v20351_v52, %v20642_v53  ;;  %v20681_v43 = vrot.slane %v6254_v17, %v19680_v7  ;;  %v20693_v36 = vrot.slane %v5861_v5, %v19680_v7 }
0x14d2   :  { %23147 = vst [vmem:[#allocation60_spill] sm:$0xff] %v20684_v29  ;;  %23148 = vst [vmem:[#allocation61_spill] sm:$0xff] %v20690_v20  ;;  %v5997_v2 = vcombine.low %v23149_v55, %v20363_v0  ;;  %v20702_v25 = vrot.slane %v6525_v22, %v19680_v7  ;;  %v5774_v30 = vcombine.high %v20611_v23, %v5733_v58 }
0x14d3   :  { %v20706_v56 = vrot.slane %v5862_v4, %v19680_v7  ;;  %v5998_v5 = vcombine.high %v23149_v55, %v20363_v0  ;;  %v20715_v45 = vrot.slane %v5773_v21, %v20089_v51  ;;  %v5789_v22 = vcombine.low %v20614_v24, %v20687_v31 }
0x14d4   :  { %23150 = vst [vmem:[#allocation63_spill] sm:$0xff] %v20702_v25  ;;  %v5790_v58 = vcombine.high %v20614_v24, %v20687_v31  ;;  %v23151_v24 = vld [vmem:[#allocation79_spill] sm:$0xff] }
0x14d5   :  { %v6709_v39 = vpop.trf.xlu0  ;;  %8709 = vxpose.xlu0.b32.start.end [1/1] (short) (narrow) %v5670_v10, 8  ;;  %8805 = vxpose.xlu1.b32.start.end [1/1] (short) (narrow) %v5673_v6, 8  ;;  %v20697_v17 = vpop.trf.xlu1  ;;  %v5672_v10 = vcombine.high %v20345_v47, %v20604_v35  ;;  %v5675_v6 = vcombine.low %v20357_v32, %v20675_v40  ;;  %v20726_v35 = vrot.slane %v5997_v2, %v19680_v7 }
0x14d6   :  { %v10725_v23 = vcombine.low %v6645_v48, %v6709_v39  ;;  %v10726_v4 = vcombine.high %v6645_v48, %v6709_v39  ;;  %v6133_v31 = vcombine.low %v23151_v24, %v20453_v3  ;;  %v20733_v0 = vrot.slane %v5998_v5, %v19680_v7 }
0x14d7   :  { %v5674_v47 = vcombine.high %v20351_v52, %v20642_v53  ;;  %v5805_v2 = vcombine.low %v20369_v1, %v20715_v45  ;;  %v23152_v52 = vld [vmem:[#allocation80_spill] sm:$0xff] }
0x14d8   :  { %v20746_v12 = vrot.slane %v10726_v4, %v19680_v7 }
0x14d9   :  { %v6741_v55 = vpop.trf.xlu0  ;;  %8773 = vxpose.xlu0.b32.start.end [1/1] (short) (narrow) %v5672_v10, 8  ;;  %8869 = vxpose.xlu1.b32.start.end [1/1] (short) (narrow) %v5675_v6, 8  ;;  %v6837_v21 = vpop.trf.xlu1  ;;  %v20740_v10 = vrot.slane %v5774_v30, %v20089_v51  ;;  %v20743_v6 = vrot.slane %v10725_v23, %v19680_v7  ;;  %v6134_v30 = vcombine.high %v23151_v24, %v20453_v3 }
0x14da   :  { %v10741_v48 = vcombine.low %v6677_v9, %v6741_v55  ;;  %v10742_v39 = vcombine.high %v6677_v9, %v6741_v55  ;;  %v20763_v55 = vrot.slane %v6133_v31, %v19680_v7  ;;  %v6269_v3 = vcombine.low %v23152_v52, %v20512_v8 }
0x14db   :  { %v5807_v24 = vcombine.low %v20375_v19, %v20740_v10  ;;  %v20778_v31 = vrot.slane %v5789_v22, %v20089_v51  ;;  %v10757_v53 = vcombine.low %v20697_v17, %v6837_v21  ;;  %v10758_v62 = vcombine.high %v20697_v17, %v6837_v21 }
0x14dc   :  { %v20749_v9 = vrot.slane %v10741_v48, %v19680_v7  ;;  %v20752_v5 = vrot.slane %v10742_v39, %v19680_v7  ;;  %v20800_v37 = vrot.slane %v6269_v3, %v19680_v7 }
0x14dd   :  { %v6805_v23 = vpop.trf.xlu0  ;;  %8837 = vxpose.xlu0.b32.start.end [1/1] (short) (narrow) %v5674_v47, 8  ;;  %8933 = vxpose.xlu1.b32.start.end [1/1] (short) (narrow) %v5805_v2, 8  ;;  %v20760_v4 = vpop.trf.xlu1  ;;  %v5676_v47 = vcombine.high %v20357_v32, %v20675_v40  ;;  %v20789_v32 = vrot.slane %v6134_v30, %v19680_v7  ;;  %v6270_v40 = vcombine.high %v23152_v52, %v20512_v8 }
0x14de   :  { %v10790_v48 = vcombine.high %v20743_v6, %v20749_v9  ;;  %v10805_v39 = vcombine.low %v20746_v12, %v20752_v5  ;;  %v5806_v30 = vcombine.high %v20369_v1, %v20715_v45  ;;  %v5809_v8 = vcombine.low %v20384_v28, %v20778_v31 }
0x14df   :  { %v20807_v52 = vrot.slane %v5790_v58, %v20089_v51  ;;  %v20822_v45 = vrot.slane %v6270_v40, %v19680_v7  ;;  %v5808_v40 = vcombine.high %v20375_v19, %v20740_v10 }
0x14e1   :  { %v6869_v22 = vpop.trf.xlu0  ;;  %8901 = vxpose.xlu0.b32.start.end [1/1] (short) (narrow) %v5676_v47, 8  ;;  %8997 = vxpose.xlu1.b32.start.end [1/1] (short) (narrow) %v5807_v24, 8  ;;  %v20793_v2 = vpop.trf.xlu1  ;;  %v20810_v47 = vrot.slane %v10757_v53, %v19680_v7  ;;  %v10772_v24 = vrot.slane %v10758_v62, %v19680_v7  ;;  %v23153_v62 = vld [vmem:[#allocation81_spill] sm:$0xff] }
0x14e2   :  { %v10773_v21 = vcombine.low %v6805_v23, %v6869_v22  ;;  %v10774_v20 = vcombine.high %v6805_v23, %v6869_v22  ;;  %v6405_v22 = vcombine.low %v23153_v62, %v20566_v60  ;;  %v6406_v1 = vcombine.high %v23153_v62, %v20566_v60 }
0x14e3   :  { %v10861_v60 = vcombine.low %v20760_v4, %v20793_v2 }
0x14e4   :  { %v20814_v17 = vrot.slane %v10773_v21, %v19680_v7  ;;  %v10788_v23 = vrot.slane %v10774_v20, %v19680_v7 }
0x14e5   :  { %v20824_v58 = vpop.trf.xlu0  ;;  %8965 = vxpose.xlu0.b32.start.end [1/1] (short) (narrow) %v5806_v30, 8  ;;  %9061 = vxpose.xlu1.b32.start.end [1/1] (short) (narrow) %v5809_v8, 8  ;;  %v20826_v53 = vpop.trf.xlu1  ;;  %v5811_v30 = vcombine.low %v20390_v18, %v20807_v52  ;;  %v23154_v8 = vcombine.low %v20617_v50, %v20693_v36 }
0x14e6   :  { %v10822_v20 = vcombine.high %v20810_v47, %v20814_v17  ;;  %v10837_v21 = vcombine.low %v10772_v24, %v10788_v23  ;;  %v10838_v3 = vcombine.high %v10772_v24, %v10788_v23  ;;  %v20862_v24 = vrot.slane %v6405_v22, %v19680_v7 }
0x14e7   :  { %v20842_v25 = vrot.slane %v23154_v8, %v20089_v51  ;;  %v20856_v8 = vrot.slane %v10790_v48, %v20089_v51  ;;  %v20878_v22 = vrot.slane %v10805_v39, %v20089_v51  ;;  %v23158_v39 = vcombine.high %v20746_v12, %v20752_v5 }
0x14e8   :  { %v20851_v19 = vrot.slane %v10822_v20, %v20089_v51  ;;  %v20859_v61 = vrot.slane %v10837_v21, %v20089_v51  ;;  %23155 = vst [vmem:[#allocation62_spill] sm:$0xff] %v20862_v24  ;;  %v5810_v20 = vcombine.high %v20384_v28, %v20778_v31  ;;  %v20881_v10 = vrot.slane %v10838_v3, %v20089_v51 }
0x14e9   :  { %v6997_v23 = vpop.trf.xlu0  ;;  %9029 = vxpose.xlu0.b32.start.end [1/1] (short) (narrow) %v5808_v40, 8  ;;  %9125 = vxpose.xlu1.b32.start.end [1/1] (short) (narrow) %v5811_v30, 8  ;;  %v7093_v62 = vpop.trf.xlu1  ;;  %v23156_v40 = vcombine.high %v20617_v50, %v20693_v36  ;;  %v5941_v48 = vcombine.low %v20396_v34, %v20842_v25  ;;  %v20884_v28 = vrot.slane %v10861_v60, %v19680_v7 }
0x14ea   :  { %v10877_v14 = vcombine.low %v20824_v58, %v6997_v23  ;;  %v23157_v50 = vcombine.low %v20620_v16, %v20706_v56  ;;  %v20912_v12 = vrot.slane %v6406_v1, %v19680_v7  ;;  %v23160_v1 = vld [vmem:[#allocation82_spill] sm:$0xff]  ;;  %v10893_v5 = vcombine.low %v20826_v53, %v7093_v62 }
0x14eb   :  { %v20871_v30 = vrot.slane %v23156_v40, %v20089_v51  ;;  %v20899_v40 = vrot.slane %v23158_v39, %v20089_v51  ;;  %v10821_v59 = vcombine.low %v20810_v47, %v20814_v17  ;;  %v23163_v17 = vcombine.high %v20629_v33, %v20726_v35 }
0x14ec   :  { %v20887_v31 = vrot.slane %v10877_v14, %v19680_v7  ;;  %v20893_v36 = vrot.slane %v23157_v50, %v20089_v51  ;;  %23159 = vst [vmem:[#allocation64_spill] sm:$0xff] %v20912_v12  ;;  %v5942_v14 = vcombine.high %v20396_v34, %v20842_v25  ;;  %v23161_v25 = vcombine.high %v20620_v16, %v20706_v56 }
0x14ed   :  { %v7061_v3 = vpop.trf.xlu0  ;;  %9093 = vxpose.xlu0.b32.start.end [1/1] (short) (narrow) %v5810_v20, 8  ;;  %9189 = vxpose.xlu1.b32.start.end [1/1] (short) (narrow) %v5941_v48, 8  ;;  %v20901_v60 = vpop.trf.xlu1  ;;  %v5812_v48 = vcombine.high %v20390_v18, %v20807_v52  ;;  %v5943_v39 = vcombine.low %v20405_v42, %v20871_v30  ;;  %v10878_v52 = vcombine.high %v20824_v58, %v6997_v23 }
0x14ee   :  { %v5945_v18 = vcombine.low %v20411_v15, %v20893_v36  ;;  %v10894_v20 = vcombine.high %v20826_v53, %v7093_v62  ;;  %v5944_v21 = vcombine.high %v20405_v42, %v20871_v30  ;;  %v20945_v58 = vrot.slane %v23161_v25, %v20089_v51 }
0x14ef   :  { %v10862_v53 = vcombine.high %v20760_v4, %v20793_v2  ;;  %v5946_v23 = vcombine.high %v20411_v15, %v20893_v36  ;;  %v23162_v42 = vcombine.low %v20629_v33, %v20726_v35  ;;  %v20961_v47 = vrot.slane %v23163_v17, %v20089_v51 }
0x14f0   :  { %v10789_v56 = vcombine.low %v20743_v6, %v20749_v9  ;;  %v10901_v16 = vrot.slane %v10893_v5, %v19680_v7  ;;  %v20969_v2 = vrot.slane %v10878_v52, %v19680_v7  ;;  %v10925_v30 = vcombine.low %v20884_v28, %v20887_v31 }
0x14f1   :  { %v7125_v12 = vpop.trf.xlu0  ;;  %9157 = vxpose.xlu0.b32.start.end [1/1] (short) (narrow) %v5812_v48, 8  ;;  %9253 = vxpose.xlu1.b32.start.end [1/1] (short) (narrow) %v5943_v39, 8  ;;  %v20935_v50 = vpop.trf.xlu1  ;;  %v20955_v62 = vrot.slane %v23162_v42, %v20089_v51  ;;  %v10908_v36 = vrot.slane %v10894_v20, %v19680_v7  ;;  %v20986_v5 = vrot.slane %v10862_v53, %v19680_v7 }
0x14f2   :  { %v10909_v29 = vcombine.low %v7061_v3, %v7125_v12  ;;  %v10910_v34 = vcombine.high %v7061_v3, %v7125_v12  ;;  %v23164_v3 = vcombine.low %v20653_v13, %v20733_v0  ;;  %v23165_v48 = vcombine.high %v20653_v13, %v20733_v0 }
0x14f3   :  { %v10941_v53 = vcombine.low %v20986_v5, %v20969_v2  ;;  %v6077_v0 = vcombine.low %v20423_v11, %v20955_v62  ;;  %v10933_v17 = vrot.slane %v10925_v30, %v20089_v51  ;;  %v5948_v30 = vcombine.high %v20417_v46, %v20945_v58 }
0x14f4   :  { %v10917_v4 = vrot.slane %v10909_v29, %v19680_v7  ;;  %v10924_v15 = vrot.slane %v10910_v34, %v19680_v7  ;;  %v10829_v29 = vrot.slane %v10821_v59, %v20089_v51  ;;  %v20983_v12 = vrot.slane %v23164_v3, %v20089_v51 }
0x14f5   :  { %v20974_v33 = vpop.trf.xlu0  ;;  %9221 = vxpose.xlu0.b32.start.end [1/1] (short) (narrow) %v5942_v14, 8  ;;  %9317 = vxpose.xlu1.b32.start.end [1/1] (short) (narrow) %v5945_v18, 8  ;;  %v20976_v35 = vpop.trf.xlu1  ;;  %v5947_v14 = vcombine.low %v20417_v46, %v20945_v58  ;;  %v20994_v39 = vrot.slane %v23165_v48, %v20089_v51  ;;  %v10997_v59 = vcombine.low %v20901_v60, %v20935_v50 }
0x14f6   :  { %v10957_v6 = vcombine.low %v10901_v16, %v10917_v4  ;;  %v10958_v9 = vcombine.high %v10901_v16, %v10917_v4  ;;  %v10973_v20 = vcombine.low %v10908_v36, %v10924_v15  ;;  %v10797_v18 = vrot.slane %v10789_v56, %v20089_v51 }
0x14f7   :  { %v23166_v34 = vcombine.low %v20660_v54, %v20763_v55  ;;  %v10974_v56 = vcombine.high %v10908_v36, %v10924_v15  ;;  %v23167_v15 = vcombine.high %v20884_v28, %v20887_v31  ;;  %v6079_v58 = vcombine.low %v20430_v57, %v20961_v47 }
0x14f8   :  { %v10965_v52 = vrot.slane %v10957_v6, %v20089_v51  ;;  %v10853_v4 = vcombine.low %v10797_v18, %v10829_v29  ;;  %v10854_v6 = vcombine.high %v10797_v18, %v10829_v29  ;;  %v10981_v24 = vrot.slane %v10973_v20, %v20089_v51 }
0x14f9   :  { %v21004_v25 = vrot.slane %v23166_v34, %v20089_v51  ;;  %v7253_v42 = vpop.trf.xlu0  ;;  %9285 = vxpose.xlu0.b32.start.end [1/1] (short) (narrow) %v5944_v21, 8  ;;  %9381 = vxpose.xlu1.b32.start.end [1/1] (short) (narrow) %v5947_v14, 8  ;;  %v7349_v13 = vpop.trf.xlu1  ;;  %v10972_v34 = vrot.slane %v10958_v9, %v20089_v51  ;;  %v21015_v21 = vrot.slane %v10997_v59, %v19680_v7 }
0x14fa   :  { %v11013_v16 = vcombine.low %v20974_v33, %v7253_v42  ;;  %v10989_v3 = vcombine.low %v10933_v17, %v10965_v52  ;;  %v10990_v48 = vcombine.high %v10933_v17, %v10965_v52  ;;  %v10940_v36 = vrot.slane %v23167_v15, %v20089_v51 }
0x14fb   :  { %v10949_v59 = vrot.slane %v10941_v53, %v20089_v51  ;;  %v10942_v52 = vcombine.high %v20986_v5, %v20969_v2  ;;  %v10988_v28 = vrot.slane %v10974_v56, %v20089_v51  ;;  %v11014_v17 = vcombine.high %v20974_v33, %v7253_v42 }
0x14fc   :  { %v21018_v14 = vrot.slane %v11013_v16, %v19680_v7  ;;  %v16903_v20 = vpack.c.bf16 %v10989_v3, %v10853_v4  ;;  %v16935_v18 = vpack.c.bf16 %v10990_v48, %v10854_v6  ;;  %v10991_v31 = vcombine.low %v10940_v36, %v10972_v34 }
0x14fd   :  { %v7317_v29 = vpop.trf.xlu0  ;;  %9349 = vxpose.xlu0.b32.start.end [1/1] (short) (narrow) %v5946_v23, 8  ;;  %9445 = vxpose.xlu1.b32.start.end [1/1] (short) (narrow) %v6077_v0, 8  ;;  %v21026_v9 = vpop.trf.xlu1  ;;  %v10992_v23 = vcombine.high %v10940_v36, %v10972_v34  ;;  %v10993_v0 = vcombine.low %v10949_v59, %v10981_v24  ;;  %v11029_v53 = vcombine.low %v20976_v35, %v7349_v13 }
0x14fe   :  { %v11062_v46 = vcombine.high %v21015_v21, %v21018_v14  ;;  %16904 = vmatprep.subr.bf16.mxu1 %v16903_v20  ;;  %16936 = vmatprep.subr.bf16.mxu0 %v16935_v18  ;;  %v10994_v2 = vcombine.high %v10949_v59, %v10981_v24  ;;  %v11030_v5 = vcombine.high %v20976_v35, %v7349_v13 }
0x14ff   :  { %16906 = vmatpush3.bf16.msra.mxu1 %v16903_v20  ;;  %16938 = vmatpush3.bf16.msra.mxu0 %v16935_v18  ;;  %v23168_v56 = vcombine.low %v20856_v8, %v20851_v19  ;;  %v23169_v33 = vcombine.high %v20856_v8, %v20851_v19  ;;  %v10998_v24 = vcombine.high %v20901_v60, %v20935_v50 }
0x1500   :  { %v23170_v13 = vcombine.high %v20660_v54, %v20763_v55  ;;  %v6078_v34 = vcombine.high %v20423_v11, %v20955_v62  ;;  %v23171_v19 = vcombine.low %v20878_v22, %v20859_v61  ;;  %v10956_v60 = vrot.slane %v10942_v52, %v20089_v51 }
0x1501   :  { %v7381_v16 = vpop.trf.xlu0  ;;  %9413 = vxpose.xlu0.b32.start.end [1/1] (short) (narrow) %v5948_v30, 8  ;;  %9509 = vxpose.xlu1.b32.start.end [1/1] (short) (narrow) %v6079_v58, 8  ;;  %v21039_v4 = vpop.trf.xlu1  ;;  %v21044_v6 = vpack.c.bf16 %v10991_v31, %v23168_v56  ;;  %v21049_v42 = vpack.c.bf16 %v10992_v23, %v23169_v33  ;;  %v6081_v30 = vcombine.low %v20436_v41, %v20983_v12 }
0x1502   :  { %v11045_v3 = vcombine.low %v7317_v29, %v7381_v16  ;;  %v11046_v35 = vcombine.high %v7317_v29, %v7381_v16  ;;  %v21057_v48 = vrot.slane %v23170_v13, %v20089_v51  ;;  %v21066_v8 = vpack.c.bf16 %v10993_v0, %v23171_v19 }
0x1503   :  { %v11028_v50 = vrot.slane %v11014_v17, %v19680_v7  ;;  %v21071_v15 = vrot.slane %v11029_v53, %v19680_v7  ;;  %v11044_v55 = vrot.slane %v11030_v5, %v19680_v7  ;;  %v23172_v29 = vcombine.high %v20878_v22, %v20859_v61 }
0x1504   :  { %v21074_v54 = vrot.slane %v11045_v3, %v19680_v7  ;;  %v11060_v11 = vrot.slane %v11046_v35, %v19680_v7  ;;  %v10995_v18 = vcombine.low %v10956_v60, %v10988_v28  ;;  %v11012_v59 = vrot.slane %v10998_v24, %v19680_v7 }
0x1505   :  { %v7445_v62 = vpop.trf.xlu0  ;;  %9477 = vxpose.xlu0.b32.start.end [1/1] (short) (narrow) %v6078_v34, 8  ;;  %9573 = vxpose.xlu1.b32.start.end [1/1] (short) (narrow) %v6081_v30, 8  ;;  %v21078_v36 = vpop.trf.xlu1  ;;  %v21083_v20 = vpack.c.bf16 %v10994_v2, %v23172_v29  ;;  %v6080_v58 = vcombine.high %v20430_v57, %v20961_v47  ;;  %v6083_v31 = vcombine.low %v20448_v63, %v20994_v39 }
0x1506   :  { %v11094_v52 = vcombine.high %v21071_v15, %v21074_v54  ;;  %v11109_v23 = vcombine.low %v11044_v55, %v11060_v11  ;;  %v11110_v0 = vcombine.high %v11044_v55, %v11060_v11  ;;  %v23174_v17 = vcombine.low %v20899_v40, %v20881_v10 }
0x1507   :  { %23173 = vst [vmem:[#allocation83_spill] sm:$0xff] %v21083_v20  ;;  %v10996_v22 = vcombine.high %v10956_v60, %v10988_v28  ;;  %v11077_v53 = vcombine.low %v11012_v59, %v11028_v50  ;;  %v11078_v2 = vcombine.high %v11012_v59, %v11028_v50  ;;  %v11133_v5 = vcombine.low %v21026_v9, %v21039_v4 }
0x1508   :  { %v21095_v61 = vpack.c.bf16 %v10995_v18, %v23174_v17  ;;  %v6082_v16 = vcombine.high %v20436_v41, %v20983_v12  ;;  %v6213_v56 = vcombine.low %v20467_v44, %v21004_v25  ;;  %v21104_v33 = vrot.slane %v11094_v52, %v20089_v51  ;;  %v23178_v41 = vld [vmem:[#allocation45_spill] sm:$0xff] }
0x1509   :  { %v7509_v57 = vpop.trf.xlu0  ;;  %9541 = vxpose.xlu0.b32.start.end [1/1] (short) (narrow) %v6080_v58, 8  ;;  %9637 = vxpose.xlu1.b32.start.end [1/1] (short) (narrow) %v6083_v31, 8  ;;  %v7605_v47 = vpop.trf.xlu1  ;;  %v23176_v28 = vcombine.high %v20899_v40, %v20881_v10  ;;  %v6084_v35 = vcombine.high %v20448_v63, %v20994_v39  ;;  %v6215_v12 = vcombine.low %v23178_v41, %v21057_v48 }
0x150a   :  { %23175 = vst [vmem:[#allocation40_spill] sm:$0xff] %v21095_v61  ;;  %v11149_v3 = vcombine.low %v7445_v62, %v7509_v57  ;;  %v6214_v13 = vcombine.high %v20467_v44, %v21004_v25  ;;  %v23179_v34 = vcombine.low %v20663_v38, %v20789_v32  ;;  %v21127_v10 = vrot.slane %v11062_v46, %v20089_v51 }
0x150b   :  { %v21109_v24 = vpack.c.bf16 %v10996_v22, %v23176_v28  ;;  %v21130_v63 = vrot.slane %v11109_v23, %v20089_v51  ;;  %v21133_v40 = vrot.slane %v11110_v0, %v20089_v51  ;;  %v21136_v44 = vrot.slane %v11133_v5, %v19680_v7 }
0x150c   :  { %v21121_v30 = vrot.slane %v23179_v34, %v20089_v51  ;;  %v21139_v39 = vrot.slane %v11149_v3, %v19680_v7  ;;  %v21142_v25 = vrot.slane %v11077_v53, %v20089_v51  ;;  %v21145_v19 = vrot.slane %v11078_v2, %v20089_v51 }
0x150d   :  { %23177 = vst [vmem:[#allocation73_spill] sm:$0xff] %v21109_v24  ;;  %v11150_v46 = vcombine.high %v7445_v62, %v7509_v57  ;;  %v7573_v60 = vpop.trf.xlu0  ;;  %9605 = vxpose.xlu0.b32.start.end [1/1] (short) (narrow) %v6082_v16, 8  ;;  %9701 = vxpose.xlu1.b32.start.end [1/1] (short) (narrow) %v6213_v56, 8  ;;  %v21147_v50 = vpop.trf.xlu1  ;;  %v11127_v11 = vcombine.low %v21127_v10, %v21104_v33  ;;  %v23183_v57 = vld [vmem:[#allocation47_spill] sm:$0xff] }
0x150e   :  { %v11128_v55 = vcombine.high %v21127_v10, %v21104_v33  ;;  %v11093_v29 = vcombine.low %v21071_v15, %v21074_v54  ;;  %v11134_v18 = vcombine.high %v21026_v9, %v21039_v4  ;;  %v11198_v62 = vcombine.high %v21136_v44, %v21139_v39 }
0x150f   :  { %v6216_v59 = vcombine.high %v23178_v41, %v21057_v48  ;;  %v11129_v52 = vcombine.low %v21142_v25, %v21130_v63  ;;  %v11130_v58 = vcombine.high %v21142_v25, %v21130_v63  ;;  %v11131_v31 = vcombine.low %v21145_v19, %v21133_v40  ;;  %v23194_v63 = vld [vmem:[#allocation62_spill] sm:$0xff]  ;;  %v23195_v25 = vld [vmem:[#allocation60_spill] sm:$0xff] }
0x1510   :  { %v11132_v15 = vcombine.high %v21145_v19, %v21133_v40  ;;  %v11165_v9 = vcombine.low %v21078_v36, %v7605_v47  ;;  %v11166_v4 = vcombine.high %v21078_v36, %v7605_v47  ;;  %v23180_v48 = vcombine.high %v20663_v38, %v20789_v32 }
0x1511   :  { %v23181_v23 = vcombine.low %v20678_v49, %v20800_v37  ;;  %v11061_v17 = vcombine.low %v21015_v21, %v21018_v14  ;;  %v21186_v22 = vrot.slane %v11150_v46, %v19680_v7  ;;  %v7637_v53 = vpop.trf.xlu0  ;;  %9669 = vxpose.xlu0.b32.start.end [1/1] (short) (narrow) %v6084_v35, 8  ;;  %9765 = vxpose.xlu1.b32.start.end [1/1] (short) (narrow) %v6215_v12, 8  ;;  %v7733_v36 = vpop.trf.xlu1 }
0x1512   :  { %v21175_v54 = vrot.slane %v23180_v48, %v20089_v51  ;;  %v23182_v38 = vcombine.high %v20678_v49, %v20800_v37  ;;  %v11181_v2 = vcombine.low %v7573_v60, %v7637_v53  ;;  %v11182_v5 = vcombine.high %v7573_v60, %v7637_v53  ;;  %v23185_v48 = vld [vmem:[#allocation48_spill] sm:$0xff]  ;;  %v23186_v53 = vld [vmem:[#allocation51_spill] sm:$0xff] }
0x1513   :  { %v21181_v0 = vrot.slane %v23181_v23, %v20089_v51  ;;  %v11270_v16 = vcombine.high %v21147_v50, %v7733_v36  ;;  %v6217_v21 = vcombine.low %v23183_v57, %v21121_v30  ;;  %v21198_v14 = vrot.slane %v11134_v18, %v19680_v7 }
0x1514   :  { %v21192_v32 = vrot.slane %v23182_v38, %v20089_v51  ;;  %v6218_v47 = vcombine.high %v23183_v57, %v21121_v30  ;;  %v11101_v56 = vrot.slane %v11093_v29, %v20089_v51  ;;  %v23184_v37 = vcombine.low %v20681_v43, %v20822_v45 }
0x1515   :  { %v11173_v28 = vrot.slane %v11165_v9, %v19680_v7  ;;  %v11180_v3 = vrot.slane %v11166_v4, %v19680_v7  ;;  %v11189_v35 = vrot.slane %v11181_v2, %v19680_v7  ;;  %v11196_v41 = vrot.slane %v11182_v5, %v19680_v7  ;;  %v7701_v30 = vpop.trf.xlu0  ;;  %9733 = vxpose.xlu0.b32.start.end [1/1] (short) (narrow) %v6214_v13, 8  ;;  %v21217_v46 = vpop.trf.xlu1 }
0x1516   :  { %v21207_v49 = vrot.slane %v23184_v37, %v20089_v51  ;;  %v11197_v12 = vcombine.low %v21136_v44, %v21139_v39  ;;  %v11213_v34 = vcombine.low %v21198_v14, %v21186_v22  ;;  %9829 = vxpose.xlu1.b32.start.end [1/1] (short) (narrow) %v6217_v21, 8  ;;  %v11069_v60 = vrot.slane %v11061_v17, %v20089_v51 }
0x1517   :  { %v11229_v29 = vcombine.low %v11173_v28, %v11189_v35  ;;  %v11230_v18 = vcombine.high %v11173_v28, %v11189_v35  ;;  %v11245_v9 = vcombine.low %v11180_v3, %v11196_v41  ;;  %v11246_v4 = vcombine.high %v11180_v3, %v11196_v41 }
0x1518   :  { %v6219_v23 = vcombine.low %v23185_v48, %v21175_v54  ;;  %v6349_v44 = vcombine.low %v23186_v53, %v21181_v0  ;;  %v11125_v39 = vcombine.low %v11069_v60, %v11101_v56  ;;  %v11126_v38 = vcombine.high %v11069_v60, %v11101_v56 }
0x1519   :  { %v11214_v13 = vcombine.high %v21198_v14, %v21186_v22  ;;  %v11237_v2 = vrot.slane %v11229_v29, %v20089_v51  ;;  %v11244_v5 = vrot.slane %v11230_v18, %v20089_v51  ;;  %v11269_v17 = vcombine.low %v21147_v50, %v7733_v36  ;;  %v7765_v57 = vpop.trf.xlu0  ;;  %9797 = vxpose.xlu0.b32.start.end [1/1] (short) (narrow) %v6216_v59, 8  ;;  %v7861_v21 = vpop.trf.xlu1 }
0x151a   :  { %9893 = vxpose.xlu1.b32.start.end [1/1] (short) (narrow) %v6219_v23, 8  ;;  %v11205_v37 = vrot.slane %v11197_v12, %v20089_v51  ;;  %v11212_v28 = vrot.slane %v11198_v62, %v20089_v51  ;;  %v11221_v3 = vrot.slane %v11213_v34, %v20089_v51  ;;  %v11253_v56 = vrot.slane %v11245_v9, %v20089_v51 }
0x151b   :  { %v11285_v35 = vcombine.low %v7701_v30, %v7765_v57  ;;  %v11286_v22 = vcombine.high %v7701_v30, %v7765_v57  ;;  %v11302_v14 = vcombine.high %v21217_v46, %v7861_v21  ;;  %v21235_v59 = vrot.slane %v11269_v17, %v19680_v7 }
0x151c   :  { %v11261_v41 = vcombine.low %v11205_v37, %v11237_v2  ;;  %v11262_v60 = vcombine.high %v11205_v37, %v11237_v2  ;;  %v11263_v29 = vcombine.low %v11212_v28, %v11244_v5  ;;  %v11264_v50 = vcombine.high %v11212_v28, %v11244_v5 }
0x151d   :  { %v21238_v36 = vrot.slane %v11270_v16, %v19680_v7  ;;  %v21241_v62 = vrot.slane %v11285_v35, %v19680_v7  ;;  %v21244_v12 = vrot.slane %v11286_v22, %v19680_v7  ;;  %v7829_v34 = vpop.trf.xlu0  ;;  %9861 = vxpose.xlu0.b32.start.end [1/1] (short) (narrow) %v6218_v47, 8  ;;  %v21246_v30 = vpop.trf.xlu1  ;;  %v6220_v47 = vcombine.high %v23185_v48, %v21175_v54 }
0x151e   :  { %9957 = vxpose.xlu1.b32.start.end [1/1] (short) (narrow) %v6349_v44, 8  ;;  %v16907_v18 = vpack.c.bf16 %v11261_v41, %v11125_v39  ;;  %v16939_v9 = vpack.c.bf16 %v11262_v60, %v11126_v38  ;;  %v21251_v23 = vpack.c.bf16 %v11263_v29, %v11127_v11  ;;  %v11260_v44 = vrot.slane %v11246_v4, %v20089_v51  ;;  %v23192_v60 = vld [vmem:[#allocation58_spill] sm:$0xff] }
0x151f   :  { %v11334_v16 = vcombine.high %v21235_v59, %v21241_v62  ;;  %v11349_v2 = vcombine.low %v21238_v36, %v21244_v12  ;;  %v11350_v5 = vcombine.high %v21238_v36, %v21244_v12  ;;  %v21265_v11 = vpack.c.bf16 %v11264_v50, %v11128_v55 }
0x1520   :  { %16908 = vmatprep.subr.bf16.mxu1 %v16907_v18  ;;  %16940 = vmatprep.subr.bf16.mxu0 %v16939_v9  ;;  %v11265_v39 = vcombine.low %v11221_v3, %v11253_v56  ;;  %v6542_v38 = vcombine.high %v23160_v1, %v20626_v27  ;;  %v11301_v17 = vcombine.low %v21217_v46, %v7861_v21 }
0x1521   :  { %16910 = vmatpush3.bf16.msra.mxu1 %v16907_v18  ;;  %v6351_v57 = vcombine.low %v20538_v26, %v21192_v32  ;;  %v23187_v54 = vcombine.high %v20681_v43, %v20822_v45  ;;  %16942 = vmatpush3.bf16.msra.mxu0 %v16939_v9  ;;  %v7893_v33 = vpop.trf.xlu0  ;;  %v7989_v10 = vpop.trf.xlu1  ;;  %v11266_v46 = vcombine.high %v11221_v3, %v11253_v56  ;;  %v23189_v45 = vld [vmem:[#allocation50_spill] sm:$0xff] }
0x1522   :  { %9925 = vxpose.xlu0.b32.start.end [1/1] (short) (narrow) %v6220_v47, 8  ;;  %v21281_v55 = vpack.c.bf16 %v11265_v39, %v11129_v52  ;;  %v11228_v48 = vrot.slane %v11214_v13, %v20089_v51  ;;  %v11317_v21 = vcombine.low %v7829_v34, %v7893_v33  ;;  %v11318_v37 = vcombine.high %v7829_v34, %v7893_v33  ;;  %v23198_v47 = vld [vmem:[#allocation64_spill] sm:$0xff] }
0x1523   :  { %v21276_v4 = vrot.slane %v23187_v54, %v20089_v51  ;;  %10021 = vxpose.xlu1.b32.start.end [1/1] (short) (narrow) %v6351_v57, 8  ;;  %v11406_v28 = vcombine.high %v21246_v30, %v7989_v10  ;;  %v6350_v43 = vcombine.high %v23186_v53, %v21181_v0  ;;  %v6353_v35 = vcombine.low %v23189_v45, %v21207_v49  ;;  %v23191_v53 = vld [vmem:[#allocation92_spill] sm:$0xff] }
0x1524   :  { %23188 = vst [vmem:[#allocation41_spill] sm:$0xff] %v21281_v55  ;;  %v21292_v22 = vpack.c.bf16 %v11266_v46, %v11130_v58  ;;  %v11267_v52 = vcombine.low %v11228_v48, %v11260_v44  ;;  %v11268_v3 = vcombine.high %v11228_v48, %v11260_v44  ;;  %v21295_v13 = vrot.slane %v11301_v17, %v19680_v7  ;;  %v23199_v44 = vld [vmem:[#allocation61_spill] sm:$0xff] }
0x1525   :  { %v11316_v56 = vrot.slane %v11302_v14, %v19680_v7  ;;  %v21299_v41 = vrot.slane %v11317_v21, %v19680_v7  ;;  %v11332_v0 = vrot.slane %v11318_v37, %v19680_v7  ;;  %v23193_v29 = vcombine.high %v23191_v53, %v23192_v60  ;;  %v7957_v34 = vpop.trf.xlu0  ;;  %v21310_v18 = vpop.trf.xlu1 }
0x1526   :  { %23190 = vst [vmem:[#allocation75_spill] sm:$0xff] %v21292_v22  ;;  %v6454_v58 = vcombine.high %v23195_v25, %v23194_v63  ;;  %9989 = vxpose.xlu0.b32.start.end [1/1] (short) (narrow) %v6350_v43, 8  ;;  %v21315_v14 = vpack.c.bf16 %v11267_v52, %v11131_v31  ;;  %v21320_v9 = vpack.c.bf16 %v11268_v3, %v11132_v15 }
0x1527   :  { %v21306_v50 = vrot.slane %v23193_v29, %v19680_v7  ;;  %v6469_v39 = vcombine.low %v23199_v44, %v23198_v47  ;;  %v11366_v17 = vcombine.high %v21295_v13, %v21299_v41  ;;  %v11381_v57 = vcombine.low %v11316_v56, %v11332_v0  ;;  %10085 = vxpose.xlu1.b32.start.end [1/1] (short) (narrow) %v6353_v35, 8 }
0x1528   :  { %23196 = vst [vmem:[#allocation84_spill] sm:$0xff] %v21315_v14  ;;  %23197 = vst [vmem:[#allocation42_spill] sm:$0xff] %v21320_v9  ;;  %v11382_v54 = vcombine.high %v11316_v56, %v11332_v0  ;;  %v6470_v33 = vcombine.high %v23199_v44, %v23198_v47  ;;  %v23200_v31 = vcombine.low %v23160_v1, %v20626_v27  ;;  %v23202_v27 = vld [vmem:[#allocation52_spill] sm:$0xff] }
0x1529   :  { %v6352_v40 = vcombine.high %v20538_v26, %v21192_v32  ;;  %v23201_v19 = vcombine.low %v23195_v25, %v23194_v63  ;;  %v21343_v48 = vrot.slane %v6542_v38, %v19680_v7  ;;  %v21346_v21 = vrot.slane %v11366_v17, %v20089_v51  ;;  %v8021_v35 = vpop.trf.xlu0  ;;  %v8117_v38 = vpop.trf.xlu1 }
0x152a   :  { %v21332_v46 = vrot.slane %v23200_v31, %v19680_v7  ;;  %v11405_v37 = vcombine.low %v21246_v30, %v7989_v10  ;;  %v6355_v1 = vcombine.low %v23202_v27, %v21276_v4  ;;  %v21352_v43 = vrot.slane %v11334_v16, %v20089_v51 }
0x152b   :  { %v21340_v15 = vrot.slane %v23201_v19, %v20089_v51  ;;  %v21355_v26 = vrot.slane %v11381_v57, %v20089_v51  ;;  %v21358_v32 = vrot.slane %v11382_v54, %v20089_v51  ;;  %10053 = vxpose.xlu0.b32.start.end [1/1] (short) (narrow) %v6352_v40, 8  ;;  %v6354_v52 = vcombine.high %v23189_v45, %v21207_v49  ;;  %v23203_v49 = vld [vmem:[#allocation55_spill] sm:$0xff] }
0x152c   :  { %v11421_v3 = vcombine.low %v7957_v34, %v8021_v35  ;;  %v11422_v30 = vcombine.high %v7957_v34, %v8021_v35  ;;  %10149 = vxpose.xlu1.b32.start.end [1/1] (short) (narrow) %v6355_v1, 8  ;;  %v11438_v10 = vcombine.high %v21310_v18, %v8117_v38  ;;  %v21364_v16 = vrot.slane %v6454_v58, %v20089_v51  ;;  %v23204_v34 = vld [vmem:[#allocation63_spill] sm:$0xff]  ;;  %v23205_v1 = vld [vmem:[#allocation54_spill] sm:$0xff] }
0x152d   :  { %v21370_v56 = vrot.slane %v11349_v2, %v20089_v51  ;;  %v21376_v0 = vrot.slane %v11350_v5, %v20089_v51  ;;  %v6485_v45 = vcombine.low %v23203_v49, %v21340_v15  ;;  %v11399_v53 = vcombine.low %v21352_v43, %v21346_v21  ;;  %v8085_v36 = vpop.trf.xlu0  ;;  %v21394_v12 = vpop.trf.xlu1 }
0x152e   :  { %v21383_v60 = vrot.slane %v11405_v37, %v19680_v7  ;;  %v21386_v29 = vrot.slane %v11406_v28, %v19680_v7  ;;  %v21389_v2 = vrot.slane %v11421_v3, %v19680_v7  ;;  %v21392_v63 = vrot.slane %v11422_v30, %v19680_v7  ;;  %v23207_v3 = vld [vmem:[#allocation53_spill] sm:$0xff] }
0x152f   :  { %10117 = vxpose.xlu0.b32.start.end [1/1] (short) (narrow) %v6354_v52, 8  ;;  %v11400_v5 = vcombine.high %v21352_v43, %v21346_v21  ;;  %v6589_v47 = vcombine.low %v23204_v34, %v21332_v46  ;;  %v6590_v54 = vcombine.high %v23204_v34, %v21332_v46  ;;  %v6356_v31 = vcombine.high %v23202_v27, %v21276_v4  ;;  %v23206_v52 = vld [vmem:[#allocation46_spill] sm:$0xff] }
0x1530   :  { %v11470_v44 = vcombine.high %v21383_v60, %v21389_v2  ;;  %v11485_v17 = vcombine.low %v21386_v29, %v21392_v63  ;;  %v11486_v57 = vcombine.high %v21386_v29, %v21392_v63  ;;  %10213 = vxpose.xlu1.b32.start.end [1/1] (short) (narrow) %v6485_v45, 8  ;;  %v21417_v40 = vrot.slane %v6469_v39, %v20089_v51 }
0x1531   :  { %v11437_v37 = vcombine.low %v21310_v18, %v8117_v38  ;;  %v6487_v35 = vcombine.low %v23205_v1, %v21364_v16  ;;  %v23208_v30 = vcombine.low %v23206_v52, %v23207_v3  ;;  %v23209_v4 = vcombine.high %v23206_v52, %v23207_v3  ;;  %v8149_v38 = vpop.trf.xlu0  ;;  %v8245_v34 = vpop.trf.xlu1 }
0x1532   :  { %v6605_v46 = vcombine.low %v21306_v50, %v21343_v48  ;;  %v11365_v27 = vcombine.low %v21295_v13, %v21299_v41  ;;  %v11453_v19 = vcombine.low %v8085_v36, %v8149_v38  ;;  %v11454_v58 = vcombine.high %v8085_v36, %v8149_v38  ;;  %v23210_v41 = vld [vmem:[#allocation57_spill] sm:$0xff] }
0x1533   :  { %v21428_v45 = vrot.slane %v23208_v30, %v20089_v51  ;;  %v21434_v39 = vrot.slane %v23209_v4, %v20089_v51  ;;  %10181 = vxpose.xlu0.b32.start.end [1/1] (short) (narrow) %v6356_v31, 8  ;;  %v21443_v30 = vrot.slane %v6470_v33, %v20089_v51  ;;  %v11542_v52 = vcombine.high %v21394_v12, %v8245_v34 }
0x1534   :  { %10277 = vxpose.xlu1.b32.start.end [1/1] (short) (narrow) %v6487_v35, 8  ;;  %v21447_v3 = vrot.slane %v6589_v47, %v20089_v51  ;;  %v11333_v4 = vcombine.low %v21235_v59, %v21241_v62  ;;  %v6486_v13 = vcombine.high %v23203_v49, %v21340_v15  ;;  %v6489_v31 = vcombine.low %v23210_v41, %v21417_v40 }
0x1535   :  { %v21456_v33 = vrot.slane %v6590_v54, %v20089_v51  ;;  %v11445_v36 = vrot.slane %v11437_v37, %v19680_v7  ;;  %v11452_v35 = vrot.slane %v11438_v10, %v19680_v7  ;;  %v11461_v38 = vrot.slane %v11453_v19, %v19680_v7  ;;  %v8213_v62 = vpop.trf.xlu0  ;;  %v21465_v15 = vpop.trf.xlu1 }
0x1536   :  { %v11468_v47 = vrot.slane %v11454_v58, %v19680_v7  ;;  %v11373_v18 = vrot.slane %v11365_v27, %v20089_v51  ;;  %v11469_v59 = vcombine.low %v21383_v60, %v21389_v2  ;;  %v6488_v49 = vcombine.high %v23205_v1, %v21364_v16  ;;  %v23211_v27 = vld [vmem:[#allocation59_spill] sm:$0xff] }
0x1537   :  { %10245 = vxpose.xlu0.b32.start.end [1/1] (short) (narrow) %v6486_v13, 8  ;;  %v21470_v54 = vrot.slane %v6605_v46, %v20089_v51  ;;  %v11501_v10 = vcombine.low %v11445_v36, %v11461_v38  ;;  %v11502_v37 = vcombine.high %v11445_v36, %v11461_v38  ;;  %v11341_v58 = vrot.slane %v11333_v4, %v20089_v51 }
0x1538   :  { %v11517_v19 = vcombine.low %v11452_v35, %v11468_v47  ;;  %v11518_v28 = vcombine.high %v11452_v35, %v11468_v47  ;;  %10341 = vxpose.xlu1.b32.start.end [1/1] (short) (narrow) %v6489_v31, 8  ;;  %v6491_v60 = vcombine.low %v23211_v27, %v21443_v30  ;;  %v6490_v2 = vcombine.high %v23210_v41, %v21417_v40 }
0x1539   :  { %v6621_v13 = vcombine.low %v21428_v45, %v21447_v3  ;;  %v11509_v16 = vrot.slane %v11501_v10, %v20089_v51  ;;  %v11516_v1 = vrot.slane %v11502_v37, %v20089_v51  ;;  %v11541_v46 = vcombine.low %v21394_v12, %v8245_v34  ;;  %v8277_v35 = vpop.trf.xlu0  ;;  %v8373_v38 = vpop.trf.xlu1 }
0x153a   :  { %v6492_v31 = vcombine.high %v23211_v27, %v21443_v30  ;;  %v11477_v4 = vrot.slane %v11469_v59, %v20089_v51  ;;  %v11484_v36 = vrot.slane %v11470_v44, %v20089_v51  ;;  %v11397_v40 = vcombine.low %v11341_v58, %v11373_v18 }
0x153b   :  { %10309 = vxpose.xlu0.b32.start.end [1/1] (short) (narrow) %v6488_v49, 8  ;;  %v11398_v41 = vcombine.high %v11341_v58, %v11373_v18  ;;  %v11493_v47 = vrot.slane %v11485_v17, %v20089_v51  ;;  %v11557_v25 = vcombine.low %v8213_v62, %v8277_v35  ;;  %v11558_v10 = vcombine.high %v8213_v62, %v8277_v35 }
0x153c   :  { %10405 = vxpose.xlu1.b32.start.end [1/1] (short) (narrow) %v6491_v60, 8  ;;  %v11574_v37 = vcombine.high %v21465_v15, %v8373_v38  ;;  %v11525_v12 = vrot.slane %v11517_v19, %v20089_v51  ;;  %v11533_v34 = vcombine.low %v11477_v4, %v11509_v16  ;;  %v11534_v30 = vcombine.high %v11477_v4, %v11509_v16 }
0x153d   :  { %v11535_v27 = vcombine.low %v11484_v36, %v11516_v1  ;;  %v21490_v59 = vrot.slane %v11541_v46, %v19680_v7  ;;  %v21493_v44 = vrot.slane %v11542_v52, %v19680_v7  ;;  %v21496_v18 = vrot.slane %v11557_v25, %v19680_v7  ;;  %v8341_v62 = vpop.trf.xlu0  ;;  %v21501_v49 = vpop.trf.xlu1 }
0x153e   :  { %v21499_v17 = vrot.slane %v11558_v10, %v19680_v7  ;;  %v16911_v19 = vpack.c.bf16 %v11533_v34, %v11397_v40  ;;  %v16943_v58 = vpack.c.bf16 %v11534_v30, %v11398_v41  ;;  %v11536_v16 = vcombine.high %v11484_v36, %v11516_v1  ;;  %v23213_v36 = vld [vmem:[#allocation49_spill] sm:$0xff] }
0x153f   :  { %10373 = vxpose.xlu0.b32.start.end [1/1] (short) (narrow) %v6490_v2, 8  ;;  %v21506_v60 = vpack.c.bf16 %v11535_v27, %v11399_v53  ;;  %v11532_v52 = vrot.slane %v11518_v28, %v20089_v51  ;;  %v11606_v25 = vcombine.high %v21490_v59, %v21496_v18  ;;  %v11537_v1 = vcombine.low %v11493_v47, %v11525_v12  ;;  %v23212_v28 = vld [vmem:[#allocation56_spill] sm:$0xff] }
0x1540   :  { %v11621_v46 = vcombine.low %v21493_v44, %v21499_v17  ;;  %v11622_v2 = vcombine.high %v21493_v44, %v21499_v17  ;;  %10469 = vxpose.xlu1.b32.start.end [1/1] (short) (narrow) %v6621_v13, 8  ;;  %16912 = vmatprep.subr.bf16.mxu1 %v16911_v19  ;;  %v21518_v53 = vpack.c.bf16 %v11536_v16, %v11400_v5 }
0x1541   :  { %16944 = vmatprep.subr.bf16.mxu0 %v16943_v58  ;;  %v11538_v4 = vcombine.high %v11493_v47, %v11525_v12  ;;  %v6574_v35 = vcombine.high %v23213_v36, %v23212_v28  ;;  %v11573_v40 = vcombine.low %v21465_v15, %v8373_v38  ;;  %16914 = vmatpush3.bf16.msra.mxu1 %v16911_v19  ;;  %v8405_v43 = vpop.trf.xlu0  ;;  %v8501_v5 = vpop.trf.xlu1 }
0x1542   :  { %v6623_v41 = vcombine.low %v21434_v39, %v21456_v33  ;;  %v23214_v13 = vcombine.low %v23213_v36, %v23212_v28  ;;  %v11500_v21 = vrot.slane %v11486_v57, %v20089_v51  ;;  %16946 = vmatpush3.bf16.msra.mxu0 %v16943_v58  ;;  %v23215_v15 = vcombine.low %v21370_v56, %v21355_v26  ;;  %v4069_v36 = vld [vmem:[#allocation17] sm:$0xff] }
0x1543   :  { %10437 = vxpose.xlu0.b32.start.end [1/1] (short) (narrow) %v6492_v31, 8  ;;  %v23217_v47 = vcombine.high %v21370_v56, %v21355_v26  ;;  %v11589_v34 = vcombine.low %v8341_v62, %v8405_v43  ;;  %v11590_v30 = vcombine.high %v8341_v62, %v8405_v43  ;;  %v11678_v29 = vcombine.high %v21501_v49, %v8501_v5 }
0x1544   :  { %v6581_v10 = vrot.slane %v23214_v13, %v20089_v51  ;;  %v21536_v38 = vpack.c.bf16 %v11537_v1, %v23215_v15  ;;  %10533 = vxpose.xlu1.b32.start.end [1/1] (short) (narrow) %v6623_v41, 8  ;;  %v6622_v63 = vcombine.high %v21428_v45, %v21447_v3  ;;  %v23219_v31 = vcombine.high %v21306_v50, %v21343_v48 }
0x1545   :  { %v21541_v12 = vpack.c.bf16 %v11538_v4, %v23217_v47  ;;  %v11539_v44 = vcombine.low %v11500_v21, %v11532_v52  ;;  %v11540_v26 = vcombine.high %v11500_v21, %v11532_v52  ;;  %v21554_v56 = vrot.slane %v11573_v40, %v19680_v7  ;;  %v8469_v3 = vpop.trf.xlu0  ;;  %v21561_v19 = vpop.trf.xlu1  ;;  %v4085_v40 = vld [vmem:[#allocation17 + $0x80] sm:$0xff] }
0x1546   :  { %23216 = vst [vmem:[#allocation65_spill] sm:$0xff] %v21536_v38  ;;  %v6625_v57 = vcombine.low %v6581_v10, %v21470_v54  ;;  %v21551_v27 = vrot.slane %v23219_v31, %v20089_v51  ;;  %v11588_v17 = vrot.slane %v11574_v37, %v19680_v7  ;;  %v21558_v62 = vrot.slane %v11589_v34, %v19680_v7 }
0x1547   :  { %23218 = vst [vmem:[#allocation67_spill] sm:$0xff] %v21541_v12  ;;  %v11604_v45 = vrot.slane %v11590_v30, %v19680_v7  ;;  %10501 = vxpose.xlu0.b32.start.end [1/1] (short) (narrow) %v6622_v63, 8  ;;  %v23220_v50 = vcombine.low %v21376_v0, %v21358_v32  ;;  %v23222_v58 = vcombine.high %v21376_v0, %v21358_v32  ;;  %v4070_v30 = vld [vmem:[#allocation17 + $0x8] sm:$0xff] }
0x1548   :  { %v11638_v37 = vcombine.high %v21554_v56, %v21558_v62  ;;  %10597 = vxpose.xlu1.b32.start.end [1/1] (short) (narrow) %v6625_v57, 8  ;;  %v6588_v4 = vrot.slane %v6574_v35, %v20089_v51  ;;  %v6624_v28 = vcombine.high %v21434_v39, %v21456_v33  ;;  %v11677_v32 = vcombine.low %v21501_v49, %v8501_v5  ;;  %v4086_v63 = vld [vmem:[#allocation17 + $0x88] sm:$0xff]  ;;  %v4104_v57 = vld [vmem:[#allocation17 + $0x118] sm:$0xff] }
0x1549   :  { %v21566_v48 = vpack.c.bf16 %v11539_v44, %v23220_v50  ;;  %v21571_v16 = vpack.c.bf16 %v11540_v26, %v23222_v58  ;;  %v11653_v52 = vcombine.low %v11588_v17, %v11604_v45  ;;  %v11654_v1 = vcombine.high %v11588_v17, %v11604_v45  ;;  %v8533_v43 = vpop.trf.xlu0  ;;  %v8629_v39 = vpop.trf.xlu1  ;;  %v4088_v45 = vld [vmem:[#allocation17 + $0x98] sm:$0xff]  ;;  %v4118_v17 = vld [vmem:[#allocation17 + $0x188] sm:$0xff] }
0x154a   :  { %v21579_v41 = vrot.slane %v11638_v37, %v20089_v51  ;;  %v6627_v0 = vcombine.low %v6588_v4, %v21551_v27  ;;  %v21584_v13 = vrot.slane %v11606_v25, %v20089_v51  ;;  %v11693_v33 = vcombine.low %v8469_v3, %v8533_v43  ;;  %v4146_v12 = vld [vmem:[#allocation17 + $0x268] sm:$0xff] }
0x154b   :  { %23221 = vst [vmem:[#allocation85_spill] sm:$0xff] %v21566_v48  ;;  %23223 = vst [vmem:[#allocation66_spill] sm:$0xff] %v21571_v16  ;;  %v21587_v21 = vrot.slane %v11653_v52, %v20089_v51  ;;  %v21590_v35 = vrot.slane %v11654_v1, %v20089_v51  ;;  %10565 = vxpose.xlu0.b32.start.end [1/1] (short) (narrow) %v6624_v28, 8  ;;  %v11694_v15 = vcombine.high %v8469_v3, %v8533_v43  ;;  %v4101_v52 = vld [vmem:[#allocation17 + $0x100] sm:$0xff] }
0x154c   :  { %10661 = vxpose.xlu1.b32.start.end [1/1] (short) (narrow) %v6627_v0, 8  ;;  %v11710_v47 = vcombine.high %v21561_v19, %v8629_v39  ;;  %v17343_v49 = vpack.i.bf16 %v4085_v40, %v4069_v36  ;;  %v21594_v5 = vrot.slane %v11621_v46, %v20089_v51  ;;  %v21597_v25 = vrot.slane %v11622_v2, %v20089_v51  ;;  %v4117_v1 = vld [vmem:[#allocation17 + $0x180] sm:$0xff]  ;;  %v4071_v36 = vld [vmem:[#allocation17 + $0x10] sm:$0xff] }
0x154d   :  { %v6626_v34 = vcombine.high %v6581_v10, %v21470_v54  ;;  %v21603_v31 = vrot.slane %v11677_v32, %v19680_v7  ;;  %v21606_v44 = vrot.slane %v11678_v29, %v19680_v7  ;;  %v21609_v26 = vrot.slane %v11693_v33, %v19680_v7  ;;  %v8597_v2 = vpop.trf.xlu0  ;;  %v21614_v54 = vpop.trf.xlu1  ;;  %v4087_v40 = vld [vmem:[#allocation17 + $0x90] sm:$0xff]  ;;  %v4102_v29 = vld [vmem:[#allocation17 + $0x108] sm:$0xff] }
0x154e   :  { %v21612_v46 = vrot.slane %v11694_v15, %v19680_v7  ;;  %v17345_v37 = vpack.i.bf16 %v4086_v63, %v4070_v30  ;;  %v6628_v28 = vcombine.high %v6588_v4, %v21551_v27  ;;  %v11709_v0 = vcombine.low %v21561_v19, %v8629_v39 }
0x154f   :  { %10629 = vxpose.xlu0.b32.start.end [1/1] (short) (narrow) %v6626_v34, 8  ;;  %v11637_v43 = vcombine.low %v21554_v56, %v21558_v62  ;;  %v4072_v34 = vld [vmem:[#allocation17 + $0x18] sm:$0xff]  ;;  %v17347_v4 = vpack.i.bf16 %v4087_v40, %v4071_v36  ;;  %v11605_v19 = vcombine.low %v21490_v59, %v21496_v18  ;;  %v11724_v56 = vrot.slane %v11710_v47, %v19680_v7  ;;  %v21650_v18 = vld [vmem:[#allocation17 + $0xa8] sm:$0xff] }
0x1550   :  { %17344 = vxpose.xlu1.b32.start [1/16] %v17343_v49, 128  ;;  %v17455_v49 = vpack.i.bf16 %v4117_v1, %v4101_v52  ;;  %v11717_v39 = vrot.slane %v11709_v0, %v19680_v7  ;;  %v4073_v1 = vld [vmem:[#allocation17 + $0x20] sm:$0xff]  ;;  %v11741_v36 = vcombine.low %v21603_v31, %v21609_v26  ;;  %v17349_v59 = vpack.i.bf16 %v4088_v45, %v4072_v34  ;;  %v4103_v0 = vld [vmem:[#allocation17 + $0x110] sm:$0xff] }
0x1551   :  { %v8661_v33 = vpop.trf.xlu0  ;;  %v8757_v15 = vpop.trf.xlu1  ;;  %v17457_v47 = vpack.i.bf16 %v4118_v17, %v4102_v29  ;;  %v11613_v50 = vrot.slane %v11605_v19, %v20089_v51 }
0x1552   :  { %v11725_v30 = vcombine.low %v8597_v2, %v8661_v33  ;;  %v11726_v63 = vcombine.high %v8597_v2, %v8661_v33  ;;  %v11814_v27 = vcombine.high %v21614_v54, %v8757_v15  ;;  %v4089_v2 = vld [vmem:[#allocation17 + $0xa0] sm:$0xff]  ;;  %v11813_v45 = vcombine.low %v21614_v54, %v8757_v15 }
0x1553   :  { %10693 = vxpose.xlu0.b32.start.end [1/1] (short) (narrow) %v6628_v28, 8  ;;  %v11645_v28 = vrot.slane %v11637_v43, %v20089_v51  ;;  %v4120_v43 = vld [vmem:[#allocation17 + $0x198] sm:$0xff]  ;;  %v17351_v3 = vpack.i.bf16 %v4089_v2, %v4073_v1  ;;  %v11749_v29 = vrot.slane %v11741_v36, %v20089_v51  ;;  %v23224_v54 = vcombine.high %v21603_v31, %v21609_v26 }
0x1554   :  { %17346 = vxpose.xlu1.b32.cont [2/16] %v17345_v37, 128  ;;  %v11733_v62 = vrot.slane %v11725_v30, %v19680_v7  ;;  %v11740_v52 = vrot.slane %v11726_v63, %v19680_v7  ;;  %v21643_v37 = vld [vmem:[#allocation17 + $0x28] sm:$0xff]  ;;  %v4119_v30 = vld [vmem:[#allocation17 + $0x190] sm:$0xff]  ;;  %v23225_v31 = vcombine.low %v21606_v44, %v21612_v46 }
0x1555   :  { %v8725_v40 = vpop.trf.xlu0  ;;  %v21648_v33 = vpop.trf.xlu1  ;;  %v17353_v34 = vpack.i.bf16 %v21650_v18, %v21643_v37  ;;  %v17459_v17 = vpack.i.bf16 %v4119_v30, %v4103_v0  ;;  %v11670_v2 = vcombine.high %v11613_v50, %v11645_v28  ;;  %v11756_v15 = vrot.slane %v23224_v54, %v20089_v51 }
0x1556   :  { %v11773_v63 = vcombine.low %v11717_v39, %v11733_v62  ;;  %v11774_v32 = vcombine.high %v11717_v39, %v11733_v62  ;;  %v11789_v10 = vcombine.low %v11724_v56, %v11740_v52  ;;  %v11790_v58 = vcombine.high %v11724_v56, %v11740_v52 }
0x1557   :  { %17456 = vxpose.xlu0.b32.start [1/16] %v17455_v49, 128  ;;  %v17461_v62 = vpack.i.bf16 %v4120_v43, %v4104_v57  ;;  %v21666_v18 = vrot.slane %v11813_v45, %v19680_v7  ;;  %v21669_v57 = vrot.slane %v11814_v27, %v19680_v7  ;;  %v11765_v26 = vrot.slane %v23225_v31, %v20089_v51  ;;  %v4121_v27 = vld [vmem:[#allocation17 + $0x1a0] sm:$0xff] }
0x1558   :  { %17348 = vxpose.xlu1.b32.cont [3/16] %v17347_v4, 128  ;;  %v11781_v16 = vrot.slane %v11773_v63, %v20089_v51  ;;  %v11788_v49 = vrot.slane %v11774_v32, %v20089_v51  ;;  %v11669_v4 = vcombine.low %v11613_v50, %v11645_v28  ;;  %v11797_v37 = vrot.slane %v11789_v10, %v20089_v51 }
0x1559   :  { %v8789_v39 = vpop.trf.xlu0  ;;  %v8885_v56 = vpop.trf.xlu1  ;;  %v11804_v30 = vrot.slane %v11790_v58, %v20089_v51  ;;  %v23227_v54 = vcombine.high %v21606_v44, %v21612_v46  ;;  %v23228_v31 = vcombine.high %v21584_v13, %v21579_v41 }
0x155a   :  { %v11829_v52 = vcombine.low %v8725_v40, %v8789_v39  ;;  %v11830_v19 = vcombine.high %v8725_v40, %v8789_v39  ;;  %v11846_v1 = vcombine.high %v21648_v33, %v8885_v56  ;;  %v11805_v36 = vcombine.low %v11749_v29, %v11781_v16  ;;  %v4091_v39 = vld [vmem:[#allocation17 + $0xb0] sm:$0xff] }
0x155b   :  { %17458 = vxpose.xlu0.b32.cont [2/16] %v17457_v47, 128  ;;  %v11806_v32 = vcombine.high %v11749_v29, %v11781_v16  ;;  %v4105_v47 = vld [vmem:[#allocation17 + $0x120] sm:$0xff]  ;;  %v11807_v0 = vcombine.low %v11756_v15, %v11788_v49  ;;  %v4075_v29 = vld [vmem:[#allocation17 + $0x30] sm:$0xff]  ;;  %v11808_v58 = vcombine.high %v11756_v15, %v11788_v49  ;;  %v23229_v49 = vcombine.low %v21594_v5, %v21587_v21 }
0x155c   :  { %17350 = vxpose.xlu1.b32.cont [4/16] %v17349_v59, 128  ;;  %v21672_v40 = vrot.slane %v11829_v52, %v19680_v7  ;;  %v21675_v50 = vrot.slane %v11830_v19, %v19680_v7  ;;  %v16915_v16 = vpack.c.bf16 %v11805_v36, %v11669_v4  ;;  %v11809_v52 = vcombine.low %v11765_v26, %v11797_v37 }
0x155d   :  { %v8853_v10 = vpop.trf.xlu0  ;;  %v21681_v28 = vpop.trf.xlu1  ;;  %v16947_v59 = vpack.c.bf16 %v11806_v32, %v11670_v2  ;;  %v11845_v19 = vcombine.low %v21648_v33, %v8885_v56  ;;  %v17463_v2 = vpack.i.bf16 %v4121_v27, %v4105_v47  ;;  %v17355_v46 = vpack.i.bf16 %v4091_v39, %v4075_v29  ;;  %v4076_v47 = vld [vmem:[#allocation17 + $0x38] sm:$0xff]  ;;  %v4077_v29 = vld [vmem:[#allocation17 + $0x40] sm:$0xff] }
0x155e   :  { %v11878_v63 = vcombine.high %v21666_v18, %v21672_v40  ;;  %v11893_v43 = vcombine.low %v21669_v57, %v21675_v50  ;;  %v11894_v45 = vcombine.high %v21669_v57, %v21675_v50  ;;  %16916 = vmatprep.subr.bf16.mxu1 %v16915_v16  ;;  %v21708_v33 = vpack.c.bf16 %v11809_v52, %v23229_v49  ;;  %v4093_v39 = vld [vmem:[#allocation17 + $0xc0] sm:$0xff] }
0x155f   :  { %17460 = vxpose.xlu0.b32.cont [3/16] %v17459_v17, 128  ;;  %16948 = vmatprep.subr.bf16.mxu0 %v16947_v59  ;;  %v23226_v17 = vcombine.low %v21584_v13, %v21579_v41  ;;  %v11810_v27 = vcombine.high %v11765_v26, %v11797_v37  ;;  %v21712_v13 = vrot.slane %v11845_v19, %v19680_v7 }
0x1560   :  { %17352 = vxpose.xlu1.b32.cont [5/16] %v17351_v3, 128  ;;  %16918 = vmatpush3.bf16.msra.mxu1 %v16915_v16  ;;  %v11772_v3 = vrot.slane %v23227_v54, %v20089_v51  ;;  %23230 = vst [vmem:[#allocation68_spill] sm:$0xff] %v21708_v33  ;;  %v4106_v16 = vld [vmem:[#allocation17 + $0x128] sm:$0xff]  ;;  %v23231_v37 = vcombine.high %v21594_v5, %v21587_v21  ;;  %v4107_v21 = vld [vmem:[#allocation17 + $0x130] sm:$0xff] }
0x1561   :  { %v21693_v4 = vpack.c.bf16 %v11807_v0, %v23226_v17  ;;  %16950 = vmatpush3.bf16.msra.mxu0 %v16947_v59  ;;  %v8917_v36 = vpop.trf.xlu0  ;;  %v9013_v32 = vpop.trf.xlu1  ;;  %v21703_v0 = vpack.c.bf16 %v11808_v58, %v23228_v31  ;;  %v4122_v59 = vld [vmem:[#allocation17 + $0x1a8] sm:$0xff]  ;;  %v11860_v58 = vrot.slane %v11846_v1, %v19680_v7  ;;  %v23233_v1 = vcombine.low %v21597_v25, %v21590_v35  ;;  %v4123_v5 = vld [vmem:[#allocation17 + $0x1b0] sm:$0xff] }
0x1562   :  { %v11861_v56 = vcombine.low %v8853_v10, %v8917_v36  ;;  %v11862_v15 = vcombine.high %v8853_v10, %v8917_v36  ;;  %v11950_v44 = vcombine.high %v21681_v28, %v9013_v32  ;;  %v11811_v17 = vcombine.low %v11772_v3, %v11804_v30 }
0x1563   :  { %17462 = vxpose.xlu0.b32.cont [4/16] %v17461_v62, 128  ;;  %v4092_v62 = vld [vmem:[#allocation17 + $0xb8] sm:$0xff]  ;;  %v11812_v41 = vcombine.high %v11772_v3, %v11804_v30  ;;  %v17465_v36 = vpack.i.bf16 %v4122_v59, %v4106_v16  ;;  %v21724_v26 = vpack.c.bf16 %v11810_v27, %v23231_v37  ;;  %v23235_v19 = vcombine.high %v21597_v25, %v21590_v35 }
0x1564   :  { %17354 = vxpose.xlu1.b32.cont [6/16] %v17353_v34, 128  ;;  %v21716_v52 = vrot.slane %v11861_v56, %v19680_v7  ;;  %v11876_v34 = vrot.slane %v11862_v15, %v19680_v7  ;;  %v21729_v30 = vpack.c.bf16 %v11811_v17, %v23233_v1  ;;  %v17357_v56 = vpack.i.bf16 %v4092_v62, %v4076_v47  ;;  %v4108_v15 = vld [vmem:[#allocation17 + $0x138] sm:$0xff] }
0x1565   :  { %v8981_v10 = vpop.trf.xlu0  ;;  %v21719_v54 = vpop.trf.xlu1  ;;  %23232 = vst [vmem:[#allocation69_spill] sm:$0xff] %v21724_v26  ;;  %v21734_v3 = vpack.c.bf16 %v11812_v41, %v23235_v19  ;;  %v4124_v16 = vld [vmem:[#allocation17 + $0x1b8] sm:$0xff]  ;;  %v11949_v27 = vcombine.low %v21681_v28, %v9013_v32  ;;  %v17359_v17 = vpack.i.bf16 %v4093_v39, %v4077_v29  ;;  %v21743_v35 = vrot.slane %v11878_v63, %v20089_v51  ;;  %v4078_v29 = vld [vmem:[#allocation17 + $0x48] sm:$0xff] }
0x1566   :  { %23234 = vst [vmem:[#allocation71_spill] sm:$0xff] %v21729_v30  ;;  %v11910_v31 = vcombine.high %v21712_v13, %v21716_v52  ;;  %v11926_v49 = vcombine.high %v11860_v58, %v11876_v34  ;;  %v17467_v62 = vpack.i.bf16 %v4123_v5, %v4107_v21  ;;  %v17469_v28 = vpack.i.bf16 %v4124_v16, %v4108_v15  ;;  %v4094_v39 = vld [vmem:[#allocation17 + $0xc8] sm:$0xff]  ;;  %v4109_v16 = vld [vmem:[#allocation17 + $0x140] sm:$0xff] }
0x1567   :  { %17464 = vxpose.xlu0.b32.cont [5/16] %v17463_v2, 128  ;;  %23236 = vst [vmem:[#allocation74_spill] sm:$0xff] %v21734_v3  ;;  %v11925_v2 = vcombine.low %v11860_v58, %v11876_v34  ;;  %v21756_v63 = vrot.slane %v11893_v43, %v20089_v51  ;;  %v21762_v32 = vrot.slane %v11894_v45, %v20089_v51 }
0x1568   :  { %17356 = vxpose.xlu1.b32.cont [7/16] %v17355_v46, 128  ;;  %v21739_v59 = vrot.slane %v11910_v31, %v20089_v51  ;;  %v21749_v41 = vrot.slane %v11926_v49, %v20089_v51  ;;  %v21769_v1 = vrot.slane %v11949_v27, %v19680_v7  ;;  %v21772_v43 = vrot.slane %v11950_v44, %v19680_v7  ;;  %v4125_v27 = vld [vmem:[#allocation17 + $0x1c0] sm:$0xff]  ;;  %v4080_v31 = vld [vmem:[#allocation17 + $0x58] sm:$0xff] }
0x1569   :  { %v21746_v25 = vrot.slane %v11925_v2, %v20089_v51  ;;  %v9045_v46 = vpop.trf.xlu0  ;;  %v9141_v47 = vpop.trf.xlu1  ;;  %v17361_v15 = vpack.i.bf16 %v4094_v39, %v4078_v29  ;;  %v11877_v49 = vcombine.low %v21666_v18, %v21672_v40  ;;  %v4126_v18 = vld [vmem:[#allocation17 + $0x1c8] sm:$0xff] }
0x156a   :  { %v11965_v58 = vcombine.low %v8981_v10, %v9045_v46  ;;  %v11966_v34 = vcombine.high %v8981_v10, %v9045_v46  ;;  %v11982_v37 = vcombine.high %v21719_v54, %v9141_v47  ;;  %v11909_v46 = vcombine.low %v21712_v13, %v21716_v52  ;;  %v4111_v10 = vld [vmem:[#allocation17 + $0x150] sm:$0xff] }
0x156b   :  { %17466 = vxpose.xlu0.b32.cont [6/16] %v17465_v36, 128  ;;  %v4096_v36 = vld [vmem:[#allocation17 + $0xd8] sm:$0xff] }
0x156c   :  { %17358 = vxpose.xlu1.b32.cont [8/16] %v17357_v56, 128  ;;  %v21775_v19 = vrot.slane %v11965_v58, %v19680_v7  ;;  %v21778_v57 = vrot.slane %v11966_v34, %v19680_v7  ;;  %v4079_v58 = vld [vmem:[#allocation17 + $0x50] sm:$0xff]  ;;  %v11917_v40 = vrot.slane %v11909_v46, %v20089_v51 }
0x156d   :  { %v9109_v50 = vpop.trf.xlu0  ;;  %v21780_v45 = vpop.trf.xlu1  ;;  %v4095_v34 = vld [vmem:[#allocation17 + $0xd0] sm:$0xff] }
0x156e   :  { %v12014_v56 = vcombine.high %v21769_v1, %v21775_v19  ;;  %v12029_v21 = vcombine.low %v21772_v43, %v21778_v57  ;;  %v12030_v5 = vcombine.high %v21772_v43, %v21778_v57  ;;  %v21803_v43 = vld [vmem:[#allocation17 + $0x60] sm:$0xff]  ;;  %v17363_v52 = vpack.i.bf16 %v4095_v34, %v4079_v58  ;;  %v21818_v58 = vld [vmem:[#allocation17 + $0x1d8] sm:$0xff] }
0x156f   :  { %17468 = vxpose.xlu0.b32.cont [7/16] %v17467_v62, 128  ;;  %v11981_v62 = vcombine.low %v21719_v54, %v9141_v47  ;;  %v21807_v54 = vld [vmem:[#allocation17 + $0xe0] sm:$0xff]  ;;  %v4110_v47 = vld [vmem:[#allocation17 + $0x148] sm:$0xff]  ;;  %v11885_v34 = vrot.slane %v11877_v49, %v20089_v51 }
0x1570   :  { %17360 = vxpose.xlu1.b32.cont [9/16] %v17359_v17, 128  ;;  %v17471_v17 = vpack.i.bf16 %v4125_v27, %v4109_v16  ;;  %v11996_v16 = vrot.slane %v11982_v37, %v19680_v7  ;;  %v21816_v27 = vld [vmem:[#allocation17 + $0x158] sm:$0xff]  ;;  %v17473_v37 = vpack.i.bf16 %v4126_v18, %v4110_v47 }
0x1571   :  { %v9173_v44 = vpop.trf.xlu0  ;;  %v21801_v2 = vpop.trf.xlu1  ;;  %v11989_v57 = vrot.slane %v11981_v62, %v19680_v7  ;;  %v17365_v62 = vpack.i.bf16 %v4096_v36, %v4080_v31  ;;  %v11941_v48 = vcombine.low %v11885_v34, %v11917_v40  ;;  %v11942_v9 = vcombine.high %v11885_v34, %v11917_v40 }
0x1572   :  { %v11997_v29 = vcombine.low %v9109_v50, %v9173_v44  ;;  %v11998_v39 = vcombine.high %v9109_v50, %v9173_v44  ;;  %v12086_v13 = vcombine.high %v21780_v45, %v21801_v2  ;;  %v17477_v49 = vpack.i.bf16 %v21818_v58, %v21816_v27 }
0x1573   :  { %17470 = vxpose.xlu0.b32.cont [8/16] %v17469_v28, 128  ;;  %v12013_v28 = vcombine.low %v21769_v1, %v21775_v19  ;;  %v17367_v1 = vpack.i.bf16 %v21807_v54, %v21803_v43  ;;  %v12085_v43 = vcombine.low %v21780_v45, %v21801_v2  ;;  %v12037_v54 = vrot.slane %v12029_v21, %v20089_v51  ;;  %v4098_v21 = vld [vmem:[#allocation17 + $0xe8] sm:$0xff] }
0x1574   :  { %17362 = vxpose.xlu1.b32.cont [10/16] %v17361_v15, 128  ;;  %v12005_v50 = vrot.slane %v11997_v29, %v19680_v7  ;;  %v12012_v44 = vrot.slane %v11998_v39, %v19680_v7  ;;  %v4127_v15 = vld [vmem:[#allocation17 + $0x1d0] sm:$0xff] }
0x1575   :  { %v9237_v46 = vpop.trf.xlu0  ;;  %v21821_v3 = vpop.trf.xlu1  ;;  %v17475_v14 = vpack.i.bf16 %v4127_v15, %v4111_v10  ;;  %v12021_v24 = vrot.slane %v12013_v28, %v20089_v51 }
0x1576   :  { %v12045_v19 = vcombine.low %v11989_v57, %v12005_v50  ;;  %v12046_v29 = vcombine.high %v11989_v57, %v12005_v50  ;;  %v12061_v30 = vcombine.low %v11996_v16, %v12012_v44  ;;  %v12062_v39 = vcombine.high %v11996_v16, %v12012_v44  ;;  %v4082_v16 = vld [vmem:[#allocation17 + $0x68] sm:$0xff] }
0x1577   :  { %17472 = vxpose.xlu0.b32.cont [9/16] %v17471_v17, 128  ;;  %v12028_v17 = vrot.slane %v12014_v56, %v20089_v51  ;;  %v21843_v44 = vrot.slane %v12085_v43, %v19680_v7  ;;  %v4099_v43 = vld [vmem:[#allocation17 + $0xf0] sm:$0xff] }
0x1578   :  { %17364 = vxpose.xlu1.b32.cont [11/16] %v17363_v52, 128  ;;  %v12053_v36 = vrot.slane %v12045_v19, %v20089_v51  ;;  %v12060_v31 = vrot.slane %v12046_v29, %v20089_v51  ;;  %v21835_v52 = vrot.slane %v12030_v5, %v20089_v51  ;;  %v12069_v10 = vrot.slane %v12061_v30, %v20089_v51 }
0x1579   :  { %v9301_v47 = vpop.trf.xlu0  ;;  %v9397_v18 = vpop.trf.xlu1  ;;  %v21839_v40 = vrot.slane %v12062_v39, %v20089_v51  ;;  %v21846_v30 = vrot.slane %v12086_v13, %v19680_v7  ;;  %v23237_v19 = vcombine.low %v21743_v35, %v21739_v59  ;;  %v23238_v13 = vcombine.high %v21743_v35, %v21739_v59 }
0x157a   :  { %v12101_v57 = vcombine.low %v9237_v46, %v9301_v47  ;;  %v12102_v28 = vcombine.high %v9237_v46, %v9301_v47  ;;  %v12118_v45 = vcombine.high %v21821_v3, %v9397_v18  ;;  %v12077_v2 = vcombine.low %v12021_v24, %v12053_v36 }
0x157b   :  { %17474 = vxpose.xlu0.b32.cont [10/16] %v17473_v37, 128  ;;  %v12078_v56 = vcombine.high %v12021_v24, %v12053_v36  ;;  %v12079_v50 = vcombine.low %v12028_v17, %v12060_v31  ;;  %v12080_v5 = vcombine.high %v12028_v17, %v12060_v31  ;;  %v4129_v37 = vld [vmem:[#allocation17 + $0x1e0] sm:$0xff]  ;;  %v4083_v31 = vld [vmem:[#allocation17 + $0x70] sm:$0xff]  ;;  %v12081_v17 = vcombine.low %v12037_v54, %v12069_v10 }
0x157c   :  { %17366 = vxpose.xlu1.b32.cont [12/16] %v17365_v62, 128  ;;  %v21849_v15 = vrot.slane %v12101_v57, %v19680_v7  ;;  %v21852_v27 = vrot.slane %v12102_v28, %v19680_v7  ;;  %v16919_v24 = vpack.c.bf16 %v12077_v2, %v11941_v48  ;;  %v4113_v62 = vld [vmem:[#allocation17 + $0x160] sm:$0xff]  ;;  %v12082_v47 = vcombine.high %v12037_v54, %v12069_v10 }
0x157d   :  { %v9365_v58 = vpop.trf.xlu0  ;;  %v21854_v34 = vpop.trf.xlu1  ;;  %v16951_v46 = vpack.c.bf16 %v12078_v56, %v11942_v9  ;;  %v21859_v29 = vpack.c.bf16 %v12079_v50, %v23237_v19  ;;  %v21864_v39 = vpack.c.bf16 %v12080_v5, %v23238_v13  ;;  %v17369_v9 = vpack.i.bf16 %v4098_v21, %v4082_v16  ;;  %v4114_v5 = vld [vmem:[#allocation17 + $0x168] sm:$0xff] }
0x157e   :  { %v12150_v36 = vcombine.high %v21843_v44, %v21849_v15  ;;  %v12165_v48 = vcombine.low %v21846_v30, %v21852_v27  ;;  %16920 = vmatprep.subr.bf16.mxu1 %v16919_v24  ;;  %v12083_v59 = vcombine.low %v21835_v52, %v21839_v40  ;;  %v12117_v35 = vcombine.low %v21821_v3, %v9397_v18 }
0x157f   :  { %17476 = vxpose.xlu0.b32.cont [11/16] %v17475_v14, 128  ;;  %v12166_v14 = vcombine.high %v21846_v30, %v21852_v27  ;;  %16952 = vmatprep.subr.bf16.mxu0 %v16951_v46  ;;  %v17479_v57 = vpack.i.bf16 %v4129_v37, %v4113_v62  ;;  %v23241_v16 = vcombine.high %v21756_v63, %v21746_v25  ;;  %v4100_v62 = vld [vmem:[#allocation17 + $0xf8] sm:$0xff] }
0x1580   :  { %17368 = vxpose.xlu1.b32.cont [13/16] %v17367_v1, 128  ;;  %16922 = vmatpush3.bf16.msra.mxu1 %v16919_v24  ;;  %v23239_v1 = vcombine.low %v21756_v63, %v21746_v25  ;;  %v23243_v10 = vcombine.low %v21762_v32, %v21749_v41  ;;  %v17371_v50 = vpack.i.bf16 %v4099_v43, %v4083_v31  ;;  %v4130_v24 = vld [vmem:[#allocation17 + $0x1e8] sm:$0xff] }
0x1581   :  { %16954 = vmatpush3.bf16.msra.mxu0 %v16951_v46  ;;  %v9429_v28 = vpop.trf.xlu0  ;;  %v9525_v2 = vpop.trf.xlu1  ;;  %v21883_v54 = vpack.c.bf16 %v12082_v47, %v23241_v16  ;;  %v4084_v46 = vld [vmem:[#allocation17 + $0x78] sm:$0xff]  ;;  %v12084_v25 = vcombine.high %v21835_v52, %v21839_v40  ;;  %v21894_v63 = vrot.slane %v12117_v35, %v19680_v7  ;;  %v12132_v37 = vrot.slane %v12118_v45, %v19680_v7  ;;  %v4131_v35 = vld [vmem:[#allocation17 + $0x1f0] sm:$0xff]  ;;  %v4133_v16 = vld [vmem:[#allocation17 + $0x200] sm:$0xff] }
0x1582   :  { %v21878_v56 = vpack.c.bf16 %v12081_v17, %v23239_v1  ;;  %v21888_v3 = vpack.c.bf16 %v12083_v59, %v23243_v10  ;;  %v12133_v18 = vcombine.low %v9365_v58, %v9429_v28  ;;  %v12134_v21 = vcombine.high %v9365_v58, %v9429_v28  ;;  %v4115_v59 = vld [vmem:[#allocation17 + $0x170] sm:$0xff]  ;;  %v4116_v28 = vld [vmem:[#allocation17 + $0x178] sm:$0xff]  ;;  %v4149_v10 = vld [vmem:[#allocation17 + $0x280] sm:$0xff] }
0x1583   :  { %17478 = vxpose.xlu0.b32.cont [12/16] %v17477_v49, 128  ;;  %23242 = vst [vmem:[#allocation70_spill] sm:$0xff] %v21883_v54  ;;  %v12222_v49 = vcombine.high %v21854_v34, %v9525_v2  ;;  %v17481_v31 = vpack.i.bf16 %v4130_v24, %v4114_v5  ;;  %v23245_v43 = vcombine.high %v21762_v32, %v21749_v41  ;;  %v4132_v1 = vld [vmem:[#allocation17 + $0x1f8] sm:$0xff] }
0x1584   :  { %23240 = vst [vmem:[#allocation44_spill] sm:$0xff] %v21878_v56  ;;  %23244 = vst [vmem:[#allocation72_spill] sm:$0xff] %v21888_v3  ;;  %17370 = vxpose.xlu1.b32.cont [14/16] %v17369_v9, 128  ;;  %v21898_v19 = vrot.slane %v12133_v18, %v19680_v7  ;;  %v12148_v58 = vrot.slane %v12134_v21, %v19680_v7  ;;  %v17373_v47 = vpack.i.bf16 %v4100_v62, %v4084_v46  ;;  %v4161_v56 = vld [vmem:[#allocation17 + $0x2e0] sm:$0xff] }
0x1585   :  { %v9493_v13 = vpop.trf.xlu0  ;;  %v21901_v9 = vpop.trf.xlu1  ;;  %v21906_v17 = vpack.c.bf16 %v12084_v25, %v23245_v43  ;;  %v12221_v41 = vcombine.low %v21854_v34, %v9525_v2  ;;  %v21915_v32 = vrot.slane %v12150_v36, %v20089_v51  ;;  %v17483_v24 = vpack.i.bf16 %v4131_v35, %v4115_v59  ;;  %v4134_v2 = vld [vmem:[#allocation17 + $0x208] sm:$0xff] }
0x1586   :  { %v12182_v52 = vcombine.high %v21894_v63, %v21898_v19  ;;  %v12197_v40 = vcombine.low %v12132_v37, %v12148_v58  ;;  %v12198_v45 = vcombine.high %v12132_v37, %v12148_v58  ;;  %v17485_v25 = vpack.i.bf16 %v4132_v1, %v4116_v28  ;;  %v4150_v58 = vld [vmem:[#allocation17 + $0x288] sm:$0xff] }
0x1587   :  { %17480 = vxpose.xlu0.b32.cont [13/16] %v17479_v57, 128  ;;  %23246 = vst [vmem:[#allocation86_spill] sm:$0xff] %v21906_v17  ;;  %v17567_v37 = vpack.i.bf16 %v4149_v10, %v4133_v16  ;;  %v21927_v34 = vrot.slane %v12165_v48, %v20089_v51  ;;  %v21933_v36 = vrot.slane %v12166_v14, %v20089_v51  ;;  %v4135_v16 = vld [vmem:[#allocation17 + $0x210] sm:$0xff] }
0x1588   :  { %17372 = vxpose.xlu1.b32.cont [15/16] %v17371_v50, 128  ;;  %v21911_v57 = vrot.slane %v12182_v52, %v20089_v51  ;;  %v21918_v18 = vrot.slane %v12197_v40, %v20089_v51  ;;  %v21921_v21 = vrot.slane %v12198_v45, %v20089_v51  ;;  %v12229_v43 = vrot.slane %v12221_v41, %v19680_v7  ;;  %v4151_v10 = vld [vmem:[#allocation17 + $0x290] sm:$0xff] }
0x1589   :  { %v9557_v50 = vpop.trf.xlu0  ;;  %v9653_v5 = vpop.trf.xlu1  ;;  %v21941_v52 = vrot.slane %v12222_v49, %v19680_v7  ;;  %v17569_v1 = vpack.i.bf16 %v4150_v58, %v4134_v2  ;;  %v17571_v45 = vpack.i.bf16 %v4151_v10, %v4135_v16  ;;  %v12149_v2 = vcombine.low %v21843_v44, %v21849_v15  ;;  %v4137_v15 = vld [vmem:[#allocation17 + $0x220] sm:$0xff] }
0x158a   :  { %v12237_v46 = vcombine.low %v9493_v13, %v9557_v50  ;;  %v12238_v62 = vcombine.high %v9493_v13, %v9557_v50  ;;  %v12253_v41 = vcombine.low %v21901_v9, %v9653_v5  ;;  %v12254_v50 = vcombine.high %v21901_v9, %v9653_v5 }
0x158b   :  { %17482 = vxpose.xlu0.b32.cont [14/16] %v17481_v31, 128  ;;  %v4165_v31 = vld [vmem:[#allocation17 + $0x300] sm:$0xff] }
0x158c   :  { %17374 = vxpose.xlu1.b32.end [16/16] %v17373_v47, 128  ;;  %v12245_v48 = vrot.slane %v12237_v46, %v19680_v7  ;;  %v21945_v40 = vrot.slane %v12238_v62, %v19680_v7  ;;  %v12261_v58 = vrot.slane %v12253_v41, %v19680_v7  ;;  %v12268_v9 = vrot.slane %v12254_v50, %v19680_v7  ;;  %v4153_v41 = vld [vmem:[#allocation17 + $0x2a0] sm:$0xff] }
0x158d   :  { %v9621_v30 = vpop.trf.xlu0  ;;  %v21947_v27 = vpop.trf.xlu1  ;;  %v12157_v50 = vrot.slane %v12149_v2, %v20089_v51 }
0x158e   :  { %v12286_v59 = vcombine.high %v12229_v43, %v12245_v48  ;;  %v12301_v35 = vcombine.low %v21941_v52, %v21945_v40  ;;  %v12302_v28 = vcombine.high %v21941_v52, %v21945_v40  ;;  %v4136_v52 = vld [vmem:[#allocation17 + $0x218] sm:$0xff] }
0x158f   :  { %17484 = vxpose.xlu0.b32.cont [15/16] %v17483_v24, 128  ;;  %v12181_v24 = vcombine.low %v21894_v63, %v21898_v19 }
0x1590   :  { %17568 = vxpose.xlu1.b32.start [1/16] %v17567_v37, 128  ;;  %v4152_v37 = vld [vmem:[#allocation17 + $0x298] sm:$0xff] }
0x1591   :  { %v9685_v46 = vpop.trf.xlu0  ;;  %v21965_v62 = vpop.trf.xlu1  ;;  %v12189_v19 = vrot.slane %v12181_v24, %v20089_v51 }
0x1592   :  { %v12269_v49 = vcombine.low %v9621_v30, %v9685_v46  ;;  %v12270_v47 = vcombine.high %v9621_v30, %v9685_v46 }
0x1593   :  { %17486 = vxpose.xlu0.b32.end [16/16] %v17485_v25, 128  ;;  %v12285_v25 = vcombine.low %v12229_v43, %v12245_v48  ;;  %v12300_v48 = vrot.slane %v12286_v59, %v20089_v51  ;;  %v4181_v59 = vld [vmem:[#allocation17 + $0x380] sm:$0xff] }
0x1594   :  { %17570 = vxpose.xlu1.b32.cont [2/16] %v17569_v1, 128  ;;  %v12277_v5 = vrot.slane %v12269_v49, %v19680_v7  ;;  %v12284_v63 = vrot.slane %v12270_v47, %v19680_v7  ;;  %v17573_v1 = vpack.i.bf16 %v4152_v37, %v4136_v52  ;;  %v12213_v37 = vcombine.low %v12157_v50, %v12189_v19 }
0x1595   :  { %v21974_v40 = vpop.trf.xlu0  ;;  %v12293_v43 = vrot.slane %v12285_v25, %v20089_v51  ;;  %v12309_v25 = vrot.slane %v12301_v35, %v20089_v51  ;;  %v12316_v35 = vrot.slane %v12302_v28, %v20089_v51  ;;  %v23249_v28 = vcombine.low %v21927_v34, %v21918_v18 }
0x1596   :  { %v21976_v30 = vpop.trf.xlu1  ;;  %v12317_v16 = vcombine.low %v12261_v58, %v12277_v5  ;;  %v12318_v10 = vcombine.high %v12261_v58, %v12277_v5  ;;  %v12333_v46 = vcombine.low %v12268_v9, %v12284_v63  ;;  %v12334_v44 = vcombine.high %v12268_v9, %v12284_v63  ;;  %v4138_v63 = vld [vmem:[#allocation17 + $0x228] sm:$0xff] }
0x1597   :  { %v12214_v58 = vcombine.high %v12157_v50, %v12189_v19 }
0x1598   :  { %17572 = vxpose.xlu1.b32.cont [3/16] %v17571_v45, 128  ;;  %v12325_v49 = vrot.slane %v12317_v16, %v20089_v51  ;;  %v12332_v47 = vrot.slane %v12318_v10, %v20089_v51  ;;  %v17575_v45 = vpack.i.bf16 %v4153_v41, %v4137_v15  ;;  %v12341_v9 = vrot.slane %v12333_v46, %v20089_v51  ;;  %v4154_v16 = vld [vmem:[#allocation17 + $0x2a8] sm:$0xff] }
0x1599   :  { %v21983_v24 = vpop.trf.xlu0  ;;  %v12348_v13 = vrot.slane %v12334_v44, %v20089_v51  ;;  %v23247_v46 = vcombine.low %v21915_v32, %v21911_v57  ;;  %v23248_v41 = vcombine.high %v21915_v32, %v21911_v57  ;;  %v17577_v44 = vpack.i.bf16 %v4154_v16, %v4138_v63 }
0x159a   :  { %v21985_v52 = vpop.trf.xlu1  ;;  %v12349_v5 = vcombine.low %v12293_v43, %v12325_v49  ;;  %v12350_v2 = vcombine.high %v12293_v43, %v12325_v49  ;;  %v12351_v14 = vcombine.low %v12300_v48, %v12332_v47  ;;  %v12352_v10 = vcombine.high %v12300_v48, %v12332_v47  ;;  %v4139_v49 = vld [vmem:[#allocation17 + $0x230] sm:$0xff]  ;;  %v4166_v48 = vld [vmem:[#allocation17 + $0x308] sm:$0xff] }
0x159b   :  { %v4155_v47 = vld [vmem:[#allocation17 + $0x2b0] sm:$0xff]  ;;  %v17679_v43 = vpack.i.bf16 %v4181_v59, %v4165_v31  ;;  %v23251_v31 = vcombine.high %v21927_v34, %v21918_v18  ;;  %v12355_v63 = vcombine.low %v12316_v35, %v12348_v13  ;;  %v12356_v59 = vcombine.high %v12316_v35, %v12348_v13 }
0x159c   :  { %17574 = vxpose.xlu1.b32.cont [4/16] %v17573_v1, 128  ;;  %v16923_v19 = vpack.c.bf16 %v12349_v5, %v12213_v37  ;;  %v16955_v1 = vpack.c.bf16 %v12350_v2, %v12214_v58  ;;  %v21997_v15 = vpack.c.bf16 %v12351_v14, %v23247_v46  ;;  %v22002_v50 = vpack.c.bf16 %v12352_v10, %v23248_v41  ;;  %v4182_v37 = vld [vmem:[#allocation17 + $0x388] sm:$0xff]  ;;  %v4167_v46 = vld [vmem:[#allocation17 + $0x310] sm:$0xff] }
0x159d   :  { %v21990_v17 = vpop.trf.xlu0  ;;  %v12353_v58 = vcombine.low %v12309_v25, %v12341_v9  ;;  %v12354_v5 = vcombine.high %v12309_v25, %v12341_v9  ;;  %v12390_v14 = vcombine.high %v21976_v30, %v21985_v52  ;;  %17680 = vxpose.xlu0.b32.start [1/16] %v17679_v43, 128  ;;  %v17681_v32 = vpack.i.bf16 %v4182_v37, %v4166_v48  ;;  %v4140_v25 = vld [vmem:[#allocation17 + $0x238] sm:$0xff]  ;;  %v4183_v41 = vld [vmem:[#allocation17 + $0x390] sm:$0xff]  ;;  %v4185_v37 = vld [vmem:[#allocation17 + $0x3a0] sm:$0xff] }
0x159e   :  { %v21992_v3 = vpop.trf.xlu1  ;;  %16924 = vmatprep.subr.bf16.mxu1 %v16923_v19  ;;  %16956 = vmatprep.subr.bf16.mxu0 %v16955_v1  ;;  %v17579_v10 = vpack.i.bf16 %v4155_v47, %v4139_v49  ;;  %v23253_v18 = vcombine.low %v21933_v36, %v21921_v21  ;;  %v23255_v13 = vcombine.high %v21933_v36, %v21921_v21 }
0x159f   :  { %16926 = vmatpush3.bf16.msra.mxu1 %v16923_v19  ;;  %16958 = vmatpush3.bf16.msra.mxu0 %v16955_v1  ;;  %v22015_v2 = vpack.c.bf16 %v12354_v5, %v23251_v31  ;;  %v4156_v1 = vld [vmem:[#allocation17 + $0x2b8] sm:$0xff]  ;;  %v22028_v43 = vrot.slane %v12390_v14, %v19680_v7  ;;  %v17683_v49 = vpack.i.bf16 %v4183_v41, %v4167_v46  ;;  %v4141_v14 = vld [vmem:[#allocation17 + $0x240] sm:$0xff]  ;;  %v4142_v41 = vld [vmem:[#allocation17 + $0x248] sm:$0xff] }
0x15a0   :  { %17576 = vxpose.xlu1.b32.cont [5/16] %v17575_v45, 128  ;;  %v22010_v45 = vpack.c.bf16 %v12353_v58, %v23249_v28  ;;  %v22025_v34 = vpack.c.bf16 %v12355_v63, %v23253_v18  ;;  %v22036_v35 = vpack.c.bf16 %v12356_v59, %v23255_v13  ;;  %v17581_v5 = vpack.i.bf16 %v4156_v1, %v4140_v25  ;;  %v4157_v28 = vld [vmem:[#allocation17 + $0x2c0] sm:$0xff]  ;;  %v4168_v31 = vld [vmem:[#allocation17 + $0x318] sm:$0xff]  ;;  %v4158_v1 = vld [vmem:[#allocation17 + $0x2c8] sm:$0xff] }
0x15a1   :  { %23252 = vst [vmem:[#allocation88_spill] sm:$0xff] %v22015_v2  ;;  %17682 = vxpose.xlu0.b32.cont [2/16] %v17681_v32, 128  ;;  %v4184_v63 = vld [vmem:[#allocation17 + $0x398] sm:$0xff]  ;;  %v17583_v46 = vpack.i.bf16 %v4157_v28, %v4141_v14  ;;  %v12373_v18 = vcombine.low %v21974_v40, %v21983_v24  ;;  %v4169_v13 = vld [vmem:[#allocation17 + $0x320] sm:$0xff] }
0x15a2   :  { %v9941_v57 = vpop.trf.xlu0  ;;  %23250 = vst [vmem:[#allocation87_spill] sm:$0xff] %v22010_v45  ;;  %23254 = vst [vmem:[#allocation76_spill] sm:$0xff] %v22025_v34  ;;  %v17685_v32 = vpack.i.bf16 %v4184_v63, %v4168_v31  ;;  %v17585_v63 = vpack.i.bf16 %v4158_v1, %v4142_v41  ;;  %v4172_v2 = vld [vmem:[#allocation17 + $0x338] sm:$0xff] }
0x15a3   :  { %v12406_v9 = vcombine.high %v21990_v17, %v9941_v57  ;;  %v22018_v16 = vpop.trf.xlu1  ;;  %23256 = vst [vmem:[#allocation89_spill] sm:$0xff] %v22036_v35  ;;  %v12405_v21 = vcombine.low %v21990_v17, %v9941_v57 }
0x15a4   :  { %17578 = vxpose.xlu1.b32.cont [6/16] %v17577_v44, 128  ;;  %v12494_v19 = vcombine.high %v21992_v3, %v22018_v16 }
0x15a5   :  { %v22031_v48 = vrot.slane %v12406_v9, %v19680_v7  ;;  %17684 = vxpose.xlu0.b32.cont [3/16] %v17683_v49, 128  ;;  %v22059_v14 = vrot.slane %v12405_v21, %v19680_v7  ;;  %v12374_v21 = vcombine.high %v21974_v40, %v21983_v24 }
0x15a6   :  { %v10005_v44 = vpop.trf.xlu0  ;;  %v22051_v17 = vrot.slane %v12494_v19, %v19680_v7  ;;  %v4144_v19 = vld [vmem:[#allocation17 + $0x258] sm:$0xff] }
0x15a7   :  { %v22042_v58 = vpop.trf.xlu1 }
0x15a8   :  { %17580 = vxpose.xlu1.b32.cont [7/16] %v17579_v10, 128  ;;  %v12389_v10 = vcombine.low %v21976_v30, %v21985_v52  ;;  %v17687_v30 = vpack.i.bf16 %v4185_v37, %v4169_v13  ;;  %v12493_v52 = vcombine.low %v21992_v3, %v22018_v16  ;;  %v4159_v16 = vld [vmem:[#allocation17 + $0x2d0] sm:$0xff]  ;;  %v4186_v13 = vld [vmem:[#allocation17 + $0x3a8] sm:$0xff] }
0x15a9   :  { %17686 = vxpose.xlu0.b32.cont [4/16] %v17685_v32, 128  ;;  %v22072_v32 = vrot.slane %v12373_v18, %v19680_v7 }
0x15aa   :  { %v22075_v37 = vrot.slane %v12389_v10, %v19680_v7 }
0x15ab   :  { %v10069_v36 = vpop.trf.xlu0 }
0x15ac   :  { %v12510_v9 = vcombine.high %v10005_v44, %v10069_v36  ;;  %v10165_v59 = vpop.trf.xlu1  ;;  %17582 = vxpose.xlu1.b32.cont [8/16] %v17581_v5, 128  ;;  %v12509_v57 = vcombine.low %v10005_v44, %v10069_v36  ;;  %v12357_v5 = vcombine.low %v21947_v27, %v21965_v62  ;;  %v4143_v36 = vld [vmem:[#allocation17 + $0x250] sm:$0xff]  ;;  %v12453_v40 = vcombine.low %v22075_v37, %v22059_v14 }
0x15ad   :  { %v12526_v25 = vcombine.high %v22042_v58, %v10165_v59  ;;  %v12525_v3 = vcombine.low %v22042_v58, %v10165_v59  ;;  %17688 = vxpose.xlu0.b32.cont [5/16] %v17687_v30, 128  ;;  %v22089_v58 = vrot.slane %v12493_v52, %v19680_v7  ;;  %v4160_v52 = vld [vmem:[#allocation17 + $0x2d8] sm:$0xff] }
0x15ae   :  { %v22054_v49 = vrot.slane %v12510_v9, %v19680_v7  ;;  %v4170_v9 = vld [vmem:[#allocation17 + $0x328] sm:$0xff]  ;;  %v22079_v44 = vrot.slane %v12509_v57, %v19680_v7  ;;  %v22084_v41 = vrot.slane %v12357_v5, %v19680_v7  ;;  %v17587_v57 = vpack.i.bf16 %v4159_v16, %v4143_v36 }
0x15af   :  { %v10133_v28 = vpop.trf.xlu0  ;;  %v17689_v18 = vpack.i.bf16 %v4186_v13, %v4170_v9  ;;  %v22099_v5 = vrot.slane %v12525_v3, %v19680_v7  ;;  %v4171_v9 = vld [vmem:[#allocation17 + $0x330] sm:$0xff]  ;;  %v12540_v36 = vrot.slane %v12526_v25, %v19680_v7  ;;  %v12461_v3 = vrot.slane %v12453_v40, %v20089_v51  ;;  %v4188_v40 = vld [vmem:[#allocation17 + $0x3b8] sm:$0xff] }
0x15b0   :  { %v22067_v31 = vpop.trf.xlu1  ;;  %17584 = vxpose.xlu1.b32.cont [9/16] %v17583_v46, 128  ;;  %v12358_v46 = vcombine.high %v21947_v27, %v21965_v62  ;;  %v22094_v27 = vrot.slane %v12374_v21, %v19680_v7  ;;  %v12421_v62 = vcombine.low %v22084_v41, %v22072_v32 }
0x15b1   :  { %17690 = vxpose.xlu0.b32.cont [6/16] %v17689_v18, 128 }
0x15b2   :  { %v22111_v13 = vrot.slane %v12358_v46, %v19680_v7  ;;  %v12429_v46 = vrot.slane %v12421_v62, %v20089_v51 }
0x15b3   :  { %v10197_v24 = vpop.trf.xlu0 }
0x15b4   :  { %v12541_v59 = vcombine.low %v10133_v28, %v10197_v24  ;;  %v12542_v10 = vcombine.high %v10133_v28, %v10197_v24  ;;  %v22091_v1 = vpop.trf.xlu1  ;;  %17586 = vxpose.xlu1.b32.cont [10/16] %v17585_v63, 128  ;;  %v4187_v28 = vld [vmem:[#allocation17 + $0x3b0] sm:$0xff]  ;;  %v12557_v63 = vcombine.low %v22089_v58, %v22079_v44  ;;  %v12486_v54 = vcombine.high %v12429_v46, %v12461_v3 }
0x15b5   :  { %v12630_v30 = vcombine.high %v22067_v31, %v22091_v1  ;;  %v17691_v47 = vpack.i.bf16 %v4187_v28, %v4171_v9  ;;  %v23257_v9 = vcombine.low %v22028_v43, %v22031_v48  ;;  %v12438_v26 = vcombine.high %v22111_v13, %v22094_v27 }
0x15b6   :  { %v22107_v21 = vrot.slane %v12541_v59, %v19680_v7  ;;  %v12556_v16 = vrot.slane %v12542_v10, %v19680_v7  ;;  %v17589_v59 = vpack.i.bf16 %v4160_v52, %v4144_v19  ;;  %v12437_v10 = vcombine.low %v22111_v13, %v22094_v27 }
0x15b7   :  { %v22114_v24 = vpop.trf.xlu0  ;;  %v12565_v45 = vrot.slane %v12557_v63, %v20089_v51  ;;  %v12477_v28 = vrot.slane %v23257_v9, %v20089_v51  ;;  %17692 = vxpose.xlu0.b32.cont [7/16] %v17691_v47, 128  ;;  %v17693_v19 = vpack.i.bf16 %v4188_v40, %v4172_v2  ;;  %v22142_v40 = vrot.slane %v12630_v30, %v19680_v7 }
0x15b8   :  { %v12589_v35 = vcombine.low %v22099_v5, %v22107_v21  ;;  %v12605_v34 = vcombine.low %v12540_v36, %v12556_v16  ;;  %v12606_v61 = vcombine.high %v12540_v36, %v12556_v16  ;;  %v22118_v25 = vpop.trf.xlu1  ;;  %17588 = vxpose.xlu1.b32.cont [11/16] %v17587_v57, 128  ;;  %v12485_v57 = vcombine.low %v12429_v46, %v12461_v3  ;;  %v4189_v46 = vld [vmem:[#allocation17 + $0x3c0] sm:$0xff] }
0x15b9   :  { %v12445_v2 = vrot.slane %v12437_v10, %v20089_v51  ;;  %v23258_v27 = vcombine.high %v22028_v43, %v22031_v48  ;;  %v23259_v13 = vcombine.low %v22051_v17, %v22054_v49  ;;  %v12452_v43 = vrot.slane %v12438_v26, %v20089_v51  ;;  %v4175_v26 = vld [vmem:[#allocation17 + $0x350] sm:$0xff] }
0x15ba   :  { %v12597_v18 = vrot.slane %v12589_v35, %v20089_v51  ;;  %v4145_v35 = vld [vmem:[#allocation17 + $0x260] sm:$0xff]  ;;  %v12613_v9 = vrot.slane %v12605_v34, %v20089_v51 }
0x15bb   :  { %v22129_v36 = vpop.trf.xlu0  ;;  %v12484_v34 = vrot.slane %v23258_v27, %v20089_v51  ;;  %v12581_v10 = vrot.slane %v23259_v13, %v20089_v51  ;;  %v17591_v30 = vpack.i.bf16 %v4161_v56, %v4145_v35  ;;  %v12489_v38 = vcombine.low %v12445_v2, %v12477_v28  ;;  %17694 = vxpose.xlu0.b32.cont [8/16] %v17693_v19, 128  ;;  %v4174_v27 = vld [vmem:[#allocation17 + $0x348] sm:$0xff] }
0x15bc   :  { %v12646_v52 = vcombine.high %v22114_v24, %v22129_v36  ;;  %v22133_v62 = vpop.trf.xlu1  ;;  %v12621_v16 = vcombine.low %v12565_v45, %v12597_v18  ;;  %v12622_v63 = vcombine.high %v12565_v45, %v12597_v18  ;;  %17590 = vxpose.xlu1.b32.cont [12/16] %v17589_v59, 128  ;;  %v4173_v59 = vld [vmem:[#allocation17 + $0x340] sm:$0xff]  ;;  %v4190_v13 = vld [vmem:[#allocation17 + $0x3c8] sm:$0xff] }
0x15bd   :  { %v12662_v47 = vcombine.high %v22118_v25, %v22133_v62  ;;  %v12626_v56 = vcombine.high %v12581_v10, %v12613_v9  ;;  %v17695_v35 = vpack.i.bf16 %v4189_v46, %v4173_v59  ;;  %v4147_v59 = vld [vmem:[#allocation17 + $0x270] sm:$0xff] }
0x15be   :  { %v22145_v33 = vrot.slane %v12646_v52, %v19680_v7  ;;  %v16927_v45 = vpack.c.bf16 %v12621_v16, %v12485_v57  ;;  %v16959_v3 = vpack.c.bf16 %v12622_v63, %v12486_v54  ;;  %v4162_v52 = vld [vmem:[#allocation17 + $0x2e8] sm:$0xff]  ;;  %v12620_v54 = vrot.slane %v12606_v61, %v20089_v51  ;;  %v4163_v46 = vld [vmem:[#allocation17 + $0x2f0] sm:$0xff] }
0x15bf   :  { %v22155_v18 = vpop.trf.xlu0  ;;  %v12490_v16 = vcombine.high %v12445_v2, %v12477_v28  ;;  %v12625_v63 = vcombine.low %v12581_v10, %v12613_v9  ;;  %v23260_v61 = vcombine.high %v22051_v17, %v22054_v49  ;;  %v17593_v22 = vpack.i.bf16 %v4162_v52, %v4146_v12  ;;  %17696 = vxpose.xlu0.b32.cont [9/16] %v17695_v35, 128  ;;  %v4191_v10 = vld [vmem:[#allocation17 + $0x3d0] sm:$0xff]  ;;  %v4148_v35 = vld [vmem:[#allocation17 + $0x278] sm:$0xff] }
0x15c0   :  { %v12709_v57 = vcombine.low %v22142_v40, %v22145_v33  ;;  %v22162_v48 = vpop.trf.xlu1  ;;  %16928 = vmatprep.subr.bf16.mxu1 %v16927_v45  ;;  %16960 = vmatprep.subr.bf16.mxu0 %v16959_v3  ;;  %v17697_v9 = vpack.i.bf16 %v4190_v13, %v4174_v27  ;;  %v12491_v17 = vcombine.low %v12452_v43, %v12484_v34  ;;  %v4164_v27 = vld [vmem:[#allocation17 + $0x2f8] sm:$0xff] }
0x15c1   :  { %16930 = vmatpush3.bf16.msra.mxu1 %v16927_v45  ;;  %v12588_v19 = vrot.slane %v23260_v61, %v20089_v51  ;;  %16962 = vmatpush3.bf16.msra.mxu0 %v16959_v3  ;;  %v22169_v20 = vpack.c.bf16 %v12625_v63, %v12489_v38  ;;  %v22171_v28 = vpack.c.bf16 %v12626_v56, %v12490_v16 }
0x15c2   :  { %17592 = vxpose.xlu1.b32.cont [13/16] %v17591_v30, 128  ;;  %v12492_v38 = vcombine.high %v12452_v43, %v12484_v34  ;;  %v12676_v30 = vrot.slane %v12662_v47, %v19680_v7  ;;  %v17595_v56 = vpack.i.bf16 %v4163_v46, %v4147_v59  ;;  %v17699_v13 = vpack.i.bf16 %v4191_v10, %v4175_v26  ;;  %v4176_v47 = vld [vmem:[#allocation17 + $0x358] sm:$0xff] }
0x15c3   :  { %v10453_v55 = vpop.trf.xlu0  ;;  %23261 = vst [vmem:[#allocation90_spill] sm:$0xff] %v22169_v20  ;;  %23262 = vst [vmem:[#allocation91_spill] sm:$0xff] %v22171_v28  ;;  %v12627_v49 = vcombine.low %v12588_v19, %v12620_v54  ;;  %v12628_v3 = vcombine.high %v12588_v19, %v12620_v54  ;;  %17698 = vxpose.xlu0.b32.cont [10/16] %v17697_v9, 128  ;;  %v12645_v34 = vcombine.low %v22114_v24, %v22129_v36  ;;  %v4192_v43 = vld [vmem:[#allocation17 + $0x3d8] sm:$0xff] }
0x15c4   :  { %v12678_v2 = vcombine.high %v22155_v18, %v10453_v55  ;;  %v22174_v45 = vpop.trf.xlu1  ;;  %v17597_v59 = vpack.i.bf16 %v4164_v27, %v4148_v35  ;;  %v12677_v9 = vcombine.low %v22155_v18, %v10453_v55  ;;  %v12629_v24 = vcombine.low %v22067_v31, %v22091_v1 }
0x15c5   :  { %v12766_v12 = vcombine.high %v22162_v48, %v22174_v45  ;;  %v22180_v16 = vpack.c.bf16 %v12627_v49, %v12491_v17  ;;  %v22182_v54 = vpack.c.bf16 %v12628_v3, %v12492_v38  ;;  %v17701_v49 = vpack.i.bf16 %v4192_v43, %v4176_v47 }
0x15c6   :  { %v12692_v52 = vrot.slane %v12678_v2, %v19680_v7  ;;  %17594 = vxpose.xlu1.b32.cont [14/16] %v17593_v22, 128  ;;  %v12661_v2 = vcombine.low %v22118_v25, %v22133_v62  ;;  %v22198_v36 = vrot.slane %v12709_v57, %v20089_v51  ;;  %v22201_v3 = vrot.slane %v12645_v34, %v19680_v7 }
0x15c7   :  { %23263 = vst [vmem:[#allocation77_spill] sm:$0xff] %v22180_v16  ;;  %v10517_v63 = vpop.trf.xlu0  ;;  %23264 = vst [vmem:[#allocation78_spill] sm:$0xff] %v22182_v54  ;;  %17700 = vxpose.xlu0.b32.cont [11/16] %v17699_v13, 128  ;;  %v23265_v55 = vcombine.high %v22142_v40, %v22145_v33  ;;  %v22210_v26 = vrot.slane %v12766_v12, %v19680_v7  ;;  %v22223_v33 = vrot.slane %v12677_v9, %v19680_v7  ;;  %v4177_v13 = vld [vmem:[#allocation17 + $0x360] sm:$0xff]  ;;  %v4180_v16 = vld [vmem:[#allocation17 + $0x378] sm:$0xff] }
0x15c8   :  { %v12741_v61 = vcombine.low %v12676_v30, %v12692_v52  ;;  %v12742_v19 = vcombine.high %v12676_v30, %v12692_v52  ;;  %v10613_v28 = vpop.trf.xlu1  ;;  %v22220_v30 = vrot.slane %v12661_v2, %v19680_v7  ;;  %v12765_v52 = vcombine.low %v22162_v48, %v22174_v45  ;;  %v4178_v2 = vld [vmem:[#allocation17 + $0x368] sm:$0xff] }
0x15c9   :  { %v22207_v18 = vrot.slane %v23265_v55, %v20089_v51  ;;  %v22234_v47 = vrot.slane %v12629_v24, %v19680_v7  ;;  %v4194_v48 = vld [vmem:[#allocation17 + $0x3e8] sm:$0xff] }
0x15ca   :  { %v22189_v22 = vrot.slane %v12741_v61, %v20089_v51  ;;  %v22193_v46 = vrot.slane %v12742_v19, %v20089_v51  ;;  %17596 = vxpose.xlu1.b32.cont [15/16] %v17595_v56, 128  ;;  %v4193_v61 = vld [vmem:[#allocation17 + $0x3e0] sm:$0xff]  ;;  %v12725_v45 = vcombine.low %v22220_v30, %v22223_v33 }
0x15cb   :  { %v10581_v17 = vpop.trf.xlu0  ;;  %17702 = vxpose.xlu0.b32.cont [12/16] %v17701_v49, 128  ;;  %v17703_v9 = vpack.i.bf16 %v4193_v61, %v4177_v13  ;;  %v22246_v49 = vrot.slane %v12765_v52, %v19680_v7  ;;  %v4179_v52 = vld [vmem:[#allocation17 + $0x370] sm:$0xff] }
0x15cc   :  { %v12782_v25 = vcombine.high %v10517_v63, %v10581_v17  ;;  %v10677_v62 = vpop.trf.xlu1  ;;  %v12781_v38 = vcombine.low %v10517_v63, %v10581_v17  ;;  %v12693_v17 = vcombine.low %v22234_v47, %v22201_v3 }
0x15cd   :  { %v12798_v10 = vcombine.high %v10613_v28, %v10677_v62  ;;  %v12797_v35 = vcombine.low %v10613_v28, %v10677_v62 }
0x15ce   :  { %v22213_v31 = vrot.slane %v12782_v25, %v19680_v7  ;;  %17598 = vxpose.xlu1.b32.end [16/16] %v17597_v59, 128  ;;  %v22237_v43 = vrot.slane %v12781_v38, %v19680_v7  ;;  %v17705_v38 = vpack.i.bf16 %v4194_v48, %v4178_v2  ;;  %v12701_v28 = vrot.slane %v12693_v17, %v20089_v51 }
0x15cf   :  { %v10645_v40 = vpop.trf.xlu0  ;;  %v22249_v55 = vrot.slane %v12797_v35, %v19680_v7  ;;  %17704 = vxpose.xlu0.b32.cont [13/16] %v17703_v9, 128 }
0x15d0   :  { %v12845_v63 = vcombine.low %v22210_v26, %v22213_v31  ;;  %v17375_v27 = vpop.trf.xlu1 }
0x15d1   :  { %v17376_v19 = vunpack.i.l.bf16 %v17375_v27  ;;  %v17379_v34 = vunpack.i.h.bf16 %v17375_v27  ;;  %v12829_v27 = vcombine.low %v22246_v49, %v22237_v43 }
0x15d3   :  { %v10709_v59 = vpop.trf.xlu0  ;;  %15259 = vmatprep.mubr.f32.mxu1 %v17376_v19  ;;  %15315 = vmatprep.mubr.f32.mxu0 %v17379_v34  ;;  %v12812_v19 = vrot.slane %v12798_v10, %v19680_v7  ;;  %v4195_v34 = vld [vmem:[#allocation17 + $0x3f0] sm:$0xff] }
0x15d4   :  { %v12813_v24 = vcombine.low %v10645_v40, %v10709_v59  ;;  %v12814_v25 = vcombine.high %v10645_v40, %v10709_v59  ;;  %v17380_v62 = vpop.trf.xlu1  ;;  %v12733_v40 = vrot.slane %v12725_v45, %v20089_v51  ;;  %17706 = vxpose.xlu0.b32.cont [14/16] %v17705_v38, 128  ;;  %v17707_v10 = vpack.i.bf16 %v4195_v34, %v4179_v52 }
0x15d5   :  { %v17384_v20 = vunpack.i.h.bf16 %v17380_v62 }
0x15d6   :  { %v22255_v13 = vrot.slane %v12813_v24, %v19680_v7  ;;  %v12828_v61 = vrot.slane %v12814_v25, %v19680_v7  ;;  %v12837_v24 = vrot.slane %v12829_v27, %v20089_v51  ;;  %v12757_v57 = vcombine.low %v12701_v28, %v12733_v40 }
0x15d7   :  { %v22259_v59 = vpop.trf.xlu0  ;;  %v12758_v7 = vcombine.high %v12701_v28, %v12733_v40  ;;  %v23268_v28 = vcombine.high %v22210_v26, %v22213_v31 }
0x15d8   :  { %23266 = vst [vmem:[#allocation79_spill] sm:$0xff] %v22259_v59  ;;  %v12861_v35 = vcombine.low %v22249_v55, %v22255_v13  ;;  %v12877_v2 = vcombine.low %v12812_v19, %v12828_v61  ;;  %v12878_v48 = vcombine.high %v12812_v19, %v12828_v61  ;;  %v17385_v9 = vpop.trf.xlu1  ;;  %v4196_v19 = vld [vmem:[#allocation17 + $0x3f8] sm:$0xff]  ;;  %v12853_v61 = vrot.slane %v12845_v63, %v20089_v51 }
0x15d9   :  { %17708 = vxpose.xlu0.b32.cont [15/16] %v17707_v10, 128  ;;  %v12860_v63 = vrot.slane %v23268_v28, %v20089_v51 }
0x15da   :  { %v12869_v25 = vrot.slane %v12861_v35, %v20089_v51  ;;  %v12885_v12 = vrot.slane %v12877_v2, %v20089_v51  ;;  %v12892_v27 = vrot.slane %v12878_v48, %v20089_v51  ;;  %v17709_v2 = vpack.i.bf16 %v4196_v19, %v4180_v16 }
0x15db   :  { %v22267_v45 = vpop.trf.xlu0  ;;  %v23269_v16 = vcombine.low %v22198_v36, %v22189_v22 }
0x15dc   :  { %23267 = vst [vmem:[#allocation80_spill] sm:$0xff] %v22267_v45  ;;  %v17390_v1 = vpop.trf.xlu1  ;;  %v12893_v56 = vcombine.low %v12837_v24, %v12869_v25  ;;  %v12894_v54 = vcombine.high %v12837_v24, %v12869_v25  ;;  %v12897_v34 = vcombine.low %v12853_v61, %v12885_v12  ;;  %v12898_v35 = vcombine.high %v12853_v61, %v12885_v12 }
0x15dd   :  { %v17381_v45 = vunpack.i.l.bf16 %v17380_v62  ;;  %v12899_v31 = vcombine.low %v12860_v63, %v12892_v27  ;;  %v12900_v62 = vcombine.high %v12860_v63, %v12892_v27  ;;  %17710 = vxpose.xlu0.b32.end [16/16] %v17709_v2, 128  ;;  %v17391_v48 = vunpack.i.l.bf16 %v17390_v1 }
0x15de   :  { %v16931_v17 = vpack.c.bf16 %v12893_v56, %v12757_v57  ;;  %v16963_v38 = vpack.c.bf16 %v12894_v54, %v12758_v7  ;;  %v17386_v7 = vunpack.i.l.bf16 %v17385_v9  ;;  %v22282_v54 = vpack.c.bf16 %v12897_v34, %v23269_v16 }
0x15df   :  { %v22271_v52 = vpop.trf.xlu0  ;;  %v17389_v57 = vunpack.i.h.bf16 %v17385_v9  ;;  %v23270_v56 = vcombine.high %v22198_v36, %v22189_v22  ;;  %v17394_v10 = vunpack.i.h.bf16 %v17390_v1  ;;  %v23271_v22 = vcombine.low %v22207_v18, %v22193_v46 }
0x15e0   :  { %v17395_v59 = vpop.trf.xlu1  ;;  %16932 = vmatprep.subr.bf16.mxu1 %v16931_v17  ;;  %16964 = vmatprep.subr.bf16.mxu0 %v16963_v38  ;;  %v23272_v9 = vcombine.high %v22207_v18, %v22193_v46  ;;  %v12454_v46 = vcombine.high %v22075_v37, %v22059_v14  ;;  %v12422_v18 = vcombine.high %v22084_v41, %v22072_v32 }
0x15e1   :  { %16934 = vmatpush3.bf16.msra.mxu1 %v16931_v17  ;;  %16966 = vmatpush3.bf16.msra.mxu0 %v16963_v38  ;;  %v22289_v26 = vpack.c.bf16 %v12898_v35, %v23270_v56  ;;  %v22298_v36 = vpack.c.bf16 %v12899_v31, %v23271_v22  ;;  %v12726_v27 = vcombine.high %v22220_v30, %v22223_v33 }
0x15e2   :  { %16968 = vmatprep.subr.bf16.mxu1 %v21044_v6  ;;  %17000 = vmatprep.subr.bf16.mxu0 %v21049_v42  ;;  %v22303_v24 = vpack.c.bf16 %v12900_v62, %v23272_v9  ;;  %v12468_v41 = vrot.slane %v12454_v46, %v20089_v51  ;;  %v12830_v34 = vcombine.high %v22246_v49, %v22237_v43 }
0x15e3   :  { %v22284_v12 = vpop.trf.xlu0  ;;  %v12740_v28 = vrot.slane %v12726_v27, %v20089_v51 }
0x15e4   :  { %v17400_v40 = vpop.trf.xlu1  ;;  %15260 = vmatmul.mubr.f32.vlgmr.msra.gmra.mrb[32].mxu1 %v17381_v45  ;;  %15316 = vmatmul.mubr.f32.vlgmr.msra.gmra.mrb[48].mxu0 %v17384_v20  ;;  %v17396_v20 = vunpack.i.l.bf16 %v17395_v59 }
0x15e5   :  { %16970 = vmatpush3.bf16.msra.mxu1 %v21044_v6  ;;  %17002 = vmatpush3.bf16.msra.mxu0 %v21049_v42  ;;  %v17399_v6 = vunpack.i.h.bf16 %v17395_v59  ;;  %v17401_v25 = vunpack.i.l.bf16 %v17400_v40  ;;  %v17404_v45 = vunpack.i.h.bf16 %v17400_v40  ;;  %v12590_v59 = vcombine.high %v22099_v5, %v22107_v21 }
0x15e6   :  { %16972 = vmatprep.subr.bf16.mxu1 %v21251_v23  ;;  %17004 = vmatprep.subr.bf16.mxu0 %v21265_v11 }
0x15e7   :  { %15262 = vmatprep.mubr.f32.mxu1 %v17386_v7  ;;  %15318 = vmatprep.mubr.f32.mxu0 %v17389_v57  ;;  %v22305_v1 = vpop.trf.xlu0  ;;  %v12604_v5 = vrot.slane %v12590_v59, %v20089_v51 }
0x15e8   :  { %v17405_v42 = vpop.trf.xlu1  ;;  %15263 = vmatmul.mubr.f32.gmra.mrb[34].mxu1 %v17391_v48  ;;  %15319 = vmatmul.mubr.f32.gmra.mrb[50].mxu0 %v17394_v10 }
0x15e9   :  { %16974 = vmatpush3.bf16.msra.mxu1 %v21251_v23  ;;  %17006 = vmatpush3.bf16.msra.mxu0 %v21265_v11  ;;  %v17406_v19 = vunpack.i.l.bf16 %v17405_v42  ;;  %v17409_v61 = vunpack.i.h.bf16 %v17405_v42  ;;  %v12558_v11 = vcombine.high %v22089_v58, %v22079_v44  ;;  %v12436_v44 = vrot.slane %v12422_v18, %v20089_v51 }
0x15ea   :  { %16976 = vmatprep.subr.bf16.mxu1 %v21506_v60  ;;  %17008 = vmatprep.subr.bf16.mxu0 %v21518_v53 }
0x15eb   :  { %15265 = vmatprep.mubr.f32.mxu1 %v17396_v20  ;;  %15321 = vmatprep.mubr.f32.mxu0 %v17399_v6  ;;  %v22317_v23 = vpop.trf.xlu0  ;;  %v12488_v33 = vcombine.high %v12436_v44, %v12468_v41 }
0x15ec   :  { %v17410_v14 = vpop.trf.xlu1  ;;  %15266 = vmatmul.mubr.f32.gmra.mrb[36].mxu1 %v17401_v25  ;;  %15322 = vmatmul.mubr.f32.gmra.mrb[52].mxu0 %v17404_v45  ;;  %v23273_v45 = vld [vmem:[#allocation83_spill] sm:$0xff] }
0x15ed   :  { %16978 = vmatpush3.bf16.msra.mxu1 %v21506_v60  ;;  %17010 = vmatpush3.bf16.msra.mxu0 %v21518_v53  ;;  %v17411_v32 = vunpack.i.l.bf16 %v17410_v14  ;;  %v17414_v37 = vunpack.i.h.bf16 %v17410_v14  ;;  %v12572_v60 = vrot.slane %v12558_v11, %v20089_v51  ;;  %v12862_v53 = vcombine.high %v22249_v55, %v22255_v13 }
0x15ee   :  { %16980 = vmatprep.subr.bf16.mxu1 %v21693_v4  ;;  %17012 = vmatprep.subr.bf16.mxu0 %v21703_v0  ;;  %v12487_v55 = vcombine.low %v12436_v44, %v12468_v41  ;;  %v12694_v13 = vcombine.high %v22234_v47, %v22201_v3  ;;  %v12844_v3 = vrot.slane %v12830_v34, %v20089_v51 }
0x15ef   :  { %15268 = vmatprep.mubr.f32.mxu1 %v17406_v19  ;;  %15324 = vmatprep.mubr.f32.mxu0 %v17409_v61  ;;  %v22328_v58 = vpop.trf.xlu0  ;;  %v12623_v35 = vcombine.low %v12572_v60, %v12604_v5  ;;  %v12876_v2 = vrot.slane %v12862_v53, %v20089_v51 }
0x15f0   :  { %v17415_v21 = vpop.trf.xlu1  ;;  %15269 = vmatmul.mubr.f32.gmra.mrb[38].mxu1 %v17411_v32  ;;  %15325 = vmatmul.mubr.f32.gmra.mrb[54].mxu0 %v17414_v37  ;;  %v12708_v47 = vrot.slane %v12694_v13, %v20089_v51  ;;  %v17501_v13 = vunpack.i.h.bf16 %v22271_v52 }
0x15f1   :  { %16982 = vmatpush3.bf16.msra.mxu1 %v21693_v4  ;;  %17014 = vmatpush3.bf16.msra.mxu0 %v21703_v0  ;;  %v17416_v17 = vunpack.i.l.bf16 %v17415_v21  ;;  %v17419_v38 = vunpack.i.h.bf16 %v17415_v21  ;;  %v12624_v4 = vcombine.high %v12572_v60, %v12604_v5  ;;  %v16991_v63 = vpack.c.bf16 %v12623_v35, %v12487_v55  ;;  %v23274_v5 = vld [vmem:[#allocation79_spill] sm:$0xff] }
0x15f2   :  { %16984 = vmatprep.subr.bf16.mxu1 %v21859_v29  ;;  %17016 = vmatprep.subr.bf16.mxu0 %v21864_v39  ;;  %v12896_v57 = vcombine.high %v12844_v3, %v12876_v2  ;;  %v12759_v62 = vcombine.low %v12708_v47, %v12740_v28  ;;  %v12760_v40 = vcombine.high %v12708_v47, %v12740_v28  ;;  %v17488_v44 = vunpack.i.l.bf16 %v23274_v5  ;;  %v23279_v47 = vld [vmem:[#allocation67_spill] sm:$0xff] }
0x15f3   :  { %15271 = vmatprep.mubr.f32.mxu1 %v17416_v17  ;;  %15327 = vmatprep.mubr.f32.mxu0 %v17419_v38  ;;  %v22343_v0 = vpop.trf.xlu0  ;;  %v17023_v7 = vpack.c.bf16 %v12624_v4, %v12488_v33  ;;  %v17491_v60 = vunpack.i.h.bf16 %v23274_v5  ;;  %v23275_v17 = vld [vmem:[#allocation80_spill] sm:$0xff]  ;;  %v17498_v55 = vunpack.i.l.bf16 %v22271_v52  ;;  %v17503_v35 = vunpack.i.l.bf16 %v22284_v12  ;;  %v23276_v33 = vld [vmem:[#allocation41_spill] sm:$0xff] }
0x15f4   :  { %v17420_v30 = vpop.trf.xlu1  ;;  %v17027_v9 = vpack.c.bf16 %v12896_v57, %v12760_v40  ;;  %v17496_v38 = vunpack.i.h.bf16 %v23275_v17  ;;  %v17493_v27 = vunpack.i.l.bf16 %v23275_v17  ;;  %v17506_v4 = vunpack.i.h.bf16 %v22284_v12  ;;  %v23281_v57 = vld [vmem:[#allocation69_spill] sm:$0xff]  ;;  %v23282_v40 = vld [vmem:[#allocation44_spill] sm:$0xff] }
0x15f5   :  { %16986 = vmatpush3.bf16.msra.mxu1 %v21859_v29  ;;  %17018 = vmatpush3.bf16.msra.mxu0 %v21864_v39  ;;  %v17421_v43 = vunpack.i.l.bf16 %v17420_v30  ;;  %v17424_v49 = vunpack.i.h.bf16 %v17420_v30  ;;  %v12895_v39 = vcombine.low %v12844_v3, %v12876_v2  ;;  %v17508_v52 = vunpack.i.l.bf16 %v22305_v1 }
0x15f6   :  { %16988 = vmatprep.subr.bf16.mxu1 %v21997_v15  ;;  %17020 = vmatprep.subr.bf16.mxu0 %v22002_v50  ;;  %v17513_v12 = vunpack.i.l.bf16 %v22317_v23  ;;  %v17516_v28 = vunpack.i.h.bf16 %v22317_v23  ;;  %v17523_v23 = vunpack.i.l.bf16 %v22343_v0 }
0x15f7   :  { %15272 = vmatmul.mubr.f32.gmra.mrb[40].mxu1 %v17421_v43  ;;  %15328 = vmatmul.mubr.f32.gmra.mrb[56].mxu0 %v17424_v49  ;;  %v22353_v16 = vpop.trf.xlu0  ;;  %v16995_v22 = vpack.c.bf16 %v12895_v39, %v12759_v62  ;;  %v23277_v43 = vld [vmem:[#allocation75_spill] sm:$0xff]  ;;  %v17511_v49 = vunpack.i.h.bf16 %v22305_v1  ;;  %v17518_v1 = vunpack.i.l.bf16 %v22328_v58  ;;  %v23280_v39 = vld [vmem:[#allocation68_spill] sm:$0xff] }
0x15f8   :  { %v17425_v29 = vpop.trf.xlu1 }
0x15f9   :  { %16990 = vmatpush3.bf16.msra.mxu1 %v21997_v15  ;;  %17022 = vmatpush3.bf16.msra.mxu0 %v22002_v50  ;;  %v17426_v56 = vunpack.i.l.bf16 %v17425_v29  ;;  %v17429_v31 = vunpack.i.h.bf16 %v17425_v29 }
0x15fa   :  { %16992 = vmatprep.subr.bf16.mxu1 %v16991_v63  ;;  %17024 = vmatprep.subr.bf16.mxu0 %v17023_v7 }
0x15fb   :  { %15274 = vmatprep.mubr.f32.mxu1 %v17426_v56  ;;  %15330 = vmatprep.mubr.f32.mxu0 %v17429_v31  ;;  %v22357_v48 = vpop.trf.xlu0  ;;  %v17531_v56 = vunpack.i.h.bf16 %v22353_v16 }
0x15fc   :  { %v17430_v10 = vpop.trf.xlu1  ;;  %v17536_v31 = vunpack.i.h.bf16 %v22357_v48 }
0x15fd   :  { %16994 = vmatpush3.bf16.msra.mxu1 %v16991_v63  ;;  %17026 = vmatpush3.bf16.msra.mxu0 %v17023_v7  ;;  %v17431_v20 = vunpack.i.l.bf16 %v17430_v10  ;;  %v17434_v6 = vunpack.i.h.bf16 %v17430_v10  ;;  %v17521_v63 = vunpack.i.h.bf16 %v22328_v58  ;;  %v17526_v7 = vunpack.i.h.bf16 %v22343_v0  ;;  %v23283_v10 = vld [vmem:[#allocation70_spill] sm:$0xff] }
0x15fe   :  { %16996 = vmatprep.subr.bf16.mxu1 %v16995_v22  ;;  %17028 = vmatprep.subr.bf16.mxu0 %v17027_v9  ;;  %v17528_v58 = vunpack.i.l.bf16 %v22353_v16  ;;  %v17533_v0 = vunpack.i.l.bf16 %v22357_v48 }
0x15ff   :  { %15275 = vmatmul.mubr.f32.gmra.mrb[42].mxu1 %v17431_v20  ;;  %15331 = vmatmul.mubr.f32.gmra.mrb[58].mxu0 %v17434_v6  ;;  %v22359_v15 = vpop.trf.xlu0  ;;  %v23284_v6 = vld [vmem:[#allocation87_spill] sm:$0xff] }
0x1600   :  { %v17435_v50 = vpop.trf.xlu1  ;;  %v17538_v16 = vunpack.i.l.bf16 %v22359_v15 }
0x1601   :  { %16998 = vmatpush3.bf16.msra.mxu1 %v16995_v22  ;;  %17030 = vmatpush3.bf16.msra.mxu0 %v17027_v9  ;;  %v17436_v42 = vunpack.i.l.bf16 %v17435_v50  ;;  %v17439_v25 = vunpack.i.h.bf16 %v17435_v50  ;;  %v17541_v22 = vunpack.i.h.bf16 %v22359_v15  ;;  %v23285_v50 = vld [vmem:[#allocation88_spill] sm:$0xff] }
0x1602   :  { %17032 = vmatprep.subr.bf16.mxu1 %v21066_v8  ;;  %17064 = vmatprep.subr.bf16.mxu0 %v23273_v45 }
0x1603   :  { %15277 = vmatprep.mubr.f32.mxu1 %v17436_v42  ;;  %15333 = vmatprep.mubr.f32.mxu0 %v17439_v25  ;;  %v22363_v46 = vpop.trf.xlu0 }
0x1604   :  { %v17440_v18 = vpop.trf.xlu1  ;;  %v17543_v48 = vunpack.i.l.bf16 %v22363_v46  ;;  %v17546_v9 = vunpack.i.h.bf16 %v22363_v46 }
0x1605   :  { %v17441_v59 = vunpack.i.l.bf16 %v17440_v18  ;;  %v17444_v19 = vunpack.i.h.bf16 %v17440_v18 }
0x1607   :  { %15278 = vmatmul.mubr.f32.gmra.mrb[44].mxu1 %v17441_v59  ;;  %15334 = vmatmul.mubr.f32.gmra.mrb[60].mxu0 %v17444_v19  ;;  %v22365_v61 = vpop.trf.xlu0  ;;  %v23286_v59 = vld [vmem:[#allocation90_spill] sm:$0xff]  ;;  %v23287_v19 = vld [vmem:[#allocation91_spill] sm:$0xff] }
0x1608   :  { %v17445_v11 = vpop.trf.xlu1  ;;  %v17548_v15 = vunpack.i.l.bf16 %v22365_v61  ;;  %v17551_v42 = vunpack.i.h.bf16 %v22365_v61 }
0x1609   :  { %v17446_v14 = vunpack.i.l.bf16 %v17445_v11  ;;  %v17449_v32 = vunpack.i.h.bf16 %v17445_v11 }
0x160b   :  { %15280 = vmatprep.mubr.f32.mxu1 %v17446_v14  ;;  %15336 = vmatprep.mubr.f32.mxu0 %v17449_v32  ;;  %v22367_v37 = vpop.trf.xlu0 }
0x160c   :  { %v17450_v41 = vpop.trf.xlu1  ;;  %v17553_v25 = vunpack.i.l.bf16 %v22367_v37 }
0x160d   :  { %v17451_v53 = vunpack.i.l.bf16 %v17450_v41  ;;  %v17454_v21 = vunpack.i.h.bf16 %v17450_v41 }
0x160f   :  { %15281 = vmatmul.mubr.f32.gmra.mrb[46].mxu1 %v17451_v53  ;;  %15337 = vmatmul.mubr.f32.gmra.mrb[62].mxu0 %v17454_v21  ;;  %v22373_v34 = vpop.trf.xlu0 }
0x1610   :  { %15371 = vmatprep.mubr.f32.mxu1 %v17488_v44  ;;  %15427 = vmatprep.mubr.f32.mxu0 %v17491_v60  ;;  %v17558_v61 = vunpack.i.l.bf16 %v22373_v34  ;;  %v17561_v11 = vunpack.i.h.bf16 %v22373_v34 }
0x1612   :  { %v22381_v30 = vpop.trf.xlu1 }
0x1613   :  { %15372 = vmatmul.mubr.f32.vlgmr.msra.gmra.mrb[48].mxu1 %v17493_v27  ;;  %15428 = vmatmul.mubr.f32.vlgmr.msra.gmra.mrb[64].mxu0 %v17496_v38  ;;  %v22379_v2 = vpop.trf.xlu0  ;;  %v17600_v5 = vunpack.i.l.bf16 %v22381_v30  ;;  %v17603_v44 = vunpack.i.h.bf16 %v22381_v30  ;;  %v23288_v38 = vld [vmem:[#allocation40_spill] sm:$0xff]  ;;  %v23289_v27 = vld [vmem:[#allocation73_spill] sm:$0xff] }
0x1614   :  { %17034 = vmatpush3.bf16.msra.mxu1 %v21066_v8  ;;  %17066 = vmatpush3.bf16.msra.mxu0 %v23273_v45  ;;  %v23278_v8 = vld [vmem:[#allocation65_spill] sm:$0xff]  ;;  %v17556_v45 = vunpack.i.h.bf16 %v22367_v37  ;;  %v17563_v14 = vunpack.i.l.bf16 %v22379_v2  ;;  %v17566_v32 = vunpack.i.h.bf16 %v22379_v2  ;;  %v23291_v2 = vld [vmem:[#allocation42_spill] sm:$0xff] }
0x1615   :  { %17036 = vmatprep.subr.bf16.mxu1 %v23276_v33  ;;  %17068 = vmatprep.subr.bf16.mxu0 %v23277_v43 }
0x1616   :  { %15374 = vmatprep.mubr.f32.mxu1 %v17498_v55  ;;  %15430 = vmatprep.mubr.f32.mxu0 %v17501_v13  ;;  %v22391_v3 = vpop.trf.xlu1 }
0x1617   :  { %15375 = vmatmul.mubr.f32.gmra.mrb[50].mxu1 %v17503_v35  ;;  %15431 = vmatmul.mubr.f32.gmra.mrb[66].mxu0 %v17506_v4  ;;  %v17608_v60 = vunpack.i.h.bf16 %v22391_v3  ;;  %v17605_v53 = vunpack.i.l.bf16 %v22391_v3  ;;  %v23293_v3 = vld [vmem:[#allocation66_spill] sm:$0xff] }
0x1618   :  { %17038 = vmatpush3.bf16.msra.mxu1 %v23276_v33  ;;  %17070 = vmatpush3.bf16.msra.mxu0 %v23277_v43 }
0x1619   :  { %17040 = vmatprep.subr.bf16.mxu1 %v23278_v8  ;;  %17072 = vmatprep.subr.bf16.mxu0 %v23279_v47 }
0x161a   :  { %15377 = vmatprep.mubr.f32.mxu1 %v17508_v52  ;;  %15433 = vmatprep.mubr.f32.mxu0 %v17511_v49  ;;  %v22401_v29 = vpop.trf.xlu1 }
0x161b   :  { %15378 = vmatmul.mubr.f32.gmra.mrb[52].mxu1 %v17513_v12  ;;  %15434 = vmatmul.mubr.f32.gmra.mrb[68].mxu0 %v17516_v28  ;;  %v17610_v34 = vunpack.i.l.bf16 %v22401_v29  ;;  %v17613_v55 = vunpack.i.h.bf16 %v22401_v29  ;;  %v23292_v28 = vld [vmem:[#allocation85_spill] sm:$0xff]  ;;  %v23294_v29 = vld [vmem:[#allocation71_spill] sm:$0xff] }
0x161c   :  { %17042 = vmatpush3.bf16.msra.mxu1 %v23278_v8  ;;  %17074 = vmatpush3.bf16.msra.mxu0 %v23279_v47 }
0x161d   :  { %17044 = vmatprep.subr.bf16.mxu1 %v23280_v39  ;;  %17076 = vmatprep.subr.bf16.mxu0 %v23281_v57 }
0x161e   :  { %15380 = vmatprep.mubr.f32.mxu1 %v17518_v1  ;;  %15436 = vmatprep.mubr.f32.mxu0 %v17521_v63  ;;  %v22411_v62 = vpop.trf.xlu1 }
0x161f   :  { %15381 = vmatmul.mubr.f32.gmra.mrb[54].mxu1 %v17523_v23  ;;  %15437 = vmatmul.mubr.f32.gmra.mrb[70].mxu0 %v17526_v7  ;;  %v17615_v13 = vunpack.i.l.bf16 %v22411_v62  ;;  %v17618_v35 = vunpack.i.h.bf16 %v22411_v62 }
0x1620   :  { %17046 = vmatpush3.bf16.msra.mxu1 %v23280_v39  ;;  %17078 = vmatpush3.bf16.msra.mxu0 %v23281_v57  ;;  %v23295_v39 = vld [vmem:[#allocation74_spill] sm:$0xff] }
0x1621   :  { %17048 = vmatprep.subr.bf16.mxu1 %v23282_v40  ;;  %17080 = vmatprep.subr.bf16.mxu0 %v23283_v10  ;;  %v22433_v18 = vpop.trf.xlu0 }
0x1622   :  { %15383 = vmatprep.mubr.f32.mxu1 %v17528_v58  ;;  %15439 = vmatprep.mubr.f32.mxu0 %v17531_v56  ;;  %v22421_v20 = vpop.trf.xlu1 }
0x1623   :  { %15384 = vmatmul.mubr.f32.gmra.mrb[56].mxu1 %v17533_v0  ;;  %15440 = vmatmul.mubr.f32.gmra.mrb[72].mxu0 %v17536_v31  ;;  %v17620_v30 = vunpack.i.l.bf16 %v22421_v20  ;;  %v17623_v33 = vunpack.i.h.bf16 %v22421_v20 }
0x1624   :  { %17050 = vmatpush3.bf16.msra.mxu1 %v23282_v40  ;;  %17082 = vmatpush3.bf16.msra.mxu0 %v23283_v10  ;;  %v23296_v40 = vld [vmem:[#allocation72_spill] sm:$0xff]  ;;  %v23297_v10 = vld [vmem:[#allocation86_spill] sm:$0xff] }
0x1625   :  { %17052 = vmatprep.subr.bf16.mxu1 %v23284_v6  ;;  %17084 = vmatprep.subr.bf16.mxu0 %v23285_v50  ;;  %v22445_v41 = vpop.trf.xlu0 }
0x1626   :  { %15386 = vmatprep.mubr.f32.mxu1 %v17538_v16  ;;  %15442 = vmatprep.mubr.f32.mxu0 %v17541_v22  ;;  %v22431_v46 = vpop.trf.xlu1 }
0x1627   :  { %15387 = vmatmul.mubr.f32.gmra.mrb[58].mxu1 %v17543_v48  ;;  %15443 = vmatmul.mubr.f32.gmra.mrb[74].mxu0 %v17546_v9  ;;  %v17625_v43 = vunpack.i.l.bf16 %v22431_v46  ;;  %v17628_v52 = vunpack.i.h.bf16 %v22431_v46 }
0x1628   :  { %17054 = vmatpush3.bf16.msra.mxu1 %v23284_v6  ;;  %17086 = vmatpush3.bf16.msra.mxu0 %v23285_v50  ;;  %v23298_v50 = vld [vmem:[#allocation76_spill] sm:$0xff] }
0x1629   :  { %17056 = vmatprep.subr.bf16.mxu1 %v23286_v59  ;;  %17088 = vmatprep.subr.bf16.mxu0 %v23287_v19  ;;  %v22455_v17 = vpop.trf.xlu0 }
0x162a   :  { %15389 = vmatprep.mubr.f32.mxu1 %v17548_v15  ;;  %15445 = vmatprep.mubr.f32.mxu0 %v17551_v42  ;;  %v22443_v37 = vpop.trf.xlu1  ;;  %v23299_v15 = vld [vmem:[#allocation89_spill] sm:$0xff] }
0x162b   :  { %15390 = vmatmul.mubr.f32.gmra.mrb[60].mxu1 %v17553_v25  ;;  %15446 = vmatmul.mubr.f32.gmra.mrb[76].mxu0 %v17556_v45  ;;  %v17630_v8 = vunpack.i.l.bf16 %v22443_v37  ;;  %v17633_v47 = vunpack.i.h.bf16 %v22443_v37 }
0x162c   :  { %17058 = vmatpush3.bf16.msra.mxu1 %v23286_v59  ;;  %17090 = vmatpush3.bf16.msra.mxu0 %v23287_v19 }
0x162d   :  { %17060 = vmatprep.subr.bf16.mxu1 %v22282_v54  ;;  %17092 = vmatprep.subr.bf16.mxu0 %v22289_v26 }
0x162e   :  { %15392 = vmatprep.mubr.f32.mxu1 %v17558_v61  ;;  %15448 = vmatprep.mubr.f32.mxu0 %v17561_v11  ;;  %v17634_v21 = vpop.trf.xlu1  ;;  %v23300_v61 = vld [vmem:[#allocation77_spill] sm:$0xff]  ;;  %v23301_v11 = vld [vmem:[#allocation78_spill] sm:$0xff] }
0x162f   :  { %15393 = vmatmul.mubr.f32.gmra.mrb[62].mxu1 %v17563_v14  ;;  %15449 = vmatmul.mubr.f32.gmra.mrb[78].mxu0 %v17566_v32  ;;  %v17635_v1 = vunpack.i.l.bf16 %v17634_v21  ;;  %v17638_v63 = vunpack.i.h.bf16 %v17634_v21 }
0x1630   :  { %17062 = vmatpush3.bf16.msra.mxu1 %v22282_v54  ;;  %17094 = vmatpush3.bf16.msra.mxu0 %v22289_v26  ;;  %v22465_v54 = vpop.trf.xlu0  ;;  %v23290_v26 = vld [vmem:[#allocation84_spill] sm:$0xff] }
0x1631   :  { %17096 = vmatprep.subr.bf16.mxu1 %v23288_v38  ;;  %17128 = vmatprep.subr.bf16.mxu0 %v23289_v27 }
0x1632   :  { %15483 = vmatprep.mubr.f32.mxu1 %v17600_v5  ;;  %15539 = vmatprep.mubr.f32.mxu0 %v17603_v44  ;;  %v17639_v4 = vpop.trf.xlu1 }
0x1633   :  { %15484 = vmatmul.mubr.f32.vlgmr.msra.gmra.mrb[64].mxu1 %v17605_v53  ;;  %15540 = vmatmul.mubr.f32.vlgmr.msra.gmra.mrb[80].mxu0 %v17608_v60  ;;  %v17640_v57 = vunpack.i.l.bf16 %v17639_v4  ;;  %v17643_v58 = vunpack.i.h.bf16 %v17639_v4  ;;  %v17712_v60 = vunpack.i.l.bf16 %v22433_v18  ;;  %v17715_v53 = vunpack.i.h.bf16 %v22433_v18 }
0x1634   :  { %17098 = vmatpush3.bf16.msra.mxu1 %v23288_v38  ;;  %17130 = vmatpush3.bf16.msra.mxu0 %v23289_v27  ;;  %v22475_v12 = vpop.trf.xlu0 }
0x1635   :  { %17100 = vmatprep.subr.bf16.mxu1 %v23290_v26  ;;  %17132 = vmatprep.subr.bf16.mxu0 %v23291_v2  ;;  %v17732_v4 = vunpack.i.l.bf16 %v22475_v12 }
0x1636   :  { %15486 = vmatprep.mubr.f32.mxu1 %v17610_v34  ;;  %15542 = vmatprep.mubr.f32.mxu0 %v17613_v55  ;;  %v17644_v49 = vpop.trf.xlu1  ;;  %v17720_v34 = vunpack.i.h.bf16 %v22445_v41  ;;  %v17717_v55 = vunpack.i.l.bf16 %v22445_v41 }
0x1637   :  { %15487 = vmatmul.mubr.f32.gmra.mrb[66].mxu1 %v17615_v13  ;;  %15543 = vmatmul.mubr.f32.gmra.mrb[82].mxu0 %v17618_v35  ;;  %v17645_v56 = vunpack.i.l.bf16 %v17644_v49  ;;  %v17648_v0 = vunpack.i.h.bf16 %v17644_v49  ;;  %v17722_v13 = vunpack.i.l.bf16 %v22455_v17  ;;  %v17725_v35 = vunpack.i.h.bf16 %v22455_v17 }
0x1638   :  { %17102 = vmatpush3.bf16.msra.mxu1 %v23290_v26  ;;  %17134 = vmatpush3.bf16.msra.mxu0 %v23291_v2  ;;  %v22483_v7 = vpop.trf.xlu0  ;;  %v17735_v26 = vunpack.i.h.bf16 %v22475_v12 }
0x1639   :  { %17104 = vmatprep.subr.bf16.mxu1 %v23292_v28  ;;  %17136 = vmatprep.subr.bf16.mxu0 %v23293_v3  ;;  %v17737_v2 = vunpack.i.l.bf16 %v22483_v7  ;;  %v17740_v17 = vunpack.i.h.bf16 %v22483_v7 }
0x163a   :  { %15489 = vmatprep.mubr.f32.mxu1 %v17620_v30  ;;  %15545 = vmatprep.mubr.f32.mxu0 %v17623_v33  ;;  %v17649_v23 = vpop.trf.xlu1 }
0x163b   :  { %15490 = vmatmul.mubr.f32.gmra.mrb[68].mxu1 %v17625_v43  ;;  %15546 = vmatmul.mubr.f32.gmra.mrb[84].mxu0 %v17628_v52  ;;  %v17650_v16 = vunpack.i.l.bf16 %v17649_v23  ;;  %v17653_v22 = vunpack.i.h.bf16 %v17649_v23 }
0x163c   :  { %17106 = vmatpush3.bf16.msra.mxu1 %v23292_v28  ;;  %17138 = vmatpush3.bf16.msra.mxu0 %v23293_v3  ;;  %v22489_v62 = vpop.trf.xlu0 }
0x163d   :  { %17108 = vmatprep.subr.bf16.mxu1 %v23294_v29  ;;  %17140 = vmatprep.subr.bf16.mxu0 %v23295_v39  ;;  %v17742_v30 = vunpack.i.l.bf16 %v22489_v62  ;;  %v17745_v33 = vunpack.i.h.bf16 %v22489_v62 }
0x163e   :  { %15492 = vmatprep.mubr.f32.mxu1 %v17630_v8  ;;  %15548 = vmatprep.mubr.f32.mxu0 %v17633_v47  ;;  %v17654_v31 = vpop.trf.xlu1 }
0x163f   :  { %15493 = vmatmul.mubr.f32.gmra.mrb[70].mxu1 %v17635_v1  ;;  %15549 = vmatmul.mubr.f32.gmra.mrb[86].mxu0 %v17638_v63  ;;  %v17655_v48 = vunpack.i.l.bf16 %v17654_v31  ;;  %v17658_v9 = vunpack.i.h.bf16 %v17654_v31 }
0x1640   :  { %17110 = vmatpush3.bf16.msra.mxu1 %v23294_v29  ;;  %17142 = vmatpush3.bf16.msra.mxu0 %v23295_v39  ;;  %v22495_v6 = vpop.trf.xlu0 }
0x1641   :  { %17112 = vmatprep.subr.bf16.mxu1 %v23296_v40  ;;  %17144 = vmatprep.subr.bf16.mxu0 %v23297_v10  ;;  %v17747_v43 = vunpack.i.l.bf16 %v22495_v6  ;;  %v17750_v52 = vunpack.i.h.bf16 %v22495_v6 }
0x1642   :  { %15495 = vmatprep.mubr.f32.mxu1 %v17640_v57  ;;  %15551 = vmatprep.mubr.f32.mxu0 %v17643_v58  ;;  %v17659_v20 = vpop.trf.xlu1 }
0x1643   :  { %15496 = vmatmul.mubr.f32.gmra.mrb[72].mxu1 %v17645_v56  ;;  %15552 = vmatmul.mubr.f32.gmra.mrb[88].mxu0 %v17648_v0  ;;  %v17660_v42 = vunpack.i.l.bf16 %v17659_v20  ;;  %v17663_v25 = vunpack.i.h.bf16 %v17659_v20 }
0x1644   :  { %17114 = vmatpush3.bf16.msra.mxu1 %v23296_v40  ;;  %17146 = vmatpush3.bf16.msra.mxu0 %v23297_v10  ;;  %v22501_v46 = vpop.trf.xlu0 }
0x1645   :  { %17116 = vmatprep.subr.bf16.mxu1 %v23298_v50  ;;  %17148 = vmatprep.subr.bf16.mxu0 %v23299_v15  ;;  %v17752_v49 = vunpack.i.l.bf16 %v22501_v46  ;;  %v17755_v12 = vunpack.i.h.bf16 %v22501_v46 }
0x1646   :  { %15498 = vmatprep.mubr.f32.mxu1 %v17650_v16  ;;  %15554 = vmatprep.mubr.f32.mxu0 %v17653_v22  ;;  %v17664_v45 = vpop.trf.xlu1 }
0x1647   :  { %15499 = vmatmul.mubr.f32.gmra.mrb[74].mxu1 %v17655_v48  ;;  %15555 = vmatmul.mubr.f32.gmra.mrb[90].mxu0 %v17658_v9  ;;  %v17665_v59 = vunpack.i.l.bf16 %v17664_v45  ;;  %v17668_v19 = vunpack.i.h.bf16 %v17664_v45 }
0x1648   :  { %17118 = vmatpush3.bf16.msra.mxu1 %v23298_v50  ;;  %17150 = vmatpush3.bf16.msra.mxu0 %v23299_v15  ;;  %v22507_v32 = vpop.trf.xlu0 }
0x1649   :  { %17120 = vmatprep.subr.bf16.mxu1 %v23300_v61  ;;  %17152 = vmatprep.subr.bf16.mxu0 %v23301_v11  ;;  %v17757_v3 = vunpack.i.l.bf16 %v22507_v32  ;;  %v17760_v8 = vunpack.i.h.bf16 %v22507_v32 }
0x164a   :  { %15501 = vmatprep.mubr.f32.mxu1 %v17660_v42  ;;  %15557 = vmatprep.mubr.f32.mxu0 %v17663_v25  ;;  %v17669_v14 = vpop.trf.xlu1 }
0x164b   :  { %15502 = vmatmul.mubr.f32.gmra.mrb[76].mxu1 %v17665_v59  ;;  %15558 = vmatmul.mubr.f32.gmra.mrb[92].mxu0 %v17668_v19  ;;  %v17670_v37 = vunpack.i.l.bf16 %v17669_v14  ;;  %v17673_v5 = vunpack.i.h.bf16 %v17669_v14 }
0x164c   :  { %17122 = vmatpush3.bf16.msra.mxu1 %v23300_v61  ;;  %17154 = vmatpush3.bf16.msra.mxu0 %v23301_v11  ;;  %v17761_v21 = vpop.trf.xlu0 }
0x164d   :  { %17124 = vmatprep.subr.bf16.mxu1 %v22298_v36  ;;  %17156 = vmatprep.subr.bf16.mxu0 %v22303_v24  ;;  %v17762_v47 = vunpack.i.l.bf16 %v17761_v21  ;;  %v17765_v1 = vunpack.i.h.bf16 %v17761_v21 }
0x164e   :  { %15504 = vmatprep.mubr.f32.mxu1 %v17670_v37  ;;  %15560 = vmatprep.mubr.f32.mxu0 %v17673_v5  ;;  %v17674_v44 = vpop.trf.xlu1 }
0x164f   :  { %v17675_v38 = vunpack.i.l.bf16 %v17674_v44  ;;  %v17678_v27 = vunpack.i.h.bf16 %v17674_v44 }
0x1650   :  { %17126 = vmatpush3.bf16.msra.mxu1 %v22298_v36  ;;  %17158 = vmatpush3.bf16.msra.mxu0 %v22303_v24  ;;  %v17766_v18 = vpop.trf.xlu0  ;;  %v17727_v36 = vunpack.i.l.bf16 %v22465_v54  ;;  %v17730_v24 = vunpack.i.h.bf16 %v22465_v54 }
0x1651   :  { %15505 = vmatmul.mubr.f32.gmra.mrb[78].mxu1 %v17675_v38  ;;  %15561 = vmatmul.mubr.f32.gmra.mrb[94].mxu0 %v17678_v27  ;;  %v17767_v23 = vunpack.i.l.bf16 %v17766_v18  ;;  %v17770_v7 = vunpack.i.h.bf16 %v17766_v18 }
0x1652   :  { %15595 = vmatprep.mubr.f32.mxu1 %v17712_v60  ;;  %15651 = vmatprep.mubr.f32.mxu0 %v17715_v53 }
0x1654   :  { %v17771_v41 = vpop.trf.xlu0 }
0x1655   :  { %15596 = vmatmul.mubr.f32.vlgmr.msra.gmra.mrb[80].mxu1 %v17717_v55  ;;  %15652 = vmatmul.mubr.f32.vlgmr.msra.gmra.mrb[96].mxu0 %v17720_v34  ;;  %v17772_v29 = vunpack.i.l.bf16 %v17771_v41  ;;  %v17775_v39 = vunpack.i.h.bf16 %v17771_v41 }
0x1656   :  { %15598 = vmatprep.mubr.f32.mxu1 %v17722_v13  ;;  %15654 = vmatprep.mubr.f32.mxu0 %v17725_v35 }
0x1658   :  { %v17776_v54 = vpop.trf.xlu0 }
0x1659   :  { %15599 = vmatmul.mubr.f32.gmra.mrb[82].mxu1 %v17727_v36  ;;  %15655 = vmatmul.mubr.f32.gmra.mrb[98].mxu0 %v17730_v24  ;;  %v17777_v57 = vunpack.i.l.bf16 %v17776_v54  ;;  %v17780_v58 = vunpack.i.h.bf16 %v17776_v54 }
0x165a   :  { %15601 = vmatprep.mubr.f32.mxu1 %v17732_v4  ;;  %15657 = vmatprep.mubr.f32.mxu0 %v17735_v26 }
0x165c   :  { %v17781_v28 = vpop.trf.xlu0 }
0x165d   :  { %15602 = vmatmul.mubr.f32.gmra.mrb[84].mxu1 %v17737_v2  ;;  %15658 = vmatmul.mubr.f32.gmra.mrb[100].mxu0 %v17740_v17  ;;  %v17782_v56 = vunpack.i.l.bf16 %v17781_v28  ;;  %v17785_v0 = vunpack.i.h.bf16 %v17781_v28 }
0x165e   :  { %15604 = vmatprep.mubr.f32.mxu1 %v17742_v30  ;;  %15660 = vmatprep.mubr.f32.mxu0 %v17745_v33 }
0x1660   :  { %v17786_v63 = vpop.trf.xlu0 }
0x1661   :  { %15605 = vmatmul.mubr.f32.gmra.mrb[86].mxu1 %v17747_v43  ;;  %15661 = vmatmul.mubr.f32.gmra.mrb[102].mxu0 %v17750_v52  ;;  %v17787_v31 = vunpack.i.l.bf16 %v17786_v63  ;;  %v17790_v62 = vunpack.i.h.bf16 %v17786_v63 }
0x1662   :  { %15607 = vmatprep.mubr.f32.mxu1 %v17752_v49  ;;  %15663 = vmatprep.mubr.f32.mxu0 %v17755_v12 }
0x1665   :  { %15608 = vmatmul.mubr.f32.gmra.mrb[88].mxu1 %v17757_v3  ;;  %15664 = vmatmul.mubr.f32.gmra.mrb[104].mxu0 %v17760_v8 }
0x1666   :  { %15610 = vmatprep.mubr.f32.mxu1 %v17762_v47  ;;  %15666 = vmatprep.mubr.f32.mxu0 %v17765_v1 }
0x1669   :  { %15611 = vmatmul.mubr.f32.gmra.mrb[90].mxu1 %v17767_v23  ;;  %15667 = vmatmul.mubr.f32.gmra.mrb[106].mxu0 %v17770_v7 }
0x166a   :  { %15613 = vmatprep.mubr.f32.mxu1 %v17772_v29  ;;  %15669 = vmatprep.mubr.f32.mxu0 %v17775_v39 }
0x166d   :  { %15614 = vmatmul.mubr.f32.gmra.mrb[92].mxu1 %v17777_v57  ;;  %15670 = vmatmul.mubr.f32.gmra.mrb[108].mxu0 %v17780_v58 }
0x166e   :  { %15616 = vmatprep.mubr.f32.mxu1 %v17782_v56  ;;  %15672 = vmatprep.mubr.f32.mxu0 %v17785_v0 }
0x1671   :  { %15617 = vmatmul.mubr.f32.gmra.mrb[94].mxu1 %v17787_v31  ;;  %15673 = vmatmul.mubr.f32.gmra.mrb[110].mxu0 %v17790_v62 }
0x16b7   :  { %v15261_v40 = vpop.f32.mrb[32].mxu1  ;;  %v15317_v10 = vpop.f32.mrb[48].mxu0 }
0x16b8   :  { %v12999_v16 = vpop.f32.mrb[33].mxu1  ;;  %v13176_v22 = vpop.f32.mrb[49].mxu0 }
0x16b9   :  { %14317 = vxpose.xlu1.b32.start [1/16] (narrow) %v12999_v16, 8  ;;  %14349 = vxpose.xlu0.b32.start [1/16] (narrow) %v13176_v22, 8 }
0x16bb   :  { %v15264_v48 = vpop.f32.mrb[34].mxu1  ;;  %v15320_v9 = vpop.f32.mrb[50].mxu0 }
0x16bc   :  { %v13009_v20 = vpop.f32.mrb[35].mxu1  ;;  %v13186_v6 = vpop.f32.mrb[51].mxu0 }
0x16bd   :  { %14318 = vxpose.xlu1.b32.cont [2/16] (narrow) %v15261_v40, 8  ;;  %14350 = vxpose.xlu0.b32.cont [2/16] (narrow) %v15317_v10, 8 }
0x16bf   :  { %v15267_v50 = vpop.f32.mrb[36].mxu1  ;;  %v15323_v15 = vpop.f32.mrb[52].mxu0 }
0x16c0   :  { %v13019_v42 = vpop.f32.mrb[37].mxu1  ;;  %v13196_v25 = vpop.f32.mrb[53].mxu0 }
0x16c1   :  { %14319 = vxpose.xlu1.b32.cont [3/16] (narrow) %v13009_v20, 8  ;;  %14351 = vxpose.xlu0.b32.cont [3/16] (narrow) %v13186_v6, 8 }
0x16c3   :  { %v15270_v45 = vpop.f32.mrb[38].mxu1  ;;  %v15326_v46 = vpop.f32.mrb[54].mxu0 }
0x16c4   :  { %v13029_v59 = vpop.f32.mrb[39].mxu1  ;;  %v13206_v19 = vpop.f32.mrb[55].mxu0 }
0x16c5   :  { %14320 = vxpose.xlu1.b32.cont [4/16] (narrow) %v15264_v48, 8  ;;  %14352 = vxpose.xlu0.b32.cont [4/16] (narrow) %v15320_v9, 8 }
0x16c9   :  { %14321 = vxpose.xlu1.b32.cont [5/16] (narrow) %v13019_v42, 8  ;;  %14353 = vxpose.xlu0.b32.cont [5/16] (narrow) %v13196_v25, 8 }
0x16ca   :  { %v15273_v61 = vpop.f32.mrb[40].mxu1  ;;  %v15329_v11 = vpop.f32.mrb[56].mxu0 }
0x16cb   :  { %v13039_v14 = vpop.f32.mrb[41].mxu1  ;;  %v13216_v32 = vpop.f32.mrb[57].mxu0 }
0x16cd   :  { %14322 = vxpose.xlu1.b32.cont [6/16] (narrow) %v15267_v50, 8  ;;  %14354 = vxpose.xlu0.b32.cont [6/16] (narrow) %v15323_v15, 8 }
0x16d1   :  { %14323 = vxpose.xlu1.b32.cont [7/16] (narrow) %v13029_v59, 8  ;;  %14355 = vxpose.xlu0.b32.cont [7/16] (narrow) %v13206_v19, 8 }
0x16d2   :  { %v15276_v37 = vpop.f32.mrb[42].mxu1  ;;  %v15332_v5 = vpop.f32.mrb[58].mxu0 }
0x16d3   :  { %v13049_v44 = vpop.f32.mrb[43].mxu1  ;;  %v13226_v60 = vpop.f32.mrb[59].mxu0 }
0x16d5   :  { %14324 = vxpose.xlu1.b32.cont [8/16] (narrow) %v15270_v45, 8  ;;  %14356 = vxpose.xlu0.b32.cont [8/16] (narrow) %v15326_v46, 8 }
0x16d9   :  { %14325 = vxpose.xlu1.b32.cont [9/16] (narrow) %v13039_v14, 8  ;;  %14357 = vxpose.xlu0.b32.cont [9/16] (narrow) %v13216_v32, 8 }
0x16da   :  { %v15279_v53 = vpop.f32.mrb[44].mxu1  ;;  %v15335_v21 = vpop.f32.mrb[60].mxu0 }
0x16db   :  { %v13059_v38 = vpop.f32.mrb[45].mxu1  ;;  %v13236_v27 = vpop.f32.mrb[61].mxu0 }
0x16dd   :  { %14326 = vxpose.xlu1.b32.cont [10/16] (narrow) %v15273_v61, 8  ;;  %14358 = vxpose.xlu0.b32.cont [10/16] (narrow) %v15329_v11, 8 }
0x16e1   :  { %14327 = vxpose.xlu1.b32.cont [11/16] (narrow) %v13049_v44, 8  ;;  %14359 = vxpose.xlu0.b32.cont [11/16] (narrow) %v13226_v60, 8 }
0x16e2   :  { %v15282_v34 = vpop.f32.mrb[46].mxu1  ;;  %v15338_v55 = vpop.f32.mrb[62].mxu0 }
0x16e3   :  { %v13069_v13 = vpop.f32.mrb[47].mxu1  ;;  %v13246_v35 = vpop.f32.mrb[63].mxu0 }
0x16e5   :  { %14328 = vxpose.xlu1.b32.cont [12/16] (narrow) %v15276_v37, 8  ;;  %14360 = vxpose.xlu0.b32.cont [12/16] (narrow) %v15332_v5, 8 }
0x16e6   :  { %v15373_v18 = vpop.f32.mrb[48].mxu1  ;;  %v15429_v36 = vpop.f32.mrb[64].mxu0 }
0x16e7   :  { %v13353_v24 = vpop.f32.mrb[49].mxu1  ;;  %v13530_v4 = vpop.f32.mrb[65].mxu0 }
0x16e9   :  { %14329 = vxpose.xlu1.b32.cont [13/16] (narrow) %v13059_v38, 8  ;;  %14361 = vxpose.xlu0.b32.cont [13/16] (narrow) %v13236_v27, 8 }
0x16ea   :  { %v15376_v26 = vpop.f32.mrb[50].mxu1  ;;  %v15432_v41 = vpop.f32.mrb[66].mxu0 }
0x16eb   :  { %v13363_v2 = vpop.f32.mrb[51].mxu1  ;;  %v13540_v17 = vpop.f32.mrb[67].mxu0 }
0x16ed   :  { %14330 = vxpose.xlu1.b32.cont [14/16] (narrow) %v15279_v53, 8  ;;  %14362 = vxpose.xlu0.b32.cont [14/16] (narrow) %v15335_v21, 8 }
0x16ee   :  { %v15379_v30 = vpop.f32.mrb[52].mxu1  ;;  %v15435_v33 = vpop.f32.mrb[68].mxu0 }
0x16ef   :  { %v13373_v54 = vpop.f32.mrb[53].mxu1  ;;  %v13550_v43 = vpop.f32.mrb[69].mxu0 }
0x16f1   :  { %14331 = vxpose.xlu1.b32.cont [15/16] (narrow) %v13069_v13, 8  ;;  %14363 = vxpose.xlu0.b32.cont [15/16] (narrow) %v13246_v35, 8 }
0x16f2   :  { %v15382_v52 = vpop.f32.mrb[54].mxu1  ;;  %v15438_v49 = vpop.f32.mrb[70].mxu0 }
0x16f3   :  { %v13383_v12 = vpop.f32.mrb[55].mxu1  ;;  %v13560_v28 = vpop.f32.mrb[71].mxu0 }
0x16f5   :  { %14332 = vxpose.xlu1.b32.end [16/16] (narrow) %v15282_v34, 8  ;;  %14364 = vxpose.xlu0.b32.end [16/16] (narrow) %v15338_v55, 8 }
0x16f6   :  { %v15385_v3 = vpop.f32.mrb[56].mxu1  ;;  %v15441_v8 = vpop.f32.mrb[72].mxu0 }
0x16f7   :  { %v13393_v47 = vpop.f32.mrb[57].mxu1  ;;  %v13570_v1 = vpop.f32.mrb[73].mxu0 }
0x16f9   :  { %14381 = vxpose.xlu1.b32.start [1/16] (narrow) %v13353_v24, 8  ;;  %14413 = vxpose.xlu0.b32.start [1/16] (narrow) %v13530_v4, 8 }
0x16fa   :  { %v15388_v63 = vpop.f32.mrb[58].mxu1  ;;  %v15444_v23 = vpop.f32.mrb[74].mxu0 }
0x16fb   :  { %v13403_v7 = vpop.f32.mrb[59].mxu1  ;;  %v13580_v29 = vpop.f32.mrb[75].mxu0 }
0x16fd   :  { %14382 = vxpose.xlu1.b32.cont [2/16] (narrow) %v15373_v18, 8  ;;  %14414 = vxpose.xlu0.b32.cont [2/16] (narrow) %v15429_v36, 8 }
0x16fe   :  { %v22535_v39 = vpop.f32.mrb[60].mxu1  ;;  %v22537_v57 = vpop.f32.mrb[76].mxu0 }
0x16ff   :  { %v13413_v58 = vpop.f32.mrb[61].mxu1  ;;  %v13590_v56 = vpop.f32.mrb[77].mxu0 }
0x1701   :  { %14383 = vxpose.xlu1.b32.cont [3/16] (narrow) %v13363_v2, 8  ;;  %14415 = vxpose.xlu0.b32.cont [3/16] (narrow) %v13540_v17, 8 }
0x1702   :  { %v22539_v0 = vpop.f32.mrb[62].mxu1  ;;  %v22541_v31 = vpop.f32.mrb[78].mxu0 }
0x1703   :  { %v22543_v62 = vpop.f32.mrb[63].mxu1  ;;  %v22545_v40 = vpop.f32.mrb[79].mxu0 }
0x1705   :  { %14384 = vxpose.xlu1.b32.cont [4/16] (narrow) %v15376_v26, 8  ;;  %14416 = vxpose.xlu0.b32.cont [4/16] (narrow) %v15432_v41, 8 }
0x1706   :  { %v22547_v10 = vpop.f32.mrb[64].mxu1  ;;  %v22549_v16 = vpop.f32.mrb[80].mxu0 }
0x1707   :  { %v22551_v22 = vpop.f32.mrb[65].mxu1  ;;  %v22553_v48 = vpop.f32.mrb[81].mxu0 }
0x1709   :  { %14385 = vxpose.xlu1.b32.cont [5/16] (narrow) %v13373_v54, 8  ;;  %14417 = vxpose.xlu0.b32.cont [5/16] (narrow) %v13550_v43, 8 }
0x170a   :  { %v22555_v9 = vpop.f32.mrb[66].mxu1  ;;  %v22557_v20 = vpop.f32.mrb[82].mxu0 }
0x170b   :  { %v22559_v6 = vpop.f32.mrb[67].mxu1  ;;  %v22561_v50 = vpop.f32.mrb[83].mxu0 }
0x170d   :  { %14386 = vxpose.xlu1.b32.cont [6/16] (narrow) %v15379_v30, 8  ;;  %14418 = vxpose.xlu0.b32.cont [6/16] (narrow) %v15435_v33, 8 }
0x170e   :  { %v22563_v15 = vpop.f32.mrb[68].mxu1  ;;  %v22565_v42 = vpop.f32.mrb[84].mxu0 }
0x170f   :  { %v22567_v25 = vpop.f32.mrb[69].mxu1  ;;  %v22569_v45 = vpop.f32.mrb[85].mxu0 }
0x1711   :  { %14387 = vxpose.xlu1.b32.cont [7/16] (narrow) %v13383_v12, 8  ;;  %14419 = vxpose.xlu0.b32.cont [7/16] (narrow) %v13560_v28, 8  ;;  %v14709_v28 = vld [vmem:[#allocation18] sm:$0xff] }
0x1712   :  { %v22571_v46 = vpop.f32.mrb[70].mxu1  ;;  %v22573_v59 = vpop.f32.mrb[86].mxu0 }
0x1713   :  { %v22575_v19 = vpop.f32.mrb[71].mxu1  ;;  %v22577_v61 = vpop.f32.mrb[87].mxu0 }
0x1715   :  { %14388 = vxpose.xlu1.b32.cont [8/16] (narrow) %v15382_v52, 8  ;;  %14420 = vxpose.xlu0.b32.cont [8/16] (narrow) %v15438_v49, 8 }
0x1716   :  { %v22579_v11 = vpop.f32.mrb[72].mxu1  ;;  %v22581_v14 = vpop.f32.mrb[88].mxu0 }
0x1717   :  { %v22583_v32 = vpop.f32.mrb[73].mxu1  ;;  %v22585_v37 = vpop.f32.mrb[89].mxu0 }
0x1719   :  { %14389 = vxpose.xlu1.b32.cont [9/16] (narrow) %v13393_v47, 8  ;;  %14421 = vxpose.xlu0.b32.cont [9/16] (narrow) %v13570_v1, 8 }
0x171a   :  { %v22587_v5 = vpop.f32.mrb[74].mxu1  ;;  %v22589_v44 = vpop.f32.mrb[90].mxu0 }
0x171b   :  { %v22591_v60 = vpop.f32.mrb[75].mxu1  ;;  %v22593_v53 = vpop.f32.mrb[91].mxu0 }
0x171d   :  { %14390 = vxpose.xlu1.b32.cont [10/16] (narrow) %v15385_v3, 8  ;;  %14422 = vxpose.xlu0.b32.cont [10/16] (narrow) %v15441_v8, 8  ;;  %v14710_v3 = vld [vmem:[#allocation18 + $0x8] sm:$0xff] }
0x171e   :  { %v22595_v21 = vpop.f32.mrb[76].mxu1  ;;  %v22597_v38 = vpop.f32.mrb[92].mxu0  ;;  %v17159_v1 = vpack.c.bf16 %v14710_v3, %v14709_v28 }
0x171f   :  { %v22599_v27 = vpop.f32.mrb[77].mxu1  ;;  %v22601_v34 = vpop.f32.mrb[93].mxu0 }
0x1720   :  { %17160 = vmatprep.subr.bf16.mxu1 %v17159_v1 }
0x1721   :  { %14391 = vxpose.xlu1.b32.cont [11/16] (narrow) %v13403_v7, 8  ;;  %14423 = vxpose.xlu0.b32.cont [11/16] (narrow) %v13580_v29, 8  ;;  %v14713_v29 = vld [vmem:[#allocation18 + $0x20] sm:$0xff] }
0x1722   :  { %17162 = vmatpush3.bf16.msra.mxu1 %v17159_v1  ;;  %v14717_v1 = vld [vmem:[#allocation18 + $0x40] sm:$0xff] }
0x1724   :  { %v22603_v55 = vpop.f32.mrb[78].mxu1  ;;  %v22605_v13 = vpop.f32.mrb[94].mxu0 }
0x1725   :  { %14392 = vxpose.xlu1.b32.cont [12/16] (narrow) %v15388_v63, 8  ;;  %14424 = vxpose.xlu0.b32.cont [12/16] (narrow) %v15444_v23, 8  ;;  %v22607_v35 = vpop.f32.mrb[79].mxu1  ;;  %v22609_v18 = vpop.f32.mrb[95].mxu0  ;;  %v14711_v63 = vld [vmem:[#allocation18 + $0x10] sm:$0xff]  ;;  %v14712_v23 = vld [vmem:[#allocation18 + $0x18] sm:$0xff] }
0x1726   :  { %v17163_v7 = vpack.c.bf16 %v14712_v23, %v14711_v63  ;;  %v14718_v23 = vld [vmem:[#allocation18 + $0x48] sm:$0xff] }
0x1727   :  { %v17175_v51 = vpack.c.bf16 %v14718_v23, %v14717_v1 }
0x1728   :  { %v22611_v36 = vpop.f32.mrb[80].mxu1  ;;  %v22613_v24 = vpop.f32.mrb[96].mxu0  ;;  %17164 = vmatprep.subr.bf16.mxu1 %v17163_v7 }
0x1729   :  { %14393 = vxpose.xlu1.b32.cont [13/16] (narrow) %v13413_v58, 8  ;;  %14425 = vxpose.xlu0.b32.cont [13/16] (narrow) %v13590_v56, 8  ;;  %v22615_v4 = vpop.f32.mrb[81].mxu1  ;;  %v22617_v26 = vpop.f32.mrb[97].mxu0 }
0x172a   :  { %17166 = vmatpush3.bf16.msra.mxu1 %v17163_v7  ;;  %v14719_v7 = vld [vmem:[#allocation18 + $0x50] sm:$0xff] }
0x172c   :  { %v22621_v41 = vpop.f32.mrb[82].mxu1  ;;  %v22623_v2 = vpop.f32.mrb[98].mxu0 }
0x172d   :  { %14394 = vxpose.xlu1.b32.cont [14/16] (narrow) %v22535_v39, 8  ;;  %14426 = vxpose.xlu0.b32.cont [14/16] (narrow) %v22537_v57, 8  ;;  %v22625_v17 = vpop.f32.mrb[83].mxu1  ;;  %v22627_v30 = vpop.f32.mrb[99].mxu0  ;;  %v14714_v39 = vld [vmem:[#allocation18 + $0x28] sm:$0xff] }
0x1730   :  { %v22631_v33 = vpop.f32.mrb[84].mxu1  ;;  %v22633_v54 = vpop.f32.mrb[100].mxu0 }
0x1731   :  { %14395 = vxpose.xlu1.b32.cont [15/16] (narrow) %v22543_v62, 8  ;;  %14427 = vxpose.xlu0.b32.cont [15/16] (narrow) %v22545_v40, 8  ;;  %v22635_v43 = vpop.f32.mrb[85].mxu1  ;;  %v22637_v52 = vpop.f32.mrb[101].mxu0  ;;  %v14715_v62 = vld [vmem:[#allocation18 + $0x30] sm:$0xff]  ;;  %v14716_v40 = vld [vmem:[#allocation18 + $0x38] sm:$0xff] }
0x1732   :  { %v17171_v63 = vpack.c.bf16 %v14716_v40, %v14715_v62 }
0x1734   :  { %v22641_v49 = vpop.f32.mrb[86].mxu1  ;;  %v22643_v12 = vpop.f32.mrb[102].mxu0 }
0x1735   :  { %14396 = vxpose.xlu1.b32.end [16/16] (narrow) %v22539_v0, 8  ;;  %14428 = vxpose.xlu0.b32.end [16/16] (narrow) %v22541_v31, 8  ;;  %v22645_v8 = vpop.f32.mrb[87].mxu1  ;;  %v22647_v47 = vpop.f32.mrb[103].mxu0  ;;  %v17167_v31 = vpack.c.bf16 %v14714_v39, %v14713_v29 }
0x1737   :  { %17168 = vmatprep.subr.bf16.mxu1 %v17167_v31 }
0x1738   :  { %v22651_v57 = vpop.f32.mrb[88].mxu1  ;;  %v22653_v58 = vpop.f32.mrb[104].mxu0  ;;  %17170 = vmatpush3.bf16.msra.mxu1 %v17167_v31 }
0x1739   :  { %14445 = vxpose.xlu1.b32.start [1/16] (narrow) %v22551_v22, 8  ;;  %14477 = vxpose.xlu0.b32.start [1/16] (narrow) %v22553_v48, 8  ;;  %v22655_v56 = vpop.f32.mrb[89].mxu1  ;;  %v22657_v0 = vpop.f32.mrb[105].mxu0 }
0x173a   :  { %17172 = vmatprep.subr.bf16.mxu1 %v17171_v63 }
0x173c   :  { %v22661_v22 = vpop.f32.mrb[90].mxu1  ;;  %v22663_v48 = vpop.f32.mrb[106].mxu0  ;;  %17174 = vmatpush3.bf16.msra.mxu1 %v17171_v63 }
0x173d   :  { %14446 = vxpose.xlu1.b32.cont [2/16] (narrow) %v22547_v10, 8  ;;  %14478 = vxpose.xlu0.b32.cont [2/16] (narrow) %v22549_v16, 8  ;;  %23302 = vst [vmem:[#allocation81_spill] sm:$0xff] %v22663_v48  ;;  %v22665_v28 = vpop.f32.mrb[91].mxu1  ;;  %v22667_v3 = vpop.f32.mrb[107].mxu0  ;;  %v14720_v48 = vld [vmem:[#allocation18 + $0x58] sm:$0xff] }
0x173e   :  { %17176 = vmatprep.subr.bf16.mxu1 %v17175_v51 }
0x1740   :  { %v22671_v10 = vpop.f32.mrb[92].mxu1  ;;  %v22673_v16 = vpop.f32.mrb[108].mxu0  ;;  %17178 = vmatpush3.bf16.msra.mxu1 %v17175_v51  ;;  %v14721_v51 = vld [vmem:[#allocation18 + $0x60] sm:$0xff] }
0x1741   :  { %14447 = vxpose.xlu1.b32.cont [3/16] (narrow) %v22559_v6, 8  ;;  %14479 = vxpose.xlu0.b32.cont [3/16] (narrow) %v22561_v50, 8  ;;  %23303 = vst [vmem:[#allocation82_spill] sm:$0xff] %v22673_v16  ;;  %v22675_v29 = vpop.f32.mrb[93].mxu1  ;;  %v22677_v39 = vpop.f32.mrb[109].mxu0  ;;  %v17179_v16 = vpack.c.bf16 %v14720_v48, %v14719_v7 }
0x1743   :  { %17180 = vmatprep.subr.bf16.mxu1 %v17179_v16 }
0x1744   :  { %v22681_v6 = vpop.f32.mrb[94].mxu1  ;;  %v22683_v50 = vpop.f32.mrb[110].mxu0  ;;  %17182 = vmatpush3.bf16.msra.mxu1 %v17179_v16 }
0x1745   :  { %14448 = vxpose.xlu1.b32.cont [4/16] (narrow) %v22555_v9, 8  ;;  %14480 = vxpose.xlu0.b32.cont [4/16] (narrow) %v22557_v20, 8  ;;  %v22685_v62 = vpop.f32.mrb[95].mxu1  ;;  %v22687_v40 = vpop.f32.mrb[111].mxu0  ;;  %v14722_v9 = vld [vmem:[#allocation18 + $0x68] sm:$0xff]  ;;  %v14723_v20 = vld [vmem:[#allocation18 + $0x70] sm:$0xff] }
0x1749   :  { %14449 = vxpose.xlu1.b32.cont [5/16] (narrow) %v22567_v25, 8  ;;  %14481 = vxpose.xlu0.b32.cont [5/16] (narrow) %v22569_v45, 8  ;;  %v23304_v45 = vld [vmem:[#allocation81_spill] sm:$0xff] }
0x174d   :  { %14450 = vxpose.xlu1.b32.cont [6/16] (narrow) %v22563_v15, 8  ;;  %14482 = vxpose.xlu0.b32.cont [6/16] (narrow) %v22565_v42, 8  ;;  %v17183_v15 = vpack.c.bf16 %v14722_v9, %v14721_v51  ;;  %v14724_v42 = vld [vmem:[#allocation18 + $0x78] sm:$0xff] }
0x174e   :  { %v17187_v25 = vpack.c.bf16 %v14724_v42, %v14723_v20 }
0x174f   :  { %17184 = vmatprep.subr.bf16.mxu1 %v17183_v15 }
0x1750   :  { %17186 = vmatpush3.bf16.msra.mxu1 %v17183_v15 }
0x1751   :  { %14451 = vxpose.xlu1.b32.cont [7/16] (narrow) %v22575_v19, 8  ;;  %14483 = vxpose.xlu0.b32.cont [7/16] (narrow) %v22577_v61, 8  ;;  %v14365_v19 = vpop.trf.xlu0 }
0x1752   :  { %17188 = vmatprep.subr.bf16.mxu1 %v17187_v25 }
0x1754   :  { %17190 = vmatpush3.bf16.msra.mxu1 %v17187_v25 }
0x1755   :  { %14452 = vxpose.xlu1.b32.cont [8/16] (narrow) %v22571_v46, 8  ;;  %14484 = vxpose.xlu0.b32.cont [8/16] (narrow) %v22573_v59, 8  ;;  %v23305_v46 = vld [vmem:[#allocation82_spill] sm:$0xff]  ;;  %v14333_v59 = vpop.trf.xlu1 }
0x1759   :  { %14453 = vxpose.xlu1.b32.cont [9/16] (narrow) %v22583_v32, 8  ;;  %14485 = vxpose.xlu0.b32.cont [9/16] (narrow) %v22585_v37, 8 }
0x175d   :  { %14454 = vxpose.xlu1.b32.cont [10/16] (narrow) %v22579_v11, 8  ;;  %14486 = vxpose.xlu0.b32.cont [10/16] (narrow) %v22581_v14, 8 }
0x1761   :  { %14455 = vxpose.xlu1.b32.cont [11/16] (narrow) %v22591_v60, 8  ;;  %14487 = vxpose.xlu0.b32.cont [11/16] (narrow) %v22593_v53, 8 }
0x1765   :  { %14456 = vxpose.xlu1.b32.cont [12/16] (narrow) %v22587_v5, 8  ;;  %14488 = vxpose.xlu0.b32.cont [12/16] (narrow) %v22589_v44, 8  ;;  %v23306_v44 = vld [vmem:[#allocation43_spill] sm:$0xff] }
0x1769   :  { %14457 = vxpose.xlu1.b32.cont [13/16] (narrow) %v22599_v27, 8  ;;  %14489 = vxpose.xlu0.b32.cont [13/16] (narrow) %v22601_v34, 8 }
0x176d   :  { %14458 = vxpose.xlu1.b32.cont [14/16] (narrow) %v22595_v21, 8  ;;  %14490 = vxpose.xlu0.b32.cont [14/16] (narrow) %v22597_v38, 8 }
0x1771   :  { %14459 = vxpose.xlu1.b32.cont [15/16] (narrow) %v22607_v35, 8  ;;  %14491 = vxpose.xlu0.b32.cont [15/16] (narrow) %v22609_v18, 8 }
0x1775   :  { %14460 = vxpose.xlu1.b32.end [16/16] (narrow) %v22603_v55, 8  ;;  %14492 = vxpose.xlu0.b32.end [16/16] (narrow) %v22605_v13, 8 }
0x1779   :  { %14509 = vxpose.xlu1.b32.start [1/16] (narrow) %v22615_v4, 8  ;;  %14541 = vxpose.xlu0.b32.start [1/16] (narrow) %v22617_v26, 8  ;;  %v14397_v61 = vpop.trf.xlu1  ;;  %v14429_v11 = vpop.trf.xlu0 }
0x177a   :  { %v14573_v14 = vcombine.low %v14333_v59, %v14397_v61  ;;  %v14589_v32 = vcombine.low %v14365_v19, %v14429_v11  ;;  %v14574_v21 = vcombine.high %v14333_v59, %v14397_v61  ;;  %v14590_v38 = vcombine.high %v14365_v19, %v14429_v11 }
0x177c   :  { %v14581_v60 = vrot.slane %v14573_v14, %v23306_v44  ;;  %v14597_v53 = vrot.slane %v14589_v32, %v23306_v44 }
0x177d   :  { %14510 = vxpose.xlu1.b32.cont [2/16] (narrow) %v22611_v36, 8  ;;  %14542 = vxpose.xlu0.b32.cont [2/16] (narrow) %v22613_v24, 8 }
0x177e   :  { %v14637_v36 = vcombine.low %v14581_v60, %v14597_v53 }
0x1781   :  { %14511 = vxpose.xlu1.b32.cont [3/16] (narrow) %v22625_v17, 8  ;;  %14543 = vxpose.xlu0.b32.cont [3/16] (narrow) %v22627_v30, 8  ;;  %v14604_v17 = vrot.slane %v14590_v38, %v23306_v44  ;;  %v14638_v30 = vcombine.high %v14581_v60, %v14597_v53 }
0x1785   :  { %14512 = vxpose.xlu1.b32.cont [4/16] (narrow) %v22621_v41, 8  ;;  %14544 = vxpose.xlu0.b32.cont [4/16] (narrow) %v22623_v2, 8  ;;  %v14588_v2 = vrot.slane %v14574_v21, %v23306_v44 }
0x1787   :  { %v14654_v48 = vcombine.high %v14588_v2, %v14604_v17 }
0x1789   :  { %14513 = vxpose.xlu1.b32.cont [5/16] (narrow) %v22635_v43, 8  ;;  %14545 = vxpose.xlu0.b32.cont [5/16] (narrow) %v22637_v52, 8  ;;  %v23307_v52 = vld [vmem:[#allocation93_spill] sm:$0xff] }
0x178a   :  { %v14668_v23 = vrot.slane %v14654_v48, %v23307_v52 }
0x178d   :  { %14514 = vxpose.xlu1.b32.cont [6/16] (narrow) %v22631_v33, 8  ;;  %14546 = vxpose.xlu0.b32.cont [6/16] (narrow) %v22633_v54, 8 }
0x1791   :  { %14515 = vxpose.xlu1.b32.cont [7/16] (narrow) %v22645_v8, 8  ;;  %14547 = vxpose.xlu0.b32.cont [7/16] (narrow) %v22647_v47, 8  ;;  %v14653_v47 = vcombine.low %v14588_v2, %v14604_v17 }
0x1795   :  { %14516 = vxpose.xlu1.b32.cont [8/16] (narrow) %v22641_v49, 8  ;;  %14548 = vxpose.xlu0.b32.cont [8/16] (narrow) %v22643_v12, 8  ;;  %v14645_v49 = vrot.slane %v14637_v36, %v23307_v52 }
0x1799   :  { %14517 = vxpose.xlu1.b32.cont [9/16] (narrow) %v22655_v56, 8  ;;  %14549 = vxpose.xlu0.b32.cont [9/16] (narrow) %v22657_v0, 8  ;;  %v14652_v56 = vrot.slane %v14638_v30, %v23307_v52 }
0x179d   :  { %14518 = vxpose.xlu1.b32.cont [10/16] (narrow) %v22651_v57, 8  ;;  %14550 = vxpose.xlu0.b32.cont [10/16] (narrow) %v22653_v58, 8 }
0x17a1   :  { %14519 = vxpose.xlu1.b32.cont [11/16] (narrow) %v22665_v28, 8  ;;  %14551 = vxpose.xlu0.b32.cont [11/16] (narrow) %v22667_v3, 8  ;;  %v14661_v28 = vrot.slane %v14653_v47, %v23307_v52 }
0x17a5   :  { %14520 = vxpose.xlu1.b32.cont [12/16] (narrow) %v22661_v22, 8  ;;  %14552 = vxpose.xlu0.b32.cont [12/16] (narrow) %v23304_v45, 8 }
0x17a9   :  { %14521 = vxpose.xlu1.b32.cont [13/16] (narrow) %v22675_v29, 8  ;;  %14553 = vxpose.xlu0.b32.cont [13/16] (narrow) %v22677_v39, 8 }
0x17ad   :  { %14522 = vxpose.xlu1.b32.cont [14/16] (narrow) %v22671_v10, 8  ;;  %14554 = vxpose.xlu0.b32.cont [14/16] (narrow) %v23305_v46, 8 }
0x17b1   :  { %14523 = vxpose.xlu1.b32.cont [15/16] (narrow) %v22685_v62, 8  ;;  %14555 = vxpose.xlu0.b32.cont [15/16] (narrow) %v22687_v40, 8 }
0x17b5   :  { %14524 = vxpose.xlu1.b32.end [16/16] (narrow) %v22681_v6, 8  ;;  %14556 = vxpose.xlu0.b32.end [16/16] (narrow) %v22683_v50, 8 }
0x17b9   :  { %v14461_v37 = vpop.trf.xlu1  ;;  %v14493_v5 = vpop.trf.xlu0 }
0x17f9   :  { %v14525_v27 = vpop.trf.xlu1  ;;  %v14557_v34 = vpop.trf.xlu0 }
0x17fa   :  { %v14605_v55 = vcombine.low %v14461_v37, %v14525_v27  ;;  %v14606_v13 = vcombine.high %v14461_v37, %v14525_v27  ;;  %v14621_v35 = vcombine.low %v14493_v5, %v14557_v34  ;;  %v14622_v18 = vcombine.high %v14493_v5, %v14557_v34 }
0x17fc   :  { %v14613_v24 = vrot.slane %v14605_v55, %v23306_v44  ;;  %v14620_v4 = vrot.slane %v14606_v13, %v23306_v44  ;;  %v14629_v26 = vrot.slane %v14621_v35, %v23306_v44  ;;  %v14636_v41 = vrot.slane %v14622_v18, %v23306_v44 }
0x17fe   :  { %v14669_v33 = vcombine.low %v14613_v24, %v14629_v26  ;;  %v14670_v54 = vcombine.high %v14613_v24, %v14629_v26  ;;  %v14685_v43 = vcombine.low %v14620_v4, %v14636_v41  ;;  %v14686_v0 = vcombine.high %v14620_v4, %v14636_v41 }
0x1800   :  { %v14677_v12 = vrot.slane %v14669_v33, %v23307_v52  ;;  %v14684_v8 = vrot.slane %v14670_v54, %v23307_v52  ;;  %v14693_v22 = vrot.slane %v14685_v43, %v23307_v52  ;;  %v14700_v1 = vrot.slane %v14686_v0, %v23307_v52 }
0x1802   :  { %v14701_v57 = vcombine.low %v14645_v49, %v14677_v12  ;;  %v14702_v58 = vcombine.high %v14645_v49, %v14677_v12  ;;  %v14703_v31 = vcombine.low %v14652_v56, %v14684_v8  ;;  %v14704_v3 = vcombine.high %v14652_v56, %v14684_v8 }
0x1803   :  { %v14705_v63 = vcombine.low %v14661_v28, %v14693_v22  ;;  %v14706_v10 = vcombine.high %v14661_v28, %v14693_v22  ;;  %v14707_v16 = vcombine.low %v14668_v23, %v14700_v1  ;;  %v14708_v29 = vcombine.high %v14668_v23, %v14700_v1 }
0x1804   :  { %15707 = vmatprep.mubr.f32.mxu1 %v14701_v57 }
0x1805   :  { %15708 = vmatmul.mubr.f32.vlgmr.msra.gmra.mrb[96].mxu1 %v14702_v58 }
0x1806   :  { %15710 = vmatprep.mubr.f32.mxu1 %v14703_v31 }
0x1809   :  { %15711 = vmatmul.mubr.f32.gmra.mrb[98].mxu1 %v14704_v3 }
0x180a   :  { %15713 = vmatprep.mubr.f32.mxu1 %v14705_v63 }
0x180d   :  { %15714 = vmatmul.mubr.f32.gmra.mrb[100].mxu1 %v14706_v10 }
0x180e   :  { %15716 = vmatprep.mubr.f32.mxu1 %v14707_v16 }
0x1811   :  { %15717 = vmatmul.mubr.f32.gmra.mrb[102].mxu1 %v14708_v29 }
0x1812   :  { %18326 = shalt.err (!%p18323_p0)
}
0x1813   :  { %s18327_s30 = scalar_lea.hbm %s22825_s11, 256 }
0x1814   :  { %p18328_p1 = scmp.ne.s32.totalorder %s22825_s11, %s18327_s30  ;;  %p18331_p2 = scmp.lt.u32.totalorder %s18327_s30, %s22825_s11 }
0x1816   :  { %p18333_p3 = pnand %p18331_p2, %p18328_p1 }
0x1818   :  { %18336 = shalt.err (!%p18333_p3)
}
0x1819   :  { %14869 = dma.vmem_to_hbm [thread:$0]  %s14864_s26, 256, %s22825_s11, [#allocation22], %s18399_s15, %s18399_s15, %s18400_s16  }
0x181a   :  { %s18419_s24 = smov [#allocation23]  }
0x181b   :  { %s14875_s6 = sshll.u32 %s18419_s24, 4  ;;  %s14876_s6 = int_to_ptr.vmem [resolvable:$true] %s14875_s6 }
0x181c   :  { %s18337_s3 = scalar_lea.vmem %s14876_s6, 256  ;;  %p18342_p5 = scmp.lt.s32.totalorder %s14876_s6, %s14876_s6 }
0x181d   :  { %p18338_p4 = scmp.ne.s32.totalorder %s14876_s6, %s18337_s3  ;;  %p18343_p6 = scmp.lt.s32.totalorder %s18337_s3, %s18337_s3 }
0x181f   :  { %p18344_p7 = por %p18343_p6, %p18342_p5 }
0x1821   :  { %p18345_p8 = pnand %p18344_p7, %p18338_p4 }
0x1823   :  { %18348 = shalt.err (!%p18345_p8)
}
0x1824   :  { %s18349_s29 = scalar_lea.hbm %s22826_s12, 256 }
0x1825   :  { %p18350_p9 = scmp.ne.s32.totalorder %s22826_s12, %s18349_s29  ;;  %p18353_p10 = scmp.lt.u32.totalorder %s18349_s29, %s22826_s12 }
0x1827   :  { %p18355_p11 = pnand %p18353_p10, %p18350_p9 }
0x1829   :  { %18358 = shalt.err (!%p18355_p11)
}
0x182a   :  { %14881 = dma.vmem_to_hbm [thread:$0]  %s14876_s6, 256, %s22826_s12, [#allocation22], %s18399_s15, %s18399_s15, %s18400_s16   ;;  %v23308_v7 = vld [vmem:[#allocation33_spill] sm:$0xff]  ;;  %v23309_v62 = vld [vmem:[#allocation32_spill] sm:$0xff]  ;;  %v23310_v9 = vld [vmem:[#allocation35_spill] sm:$0xff] }
0x182b   :  { %v23311_v42 = vld [vmem:[#allocation34_spill] sm:$0xff]  ;;  %v23312_v46 = vld [vmem:[#allocation37_spill] sm:$0xff]  ;;  %v23313_v61 = vld [vmem:[#allocation36_spill] sm:$0xff]  ;;  %s18420_s12 = smov [#allocation20]  }
0x182c   :  { %v23314_v37 = vld [vmem:[#allocation39_spill] sm:$0xff]  ;;  %v23315_v53 = vld [vmem:[#allocation38_spill] sm:$0xff]  ;;  %s14851_s1 = sshll.u32 %s18420_s12, 4  ;;  %s14852_s1 = int_to_ptr.vmem [resolvable:$true] %s14851_s1 }
0x182d   :  { %s18359_s8 = scalar_lea.vmem %s14852_s1, 1024  ;;  %p18364_p13 = scmp.lt.s32.totalorder %s14852_s1, %s14852_s1 }
0x182e   :  { %p18360_p12 = scmp.ne.s32.totalorder %s14852_s1, %s18359_s8  ;;  %p18365_p0 = scmp.lt.s32.totalorder %s18359_s8, %s18359_s8 }
0x1830   :  { %p18366_p1 = por %p18365_p0, %p18364_p13 }
0x1832   :  { %p18367_p2 = pnand %p18366_p1, %p18360_p12 }
0x18d8   :  { %v15709_v39 = vpop.f32.mrb[96].mxu1 }
0x18d9   :  { %v14797_v6 = vadd.f32 %v15709_v39, %v23308_v7  ;;  %v14791_v50 = vpop.f32.mrb[97].mxu1 }
0x18da   :  { %v14792_v40 = vadd.f32 %v14791_v50, %v23309_v62 }
0x18db   :  { %18079 = vtanh.f32 %v14797_v6 }
0x18dc   :  { %18081 = vtanh.f32 %v14792_v40  ;;  %v15712_v51 = vpop.f32.mrb[98].mxu1 }
0x18dd   :  { %v14807_v20 = vadd.f32 %v15712_v51, %v23310_v9  ;;  %v14801_v15 = vpop.f32.mrb[99].mxu1 }
0x18de   :  { %v14802_v25 = vadd.f32 %v14801_v15, %v23311_v42 }
0x18df   :  { %18083 = vtanh.f32 %v14807_v20 }
0x18e0   :  { %18085 = vtanh.f32 %v14802_v25  ;;  %v15715_v45 = vpop.f32.mrb[100].mxu1 }
0x18e1   :  { %v14817_v59 = vadd.f32 %v15715_v45, %v23312_v46  ;;  %v14811_v19 = vpop.f32.mrb[101].mxu1 }
0x18e2   :  { %v14812_v11 = vadd.f32 %v14811_v19, %v23313_v61 }
0x18e3   :  { %18087 = vtanh.f32 %v14817_v59 }
0x18e4   :  { %18089 = vtanh.f32 %v14812_v11  ;;  %v15718_v14 = vpop.f32.mrb[102].mxu1 }
0x18e5   :  { %v18080_v32 = vpop.eup %18079  ;;  %v14827_v5 = vadd.f32 %v15718_v14, %v23314_v37  ;;  %v14821_v44 = vpop.f32.mrb[103].mxu1 }
0x18e6   :  { %v18082_v60 = vpop.eup %18081  ;;  %14839 = vst [vmem:[#allocation20 + $0x8] sm:$0xff] %v18080_v32  ;;  %v14822_v21 = vadd.f32 %v14821_v44, %v23315_v53 }
0x18e7   :  { %14838 = vst [vmem:[#allocation20] sm:$0xff] %v18082_v60  ;;  %18091 = vtanh.f32 %v14827_v5 }
0x18e8   :  { %18093 = vtanh.f32 %v14822_v21 }
0x18e9   :  { %v18084_v38 = vpop.eup %18083 }
0x18ea   :  { %v18086_v27 = vpop.eup %18085  ;;  %14841 = vst [vmem:[#allocation20 + $0x18] sm:$0xff] %v18084_v38 }
0x18eb   :  { %14840 = vst [vmem:[#allocation20 + $0x10] sm:$0xff] %v18086_v27 }
0x18ed   :  { %v18088_v34 = vpop.eup %18087 }
0x18ee   :  { %v18090_v55 = vpop.eup %18089  ;;  %14843 = vst [vmem:[#allocation20 + $0x28] sm:$0xff] %v18088_v34 }
0x18ef   :  { %14842 = vst [vmem:[#allocation20 + $0x20] sm:$0xff] %v18090_v55 }
0x18f1   :  { %v18092_v13 = vpop.eup %18091 }
0x18f2   :  { %v18094_v35 = vpop.eup %18093  ;;  %14845 = vst [vmem:[#allocation20 + $0x38] sm:$0xff] %v18092_v13 }
0x18f3   :  { %14844 = vst [vmem:[#allocation20 + $0x30] sm:$0xff] %v18094_v35 }
0x18f4   :  { %18370 = shalt.err (!%p18367_p2)
}
0x18f5   :  { %s18371_s26 = scalar_lea.hbm %s22824_s10, 1024 }
0x18f6   :  { %p18372_p3 = scmp.ne.s32.totalorder %s22824_s10, %s18371_s26  ;;  %p18375_p4 = scmp.lt.u32.totalorder %s18371_s26, %s22824_s10 }
0x18f8   :  { %p18377_p5 = pnand %p18375_p4, %p18372_p3 }
0x18fa   :  { %18380 = shalt.err (!%p18377_p5)
}
0x18fb   :  { %14857 = dma.vmem_to_hbm [thread:$0]  %s14852_s1, 1024, %s22824_s10, [#allocation5], %s18399_s15, %s18399_s15, %s18400_s16  }
0x18fc   :  { %18393 = dma.done.wait [#allocation5], 1024  }
0x18fd   :  { %18394 = vsyncadd [#allocation5], 4294966272 }
0x18fe   :  { %18395 = dma.done.wait [#allocation22], 512  }
0x18ff   :  { %18396 = vsyncadd [#allocation22], 4294966784 }
0x1900   :  { %14891 = vsyncpa [#allocation4], 1 }
0x1901   :  { %14892 = vsyncpa [#allocation7], 1 }
0x1902   :  { %14893 = vsyncpa [#allocation10], 1 }
0x1903   :  { %14894 = vsyncpa [#allocation13], 1 }
0x1904   :  { %14895 = vsyncpa [#allocation16], 1 }
0x1905   :  { %14896 = vsyncpa [#allocation19], 1 }
0x1906   :  { %14897 = vsyncpa [#allocation5], 1 }
0x1907   :  { %14898 = vsyncpa [#allocation22], 1 }

</bundles_post_ra>
